<compile_context>
chip_gen: v7x
topology: tpu7x:2x2x1
jax: 0.10.0
libtpu: 0.0.40
codegen_flags: <defaults>
</compile_context>

<pallas_src>
import functools

import jax
import jax.numpy as jnp
from jax.experimental import pallas as pl
from jax.experimental.pallas import tpu as pltpu


# --------------------------------------------------------------- helpers ----
def _round_up(x, m):
    return (x + m - 1) // m * m


def _gelu(y, use_erf):
    # nn.GELU() default is the exact (erf) form; tanh approx only as fallback.
    if use_erf:
        return 0.5 * y * (1.0 + jax.lax.erf(y * 0.7071067811865476))
    c = 0.7978845608028654  # sqrt(2/pi)
    return 0.5 * y * (1.0 + jnp.tanh(c * (y + 0.044715 * y * y * y)))


def _layernorm(x, g, b, lane_mask, true_d, eps=1e-5):
    """LayerNorm over the last (padded) dim; stats use only the true_d lanes."""
    inv_d = 1.0 / float(true_d)
    mu = jnp.sum(x, axis=-1, keepdims=True) * inv_d          # padded lanes are 0
    xc = jnp.where(lane_mask, x - mu, 0.0)
    var = jnp.sum(xc * xc, axis=-1, keepdims=True) * inv_d
    y = xc * jax.lax.rsqrt(var + eps)
    return y * g + b                                          # g,b zero-padded


# ---------------------------------------------------- fused transformer -----
def _transformer_kernel(*refs, depth, heads, dim_head, true_d, use_erf):
    x_ref = refs[0]
    o_ref = refs[-1]
    w = refs[1:-1]                                   # flat per-layer weights

    x = x_ref[...].astype(jnp.float32)               # (Np, Dp), padded lanes == 0
    n = x.shape[0]
    scale = dim_head ** (-0.5)

    # Built once per grid step, reused by every layer / head.
    lane = jax.lax.broadcasted_iota(jnp.int32, x.shape, 1)
    lane_mask = lane < true_d
    row = jax.lax.broadcasted_iota(jnp.int32, (n, n), 0)
    col = jax.lax.broadcasted_iota(jnp.int32, (n, n), 1)
    causal = col <= row                              # SDPA is_causal=True

    idx = 0
    for _ in range(depth):
        (a_g, a_b, w_q, w_k, w_v, w_o, b_o,
         f_g, f_b, w1, b1, w2, b2) = w[idx:idx + 13]
        idx += 13

        # ----- Attention block: LN -> per-head QKV / softmax / AV -> out-proj
        xn = _layernorm(x, a_g[...], a_b[...], lane_mask, true_d)
        attn = jnp.zeros_like(x)
        for h in range(heads):                       # static unroll, ref[h] loads
            qh = jnp.dot(xn, w_q[h], preferred_element_type=jnp.float32)
            kh = jnp.dot(xn, w_k[h], preferred_element_type=jnp.float32)
            vh = jnp.dot(xn, w_v[h], preferred_element_type=jnp.float32)
            s = jax.lax.dot_general(qh, kh, (((1,), (1,)), ((), ())),
                                    preferred_element_type=jnp.float32) * scale
            s = jnp.where(causal, s, -1e30)
            s = s - jnp.max(s, axis=-1, keepdims=True)
            p = jnp.exp(s)
            p = p * pl.reciprocal(jnp.sum(p, axis=-1, keepdims=True), approx=True)
            oh = jnp.dot(p, vh, preferred_element_type=jnp.float32)
            attn = attn + jnp.dot(oh, w_o[h], preferred_element_type=jnp.float32)
        x = x + attn + b_o[...]                      # residual (+ out-proj bias)

        # ----- FeedForward block: LN -> w1 -> GELU -> w2 (+ residual) --------
        hn = _layernorm(x, f_g[...], f_b[...], lane_mask, true_d)
        h1 = jnp.dot(hn, w1[...], preferred_element_type=jnp.float32) + b1[...]
        h1 = _gelu(h1, use_erf)
        h2 = jnp.dot(h1, w2[...], preferred_element_type=jnp.float32) + b2[...]
        x = x + h2

    g_f, b_f = w[idx], w[idx + 1]
    o_ref[...] = _layernorm(x, g_f[...], b_f[...], lane_mask, true_d
                            ).astype(o_ref.dtype)


def _pad_to(a, shape):
    return jnp.pad(a, [(0, s - d) for s, d in zip(shape, a.shape)])


def transformer_forward(x, params, *, heads, dim_head, use_erf=True,
                        interpret=False):
    """x: (B, N, D) float32 -> (B, N, D) float32."""
    B, N, D = x.shape
    depth = len(params["layers"])
    Dp = _round_up(max(D, 128), 128)                 # lane-dense feature dim
    Np = _round_up(N, 8)                             # sublane-aligned sequence
    inner = heads * dim_head

    x_p = _pad_to(x.astype(jnp.float32), (B, Np, Dp))

    def vec(v):                                      # (D,) -> zero-padded (1, Dp)
        return _pad_to(v.reshape(1, -1), (1, Dp))

    def per_head(wm):                                # (D, inner) -> (H, Dp, dh)
        wm = _pad_to(wm, (Dp, inner))
        return jnp.transpose(wm.reshape(Dp, heads, dim_head), (1, 0, 2))

    weights = []
    for lp in params["layers"]:
        a, f = lp["attn"], lp["ff"]
        w_q, w_k, w_v = jnp.split(a["w_qkv"], 3, axis=1)
        w_out_h = _pad_to(a["w_out"], (inner, Dp)).reshape(heads, dim_head, Dp)
        weights += [
            vec(a["ln_g"]), vec(a["ln_b"]),
            per_head(w_q), per_head(w_k), per_head(w_v),
            w_out_h, vec(a["b_out"]),
            vec(f["ln_g"]), vec(f["ln_b"]),
            _pad_to(f["w1"], (Dp, f["w1"].shape[1])), f["b1"].reshape(1, -1),
            _pad_to(f["w2"], (f["w2"].shape[0], Dp)), vec(f["b2"]),
        ]
    weights += [vec(params["final_ln"]["g"]), vec(params["final_ln"]["b"])]

    def full_spec(a):                                # whole array per grid step
        nd = a.ndim
        return pl.BlockSpec(a.shape, lambda b, nd=nd: (0,) * nd)

    in_specs = [pl.BlockSpec((None, Np, Dp), lambda b: (b, 0, 0))]
    in_specs += [full_spec(w) for w in weights]
    out_spec = pl.BlockSpec((None, Np, Dp), lambda b: (b, 0, 0))

    kernel = functools.partial(
        _transformer_kernel, depth=depth, heads=heads, dim_head=dim_head,
        true_d=D, use_erf=use_erf)

    y = pl.pallas_call(
        kernel,
        out_shape=jax.ShapeDtypeStruct((B, Np, Dp), jnp.float32),
        grid=(B,),
        in_specs=in_specs,
        out_specs=out_spec,
        compiler_params=pltpu.CompilerParams(
            dimension_semantics=("parallel",),
            vmem_limit_bytes=32 * 1024 * 1024),
        interpret=interpret,
    )(x_p, *weights)
    return y[:, :N, :D]


# ---------------------------------------------------------- param init ------
def init_transformer_params(key, dim, depth, heads, dim_head, mlp_dim):
    inner = heads * dim_head
    project_out = not (heads == 1 and dim_head == dim)

    def nrm(k, shape, std=0.02):
        return std * jax.random.normal(k, shape, jnp.float32)

    keys = jax.random.split(key, 4 * depth)
    layers, ki = [], 0
    for _ in range(depth):
        if project_out:
            w_out = nrm(keys[ki + 1], (inner, dim))
        else:                                        # nn.Identity() case
            w_out = jnp.eye(inner, dim, dtype=jnp.float32)
        attn = dict(ln_g=jnp.ones((dim,), jnp.float32),
                    ln_b=jnp.zeros((dim,), jnp.float32),
                    w_qkv=nrm(keys[ki], (dim, 3 * inner)),      # bias=False
                    w_out=w_out,
                    b_out=jnp.zeros((dim,), jnp.float32))
        ff = dict(ln_g=jnp.ones((dim,), jnp.float32),
                  ln_b=jnp.zeros((dim,), jnp.float32),
                  w1=nrm(keys[ki + 2], (dim, mlp_dim)),
                  b1=jnp.zeros((mlp_dim,), jnp.float32),
                  w2=nrm(keys[ki + 3], (mlp_dim, dim)),
                  b2=jnp.zeros((dim,), jnp.float32))
        layers.append({"attn": attn, "ff": ff})
        ki += 4
    return {"layers": layers,
            "final_ln": {"g": jnp.ones((dim,), jnp.float32),
                         "b": jnp.zeros((dim,), jnp.float32)}}


# ------------------------------------------------------ pure-JAX reference --
def reference_forward(x, params, *, heads, dim_head, use_erf=True):
    B, N, D = x.shape
    scale = dim_head ** (-0.5)

    def ln(y, g, b, eps=1e-5):
        mu = jnp.mean(y, axis=-1, keepdims=True)
        var = jnp.mean((y - mu) ** 2, axis=-1, keepdims=True)
        return (y - mu) * jax.lax.rsqrt(var + eps) * g + b

    causal = jnp.arange(N)[None, :] <= jnp.arange(N)[:, None]
    for lp in params["layers"]:
        a, f = lp["attn"], lp["ff"]
        xn = ln(x, a["ln_g"], a["ln_b"])
        q, k, v = jnp.split(xn @ a["w_qkv"], 3, axis=-1)
        sp = lambda t: jnp.transpose(t.reshape(B, N, heads, dim_head), (0, 2, 1, 3))
        q, k, v = sp(q), sp(k), sp(v)
        s = jnp.einsum("bhnd,bhmd->bhnm", q, k) * scale
        s = jnp.where(causal, s, -jnp.inf)
        p = jax.nn.softmax(s, axis=-1)
        o = jnp.einsum("bhnm,bhmd->bhnd", p, v)
        o = jnp.transpose(o, (0, 2, 1, 3)).reshape(B, N, heads * dim_head)
        x = x + o @ a["w_out"] + a["b_out"]
        h1 = _gelu(ln(x, f["ln_g"], f["ln_b"]) @ f["w1"] + f["b1"], use_erf)
        x = x + h1 @ f["w2"] + f["b2"]
    return ln(x, params["final_ln"]["g"], params["final_ln"]["b"])


def _probe_erf():
    """Check lax.erf lowers in a Pallas TPU kernel; else use tanh GELU."""
    def k(x_ref, o_ref):
        o_ref[...] = jax.lax.erf(x_ref[...])
    try:
        r = pl.pallas_call(
            k, out_shape=jax.ShapeDtypeStruct((8, 128), jnp.float32)
        )(jnp.zeros((8, 128), jnp.float32))
        jax.block_until_ready(r)
        return True
    except Exception:
        return False


if __name__ == "__main__":
    use_erf = _probe_erf()

    # Small config consistent with the JEPA usage of this Transformer:
    # dim=34, seq=51 (num_hist*(num_patches+1)), depth=2, heads=4, dim_head=16.
    dim, depth, heads, dim_head, mlp_dim = 34, 2, 4, 16, 64
    B, N = 2, 51

    key = jax.random.PRNGKey(0)
    kp, kx = jax.random.split(key)
    params = init_transformer_params(kp, dim, depth, heads, dim_head, mlp_dim)
    x = jax.random.normal(kx, (B, N, dim), jnp.float32)

    fwd = jax.jit(functools.partial(
        transformer_forward, heads=heads, dim_head=dim_head, use_erf=use_erf))
    y = fwd(x, params)
    jax.block_until_ready(y)

    assert y.shape == (B, N, dim), y.shape
    assert bool(jnp.all(jnp.isfinite(y)))

    y_ref = reference_forward(x, params, heads=heads, dim_head=dim_head,
                              use_erf=use_erf)
    err = float(jnp.max(jnp.abs(y - y_ref)))
    assert err < 5e-2, f"max abs error vs reference: {err}"
    print("KERNEL_OK")
</pallas_src>

<mosaic_0001>
module attributes {stable_mosaic.version = 11 : i64} {
  func.func @k(%arg0: memref<8x128xf32, #tpu.memory_space<vmem>>, %arg1: memref<8x128xf32, #tpu.memory_space<vmem>>) attributes {dimension_semantics = [], scalar_prefetch = 0 : i64, scratch_operands = 0 : i64, tpu.core_type = #tpu.core_type<tc>} {
    %c0 = arith.constant 0 : index
    %c0_0 = arith.constant 0 : index
    %0 = vector.load %arg0[%c0, %c0_0] : memref<8x128xf32, #tpu.memory_space<vmem>>, vector<8x128xf32>
    %1 = math.erf %0 : vector<8x128xf32>
    %c0_1 = arith.constant 0 : index
    %c0_2 = arith.constant 0 : index
    %2 = vector.load %arg1[%c0_1, %c0_2] : memref<8x128xf32, #tpu.memory_space<vmem>>, vector<8x128xf32>
    tpu.vector_store %arg1[%c0_1, %c0_2], %1 {strides = array<i32>} : memref<8x128xf32, #tpu.memory_space<vmem>>, vector<8x128xf32>,
    return
  }
}

module attributes {stable_mosaic.version = 11 : i64} {
  func.func @_transformer_kernel(%arg0: i32, %arg1: memref<1x56x128xf32, #tpu.memory_space<vmem>>, %arg2: memref<1x128xf32, #tpu.memory_space<vmem>>, %arg3: memref<1x128xf32, #tpu.memory_space<vmem>>, %arg4: memref<4x128x16xf32, #tpu.memory_space<vmem>>, %arg5: memref<4x128x16xf32, #tpu.memory_space<vmem>>, %arg6: memref<4x128x16xf32, #tpu.memory_space<vmem>>, %arg7: memref<4x16x128xf32, #tpu.memory_space<vmem>>, %arg8: memref<1x128xf32, #tpu.memory_space<vmem>>, %arg9: memref<1x128xf32, #tpu.memory_space<vmem>>, %arg10: memref<1x128xf32, #tpu.memory_space<vmem>>, %arg11: memref<128x64xf32, #tpu.memory_space<vmem>>, %arg12: memref<1x64xf32, #tpu.memory_space<vmem>>, %arg13: memref<64x128xf32, #tpu.memory_space<vmem>>, %arg14: memref<1x128xf32, #tpu.memory_space<vmem>>, %arg15: memref<1x128xf32, #tpu.memory_space<vmem>>, %arg16: memref<1x128xf32, #tpu.memory_space<vmem>>, %arg17: memref<4x128x16xf32, #tpu.memory_space<vmem>>, %arg18: memref<4x128x16xf32, #tpu.memory_space<vmem>>, %arg19: memref<4x128x16xf32, #tpu.memory_space<vmem>>, %arg20: memref<4x16x128xf32, #tpu.memory_space<vmem>>, %arg21: memref<1x128xf32, #tpu.memory_space<vmem>>, %arg22: memref<1x128xf32, #tpu.memory_space<vmem>>, %arg23: memref<1x128xf32, #tpu.memory_space<vmem>>, %arg24: memref<128x64xf32, #tpu.memory_space<vmem>>, %arg25: memref<1x64xf32, #tpu.memory_space<vmem>>, %arg26: memref<64x128xf32, #tpu.memory_space<vmem>>, %arg27: memref<1x128xf32, #tpu.memory_space<vmem>>, %arg28: memref<1x128xf32, #tpu.memory_space<vmem>>, %arg29: memref<1x128xf32, #tpu.memory_space<vmem>>, %arg30: memref<1x56x128xf32, #tpu.memory_space<vmem>>) attributes {dimension_semantics = [#tpu.dimension_semantics<parallel>], iteration_bounds = array<i64: 2>, scalar_prefetch = 0 : i64, scratch_operands = 0 : i64, tpu.core_type = #tpu.core_type<tc>, window_params = [{transform_indices = @transform_0, window_bounds = array<i64: 1, 56, 128>}, {pipeline_mode = #tpu.pipeline_mode<synchronous>, transform_indices = @transform_1, window_bounds = array<i64: 1, 128>}, {pipeline_mode = #tpu.pipeline_mode<synchronous>, transform_indices = @transform_2, window_bounds = array<i64: 1, 128>}, {pipeline_mode = #tpu.pipeline_mode<synchronous>, transform_indices = @transform_3, window_bounds = array<i64: 4, 128, 16>}, {pipeline_mode = #tpu.pipeline_mode<synchronous>, transform_indices = @transform_4, window_bounds = array<i64: 4, 128, 16>}, {pipeline_mode = #tpu.pipeline_mode<synchronous>, transform_indices = @transform_5, window_bounds = array<i64: 4, 128, 16>}, {pipeline_mode = #tpu.pipeline_mode<synchronous>, transform_indices = @transform_6, window_bounds = array<i64: 4, 16, 128>}, {pipeline_mode = #tpu.pipeline_mode<synchronous>, transform_indices = @transform_7, window_bounds = array<i64: 1, 128>}, {pipeline_mode = #tpu.pipeline_mode<synchronous>, transform_indices = @transform_8, window_bounds = array<i64: 1, 128>}, {pipeline_mode = #tpu.pipeline_mode<synchronous>, transform_indices = @transform_9, window_bounds = array<i64: 1, 128>}, {pipeline_mode = #tpu.pipeline_mode<synchronous>, transform_indices = @transform_10, window_bounds = array<i64: 128, 64>}, {pipeline_mode = #tpu.pipeline_mode<synchronous>, transform_indices = @transform_11, window_bounds = array<i64: 1, 64>}, {pipeline_mode = #tpu.pipeline_mode<synchronous>, transform_indices = @transform_12, window_bounds = array<i64: 64, 128>}, {pipeline_mode = #tpu.pipeline_mode<synchronous>, transform_indices = @transform_13, window_bounds = array<i64: 1, 128>}, {pipeline_mode = #tpu.pipeline_mode<synchronous>, transform_indices = @transform_14, window_bounds = array<i64: 1, 128>}, {pipeline_mode = #tpu.pipeline_mode<synchronous>, transform_indices = @transform_15, window_bounds = array<i64: 1, 128>}, {pipeline_mode = #tpu.pipeline_mode<synchronous>, transform_indices = @transform_16, window_bounds = array<i64: 4, 128, 16>}, {pipeline_mode = #tpu.pipeline_mode<synchronous>, transform_indices = @transform_17, window_bounds = array<i64: 4, 128, 16>}, {pipeline_mode = #tpu.pipeline_mode<synchronous>, transform_indices = @transform_18, window_bounds = array<i64: 4, 128, 16>}, {pipeline_mode = #tpu.pipeline_mode<synchronous>, transform_indices = @transform_19, window_bounds = array<i64: 4, 16, 128>}, {pipeline_mode = #tpu.pipeline_mode<synchronous>, transform_indices = @transform_20, window_bounds = array<i64: 1, 128>}, {pipeline_mode = #tpu.pipeline_mode<synchronous>, transform_indices = @transform_21, window_bounds = array<i64: 1, 128>}, {pipeline_mode = #tpu.pipeline_mode<synchronous>, transform_indices = @transform_22, window_bounds = array<i64: 1, 128>}, {pipeline_mode = #tpu.pipeline_mode<synchronous>, transform_indices = @transform_23, window_bounds = array<i64: 128, 64>}, {pipeline_mode = #tpu.pipeline_mode<synchronous>, transform_indices = @transform_24, window_bounds = array<i64: 1, 64>}, {pipeline_mode = #tpu.pipeline_mode<synchronous>, transform_indices = @transform_25, window_bounds = array<i64: 64, 128>}, {pipeline_mode = #tpu.pipeline_mode<synchronous>, transform_indices = @transform_26, window_bounds = array<i64: 1, 128>}, {pipeline_mode = #tpu.pipeline_mode<synchronous>, transform_indices = @transform_27, window_bounds = array<i64: 1, 128>}, {pipeline_mode = #tpu.pipeline_mode<synchronous>, transform_indices = @transform_28, window_bounds = array<i64: 1, 128>}, {transform_indices = @transform_29, window_bounds = array<i64: 1, 56, 128>}]} {
    %c0 = arith.constant 0 : index
    %c0_0 = arith.constant 0 : index
    %c0_1 = arith.constant 0 : index
    %0 = vector.load %arg1[%c0, %c0_0, %c0_1] : memref<1x56x128xf32, #tpu.memory_space<vmem>>, vector<1x56x128xf32>
    %1 = vector.shape_cast %0 : vector<1x56x128xf32> to vector<56x128xf32>
    %2 = tpu.iota {dimensions = array<i32: 1>} : vector<56x128xi32>
    %c34_i32 = arith.constant 34 : i32
    %3 = vector.broadcast %c34_i32 : i32 to vector<56x128xi32>
    %4 = arith.cmpi slt, %2, %3 : vector<56x128xi32>
    %5 = tpu.iota {dimensions = array<i32: 0>} : vector<56x56xi32>
    %6 = tpu.iota {dimensions = array<i32: 1>} : vector<56x56xi32>
    %7 = arith.cmpi sle, %6, %5 : vector<56x56xi32>
    %c0_2 = arith.constant 0 : index
    %c0_3 = arith.constant 0 : index
    %8 = vector.load %arg2[%c0_2, %c0_3] : memref<1x128xf32, #tpu.memory_space<vmem>>, vector<1x128xf32>
    %c0_4 = arith.constant 0 : index
    %c0_5 = arith.constant 0 : index
    %9 = vector.load %arg3[%c0_4, %c0_5] : memref<1x128xf32, #tpu.memory_space<vmem>>, vector<1x128xf32>
    %cst = arith.constant dense<0.000000e+00> : vector<56xf32>
    %10 = vector.multi_reduction <add>, %1, %cst [1] : vector<56x128xf32> to vector<56xf32>
    %11 = vector.shape_cast %10 : vector<56xf32> to vector<56x1xf32>
    %cst_6 = arith.constant 0.0294117648 : f32
    %12 = vector.broadcast %cst_6 : f32 to vector<56x1xf32>
    %13 = arith.mulf %11, %12 : vector<56x1xf32>
    %14 = vector.broadcast %13 : vector<56x1xf32> to vector<56x128xf32>
    %15 = arith.subf %1, %14 : vector<56x128xf32>
    %cst_7 = arith.constant 0.000000e+00 : f32
    %16 = vector.broadcast %cst_7 : f32 to vector<56x128xf32>
    %17 = arith.select %4, %15, %16 : vector<56x128xi1>, vector<56x128xf32>
    %18 = arith.mulf %17, %17 : vector<56x128xf32>
    %cst_8 = arith.constant dense<0.000000e+00> : vector<56xf32>
    %19 = vector.multi_reduction <add>, %18, %cst_8 [1] : vector<56x128xf32> to vector<56xf32>
    %20 = vector.shape_cast %19 : vector<56xf32> to vector<56x1xf32>
    %cst_9 = arith.constant 0.0294117648 : f32
    %21 = vector.broadcast %cst_9 : f32 to vector<56x1xf32>
    %22 = arith.mulf %20, %21 : vector<56x1xf32>
    %cst_10 = arith.constant 9.99999974E-6 : f32
    %23 = vector.broadcast %cst_10 : f32 to vector<56x1xf32>
    %24 = arith.addf %22, %23 : vector<56x1xf32>
    %25 = math.rsqrt %24 : vector<56x1xf32>
    %26 = vector.broadcast %25 : vector<56x1xf32> to vector<56x128xf32>
    %27 = arith.mulf %17, %26 : vector<56x128xf32>
    %28 = vector.broadcast %8 : vector<1x128xf32> to vector<56x128xf32>
    %29 = arith.mulf %27, %28 : vector<56x128xf32>
    %30 = vector.broadcast %9 : vector<1x128xf32> to vector<56x128xf32>
    %31 = arith.addf %29, %30 : vector<56x128xf32>
    %cst_11 = arith.constant 0.000000e+00 : f32
    %32 = vector.broadcast %cst_11 : f32 to vector<56x128xf32>
    %c0_12 = arith.constant 0 : index
    %c0_13 = arith.constant 0 : index
    %c0_14 = arith.constant 0 : index
    %33 = vector.load %arg4[%c0_12, %c0_13, %c0_14] : memref<4x128x16xf32, #tpu.memory_space<vmem>>, vector<1x128x16xf32>
    %34 = vector.shape_cast %33 : vector<1x128x16xf32> to vector<128x16xf32>
    %cst_15 = arith.constant dense<0.000000e+00> : vector<56x16xf32>
    %35 = tpu.matmul %31, %34, %cst_15 {dimension_numbers = #tpu.dot_dimension_numbers<[1], [0], [0], [1], [0, 0, 1, 1], [], []>} : vector<56x128xf32>, vector<128x16xf32>, vector<56x16xf32> -> vector<56x16xf32>
    %c0_16 = arith.constant 0 : index
    %c0_17 = arith.constant 0 : index
    %c0_18 = arith.constant 0 : index
    %36 = vector.load %arg5[%c0_16, %c0_17, %c0_18] : memref<4x128x16xf32, #tpu.memory_space<vmem>>, vector<1x128x16xf32>
    %37 = vector.shape_cast %36 : vector<1x128x16xf32> to vector<128x16xf32>
    %cst_19 = arith.constant dense<0.000000e+00> : vector<56x16xf32>
    %38 = tpu.matmul %31, %37, %cst_19 {dimension_numbers = #tpu.dot_dimension_numbers<[1], [0], [0], [1], [0, 0, 1, 1], [], []>} : vector<56x128xf32>, vector<128x16xf32>, vector<56x16xf32> -> vector<56x16xf32>
    %c0_20 = arith.constant 0 : index
    %c0_21 = arith.constant 0 : index
    %c0_22 = arith.constant 0 : index
    %39 = vector.load %arg6[%c0_20, %c0_21, %c0_22] : memref<4x128x16xf32, #tpu.memory_space<vmem>>, vector<1x128x16xf32>
    %40 = vector.shape_cast %39 : vector<1x128x16xf32> to vector<128x16xf32>
    %cst_23 = arith.constant dense<0.000000e+00> : vector<56x16xf32>
    %41 = tpu.matmul %31, %40, %cst_23 {dimension_numbers = #tpu.dot_dimension_numbers<[1], [0], [0], [1], [0, 0, 1, 1], [], []>} : vector<56x128xf32>, vector<128x16xf32>, vector<56x16xf32> -> vector<56x16xf32>
    %cst_24 = arith.constant dense<0.000000e+00> : vector<56x56xf32>
    %42 = tpu.matmul %35, %38, %cst_24 {dimension_numbers = #tpu.dot_dimension_numbers<[1], [1], [0], [0], [0, 0, 1, 0], [], []>} : vector<56x16xf32>, vector<56x16xf32>, vector<56x56xf32> -> vector<56x56xf32>
    %cst_25 = arith.constant 2.500000e-01 : f32
    %43 = vector.broadcast %cst_25 : f32 to vector<56x56xf32>
    %44 = arith.mulf %42, %43 : vector<56x56xf32>
    %cst_26 = arith.constant -1.000000e+30 : f32
    %45 = vector.broadcast %cst_26 : f32 to vector<56x56xf32>
    %46 = arith.select %7, %44, %45 : vector<56x56xi1>, vector<56x56xf32>
    %cst_27 = arith.constant dense<0xFF800000> : vector<56xf32>
    %47 = vector.multi_reduction <maximumf>, %46, %cst_27 [1] : vector<56x56xf32> to vector<56xf32>
    %48 = vector.shape_cast %47 : vector<56xf32> to vector<56x1xf32>
    %49 = vector.broadcast %48 : vector<56x1xf32> to vector<56x56xf32>
    %50 = arith.subf %46, %49 : vector<56x56xf32>
    %51 = math.exp %50 : vector<56x56xf32>
    %cst_28 = arith.constant dense<0.000000e+00> : vector<56xf32>
    %52 = vector.multi_reduction <add>, %51, %cst_28 [1] : vector<56x56xf32> to vector<56xf32>
    %53 = vector.shape_cast %52 : vector<56xf32> to vector<56x1xf32>
    %54 = tpu.reciprocal %53 {approx = true} : vector<56x1xf32> -> vector<56x1xf32>
    %55 = vector.broadcast %54 : vector<56x1xf32> to vector<56x56xf32>
    %56 = arith.mulf %51, %55 : vector<56x56xf32>
    %cst_29 = arith.constant dense<0.000000e+00> : vector<56x16xf32>
    %57 = tpu.matmul %56, %41, %cst_29 {dimension_numbers = #tpu.dot_dimension_numbers<[1], [0], [0], [1], [0, 0, 1, 1], [], []>} : vector<56x56xf32>, vector<56x16xf32>, vector<56x16xf32> -> vector<56x16xf32>
    %c0_30 = arith.constant 0 : index
    %c0_31 = arith.constant 0 : index
    %c0_32 = arith.constant 0 : index
    %58 = vector.load %arg7[%c0_30, %c0_31, %c0_32] : memref<4x16x128xf32, #tpu.memory_space<vmem>>, vector<1x16x128xf32>
    %59 = vector.shape_cast %58 : vector<1x16x128xf32> to vector<16x128xf32>
    %cst_33 = arith.constant dense<0.000000e+00> : vector<56x128xf32>
    %60 = tpu.matmul %57, %59, %cst_33 {dimension_numbers = #tpu.dot_dimension_numbers<[1], [0], [0], [1], [0, 0, 1, 1], [], []>} : vector<56x16xf32>, vector<16x128xf32>, vector<56x128xf32> -> vector<56x128xf32>
    %61 = arith.addf %32, %60 : vector<56x128xf32>
    %c1 = arith.constant 1 : index
    %c0_34 = arith.constant 0 : index
    %c0_35 = arith.constant 0 : index
    %62 = vector.load %arg4[%c1, %c0_34, %c0_35] : memref<4x128x16xf32, #tpu.memory_space<vmem>>, vector<1x128x16xf32>
    %63 = vector.shape_cast %62 : vector<1x128x16xf32> to vector<128x16xf32>
    %cst_36 = arith.constant dense<0.000000e+00> : vector<56x16xf32>
    %64 = tpu.matmul %31, %63, %cst_36 {dimension_numbers = #tpu.dot_dimension_numbers<[1], [0], [0], [1], [0, 0, 1, 1], [], []>} : vector<56x128xf32>, vector<128x16xf32>, vector<56x16xf32> -> vector<56x16xf32>
    %c1_37 = arith.constant 1 : index
    %c0_38 = arith.constant 0 : index
    %c0_39 = arith.constant 0 : index
    %65 = vector.load %arg5[%c1_37, %c0_38, %c0_39] : memref<4x128x16xf32, #tpu.memory_space<vmem>>, vector<1x128x16xf32>
    %66 = vector.shape_cast %65 : vector<1x128x16xf32> to vector<128x16xf32>
    %cst_40 = arith.constant dense<0.000000e+00> : vector<56x16xf32>
    %67 = tpu.matmul %31, %66, %cst_40 {dimension_numbers = #tpu.dot_dimension_numbers<[1], [0], [0], [1], [0, 0, 1, 1], [], []>} : vector<56x128xf32>, vector<128x16xf32>, vector<56x16xf32> -> vector<56x16xf32>
    %c1_41 = arith.constant 1 : index
    %c0_42 = arith.constant 0 : index
    %c0_43 = arith.constant 0 : index
    %68 = vector.load %arg6[%c1_41, %c0_42, %c0_43] : memref<4x128x16xf32, #tpu.memory_space<vmem>>, vector<1x128x16xf32>
    %69 = vector.shape_cast %68 : vector<1x128x16xf32> to vector<128x16xf32>
    %cst_44 = arith.constant dense<0.000000e+00> : vector<56x16xf32>
    %70 = tpu.matmul %31, %69, %cst_44 {dimension_numbers = #tpu.dot_dimension_numbers<[1], [0], [0], [1], [0, 0, 1, 1], [], []>} : vector<56x128xf32>, vector<128x16xf32>, vector<56x16xf32> -> vector<56x16xf32>
    %cst_45 = arith.constant dense<0.000000e+00> : vector<56x56xf32>
    %71 = tpu.matmul %64, %67, %cst_45 {dimension_numbers = #tpu.dot_dimension_numbers<[1], [1], [0], [0], [0, 0, 1, 0], [], []>} : vector<56x16xf32>, vector<56x16xf32>, vector<56x56xf32> -> vector<56x56xf32>
    %cst_46 = arith.constant 2.500000e-01 : f32
    %72 = vector.broadcast %cst_46 : f32 to vector<56x56xf32>
    %73 = arith.mulf %71, %72 : vector<56x56xf32>
    %cst_47 = arith.constant -1.000000e+30 : f32
    %74 = vector.broadcast %cst_47 : f32 to vector<56x56xf32>
    %75 = arith.select %7, %73, %74 : vector<56x56xi1>, vector<56x56xf32>
    %cst_48 = arith.constant dense<0xFF800000> : vector<56xf32>
    %76 = vector.multi_reduction <maximumf>, %75, %cst_48 [1] : vector<56x56xf32> to vector<56xf32>
    %77 = vector.shape_cast %76 : vector<56xf32> to vector<56x1xf32>
    %78 = vector.broadcast %77 : vector<56x1xf32> to vector<56x56xf32>
    %79 = arith.subf %75, %78 : vector<56x56xf32>
    %80 = math.exp %79 : vector<56x56xf32>
    %cst_49 = arith.constant dense<0.000000e+00> : vector<56xf32>
    %81 = vector.multi_reduction <add>, %80, %cst_49 [1] : vector<56x56xf32> to vector<56xf32>
    %82 = vector.shape_cast %81 : vector<56xf32> to vector<56x1xf32>
    %83 = tpu.reciprocal %82 {approx = true} : vector<56x1xf32> -> vector<56x1xf32>
    %84 = vector.broadcast %83 : vector<56x1xf32> to vector<56x56xf32>
    %85 = arith.mulf %80, %84 : vector<56x56xf32>
    %cst_50 = arith.constant dense<0.000000e+00> : vector<56x16xf32>
    %86 = tpu.matmul %85, %70, %cst_50 {dimension_numbers = #tpu.dot_dimension_numbers<[1], [0], [0], [1], [0, 0, 1, 1], [], []>} : vector<56x56xf32>, vector<56x16xf32>, vector<56x16xf32> -> vector<56x16xf32>
    %c1_51 = arith.constant 1 : index
    %c0_52 = arith.constant 0 : index
    %c0_53 = arith.constant 0 : index
    %87 = vector.load %arg7[%c1_51, %c0_52, %c0_53] : memref<4x16x128xf32, #tpu.memory_space<vmem>>, vector<1x16x128xf32>
    %88 = vector.shape_cast %87 : vector<1x16x128xf32> to vector<16x128xf32>
    %cst_54 = arith.constant dense<0.000000e+00> : vector<56x128xf32>
    %89 = tpu.matmul %86, %88, %cst_54 {dimension_numbers = #tpu.dot_dimension_numbers<[1], [0], [0], [1], [0, 0, 1, 1], [], []>} : vector<56x16xf32>, vector<16x128xf32>, vector<56x128xf32> -> vector<56x128xf32>
    %90 = arith.addf %61, %89 : vector<56x128xf32>
    %c2 = arith.constant 2 : index
    %c0_55 = arith.constant 0 : index
    %c0_56 = arith.constant 0 : index
    %91 = vector.load %arg4[%c2, %c0_55, %c0_56] : memref<4x128x16xf32, #tpu.memory_space<vmem>>, vector<1x128x16xf32>
    %92 = vector.shape_cast %91 : vector<1x128x16xf32> to vector<128x16xf32>
    %cst_57 = arith.constant dense<0.000000e+00> : vector<56x16xf32>
    %93 = tpu.matmul %31, %92, %cst_57 {dimension_numbers = #tpu.dot_dimension_numbers<[1], [0], [0], [1], [0, 0, 1, 1], [], []>} : vector<56x128xf32>, vector<128x16xf32>, vector<56x16xf32> -> vector<56x16xf32>
    %c2_58 = arith.constant 2 : index
    %c0_59 = arith.constant 0 : index
    %c0_60 = arith.constant 0 : index
    %94 = vector.load %arg5[%c2_58, %c0_59, %c0_60] : memref<4x128x16xf32, #tpu.memory_space<vmem>>, vector<1x128x16xf32>
    %95 = vector.shape_cast %94 : vector<1x128x16xf32> to vector<128x16xf32>
    %cst_61 = arith.constant dense<0.000000e+00> : vector<56x16xf32>
    %96 = tpu.matmul %31, %95, %cst_61 {dimension_numbers = #tpu.dot_dimension_numbers<[1], [0], [0], [1], [0, 0, 1, 1], [], []>} : vector<56x128xf32>, vector<128x16xf32>, vector<56x16xf32> -> vector<56x16xf32>
    %c2_62 = arith.constant 2 : index
    %c0_63 = arith.constant 0 : index
    %c0_64 = arith.constant 0 : index
    %97 = vector.load %arg6[%c2_62, %c0_63, %c0_64] : memref<4x128x16xf32, #tpu.memory_space<vmem>>, vector<1x128x16xf32>
    %98 = vector.shape_cast %97 : vector<1x128x16xf32> to vector<128x16xf32>
    %cst_65 = arith.constant dense<0.000000e+00> : vector<56x16xf32>
    %99 = tpu.matmul %31, %98, %cst_65 {dimension_numbers = #tpu.dot_dimension_numbers<[1], [0], [0], [1], [0, 0, 1, 1], [], []>} : vector<56x128xf32>, vector<128x16xf32>, vector<56x16xf32> -> vector<56x16xf32>
    %cst_66 = arith.constant dense<0.000000e+00> : vector<56x56xf32>
    %100 = tpu.matmul %93, %96, %cst_66 {dimension_numbers = #tpu.dot_dimension_numbers<[1], [1], [0], [0], [0, 0, 1, 0], [], []>} : vector<56x16xf32>, vector<56x16xf32>, vector<56x56xf32> -> vector<56x56xf32>
    %cst_67 = arith.constant 2.500000e-01 : f32
    %101 = vector.broadcast %cst_67 : f32 to vector<56x56xf32>
    %102 = arith.mulf %100, %101 : vector<56x56xf32>
    %cst_68 = arith.constant -1.000000e+30 : f32
    %103 = vector.broadcast %cst_68 : f32 to vector<56x56xf32>
    %104 = arith.select %7, %102, %103 : vector<56x56xi1>, vector<56x56xf32>
    %cst_69 = arith.constant dense<0xFF800000> : vector<56xf32>
    %105 = vector.multi_reduction <maximumf>, %104, %cst_69 [1] : vector<56x56xf32> to vector<56xf32>
    %106 = vector.shape_cast %105 : vector<56xf32> to vector<56x1xf32>
    %107 = vector.broadcast %106 : vector<56x1xf32> to vector<56x56xf32>
    %108 = arith.subf %104, %107 : vector<56x56xf32>
    %109 = math.exp %108 : vector<56x56xf32>
    %cst_70 = arith.constant dense<0.000000e+00> : vector<56xf32>
    %110 = vector.multi_reduction <add>, %109, %cst_70 [1] : vector<56x56xf32> to vector<56xf32>
    %111 = vector.shape_cast %110 : vector<56xf32> to vector<56x1xf32>
    %112 = tpu.reciprocal %111 {approx = true} : vector<56x1xf32> -> vector<56x1xf32>
    %113 = vector.broadcast %112 : vector<56x1xf32> to vector<56x56xf32>
    %114 = arith.mulf %109, %113 : vector<56x56xf32>
    %cst_71 = arith.constant dense<0.000000e+00> : vector<56x16xf32>
    %115 = tpu.matmul %114, %99, %cst_71 {dimension_numbers = #tpu.dot_dimension_numbers<[1], [0], [0], [1], [0, 0, 1, 1], [], []>} : vector<56x56xf32>, vector<56x16xf32>, vector<56x16xf32> -> vector<56x16xf32>
    %c2_72 = arith.constant 2 : index
    %c0_73 = arith.constant 0 : index
    %c0_74 = arith.constant 0 : index
    %116 = vector.load %arg7[%c2_72, %c0_73, %c0_74] : memref<4x16x128xf32, #tpu.memory_space<vmem>>, vector<1x16x128xf32>
    %117 = vector.shape_cast %116 : vector<1x16x128xf32> to vector<16x128xf32>
    %cst_75 = arith.constant dense<0.000000e+00> : vector<56x128xf32>
    %118 = tpu.matmul %115, %117, %cst_75 {dimension_numbers = #tpu.dot_dimension_numbers<[1], [0], [0], [1], [0, 0, 1, 1], [], []>} : vector<56x16xf32>, vector<16x128xf32>, vector<56x128xf32> -> vector<56x128xf32>
    %119 = arith.addf %90, %118 : vector<56x128xf32>
    %c3 = arith.constant 3 : index
    %c0_76 = arith.constant 0 : index
    %c0_77 = arith.constant 0 : index
    %120 = vector.load %arg4[%c3, %c0_76, %c0_77] : memref<4x128x16xf32, #tpu.memory_space<vmem>>, vector<1x128x16xf32>
    %121 = vector.shape_cast %120 : vector<1x128x16xf32> to vector<128x16xf32>
    %cst_78 = arith.constant dense<0.000000e+00> : vector<56x16xf32>
    %122 = tpu.matmul %31, %121, %cst_78 {dimension_numbers = #tpu.dot_dimension_numbers<[1], [0], [0], [1], [0, 0, 1, 1], [], []>} : vector<56x128xf32>, vector<128x16xf32>, vector<56x16xf32> -> vector<56x16xf32>
    %c3_79 = arith.constant 3 : index
    %c0_80 = arith.constant 0 : index
    %c0_81 = arith.constant 0 : index
    %123 = vector.load %arg5[%c3_79, %c0_80, %c0_81] : memref<4x128x16xf32, #tpu.memory_space<vmem>>, vector<1x128x16xf32>
    %124 = vector.shape_cast %123 : vector<1x128x16xf32> to vector<128x16xf32>
    %cst_82 = arith.constant dense<0.000000e+00> : vector<56x16xf32>
    %125 = tpu.matmul %31, %124, %cst_82 {dimension_numbers = #tpu.dot_dimension_numbers<[1], [0], [0], [1], [0, 0, 1, 1], [], []>} : vector<56x128xf32>, vector<128x16xf32>, vector<56x16xf32> -> vector<56x16xf32>
    %c3_83 = arith.constant 3 : index
    %c0_84 = arith.constant 0 : index
    %c0_85 = arith.constant 0 : index
    %126 = vector.load %arg6[%c3_83, %c0_84, %c0_85] : memref<4x128x16xf32, #tpu.memory_space<vmem>>, vector<1x128x16xf32>
    %127 = vector.shape_cast %126 : vector<1x128x16xf32> to vector<128x16xf32>
    %cst_86 = arith.constant dense<0.000000e+00> : vector<56x16xf32>
    %128 = tpu.matmul %31, %127, %cst_86 {dimension_numbers = #tpu.dot_dimension_numbers<[1], [0], [0], [1], [0, 0, 1, 1], [], []>} : vector<56x128xf32>, vector<128x16xf32>, vector<56x16xf32> -> vector<56x16xf32>
    %cst_87 = arith.constant dense<0.000000e+00> : vector<56x56xf32>
    %129 = tpu.matmul %122, %125, %cst_87 {dimension_numbers = #tpu.dot_dimension_numbers<[1], [1], [0], [0], [0, 0, 1, 0], [], []>} : vector<56x16xf32>, vector<56x16xf32>, vector<56x56xf32> -> vector<56x56xf32>
    %cst_88 = arith.constant 2.500000e-01 : f32
    %130 = vector.broadcast %cst_88 : f32 to vector<56x56xf32>
    %131 = arith.mulf %129, %130 : vector<56x56xf32>
    %cst_89 = arith.constant -1.000000e+30 : f32
    %132 = vector.broadcast %cst_89 : f32 to vector<56x56xf32>
    %133 = arith.select %7, %131, %132 : vector<56x56xi1>, vector<56x56xf32>
    %cst_90 = arith.constant dense<0xFF800000> : vector<56xf32>
    %134 = vector.multi_reduction <maximumf>, %133, %cst_90 [1] : vector<56x56xf32> to vector<56xf32>
    %135 = vector.shape_cast %134 : vector<56xf32> to vector<56x1xf32>
    %136 = vector.broadcast %135 : vector<56x1xf32> to vector<56x56xf32>
    %137 = arith.subf %133, %136 : vector<56x56xf32>
    %138 = math.exp %137 : vector<56x56xf32>
    %cst_91 = arith.constant dense<0.000000e+00> : vector<56xf32>
    %139 = vector.multi_reduction <add>, %138, %cst_91 [1] : vector<56x56xf32> to vector<56xf32>
    %140 = vector.shape_cast %139 : vector<56xf32> to vector<56x1xf32>
    %141 = tpu.reciprocal %140 {approx = true} : vector<56x1xf32> -> vector<56x1xf32>
    %142 = vector.broadcast %141 : vector<56x1xf32> to vector<56x56xf32>
    %143 = arith.mulf %138, %142 : vector<56x56xf32>
    %cst_92 = arith.constant dense<0.000000e+00> : vector<56x16xf32>
    %144 = tpu.matmul %143, %128, %cst_92 {dimension_numbers = #tpu.dot_dimension_numbers<[1], [0], [0], [1], [0, 0, 1, 1], [], []>} : vector<56x56xf32>, vector<56x16xf32>, vector<56x16xf32> -> vector<56x16xf32>
    %c3_93 = arith.constant 3 : index
    %c0_94 = arith.constant 0 : index
    %c0_95 = arith.constant 0 : index
    %145 = vector.load %arg7[%c3_93, %c0_94, %c0_95] : memref<4x16x128xf32, #tpu.memory_space<vmem>>, vector<1x16x128xf32>
    %146 = vector.shape_cast %145 : vector<1x16x128xf32> to vector<16x128xf32>
    %cst_96 = arith.constant dense<0.000000e+00> : vector<56x128xf32>
    %147 = tpu.matmul %144, %146, %cst_96 {dimension_numbers = #tpu.dot_dimension_numbers<[1], [0], [0], [1], [0, 0, 1, 1], [], []>} : vector<56x16xf32>, vector<16x128xf32>, vector<56x128xf32> -> vector<56x128xf32>
    %148 = arith.addf %119, %147 : vector<56x128xf32>
    %149 = arith.addf %1, %148 : vector<56x128xf32>
    %c0_97 = arith.constant 0 : index
    %c0_98 = arith.constant 0 : index
    %150 = vector.load %arg8[%c0_97, %c0_98] : memref<1x128xf32, #tpu.memory_space<vmem>>, vector<1x128xf32>
    %151 = vector.broadcast %150 : vector<1x128xf32> to vector<56x128xf32>
    %152 = arith.addf %149, %151 : vector<56x128xf32>
    %c0_99 = arith.constant 0 : index
    %c0_100 = arith.constant 0 : index
    %153 = vector.load %arg9[%c0_99, %c0_100] : memref<1x128xf32, #tpu.memory_space<vmem>>, vector<1x128xf32>
    %c0_101 = arith.constant 0 : index
    %c0_102 = arith.constant 0 : index
    %154 = vector.load %arg10[%c0_101, %c0_102] : memref<1x128xf32, #tpu.memory_space<vmem>>, vector<1x128xf32>
    %cst_103 = arith.constant dense<0.000000e+00> : vector<56xf32>
    %155 = vector.multi_reduction <add>, %152, %cst_103 [1] : vector<56x128xf32> to vector<56xf32>
    %156 = vector.shape_cast %155 : vector<56xf32> to vector<56x1xf32>
    %cst_104 = arith.constant 0.0294117648 : f32
    %157 = vector.broadcast %cst_104 : f32 to vector<56x1xf32>
    %158 = arith.mulf %156, %157 : vector<56x1xf32>
    %159 = vector.broadcast %158 : vector<56x1xf32> to vector<56x128xf32>
    %160 = arith.subf %152, %159 : vector<56x128xf32>
    %cst_105 = arith.constant 0.000000e+00 : f32
    %161 = vector.broadcast %cst_105 : f32 to vector<56x128xf32>
    %162 = arith.select %4, %160, %161 : vector<56x128xi1>, vector<56x128xf32>
    %163 = arith.mulf %162, %162 : vector<56x128xf32>
    %cst_106 = arith.constant dense<0.000000e+00> : vector<56xf32>
    %164 = vector.multi_reduction <add>, %163, %cst_106 [1] : vector<56x128xf32> to vector<56xf32>
    %165 = vector.shape_cast %164 : vector<56xf32> to vector<56x1xf32>
    %cst_107 = arith.constant 0.0294117648 : f32
    %166 = vector.broadcast %cst_107 : f32 to vector<56x1xf32>
    %167 = arith.mulf %165, %166 : vector<56x1xf32>
    %cst_108 = arith.constant 9.99999974E-6 : f32
    %168 = vector.broadcast %cst_108 : f32 to vector<56x1xf32>
    %169 = arith.addf %167, %168 : vector<56x1xf32>
    %170 = math.rsqrt %169 : vector<56x1xf32>
    %171 = vector.broadcast %170 : vector<56x1xf32> to vector<56x128xf32>
    %172 = arith.mulf %162, %171 : vector<56x128xf32>
    %173 = vector.broadcast %153 : vector<1x128xf32> to vector<56x128xf32>
    %174 = arith.mulf %172, %173 : vector<56x128xf32>
    %175 = vector.broadcast %154 : vector<1x128xf32> to vector<56x128xf32>
    %176 = arith.addf %174, %175 : vector<56x128xf32>
    %c0_109 = arith.constant 0 : index
    %c0_110 = arith.constant 0 : index
    %177 = vector.load %arg11[%c0_109, %c0_110] : memref<128x64xf32, #tpu.memory_space<vmem>>, vector<128x64xf32>
    %cst_111 = arith.constant dense<0.000000e+00> : vector<56x64xf32>
    %178 = tpu.matmul %176, %177, %cst_111 {dimension_numbers = #tpu.dot_dimension_numbers<[1], [0], [0], [1], [0, 0, 1, 1], [], []>} : vector<56x128xf32>, vector<128x64xf32>, vector<56x64xf32> -> vector<56x64xf32>
    %c0_112 = arith.constant 0 : index
    %c0_113 = arith.constant 0 : index
    %179 = vector.load %arg12[%c0_112, %c0_113] : memref<1x64xf32, #tpu.memory_space<vmem>>, vector<1x64xf32>
    %180 = vector.broadcast %179 : vector<1x64xf32> to vector<56x64xf32>
    %181 = arith.addf %178, %180 : vector<56x64xf32>
    %cst_114 = arith.constant 5.000000e-01 : f32
    %182 = vector.broadcast %cst_114 : f32 to vector<56x64xf32>
    %183 = arith.mulf %182, %181 : vector<56x64xf32>
    %cst_115 = arith.constant 4.471500e-02 : f32
    %184 = vector.broadcast %cst_115 : f32 to vector<56x64xf32>
    %185 = arith.mulf %184, %181 : vector<56x64xf32>
    %186 = arith.mulf %185, %181 : vector<56x64xf32>
    %187 = arith.mulf %186, %181 : vector<56x64xf32>
    %188 = arith.addf %181, %187 : vector<56x64xf32>
    %cst_116 = arith.constant 0.797884583 : f32
    %189 = vector.broadcast %cst_116 : f32 to vector<56x64xf32>
    %190 = arith.mulf %189, %188 : vector<56x64xf32>
    %191 = math.tanh %190 : vector<56x64xf32>
    %cst_117 = arith.constant 1.000000e+00 : f32
    %192 = vector.broadcast %cst_117 : f32 to vector<56x64xf32>
    %193 = arith.addf %192, %191 : vector<56x64xf32>
    %194 = arith.mulf %183, %193 : vector<56x64xf32>
    %c0_118 = arith.constant 0 : index
    %c0_119 = arith.constant 0 : index
    %195 = vector.load %arg13[%c0_118, %c0_119] : memref<64x128xf32, #tpu.memory_space<vmem>>, vector<64x128xf32>
    %cst_120 = arith.constant dense<0.000000e+00> : vector<56x128xf32>
    %196 = tpu.matmul %194, %195, %cst_120 {dimension_numbers = #tpu.dot_dimension_numbers<[1], [0], [0], [1], [0, 0, 1, 1], [], []>} : vector<56x64xf32>, vector<64x128xf32>, vector<56x128xf32> -> vector<56x128xf32>
    %c0_121 = arith.constant 0 : index
    %c0_122 = arith.constant 0 : index
    %197 = vector.load %arg14[%c0_121, %c0_122] : memref<1x128xf32, #tpu.memory_space<vmem>>, vector<1x128xf32>
    %198 = vector.broadcast %197 : vector<1x128xf32> to vector<56x128xf32>
    %199 = arith.addf %196, %198 : vector<56x128xf32>
    %200 = arith.addf %152, %199 : vector<56x128xf32>
    %c0_123 = arith.constant 0 : index
    %c0_124 = arith.constant 0 : index
    %201 = vector.load %arg15[%c0_123, %c0_124] : memref<1x128xf32, #tpu.memory_space<vmem>>, vector<1x128xf32>
    %c0_125 = arith.constant 0 : index
    %c0_126 = arith.constant 0 : index
    %202 = vector.load %arg16[%c0_125, %c0_126] : memref<1x128xf32, #tpu.memory_space<vmem>>, vector<1x128xf32>
    %cst_127 = arith.constant dense<0.000000e+00> : vector<56xf32>
    %203 = vector.multi_reduction <add>, %200, %cst_127 [1] : vector<56x128xf32> to vector<56xf32>
    %204 = vector.shape_cast %203 : vector<56xf32> to vector<56x1xf32>
    %cst_128 = arith.constant 0.0294117648 : f32
    %205 = vector.broadcast %cst_128 : f32 to vector<56x1xf32>
    %206 = arith.mulf %204, %205 : vector<56x1xf32>
    %207 = vector.broadcast %206 : vector<56x1xf32> to vector<56x128xf32>
    %208 = arith.subf %200, %207 : vector<56x128xf32>
    %cst_129 = arith.constant 0.000000e+00 : f32
    %209 = vector.broadcast %cst_129 : f32 to vector<56x128xf32>
    %210 = arith.select %4, %208, %209 : vector<56x128xi1>, vector<56x128xf32>
    %211 = arith.mulf %210, %210 : vector<56x128xf32>
    %cst_130 = arith.constant dense<0.000000e+00> : vector<56xf32>
    %212 = vector.multi_reduction <add>, %211, %cst_130 [1] : vector<56x128xf32> to vector<56xf32>
    %213 = vector.shape_cast %212 : vector<56xf32> to vector<56x1xf32>
    %cst_131 = arith.constant 0.0294117648 : f32
    %214 = vector.broadcast %cst_131 : f32 to vector<56x1xf32>
    %215 = arith.mulf %213, %214 : vector<56x1xf32>
    %cst_132 = arith.constant 9.99999974E-6 : f32
    %216 = vector.broadcast %cst_132 : f32 to vector<56x1xf32>
    %217 = arith.addf %215, %216 : vector<56x1xf32>
    %218 = math.rsqrt %217 : vector<56x1xf32>
    %219 = vector.broadcast %218 : vector<56x1xf32> to vector<56x128xf32>
    %220 = arith.mulf %210, %219 : vector<56x128xf32>
    %221 = vector.broadcast %201 : vector<1x128xf32> to vector<56x128xf32>
    %222 = arith.mulf %220, %221 : vector<56x128xf32>
    %223 = vector.broadcast %202 : vector<1x128xf32> to vector<56x128xf32>
    %224 = arith.addf %222, %223 : vector<56x128xf32>
    %cst_133 = arith.constant 0.000000e+00 : f32
    %225 = vector.broadcast %cst_133 : f32 to vector<56x128xf32>
    %c0_134 = arith.constant 0 : index
    %c0_135 = arith.constant 0 : index
    %c0_136 = arith.constant 0 : index
    %226 = vector.load %arg17[%c0_134, %c0_135, %c0_136] : memref<4x128x16xf32, #tpu.memory_space<vmem>>, vector<1x128x16xf32>
    %227 = vector.shape_cast %226 : vector<1x128x16xf32> to vector<128x16xf32>
    %cst_137 = arith.constant dense<0.000000e+00> : vector<56x16xf32>
    %228 = tpu.matmul %224, %227, %cst_137 {dimension_numbers = #tpu.dot_dimension_numbers<[1], [0], [0], [1], [0, 0, 1, 1], [], []>} : vector<56x128xf32>, vector<128x16xf32>, vector<56x16xf32> -> vector<56x16xf32>
    %c0_138 = arith.constant 0 : index
    %c0_139 = arith.constant 0 : index
    %c0_140 = arith.constant 0 : index
    %229 = vector.load %arg18[%c0_138, %c0_139, %c0_140] : memref<4x128x16xf32, #tpu.memory_space<vmem>>, vector<1x128x16xf32>
    %230 = vector.shape_cast %229 : vector<1x128x16xf32> to vector<128x16xf32>
    %cst_141 = arith.constant dense<0.000000e+00> : vector<56x16xf32>
    %231 = tpu.matmul %224, %230, %cst_141 {dimension_numbers = #tpu.dot_dimension_numbers<[1], [0], [0], [1], [0, 0, 1, 1], [], []>} : vector<56x128xf32>, vector<128x16xf32>, vector<56x16xf32> -> vector<56x16xf32>
    %c0_142 = arith.constant 0 : index
    %c0_143 = arith.constant 0 : index
    %c0_144 = arith.constant 0 : index
    %232 = vector.load %arg19[%c0_142, %c0_143, %c0_144] : memref<4x128x16xf32, #tpu.memory_space<vmem>>, vector<1x128x16xf32>
    %233 = vector.shape_cast %232 : vector<1x128x16xf32> to vector<128x16xf32>
    %cst_145 = arith.constant dense<0.000000e+00> : vector<56x16xf32>
    %234 = tpu.matmul %224, %233, %cst_145 {dimension_numbers = #tpu.dot_dimension_numbers<[1], [0], [0], [1], [0, 0, 1, 1], [], []>} : vector<56x128xf32>, vector<128x16xf32>, vector<56x16xf32> -> vector<56x16xf32>
    %cst_146 = arith.constant dense<0.000000e+00> : vector<56x56xf32>
    %235 = tpu.matmul %228, %231, %cst_146 {dimension_numbers = #tpu.dot_dimension_numbers<[1], [1], [0], [0], [0, 0, 1, 0], [], []>} : vector<56x16xf32>, vector<56x16xf32>, vector<56x56xf32> -> vector<56x56xf32>
    %cst_147 = arith.constant 2.500000e-01 : f32
    %236 = vector.broadcast %cst_147 : f32 to vector<56x56xf32>
    %237 = arith.mulf %235, %236 : vector<56x56xf32>
    %cst_148 = arith.constant -1.000000e+30 : f32
    %238 = vector.broadcast %cst_148 : f32 to vector<56x56xf32>
    %239 = arith.select %7, %237, %238 : vector<56x56xi1>, vector<56x56xf32>
    %cst_149 = arith.constant dense<0xFF800000> : vector<56xf32>
    %240 = vector.multi_reduction <maximumf>, %239, %cst_149 [1] : vector<56x56xf32> to vector<56xf32>
    %241 = vector.shape_cast %240 : vector<56xf32> to vector<56x1xf32>
    %242 = vector.broadcast %241 : vector<56x1xf32> to vector<56x56xf32>
    %243 = arith.subf %239, %242 : vector<56x56xf32>
    %244 = math.exp %243 : vector<56x56xf32>
    %cst_150 = arith.constant dense<0.000000e+00> : vector<56xf32>
    %245 = vector.multi_reduction <add>, %244, %cst_150 [1] : vector<56x56xf32> to vector<56xf32>
    %246 = vector.shape_cast %245 : vector<56xf32> to vector<56x1xf32>
    %247 = tpu.reciprocal %246 {approx = true} : vector<56x1xf32> -> vector<56x1xf32>
    %248 = vector.broadcast %247 : vector<56x1xf32> to vector<56x56xf32>
    %249 = arith.mulf %244, %248 : vector<56x56xf32>
    %cst_151 = arith.constant dense<0.000000e+00> : vector<56x16xf32>
    %250 = tpu.matmul %249, %234, %cst_151 {dimension_numbers = #tpu.dot_dimension_numbers<[1], [0], [0], [1], [0, 0, 1, 1], [], []>} : vector<56x56xf32>, vector<56x16xf32>, vector<56x16xf32> -> vector<56x16xf32>
    %c0_152 = arith.constant 0 : index
    %c0_153 = arith.constant 0 : index
    %c0_154 = arith.constant 0 : index
    %251 = vector.load %arg20[%c0_152, %c0_153, %c0_154] : memref<4x16x128xf32, #tpu.memory_space<vmem>>, vector<1x16x128xf32>
    %252 = vector.shape_cast %251 : vector<1x16x128xf32> to vector<16x128xf32>
    %cst_155 = arith.constant dense<0.000000e+00> : vector<56x128xf32>
    %253 = tpu.matmul %250, %252, %cst_155 {dimension_numbers = #tpu.dot_dimension_numbers<[1], [0], [0], [1], [0, 0, 1, 1], [], []>} : vector<56x16xf32>, vector<16x128xf32>, vector<56x128xf32> -> vector<56x128xf32>
    %254 = arith.addf %225, %253 : vector<56x128xf32>
    %c1_156 = arith.constant 1 : index
    %c0_157 = arith.constant 0 : index
    %c0_158 = arith.constant 0 : index
    %255 = vector.load %arg17[%c1_156, %c0_157, %c0_158] : memref<4x128x16xf32, #tpu.memory_space<vmem>>, vector<1x128x16xf32>
    %256 = vector.shape_cast %255 : vector<1x128x16xf32> to vector<128x16xf32>
    %cst_159 = arith.constant dense<0.000000e+00> : vector<56x16xf32>
    %257 = tpu.matmul %224, %256, %cst_159 {dimension_numbers = #tpu.dot_dimension_numbers<[1], [0], [0], [1], [0, 0, 1, 1], [], []>} : vector<56x128xf32>, vector<128x16xf32>, vector<56x16xf32> -> vector<56x16xf32>
    %c1_160 = arith.constant 1 : index
    %c0_161 = arith.constant 0 : index
    %c0_162 = arith.constant 0 : index
    %258 = vector.load %arg18[%c1_160, %c0_161, %c0_162] : memref<4x128x16xf32, #tpu.memory_space<vmem>>, vector<1x128x16xf32>
    %259 = vector.shape_cast %258 : vector<1x128x16xf32> to vector<128x16xf32>
    %cst_163 = arith.constant dense<0.000000e+00> : vector<56x16xf32>
    %260 = tpu.matmul %224, %259, %cst_163 {dimension_numbers = #tpu.dot_dimension_numbers<[1], [0], [0], [1], [0, 0, 1, 1], [], []>} : vector<56x128xf32>, vector<128x16xf32>, vector<56x16xf32> -> vector<56x16xf32>
    %c1_164 = arith.constant 1 : index
    %c0_165 = arith.constant 0 : index
    %c0_166 = arith.constant 0 : index
    %261 = vector.load %arg19[%c1_164, %c0_165, %c0_166] : memref<4x128x16xf32, #tpu.memory_space<vmem>>, vector<1x128x16xf32>
    %262 = vector.shape_cast %261 : vector<1x128x16xf32> to vector<128x16xf32>
    %cst_167 = arith.constant dense<0.000000e+00> : vector<56x16xf32>
    %263 = tpu.matmul %224, %262, %cst_167 {dimension_numbers = #tpu.dot_dimension_numbers<[1], [0], [0], [1], [0, 0, 1, 1], [], []>} : vector<56x128xf32>, vector<128x16xf32>, vector<56x16xf32> -> vector<56x16xf32>
    %cst_168 = arith.constant dense<0.000000e+00> : vector<56x56xf32>
    %264 = tpu.matmul %257, %260, %cst_168 {dimension_numbers = #tpu.dot_dimension_numbers<[1], [1], [0], [0], [0, 0, 1, 0], [], []>} : vector<56x16xf32>, vector<56x16xf32>, vector<56x56xf32> -> vector<56x56xf32>
    %cst_169 = arith.constant 2.500000e-01 : f32
    %265 = vector.broadcast %cst_169 : f32 to vector<56x56xf32>
    %266 = arith.mulf %264, %265 : vector<56x56xf32>
    %cst_170 = arith.constant -1.000000e+30 : f32
    %267 = vector.broadcast %cst_170 : f32 to vector<56x56xf32>
    %268 = arith.select %7, %266, %267 : vector<56x56xi1>, vector<56x56xf32>
    %cst_171 = arith.constant dense<0xFF800000> : vector<56xf32>
    %269 = vector.multi_reduction <maximumf>, %268, %cst_171 [1] : vector<56x56xf32> to vector<56xf32>
    %270 = vector.shape_cast %269 : vector<56xf32> to vector<56x1xf32>
    %271 = vector.broadcast %270 : vector<56x1xf32> to vector<56x56xf32>
    %272 = arith.subf %268, %271 : vector<56x56xf32>
    %273 = math.exp %272 : vector<56x56xf32>
    %cst_172 = arith.constant dense<0.000000e+00> : vector<56xf32>
    %274 = vector.multi_reduction <add>, %273, %cst_172 [1] : vector<56x56xf32> to vector<56xf32>
    %275 = vector.shape_cast %274 : vector<56xf32> to vector<56x1xf32>
    %276 = tpu.reciprocal %275 {approx = true} : vector<56x1xf32> -> vector<56x1xf32>
    %277 = vector.broadcast %276 : vector<56x1xf32> to vector<56x56xf32>
    %278 = arith.mulf %273, %277 : vector<56x56xf32>
    %cst_173 = arith.constant dense<0.000000e+00> : vector<56x16xf32>
    %279 = tpu.matmul %278, %263, %cst_173 {dimension_numbers = #tpu.dot_dimension_numbers<[1], [0], [0], [1], [0, 0, 1, 1], [], []>} : vector<56x56xf32>, vector<56x16xf32>, vector<56x16xf32> -> vector<56x16xf32>
    %c1_174 = arith.constant 1 : index
    %c0_175 = arith.constant 0 : index
    %c0_176 = arith.constant 0 : index
    %280 = vector.load %arg20[%c1_174, %c0_175, %c0_176] : memref<4x16x128xf32, #tpu.memory_space<vmem>>, vector<1x16x128xf32>
    %281 = vector.shape_cast %280 : vector<1x16x128xf32> to vector<16x128xf32>
    %cst_177 = arith.constant dense<0.000000e+00> : vector<56x128xf32>
    %282 = tpu.matmul %279, %281, %cst_177 {dimension_numbers = #tpu.dot_dimension_numbers<[1], [0], [0], [1], [0, 0, 1, 1], [], []>} : vector<56x16xf32>, vector<16x128xf32>, vector<56x128xf32> -> vector<56x128xf32>
    %283 = arith.addf %254, %282 : vector<56x128xf32>
    %c2_178 = arith.constant 2 : index
    %c0_179 = arith.constant 0 : index
    %c0_180 = arith.constant 0 : index
    %284 = vector.load %arg17[%c2_178, %c0_179, %c0_180] : memref<4x128x16xf32, #tpu.memory_space<vmem>>, vector<1x128x16xf32>
    %285 = vector.shape_cast %284 : vector<1x128x16xf32> to vector<128x16xf32>
    %cst_181 = arith.constant dense<0.000000e+00> : vector<56x16xf32>
    %286 = tpu.matmul %224, %285, %cst_181 {dimension_numbers = #tpu.dot_dimension_numbers<[1], [0], [0], [1], [0, 0, 1, 1], [], []>} : vector<56x128xf32>, vector<128x16xf32>, vector<56x16xf32> -> vector<56x16xf32>
    %c2_182 = arith.constant 2 : index
    %c0_183 = arith.constant 0 : index
    %c0_184 = arith.constant 0 : index
    %287 = vector.load %arg18[%c2_182, %c0_183, %c0_184] : memref<4x128x16xf32, #tpu.memory_space<vmem>>, vector<1x128x16xf32>
    %288 = vector.shape_cast %287 : vector<1x128x16xf32> to vector<128x16xf32>
    %cst_185 = arith.constant dense<0.000000e+00> : vector<56x16xf32>
    %289 = tpu.matmul %224, %288, %cst_185 {dimension_numbers = #tpu.dot_dimension_numbers<[1], [0], [0], [1], [0, 0, 1, 1], [], []>} : vector<56x128xf32>, vector<128x16xf32>, vector<56x16xf32> -> vector<56x16xf32>
    %c2_186 = arith.constant 2 : index
    %c0_187 = arith.constant 0 : index
    %c0_188 = arith.constant 0 : index
    %290 = vector.load %arg19[%c2_186, %c0_187, %c0_188] : memref<4x128x16xf32, #tpu.memory_space<vmem>>, vector<1x128x16xf32>
    %291 = vector.shape_cast %290 : vector<1x128x16xf32> to vector<128x16xf32>
    %cst_189 = arith.constant dense<0.000000e+00> : vector<56x16xf32>
    %292 = tpu.matmul %224, %291, %cst_189 {dimension_numbers = #tpu.dot_dimension_numbers<[1], [0], [0], [1], [0, 0, 1, 1], [], []>} : vector<56x128xf32>, vector<128x16xf32>, vector<56x16xf32> -> vector<56x16xf32>
    %cst_190 = arith.constant dense<0.000000e+00> : vector<56x56xf32>
    %293 = tpu.matmul %286, %289, %cst_190 {dimension_numbers = #tpu.dot_dimension_numbers<[1], [1], [0], [0], [0, 0, 1, 0], [], []>} : vector<56x16xf32>, vector<56x16xf32>, vector<56x56xf32> -> vector<56x56xf32>
    %cst_191 = arith.constant 2.500000e-01 : f32
    %294 = vector.broadcast %cst_191 : f32 to vector<56x56xf32>
    %295 = arith.mulf %293, %294 : vector<56x56xf32>
    %cst_192 = arith.constant -1.000000e+30 : f32
    %296 = vector.broadcast %cst_192 : f32 to vector<56x56xf32>
    %297 = arith.select %7, %295, %296 : vector<56x56xi1>, vector<56x56xf32>
    %cst_193 = arith.constant dense<0xFF800000> : vector<56xf32>
    %298 = vector.multi_reduction <maximumf>, %297, %cst_193 [1] : vector<56x56xf32> to vector<56xf32>
    %299 = vector.shape_cast %298 : vector<56xf32> to vector<56x1xf32>
    %300 = vector.broadcast %299 : vector<56x1xf32> to vector<56x56xf32>
    %301 = arith.subf %297, %300 : vector<56x56xf32>
    %302 = math.exp %301 : vector<56x56xf32>
    %cst_194 = arith.constant dense<0.000000e+00> : vector<56xf32>
    %303 = vector.multi_reduction <add>, %302, %cst_194 [1] : vector<56x56xf32> to vector<56xf32>
    %304 = vector.shape_cast %303 : vector<56xf32> to vector<56x1xf32>
    %305 = tpu.reciprocal %304 {approx = true} : vector<56x1xf32> -> vector<56x1xf32>
    %306 = vector.broadcast %305 : vector<56x1xf32> to vector<56x56xf32>
    %307 = arith.mulf %302, %306 : vector<56x56xf32>
    %cst_195 = arith.constant dense<0.000000e+00> : vector<56x16xf32>
    %308 = tpu.matmul %307, %292, %cst_195 {dimension_numbers = #tpu.dot_dimension_numbers<[1], [0], [0], [1], [0, 0, 1, 1], [], []>} : vector<56x56xf32>, vector<56x16xf32>, vector<56x16xf32> -> vector<56x16xf32>
    %c2_196 = arith.constant 2 : index
    %c0_197 = arith.constant 0 : index
    %c0_198 = arith.constant 0 : index
    %309 = vector.load %arg20[%c2_196, %c0_197, %c0_198] : memref<4x16x128xf32, #tpu.memory_space<vmem>>, vector<1x16x128xf32>
    %310 = vector.shape_cast %309 : vector<1x16x128xf32> to vector<16x128xf32>
    %cst_199 = arith.constant dense<0.000000e+00> : vector<56x128xf32>
    %311 = tpu.matmul %308, %310, %cst_199 {dimension_numbers = #tpu.dot_dimension_numbers<[1], [0], [0], [1], [0, 0, 1, 1], [], []>} : vector<56x16xf32>, vector<16x128xf32>, vector<56x128xf32> -> vector<56x128xf32>
    %312 = arith.addf %283, %311 : vector<56x128xf32>
    %c3_200 = arith.constant 3 : index
    %c0_201 = arith.constant 0 : index
    %c0_202 = arith.constant 0 : index
    %313 = vector.load %arg17[%c3_200, %c0_201, %c0_202] : memref<4x128x16xf32, #tpu.memory_space<vmem>>, vector<1x128x16xf32>
    %314 = vector.shape_cast %313 : vector<1x128x16xf32> to vector<128x16xf32>
    %cst_203 = arith.constant dense<0.000000e+00> : vector<56x16xf32>
    %315 = tpu.matmul %224, %314, %cst_203 {dimension_numbers = #tpu.dot_dimension_numbers<[1], [0], [0], [1], [0, 0, 1, 1], [], []>} : vector<56x128xf32>, vector<128x16xf32>, vector<56x16xf32> -> vector<56x16xf32>
    %c3_204 = arith.constant 3 : index
    %c0_205 = arith.constant 0 : index
    %c0_206 = arith.constant 0 : index
    %316 = vector.load %arg18[%c3_204, %c0_205, %c0_206] : memref<4x128x16xf32, #tpu.memory_space<vmem>>, vector<1x128x16xf32>
    %317 = vector.shape_cast %316 : vector<1x128x16xf32> to vector<128x16xf32>
    %cst_207 = arith.constant dense<0.000000e+00> : vector<56x16xf32>
    %318 = tpu.matmul %224, %317, %cst_207 {dimension_numbers = #tpu.dot_dimension_numbers<[1], [0], [0], [1], [0, 0, 1, 1], [], []>} : vector<56x128xf32>, vector<128x16xf32>, vector<56x16xf32> -> vector<56x16xf32>
    %c3_208 = arith.constant 3 : index
    %c0_209 = arith.constant 0 : index
    %c0_210 = arith.constant 0 : index
    %319 = vector.load %arg19[%c3_208, %c0_209, %c0_210] : memref<4x128x16xf32, #tpu.memory_space<vmem>>, vector<1x128x16xf32>
    %320 = vector.shape_cast %319 : vector<1x128x16xf32> to vector<128x16xf32>
    %cst_211 = arith.constant dense<0.000000e+00> : vector<56x16xf32>
    %321 = tpu.matmul %224, %320, %cst_211 {dimension_numbers = #tpu.dot_dimension_numbers<[1], [0], [0], [1], [0, 0, 1, 1], [], []>} : vector<56x128xf32>, vector<128x16xf32>, vector<56x16xf32> -> vector<56x16xf32>
    %cst_212 = arith.constant dense<0.000000e+00> : vector<56x56xf32>
    %322 = tpu.matmul %315, %318, %cst_212 {dimension_numbers = #tpu.dot_dimension_numbers<[1], [1], [0], [0], [0, 0, 1, 0], [], []>} : vector<56x16xf32>, vector<56x16xf32>, vector<56x56xf32> -> vector<56x56xf32>
    %cst_213 = arith.constant 2.500000e-01 : f32
    %323 = vector.broadcast %cst_213 : f32 to vector<56x56xf32>
    %324 = arith.mulf %322, %323 : vector<56x56xf32>
    %cst_214 = arith.constant -1.000000e+30 : f32
    %325 = vector.broadcast %cst_214 : f32 to vector<56x56xf32>
    %326 = arith.select %7, %324, %325 : vector<56x56xi1>, vector<56x56xf32>
    %cst_215 = arith.constant dense<0xFF800000> : vector<56xf32>
    %327 = vector.multi_reduction <maximumf>, %326, %cst_215 [1] : vector<56x56xf32> to vector<56xf32>
    %328 = vector.shape_cast %327 : vector<56xf32> to vector<56x1xf32>
    %329 = vector.broadcast %328 : vector<56x1xf32> to vector<56x56xf32>
    %330 = arith.subf %326, %329 : vector<56x56xf32>
    %331 = math.exp %330 : vector<56x56xf32>
    %cst_216 = arith.constant dense<0.000000e+00> : vector<56xf32>
    %332 = vector.multi_reduction <add>, %331, %cst_216 [1] : vector<56x56xf32> to vector<56xf32>
    %333 = vector.shape_cast %332 : vector<56xf32> to vector<56x1xf32>
    %334 = tpu.reciprocal %333 {approx = true} : vector<56x1xf32> -> vector<56x1xf32>
    %335 = vector.broadcast %334 : vector<56x1xf32> to vector<56x56xf32>
    %336 = arith.mulf %331, %335 : vector<56x56xf32>
    %cst_217 = arith.constant dense<0.000000e+00> : vector<56x16xf32>
    %337 = tpu.matmul %336, %321, %cst_217 {dimension_numbers = #tpu.dot_dimension_numbers<[1], [0], [0], [1], [0, 0, 1, 1], [], []>} : vector<56x56xf32>, vector<56x16xf32>, vector<56x16xf32> -> vector<56x16xf32>
    %c3_218 = arith.constant 3 : index
    %c0_219 = arith.constant 0 : index
    %c0_220 = arith.constant 0 : index
    %338 = vector.load %arg20[%c3_218, %c0_219, %c0_220] : memref<4x16x128xf32, #tpu.memory_space<vmem>>, vector<1x16x128xf32>
    %339 = vector.shape_cast %338 : vector<1x16x128xf32> to vector<16x128xf32>
    %cst_221 = arith.constant dense<0.000000e+00> : vector<56x128xf32>
    %340 = tpu.matmul %337, %339, %cst_221 {dimension_numbers = #tpu.dot_dimension_numbers<[1], [0], [0], [1], [0, 0, 1, 1], [], []>} : vector<56x16xf32>, vector<16x128xf32>, vector<56x128xf32> -> vector<56x128xf32>
    %341 = arith.addf %312, %340 : vector<56x128xf32>
    %342 = arith.addf %200, %341 : vector<56x128xf32>
    %c0_222 = arith.constant 0 : index
    %c0_223 = arith.constant 0 : index
    %343 = vector.load %arg21[%c0_222, %c0_223] : memref<1x128xf32, #tpu.memory_space<vmem>>, vector<1x128xf32>
    %344 = vector.broadcast %343 : vector<1x128xf32> to vector<56x128xf32>
    %345 = arith.addf %342, %344 : vector<56x128xf32>
    %c0_224 = arith.constant 0 : index
    %c0_225 = arith.constant 0 : index
    %346 = vector.load %arg22[%c0_224, %c0_225] : memref<1x128xf32, #tpu.memory_space<vmem>>, vector<1x128xf32>
    %c0_226 = arith.constant 0 : index
    %c0_227 = arith.constant 0 : index
    %347 = vector.load %arg23[%c0_226, %c0_227] : memref<1x128xf32, #tpu.memory_space<vmem>>, vector<1x128xf32>
    %cst_228 = arith.constant dense<0.000000e+00> : vector<56xf32>
    %348 = vector.multi_reduction <add>, %345, %cst_228 [1] : vector<56x128xf32> to vector<56xf32>
    %349 = vector.shape_cast %348 : vector<56xf32> to vector<56x1xf32>
    %cst_229 = arith.constant 0.0294117648 : f32
    %350 = vector.broadcast %cst_229 : f32 to vector<56x1xf32>
    %351 = arith.mulf %349, %350 : vector<56x1xf32>
    %352 = vector.broadcast %351 : vector<56x1xf32> to vector<56x128xf32>
    %353 = arith.subf %345, %352 : vector<56x128xf32>
    %cst_230 = arith.constant 0.000000e+00 : f32
    %354 = vector.broadcast %cst_230 : f32 to vector<56x128xf32>
    %355 = arith.select %4, %353, %354 : vector<56x128xi1>, vector<56x128xf32>
    %356 = arith.mulf %355, %355 : vector<56x128xf32>
    %cst_231 = arith.constant dense<0.000000e+00> : vector<56xf32>
    %357 = vector.multi_reduction <add>, %356, %cst_231 [1] : vector<56x128xf32> to vector<56xf32>
    %358 = vector.shape_cast %357 : vector<56xf32> to vector<56x1xf32>
    %cst_232 = arith.constant 0.0294117648 : f32
    %359 = vector.broadcast %cst_232 : f32 to vector<56x1xf32>
    %360 = arith.mulf %358, %359 : vector<56x1xf32>
    %cst_233 = arith.constant 9.99999974E-6 : f32
    %361 = vector.broadcast %cst_233 : f32 to vector<56x1xf32>
    %362 = arith.addf %360, %361 : vector<56x1xf32>
    %363 = math.rsqrt %362 : vector<56x1xf32>
    %364 = vector.broadcast %363 : vector<56x1xf32> to vector<56x128xf32>
    %365 = arith.mulf %355, %364 : vector<56x128xf32>
    %366 = vector.broadcast %346 : vector<1x128xf32> to vector<56x128xf32>
    %367 = arith.mulf %365, %366 : vector<56x128xf32>
    %368 = vector.broadcast %347 : vector<1x128xf32> to vector<56x128xf32>
    %369 = arith.addf %367, %368 : vector<56x128xf32>
    %c0_234 = arith.constant 0 : index
    %c0_235 = arith.constant 0 : index
    %370 = vector.load %arg24[%c0_234, %c0_235] : memref<128x64xf32, #tpu.memory_space<vmem>>, vector<128x64xf32>
    %cst_236 = arith.constant dense<0.000000e+00> : vector<56x64xf32>
    %371 = tpu.matmul %369, %370, %cst_236 {dimension_numbers = #tpu.dot_dimension_numbers<[1], [0], [0], [1], [0, 0, 1, 1], [], []>} : vector<56x128xf32>, vector<128x64xf32>, vector<56x64xf32> -> vector<56x64xf32>
    %c0_237 = arith.constant 0 : index
    %c0_238 = arith.constant 0 : index
    %372 = vector.load %arg25[%c0_237, %c0_238] : memref<1x64xf32, #tpu.memory_space<vmem>>, vector<1x64xf32>
    %373 = vector.broadcast %372 : vector<1x64xf32> to vector<56x64xf32>
    %374 = arith.addf %371, %373 : vector<56x64xf32>
    %cst_239 = arith.constant 5.000000e-01 : f32
    %375 = vector.broadcast %cst_239 : f32 to vector<56x64xf32>
    %376 = arith.mulf %375, %374 : vector<56x64xf32>
    %cst_240 = arith.constant 4.471500e-02 : f32
    %377 = vector.broadcast %cst_240 : f32 to vector<56x64xf32>
    %378 = arith.mulf %377, %374 : vector<56x64xf32>
    %379 = arith.mulf %378, %374 : vector<56x64xf32>
    %380 = arith.mulf %379, %374 : vector<56x64xf32>
    %381 = arith.addf %374, %380 : vector<56x64xf32>
    %cst_241 = arith.constant 0.797884583 : f32
    %382 = vector.broadcast %cst_241 : f32 to vector<56x64xf32>
    %383 = arith.mulf %382, %381 : vector<56x64xf32>
    %384 = math.tanh %383 : vector<56x64xf32>
    %cst_242 = arith.constant 1.000000e+00 : f32
    %385 = vector.broadcast %cst_242 : f32 to vector<56x64xf32>
    %386 = arith.addf %385, %384 : vector<56x64xf32>
    %387 = arith.mulf %376, %386 : vector<56x64xf32>
    %c0_243 = arith.constant 0 : index
    %c0_244 = arith.constant 0 : index
    %388 = vector.load %arg26[%c0_243, %c0_244] : memref<64x128xf32, #tpu.memory_space<vmem>>, vector<64x128xf32>
    %cst_245 = arith.constant dense<0.000000e+00> : vector<56x128xf32>
    %389 = tpu.matmul %387, %388, %cst_245 {dimension_numbers = #tpu.dot_dimension_numbers<[1], [0], [0], [1], [0, 0, 1, 1], [], []>} : vector<56x64xf32>, vector<64x128xf32>, vector<56x128xf32> -> vector<56x128xf32>
    %c0_246 = arith.constant 0 : index
    %c0_247 = arith.constant 0 : index
    %390 = vector.load %arg27[%c0_246, %c0_247] : memref<1x128xf32, #tpu.memory_space<vmem>>, vector<1x128xf32>
    %391 = vector.broadcast %390 : vector<1x128xf32> to vector<56x128xf32>
    %392 = arith.addf %389, %391 : vector<56x128xf32>
    %393 = arith.addf %345, %392 : vector<56x128xf32>
    %c0_248 = arith.constant 0 : index
    %c0_249 = arith.constant 0 : index
    %394 = vector.load %arg28[%c0_248, %c0_249] : memref<1x128xf32, #tpu.memory_space<vmem>>, vector<1x128xf32>
    %c0_250 = arith.constant 0 : index
    %c0_251 = arith.constant 0 : index
    %395 = vector.load %arg29[%c0_250, %c0_251] : memref<1x128xf32, #tpu.memory_space<vmem>>, vector<1x128xf32>
    %cst_252 = arith.constant dense<0.000000e+00> : vector<56xf32>
    %396 = vector.multi_reduction <add>, %393, %cst_252 [1] : vector<56x128xf32> to vector<56xf32>
    %397 = vector.shape_cast %396 : vector<56xf32> to vector<56x1xf32>
    %cst_253 = arith.constant 0.0294117648 : f32
    %398 = vector.broadcast %cst_253 : f32 to vector<56x1xf32>
    %399 = arith.mulf %397, %398 : vector<56x1xf32>
    %400 = vector.broadcast %399 : vector<56x1xf32> to vector<56x128xf32>
    %401 = arith.subf %393, %400 : vector<56x128xf32>
    %cst_254 = arith.constant 0.000000e+00 : f32
    %402 = vector.broadcast %cst_254 : f32 to vector<56x128xf32>
    %403 = arith.select %4, %401, %402 : vector<56x128xi1>, vector<56x128xf32>
    %404 = arith.mulf %403, %403 : vector<56x128xf32>
    %cst_255 = arith.constant dense<0.000000e+00> : vector<56xf32>
    %405 = vector.multi_reduction <add>, %404, %cst_255 [1] : vector<56x128xf32> to vector<56xf32>
    %406 = vector.shape_cast %405 : vector<56xf32> to vector<56x1xf32>
    %cst_256 = arith.constant 0.0294117648 : f32
    %407 = vector.broadcast %cst_256 : f32 to vector<56x1xf32>
    %408 = arith.mulf %406, %407 : vector<56x1xf32>
    %cst_257 = arith.constant 9.99999974E-6 : f32
    %409 = vector.broadcast %cst_257 : f32 to vector<56x1xf32>
    %410 = arith.addf %408, %409 : vector<56x1xf32>
    %411 = math.rsqrt %410 : vector<56x1xf32>
    %412 = vector.broadcast %411 : vector<56x1xf32> to vector<56x128xf32>
    %413 = arith.mulf %403, %412 : vector<56x128xf32>
    %414 = vector.broadcast %394 : vector<1x128xf32> to vector<56x128xf32>
    %415 = arith.mulf %413, %414 : vector<56x128xf32>
    %416 = vector.broadcast %395 : vector<1x128xf32> to vector<56x128xf32>
    %417 = arith.addf %415, %416 : vector<56x128xf32>
    %c0_258 = arith.constant 0 : index
    %c0_259 = arith.constant 0 : index
    %c0_260 = arith.constant 0 : index
    %418 = vector.load %arg30[%c0_258, %c0_259, %c0_260] : memref<1x56x128xf32, #tpu.memory_space<vmem>>, vector<1x56x128xf32>
    %419 = vector.shape_cast %418 : vector<1x56x128xf32> to vector<56x128xf32>
    %420 = vector.shape_cast %417 : vector<56x128xf32> to vector<1x56x128xf32>
    tpu.vector_store %arg30[%c0_258, %c0_259, %c0_260], %420 {strides = array<i32>} : memref<1x56x128xf32, #tpu.memory_space<vmem>>, vector<1x56x128xf32>,
    return
  }
  func.func @transform_0(%arg0: i32) -> (i32, i32, i32) {
    %c0_i32 = arith.constant 0 : i32
    %c0_i32_0 = arith.constant 0 : i32
    %c0_i32_1 = arith.constant 0 : i32
    return %arg0, %c0_i32, %c0_i32_0 : i32, i32, i32
  }
  func.func @transform_1(%arg0: i32) -> (i32, i32) {
    %c0_i32 = arith.constant 0 : i32
    %c0_i32_0 = arith.constant 0 : i32
    %c0_i32_1 = arith.constant 0 : i32
    return %c0_i32, %c0_i32_0 : i32, i32
  }
  func.func @transform_2(%arg0: i32) -> (i32, i32) {
    %c0_i32 = arith.constant 0 : i32
    %c0_i32_0 = arith.constant 0 : i32
    %c0_i32_1 = arith.constant 0 : i32
    return %c0_i32, %c0_i32_0 : i32, i32
  }
  func.func @transform_3(%arg0: i32) -> (i32, i32, i32) {
    %c0_i32 = arith.constant 0 : i32
    %c0_i32_0 = arith.constant 0 : i32
    %c0_i32_1 = arith.constant 0 : i32
    %c0_i32_2 = arith.constant 0 : i32
    return %c0_i32, %c0_i32_0, %c0_i32_1 : i32, i32, i32
  }
  func.func @transform_4(%arg0: i32) -> (i32, i32, i32) {
    %c0_i32 = arith.constant 0 : i32
    %c0_i32_0 = arith.constant 0 : i32
    %c0_i32_1 = arith.constant 0 : i32
    %c0_i32_2 = arith.constant 0 : i32
    return %c0_i32, %c0_i32_0, %c0_i32_1 : i32, i32, i32
  }
  func.func @transform_5(%arg0: i32) -> (i32, i32, i32) {
    %c0_i32 = arith.constant 0 : i32
    %c0_i32_0 = arith.constant 0 : i32
    %c0_i32_1 = arith.constant 0 : i32
    %c0_i32_2 = arith.constant 0 : i32
    return %c0_i32, %c0_i32_0, %c0_i32_1 : i32, i32, i32
  }
  func.func @transform_6(%arg0: i32) -> (i32, i32, i32) {
    %c0_i32 = arith.constant 0 : i32
    %c0_i32_0 = arith.constant 0 : i32
    %c0_i32_1 = arith.constant 0 : i32
    %c0_i32_2 = arith.constant 0 : i32
    return %c0_i32, %c0_i32_0, %c0_i32_1 : i32, i32, i32
  }
  func.func @transform_7(%arg0: i32) -> (i32, i32) {
    %c0_i32 = arith.constant 0 : i32
    %c0_i32_0 = arith.constant 0 : i32
    %c0_i32_1 = arith.constant 0 : i32
    return %c0_i32, %c0_i32_0 : i32, i32
  }
  func.func @transform_8(%arg0: i32) -> (i32, i32) {
    %c0_i32 = arith.constant 0 : i32
    %c0_i32_0 = arith.constant 0 : i32
    %c0_i32_1 = arith.constant 0 : i32
    return %c0_i32, %c0_i32_0 : i32, i32
  }
  func.func @transform_9(%arg0: i32) -> (i32, i32) {
    %c0_i32 = arith.constant 0 : i32
    %c0_i32_0 = arith.constant 0 : i32
    %c0_i32_1 = arith.constant 0 : i32
    return %c0_i32, %c0_i32_0 : i32, i32
  }
  func.func @transform_10(%arg0: i32) -> (i32, i32) {
    %c0_i32 = arith.constant 0 : i32
    %c0_i32_0 = arith.constant 0 : i32
    %c0_i32_1 = arith.constant 0 : i32
    return %c0_i32, %c0_i32_0 : i32, i32
  }
  func.func @transform_11(%arg0: i32) -> (i32, i32) {
    %c0_i32 = arith.constant 0 : i32
    %c0_i32_0 = arith.constant 0 : i32
    %c0_i32_1 = arith.constant 0 : i32
    return %c0_i32, %c0_i32_0 : i32, i32
  }
  func.func @transform_12(%arg0: i32) -> (i32, i32) {
    %c0_i32 = arith.constant 0 : i32
    %c0_i32_0 = arith.constant 0 : i32
    %c0_i32_1 = arith.constant 0 : i32
    return %c0_i32, %c0_i32_0 : i32, i32
  }
  func.func @transform_13(%arg0: i32) -> (i32, i32) {
    %c0_i32 = arith.constant 0 : i32
    %c0_i32_0 = arith.constant 0 : i32
    %c0_i32_1 = arith.constant 0 : i32
    return %c0_i32, %c0_i32_0 : i32, i32
  }
  func.func @transform_14(%arg0: i32) -> (i32, i32) {
    %c0_i32 = arith.constant 0 : i32
    %c0_i32_0 = arith.constant 0 : i32
    %c0_i32_1 = arith.constant 0 : i32
    return %c0_i32, %c0_i32_0 : i32, i32
  }
  func.func @transform_15(%arg0: i32) -> (i32, i32) {
    %c0_i32 = arith.constant 0 : i32
    %c0_i32_0 = arith.constant 0 : i32
    %c0_i32_1 = arith.constant 0 : i32
    return %c0_i32, %c0_i32_0 : i32, i32
  }
  func.func @transform_16(%arg0: i32) -> (i32, i32, i32) {
    %c0_i32 = arith.constant 0 : i32
    %c0_i32_0 = arith.constant 0 : i32
    %c0_i32_1 = arith.constant 0 : i32
    %c0_i32_2 = arith.constant 0 : i32
    return %c0_i32, %c0_i32_0, %c0_i32_1 : i32, i32, i32
  }
  func.func @transform_17(%arg0: i32) -> (i32, i32, i32) {
    %c0_i32 = arith.constant 0 : i32
    %c0_i32_0 = arith.constant 0 : i32
    %c0_i32_1 = arith.constant 0 : i32
    %c0_i32_2 = arith.constant 0 : i32
    return %c0_i32, %c0_i32_0, %c0_i32_1 : i32, i32, i32
  }
  func.func @transform_18(%arg0: i32) -> (i32, i32, i32) {
    %c0_i32 = arith.constant 0 : i32
    %c0_i32_0 = arith.constant 0 : i32
    %c0_i32_1 = arith.constant 0 : i32
    %c0_i32_2 = arith.constant 0 : i32
    return %c0_i32, %c0_i32_0, %c0_i32_1 : i32, i32, i32
  }
  func.func @transform_19(%arg0: i32) -> (i32, i32, i32) {
    %c0_i32 = arith.constant 0 : i32
    %c0_i32_0 = arith.constant 0 : i32
    %c0_i32_1 = arith.constant 0 : i32
    %c0_i32_2 = arith.constant 0 : i32
    return %c0_i32, %c0_i32_0, %c0_i32_1 : i32, i32, i32
  }
  func.func @transform_20(%arg0: i32) -> (i32, i32) {
    %c0_i32 = arith.constant 0 : i32
    %c0_i32_0 = arith.constant 0 : i32
    %c0_i32_1 = arith.constant 0 : i32
    return %c0_i32, %c0_i32_0 : i32, i32
  }
  func.func @transform_21(%arg0: i32) -> (i32, i32) {
    %c0_i32 = arith.constant 0 : i32
    %c0_i32_0 = arith.constant 0 : i32
    %c0_i32_1 = arith.constant 0 : i32
    return %c0_i32, %c0_i32_0 : i32, i32
  }
  func.func @transform_22(%arg0: i32) -> (i32, i32) {
    %c0_i32 = arith.constant 0 : i32
    %c0_i32_0 = arith.constant 0 : i32
    %c0_i32_1 = arith.constant 0 : i32
    return %c0_i32, %c0_i32_0 : i32, i32
  }
  func.func @transform_23(%arg0: i32) -> (i32, i32) {
    %c0_i32 = arith.constant 0 : i32
    %c0_i32_0 = arith.constant 0 : i32
    %c0_i32_1 = arith.constant 0 : i32
    return %c0_i32, %c0_i32_0 : i32, i32
  }
  func.func @transform_24(%arg0: i32) -> (i32, i32) {
    %c0_i32 = arith.constant 0 : i32
    %c0_i32_0 = arith.constant 0 : i32
    %c0_i32_1 = arith.constant 0 : i32
    return %c0_i32, %c0_i32_0 : i32, i32
  }
  func.func @transform_25(%arg0: i32) -> (i32, i32) {
    %c0_i32 = arith.constant 0 : i32
    %c0_i32_0 = arith.constant 0 : i32
    %c0_i32_1 = arith.constant 0 : i32
    return %c0_i32, %c0_i32_0 : i32, i32
  }
  func.func @transform_26(%arg0: i32) -> (i32, i32) {
    %c0_i32 = arith.constant 0 : i32
    %c0_i32_0 = arith.constant 0 : i32
    %c0_i32_1 = arith.constant 0 : i32
    return %c0_i32, %c0_i32_0 : i32, i32
  }
  func.func @transform_27(%arg0: i32) -> (i32, i32) {
    %c0_i32 = arith.constant 0 : i32
    %c0_i32_0 = arith.constant 0 : i32
    %c0_i32_1 = arith.constant 0 : i32
    return %c0_i32, %c0_i32_0 : i32, i32
  }
  func.func @transform_28(%arg0: i32) -> (i32, i32) {
    %c0_i32 = arith.constant 0 : i32
    %c0_i32_0 = arith.constant 0 : i32
    %c0_i32_1 = arith.constant 0 : i32
    return %c0_i32, %c0_i32_0 : i32, i32
  }
  func.func @transform_29(%arg0: i32) -> (i32, i32, i32) {
    %c0_i32 = arith.constant 0 : i32
    %c0_i32_0 = arith.constant 0 : i32
    %c0_i32_1 = arith.constant 0 : i32
    return %arg0, %c0_i32, %c0_i32_0 : i32, i32, i32
  }
}

</mosaic_0001>

<bundles_post_ra>
// kernel: tpu_custom_call.1
= control target key start
LH: loop header
LB: loop body
LE: loop exit
PB: predicated region body
PF: predicated region fallthrough
CT: control target
= control target key end

     0   :  { %6 = vsyncpa [#allocation3], 0  ;;  %s127_s0 = inlined_call_operand.hbm [shape: f32[8,128], index: 0, kind: input, shape index: {}]   ;;  %s128_s1 = inlined_call_operand.hbm [shape: f32[8,128], index: 1, kind: output, shape index: {}]  }
   0x1   :  { %7 = vsyncpa [#allocation4], 0  ;;  %s91_s6 = smov [#allocation2]   ;;  %s43_s10 = scalar_lea.hbm %s127_s0, 128 }
   0x2   :  { %s14_s7 = sshll.u32 %s91_s6, 4  ;;  %p44_p0 = scmp.ne.s32.totalorder %s127_s0, %s43_s10  ;;  %s15_s7 = int_to_ptr.vmem [resolvable:$true] %s14_s7 }
   0x3   :  { %p47_p1 = scmp.lt.u32.totalorder %s43_s10, %s127_s0 }
   0x5   :  { %p49_p2 = pnand %p47_p1, %p44_p0 }
   0x7   :  { %52 = shalt.err (!%p49_p2)
}
   0x8   :  { %s53_s15 = scalar_lea.vmem %s15_s7, 128  ;;  %p58_p4 = scmp.lt.s32.totalorder %s15_s7, %s15_s7 }
   0x9   :  { %p54_p3 = scmp.ne.s32.totalorder %s15_s7, %s53_s15  ;;  %p59_p5 = scmp.lt.s32.totalorder %s53_s15, %s53_s15 }
   0xb   :  { %p60_p6 = por %p59_p5, %p58_p4 }
   0xd   :  { %p61_p7 = pnand %p60_p6, %p54_p3 }
   0xf   :  { %64 = shalt.err (!%p61_p7)
}
  0x10   :  { %17 = dma.hbm_to_vmem [thread:$0]  %s127_s0, 128, %s15_s7, [#allocation3]  }
  0x11   :  { %87 = dma.done.wait [#allocation3], 128  }
  0x12   :  { %88 = vsyncadd [#allocation3], 4294967168  ;;  %v21_v0 = vld [vmem:[#allocation2] sm:$0xff]  ;;  %s92_s18 = smov [#allocation5]  }
  0x13   :  { %41 = verf.f32 %v21_v0  ;;  %s30_s19 = sshll.u32 %s92_s18, 4  ;;  %s31_s19 = int_to_ptr.vmem [resolvable:$true] %s30_s19 }
  0x14   :  { %s65_s20 = scalar_lea.vmem %s31_s19, 128  ;;  %p70_p9 = scmp.lt.s32.totalorder %s31_s19, %s31_s19 }
  0x15   :  { %p66_p8 = scmp.ne.s32.totalorder %s31_s19, %s65_s20  ;;  %p71_p10 = scmp.lt.s32.totalorder %s65_s20, %s65_s20 }
  0x17   :  { %p72_p11 = por %p71_p10, %p70_p9 }
  0x19   :  { %p73_p12 = pnand %p72_p11, %p66_p8 }
  0x1d   :  { %v42_v1 = vpop.eup %41 }
  0x1e   :  { %23 = vst [vmem:[#allocation5] sm:$0xff] %v42_v1 }
  0x1f   :  { %76 = shalt.err (!%p73_p12)
}
  0x20   :  { %s77_s0 = scalar_lea.hbm %s128_s1, 128 }
  0x21   :  { %p78_p13 = scmp.ne.s32.totalorder %s128_s1, %s77_s0  ;;  %p81_p0 = scmp.lt.u32.totalorder %s77_s0, %s128_s1 }
  0x23   :  { %p83_p1 = pnand %p81_p0, %p78_p13 }
  0x25   :  { %86 = shalt.err (!%p83_p1)
}
  0x26   :  { %33 = dma.vmem_to_hbm [thread:$0]  %s31_s19, 128, %s128_s1, [#allocation4]  }
  0x27   :  { %89 = dma.done.wait [#allocation4], 128  }
  0x28   :  { %90 = vsyncadd [#allocation4], 4294967168 }
  0x29   :  { %37 = vsyncpa [#allocation3], 1 }
  0x2a   :  { %38 = vsyncpa [#allocation4], 1 }

// kernel: transformer_forward.1
= control target key start
LH: loop header
LB: loop body
LE: loop exit
PB: predicated region body
PF: predicated region fallthrough
CT: control target
= control target key end

     0   :  { %s13851_s6 = smov 1   ;;  %s13852_s10 = smov 2   ;;  %s16974_s0 = inlined_call_operand.smem [shape: u32[30], index: -1, kind: input, shape index: {}] }
   0x1   :  { %s13891_s5 = sld [smem:[%s16974_s0]]   ;;  %s13853_s14 = smov 3  }
   0x2   :  { %s13896_s9 = sld [smem:[%s16974_s0 + %s13851_s6]]   ;;  %s13854_s18 = smov 4  }
   0x3   :  { %s13901_s13 = sld [smem:[%s16974_s0 + %s13852_s10]]   ;;  %s13855_s22 = smov 5  }
   0x4   :  { %s13906_s17 = sld [smem:[%s16974_s0 + %s13853_s14]]   ;;  %s13856_s26 = smov 6  }
   0x5   :  { %s13911_s21 = sld [smem:[%s16974_s0 + %s13854_s18]]   ;;  %s13857_s30 = smov 7  }
   0x6   :  { %s13916_s25 = sld [smem:[%s16974_s0 + %s13855_s22]]   ;;  %s13858_s4 = smov 8  }
   0x7   :  { %s13921_s29 = sld [smem:[%s16974_s0 + %s13856_s26]]   ;;  %s13859_s10 = smov 9  }
   0x8   :  { %s13926_s3 = sld [smem:[%s16974_s0 + %s13857_s30]]   ;;  %s13860_s15 = smov 10  }
   0x9   :  { %s13931_s8 = sld [smem:[%s16974_s0 + %s13858_s4]]   ;;  %s13861_s20 = smov 11  }
   0xa   :  { %s13936_s14 = sld [smem:[%s16974_s0 + %s13859_s10]]   ;;  %s13862_s26 = smov 12  }
   0xb   :  { %s13941_s19 = sld [smem:[%s16974_s0 + %s13860_s15]]   ;;  %s13863_s1 = smov 13  }
   0xc   :  { %s13946_s24 = sld [smem:[%s16974_s0 + %s13861_s20]]   ;;  %s13864_s7 = smov 14  }
   0xd   :  { %s13951_s30 = sld [smem:[%s16974_s0 + %s13862_s26]]   ;;  %s13865_s15 = smov 15  }
   0xe   :  { %s13956_s6 = sld [smem:[%s16974_s0 + %s13863_s1]]   ;;  %s13866_s22 = smov 16  }
   0xf   :  { %s13961_s12 = sld [smem:[%s16974_s0 + %s13864_s7]]   ;;  %s13867_s28 = smov 17  }
  0x10   :  { %s13966_s20 = sld [smem:[%s16974_s0 + %s13865_s15]]   ;;  %s13868_s7 = smov 18  }
  0x11   :  { %s13971_s27 = sld [smem:[%s16974_s0 + %s13866_s22]]   ;;  %s13869_s15 = smov 19  }
  0x12   :  { %s13976_s4 = sld [smem:[%s16974_s0 + %s13867_s28]]   ;;  %s13870_s22 = smov 20  }
  0x13   :  { %s13871_s28 = smov 21  }
  0x15   :  { %16981 = sst [smem:[#allocation2_spill]] %s13961_s12 }
  0x16   :  { %16982 = sst [smem:[#allocation3_spill]] %s13966_s20 }
  0x17   :  { %16983 = sst [smem:[#allocation4_spill]] %s13971_s27 }
  0x18   :  { %16984 = sst [smem:[#allocation5_spill]] %s13976_s4 }
  0x19   :  { %s13981_s12 = sld [smem:[%s16974_s0 + %s13868_s7]]   ;;  %s13872_s7 = smov 22  }
  0x1a   :  { %s13986_s20 = sld [smem:[%s16974_s0 + %s13869_s15]]   ;;  %s13873_s15 = smov 23  }
  0x1b   :  { %s13991_s27 = sld [smem:[%s16974_s0 + %s13870_s22]]   ;;  %s13874_s22 = smov 24  }
  0x1c   :  { %s13996_s4 = sld [smem:[%s16974_s0 + %s13871_s28]]   ;;  %s13875_s28 = smov 25  }
  0x1f   :  { %16985 = sst [smem:[#allocation6_spill]] %s13981_s12 }
  0x20   :  { %16986 = sst [smem:[#allocation7_spill]] %s13986_s20 }
  0x21   :  { %16987 = sst [smem:[#allocation8_spill]] %s13991_s27 }
  0x22   :  { %16988 = sst [smem:[#allocation9_spill]] %s13996_s4 }
  0x23   :  { %s14001_s12 = sld [smem:[%s16974_s0 + %s13872_s7]]   ;;  %s13876_s7 = smov 26  }
  0x24   :  { %s14006_s20 = sld [smem:[%s16974_s0 + %s13873_s15]]   ;;  %s13877_s15 = smov 27  }
  0x25   :  { %s14011_s27 = sld [smem:[%s16974_s0 + %s13874_s22]]   ;;  %s13878_s22 = smov 28  }
  0x26   :  { %s14016_s4 = sld [smem:[%s16974_s0 + %s13875_s28]]   ;;  %s13879_s28 = smov 29  }
  0x29   :  { %16989 = sst [smem:[#allocation10_spill]] %s14001_s12 }
  0x2a   :  { %16990 = sst [smem:[#allocation11_spill]] %s14006_s20 }
  0x2b   :  { %16991 = sst [smem:[#allocation12_spill]] %s14011_s27 }
  0x2c   :  { %16992 = sst [smem:[#allocation13_spill]] %s14016_s4 }
  0x2d   :  { %s14021_s12 = sld [smem:[%s16974_s0 + %s13876_s7]]   ;;  %s14038_s7 = smov 0  }
  0x2e   :  { %s14026_s20 = sld [smem:[%s16974_s0 + %s13877_s15]]  }
  0x2f   :  { %s14031_s27 = sld [smem:[%s16974_s0 + %s13878_s22]]  }
  0x30   :  { %s14036_s4 = sld [smem:[%s16974_s0 + %s13879_s28]]  }
  0x31 LB: > { %s8934_s10 = sadd.s32 4294967295, %s13849_s7   ;;  %p8938_p0 = scmp.ge.s32.totalorder %s13849_s7, 1  ;;  %s13849_s7 = sphi %s14038_s7, %s69_s7  }
  0x32   : > { %p817_p1 = scmp.lt.s32.totalorder %s13849_s7, 3 }
  0x34   : > { %p818_p2 = pnand %p8938_p0, %p817_p1 }
  0x35   : > { %p893_p3 = scmp.lt.s32.totalorder (!%p818_p2), %s8934_s10, 1  ;;  %v1040_v7 = vld [vmem:[%s13906_s17] sm:$0xff] (!%p818_p2)  ;;  %v1041_v8 = vld [vmem:[%s13906_s17 + $0x8] sm:$0xff] (!%p818_p2)  ;;  %v13880_v10 = vmov (!%p818_p2), 0.0|0.0   ;;  %v1042_v13 = vld [vmem:[%s13906_s17 + $0x10] sm:$0xff] (!%p818_p2)  ;;  %v910_v26 = vlaneseq (!%p818_p2)  ;;  %vm13881_vm1 = vmmov (!%p818_p2), 0  }
  0x36   : > { %821 = sbr.rel (%p818_p2) target bundleno = 10588 (0x295c), region = 136  ;;  %v1156_v9 = vld [vmem:[%s13911_s21] sm:$0xff] (!%p818_p2)  ;;  %12633 = vmatprep.subr.bf16.mxu0 (!%p818_p2), %v13880_v10  ;;  %v12634_v11 = vpack.c.bf16 (!%p818_p2), %v1041_v8, %v1040_v7  ;;  %12657 = vmatprep.subr.bf16.mxu1 (!%p818_p2), %v13880_v10  ;;  %v1157_v12 = vld [vmem:[%s13911_s21 + $0x8] sm:$0xff] (!%p818_p2)  ;;  %v1043_v14 = vld [vmem:[%s13906_s17 + $0x18] sm:$0xff] (!%p818_p2)  ;;  %vm1388_vm2 = vcmask (!%p818_p2), 130048   ;;  %vm1545_vm5 = vcmask (!%p818_p2), 457728  }
  0x37   : > { %v12658_v15 = vpack.c.bf16 (!%p818_p2), %v1157_v12, %v1156_v9  ;;  %v1158_v16 = vld [vmem:[%s13911_s21 + $0x10] sm:$0xff] (!%p818_p2)  ;;  %v1159_v17 = vld [vmem:[%s13911_s21 + $0x18] sm:$0xff] (!%p818_p2)  ;;  %v12637_v18 = vpack.c.bf16 (!%p818_p2), %v1043_v14, %v1042_v13  ;;  %v1044_v20 = vld [vmem:[%s13906_s17 + $0x20] sm:$0xff] (!%p818_p2)  ;;  %v14097_v27 = vand.u32 (!%p818_p2), 127, %v910_v26  ;;  %vm4702_vm12 = vcmask (!%p818_p2), 523264   ;;  %s17009_s15 = sld [smem:[#allocation4_spill]] (!%p818_p2) }
  0x38   : > { %12635 = vmatpush3.bf16.msra.mxu0 (!%p818_p2), %v12634_v11  ;;  %v12661_v19 = vpack.c.bf16 (!%p818_p2), %v1159_v17, %v1158_v16  ;;  %v1045_v21 = vld [vmem:[%s13906_s17 + $0x28] sm:$0xff] (!%p818_p2)  ;;  %v1160_v22 = vld [vmem:[%s13911_s21 + $0x20] sm:$0xff] (!%p818_p2)  ;;  %v1046_v63 = vld [vmem:[%s13906_s17 + $0x30] sm:$0xff] (!%p818_p2)  ;;  %s17010_s16 = sld [smem:[#allocation5_spill]] (!%p818_p2)  ;;  %s17011_s18 = sld [smem:[#allocation2_spill]] (!%p818_p2) }
  0x39   : > { %12659 = vmatpush3.bf16.msra.mxu1 (!%p818_p2), %v12658_v15  ;;  %12636 = vmatprep.subr.bf16.mxu0 (!%p818_p2), %v13880_v10  ;;  %v1161_v23 = vld [vmem:[%s13911_s21 + $0x28] sm:$0xff] (!%p818_p2)  ;;  %v12640_v24 = vpack.c.bf16 (!%p818_p2), %v1045_v21, %v1044_v20  ;;  %vm912_vm0 = vcmp.lt.s32.totalorder (!%p818_p2), %v14097_v27, 34  ;;  %v1164_v8 = vld [vmem:[%s13911_s21 + $0x40] sm:$0xff] (!%p818_p2)  ;;  %v1050_v12 = vld [vmem:[%s13906_s17 + $0x50] sm:$0xff] (!%p818_p2)  ;;  %s17012_s22 = sld [smem:[#allocation6_spill]] (!%p818_p2)  ;;  %s17013_s23 = sld [smem:[#allocation3_spill]] (!%p818_p2) }
  0x3a   : > { %12660 = vmatprep.subr.bf16.mxu1 (!%p818_p2), %v13880_v10  ;;  %v12664_v25 = vpack.c.bf16 (!%p818_p2), %v1161_v23, %v1160_v22  ;;  %v1165_v9 = vld [vmem:[%s13911_s21 + $0x48] sm:$0xff] (!%p818_p2)  ;;  %v1051_v13 = vld [vmem:[%s13906_s17 + $0x58] sm:$0xff] (!%p818_p2)  ;;  %v1166_v15 = vld [vmem:[%s13911_s21 + $0x50] sm:$0xff] (!%p818_p2)  ;;  %s17014_s26 = sld [smem:[#allocation7_spill]] (!%p818_p2)  ;;  %s17015_s28 = sld [smem:[#allocation8_spill]] (!%p818_p2) }
  0x3b   : > { %v12670_v11 = vpack.c.bf16 (!%p818_p2), %v1165_v9, %v1164_v8  ;;  %v12649_v14 = vpack.c.bf16 (!%p818_p2), %v1051_v13, %v1050_v12  ;;  %v1167_v16 = vld [vmem:[%s13911_s21 + $0x58] sm:$0xff] (!%p818_p2)  ;;  %v1168_v21 = vld [vmem:[%s13911_s21 + $0x60] sm:$0xff] (!%p818_p2)  ;;  %v1169_v22 = vld [vmem:[%s13911_s21 + $0x68] sm:$0xff] (!%p818_p2)  ;;  %s17016_s1 = sld [smem:[#allocation11_spill]] (!%p818_p2)  ;;  %s17017_s2 = sld [smem:[#allocation9_spill]] (!%p818_p2) }
  0x3c   : > { %12638 = vmatpush3.bf16.msra.mxu0 (!%p818_p2), %v12637_v18  ;;  %v12673_v17 = vpack.c.bf16 (!%p818_p2), %v1167_v16, %v1166_v15  ;;  %v1052_v18 = vld [vmem:[%s13906_s17 + $0x60] sm:$0xff] (!%p818_p2)  ;;  %v12676_v23 = vpack.c.bf16 (!%p818_p2), %v1169_v22, %v1168_v21  ;;  %v1274_v9 = vld [vmem:[%s13916_s25 + $0x10] sm:$0xff] (!%p818_p2)  ;;  %vm14401_vm3 = vmpackc.low (!%p818_p2), %vm1388_vm2, %vm1388_vm2 }
  0x3d   : > { %s17022_s10 = smov (!%p893_p3, %s8934_s10), 1  ;;  %12662 = vmatpush3.bf16.msra.mxu1 %v12661_v19  ;;  %12639 = vmatprep.subr.bf16.mxu0 %v13880_v10  ;;  %v1053_v19 = vld [vmem:[%s13906_s17 + $0x68] sm:$0xff]  ;;  %v1276_v16 = vld [vmem:[%s13916_s25 + $0x20] sm:$0xff] }
  0x3e   : > { %s13473_s0 = smul.u32 56, %s17022_s10  ;;  %12663 = vmatprep.subr.bf16.mxu1 %v13880_v10  ;;  %v12652_v20 = vpack.c.bf16 %v1053_v19, %v1052_v18 }
  0x40   : > { %s14052_s11 = scalar_lea.vmem %s13891_s5, %s13473_s0  ;;  %12641 = vmatpush3.bf16.msra.mxu0 %v12640_v24  ;;  %v1054_v24 = vld [vmem:[%s13906_s17 + $0x70] sm:$0xff] }
  0x41   : > { %v903_v0 = vld [vmem:[%s14052_s11] sm:$0xff]  ;;  %v905_v1 = vld [vmem:[%s14052_s11 + $0x10] sm:$0xff]  ;;  %v14057_v2 = vld [vmem:[%s14052_s11 + $0x8] sm:$0xff]  ;;  %12665 = vmatpush3.bf16.msra.mxu1 %v12664_v25  ;;  %12642 = vmatprep.subr.bf16.mxu0 %v13880_v10 }
  0x42   : > { %930 = vadd.xlane.f32.xlu0 %v903_v0  ;;  %934 = vadd.xlane.f32.xlu1 %v905_v1  ;;  %v14060_v3 = vld [vmem:[%s14052_s11 + $0x18] sm:$0xff]  ;;  %v14065_v4 = vld [vmem:[%s14052_s11 + $0x20] sm:$0xff]  ;;  %v14068_v5 = vld [vmem:[%s14052_s11 + $0x28] sm:$0xff] }
  0x43   : > { %v14073_v6 = vld [vmem:[%s14052_s11 + $0x30] sm:$0xff]  ;;  %12666 = vmatprep.subr.bf16.mxu1 %v13880_v10  ;;  %v1055_v25 = vld [vmem:[%s13906_s17 + $0x78] sm:$0xff] }
  0x46   : > { %932 = vadd.xlane.f32.xlu0 %v14057_v2  ;;  %936 = vadd.xlane.f32.xlu1 %v14060_v3 }
  0x4a   : > { %938 = vadd.xlane.f32.xlu0 %v14065_v4  ;;  %940 = vadd.xlane.f32.xlu1 %v14068_v5 }
  0x4e   : > { %942 = vadd.xlane.f32.xlu0 %v14073_v6 }
  0xcf   : > { %v931_v28 = vpop.xlane.xlu0 %930  ;;  %v935_v29 = vpop.xlane.xlu1 %934 }
  0xd0   : > { %v944_v30 = vmul.f32 0.029411765, %v931_v28  ;;  %v946_v31 = vmul.f32 0.029411765, %v935_v29  ;;  %v12655_v28 = vpack.c.bf16 %v1055_v25, %v1054_v24  ;;  %v1170_v29 = vld [vmem:[%s13911_s21 + $0x70] sm:$0xff] }
  0xd2   : > { %v951_v32 = vsub.f32 %v903_v0, %v944_v30  ;;  %v953_v33 = vsub.f32 %v905_v1, %v946_v31  ;;  %v1047_v0 = vld [vmem:[%s13906_s17 + $0x38] sm:$0xff] }
  0xd3   : > { %v933_v34 = vpop.xlane.xlu0 %932  ;;  %v937_v35 = vpop.xlane.xlu1 %936  ;;  %v12643_v1 = vpack.c.bf16 %v1047_v0, %v1046_v63  ;;  %v1171_v30 = vld [vmem:[%s13911_s21 + $0x78] sm:$0xff]  ;;  %v1272_v63 = vld [vmem:[%s13916_s25] sm:$0xff]  ;;  %v1273_v0 = vld [vmem:[%s13916_s25 + $0x8] sm:$0xff] }
  0xd4   : > { %v945_v36 = vmul.f32 0.029411765, %v933_v34  ;;  %v947_v37 = vmul.f32 0.029411765, %v937_v35  ;;  %v14102_v38 = vsel %vm912_vm0, %v951_v32, 0.0  ;;  %v14106_v39 = vsel %vm912_vm0, %v953_v33, 0.0 }
  0xd5   : > { %v965_v40 = vmul.f32 %v14102_v38, %v14102_v38  ;;  %v967_v45 = vmul.f32 %v14106_v39, %v14106_v39  ;;  %12644 = vmatpush3.bf16.msra.mxu0 %v12643_v1  ;;  %v12679_v31 = vpack.c.bf16 %v1171_v30, %v1170_v29  ;;  %v13882_v32 = vmov 0.0   ;;  %v14188_v1 = vld [vmem:[%s13901_s13] ss:$0 sm:$0xff] }
  0xd6   : > { %v952_v41 = vsub.f32 %v14057_v2, %v945_v36  ;;  %v954_v42 = vsub.f32 %v14060_v3, %v947_v37  ;;  %v1162_v2 = vld [vmem:[%s13911_s21 + $0x30] sm:$0xff]  ;;  %v1163_v3 = vld [vmem:[%s13911_s21 + $0x38] sm:$0xff]  ;;  %12645 = vmatprep.subr.bf16.mxu0 %v13880_v10  ;;  %10453 = vmatprep.mubr.msk.f32.mxu0 %vm13881_vm1, %v13882_v32  ;;  %v1280_v30 = vld [vmem:[%s13916_s25 + $0x40] sm:$0xff] }
  0xd7   : > { %972 = vadd.xlane.f32.xlu1 %v965_v40  ;;  %v939_v43 = vpop.xlane.xlu0 %938  ;;  %v941_v44 = vpop.xlane.xlu1 %940  ;;  %10506 = vmatprep.mubr.msk.f32.mxu1 %vm13881_vm1, %v13882_v32 }
  0xd8   : > { %v948_v46 = vmul.f32 0.029411765, %v939_v43  ;;  %v949_v47 = vmul.f32 0.029411765, %v941_v44  ;;  %v14116_v48 = vsel %vm912_vm0, %v952_v41, 0.0  ;;  %v14120_v49 = vsel %vm912_vm0, %v954_v42, 0.0 }
  0xd9   : > { %v966_v50 = vmul.f32 %v14116_v48, %v14116_v48  ;;  %v968_v54 = vmul.f32 %v14120_v49, %v14120_v49 }
  0xda   : > { %v955_v51 = vsub.f32 %v14065_v4, %v948_v46  ;;  %v956_v52 = vsub.f32 %v14068_v5, %v949_v47  ;;  %v12667_v4 = vpack.c.bf16 %v1163_v3, %v1162_v2  ;;  %v1048_v5 = vld [vmem:[%s13906_s17 + $0x40] sm:$0xff] }
  0xdb   : > { %976 = vadd.xlane.f32.xlu1 %v967_v45  ;;  %974 = vadd.xlane.f32.xlu0 %v966_v50  ;;  %v943_v53 = vpop.xlane.xlu0 %942 }
  0xdc   : > { %v950_v55 = vmul.f32 0.029411765, %v943_v53  ;;  %v14130_v56 = vsel %vm912_vm0, %v955_v51, 0.0  ;;  %v14134_v57 = vsel %vm912_vm0, %v956_v52, 0.0  ;;  %12668 = vmatpush3.bf16.msra.mxu1 %v12667_v4  ;;  %v12682_v4 = vpack.c.bf16 %v1273_v0, %v1272_v63  ;;  %v8970_v0 = vld [vmem:[%s13906_s17 + $0xb0] sm:$0xff] }
  0xdd   : > { %v969_v58 = vmul.f32 %v14130_v56, %v14130_v56  ;;  %v970_v60 = vmul.f32 %v14134_v57, %v14134_v57  ;;  %12669 = vmatprep.subr.bf16.mxu1 %v13880_v10 }
  0xde   : > { %v957_v59 = vsub.f32 %v14073_v6, %v950_v55  ;;  %v1049_v6 = vld [vmem:[%s13906_s17 + $0x48] sm:$0xff] }
  0xdf   : > { %978 = vadd.xlane.f32.xlu0 %v968_v54  ;;  %980 = vadd.xlane.f32.xlu1 %v969_v58  ;;  %v12646_v7 = vpack.c.bf16 %v1049_v6, %v1048_v5  ;;  %v14182_v58 = vld [vmem:[%s13896_s9] ss:$0 sm:$0xff] }
  0xe0   : > { %v14143_v61 = vsel %vm912_vm0, %v957_v59, 0.0  ;;  %12671 = vmatpush3.bf16.msra.mxu1 %v12670_v11  ;;  %v1275_v11 = vld [vmem:[%s13916_s25 + $0x18] sm:$0xff] }
  0xe1   : > { %v971_v62 = vmul.f32 %v14143_v61, %v14143_v61  ;;  %12647 = vmatpush3.bf16.msra.mxu0 %v12646_v7  ;;  %12672 = vmatprep.subr.bf16.mxu1 %v13880_v10 }
  0xe2   : > { %12648 = vmatprep.subr.bf16.mxu0 %v13880_v10 }
  0xe3   : > { %982 = vadd.xlane.f32.xlu0 %v970_v60  ;;  %984 = vadd.xlane.f32.xlu1 %v971_v62 }
  0xe4   : > { %12674 = vmatpush3.bf16.msra.mxu1 %v12673_v17  ;;  %v1277_v17 = vld [vmem:[%s13916_s25 + $0x28] sm:$0xff] }
  0xe5   : > { %12650 = vmatpush3.bf16.msra.mxu0 %v12649_v14  ;;  %12675 = vmatprep.subr.bf16.mxu1 %v13880_v10  ;;  %v12688_v19 = vpack.c.bf16 %v1277_v17, %v1276_v16  ;;  %v8997_v16 = vld [vmem:[%s13916_s25 + $0x88] sm:$0xff] }
  0xe6   : > { %12651 = vmatprep.subr.bf16.mxu0 %v13880_v10 }
  0xe8   : > { %12677 = vmatpush3.bf16.msra.mxu1 %v12676_v23  ;;  %v1279_v23 = vld [vmem:[%s13916_s25 + $0x38] sm:$0xff] }
  0xe9   : > { %12653 = vmatpush3.bf16.msra.mxu0 %v12652_v20  ;;  %12678 = vmatprep.subr.bf16.mxu1 %v13880_v10 }
  0xea   : > { %12654 = vmatprep.subr.bf16.mxu0 %v13880_v10 }
  0xec   : > { %12680 = vmatpush3.bf16.msra.mxu1 %v12679_v31  ;;  %v1281_v31 = vld [vmem:[%s13916_s25 + $0x48] sm:$0xff] }
  0xed   : > { %12656 = vmatpush3.bf16.msra.mxu0 %v12655_v28  ;;  %12705 = vmatprep.subr.bf16.mxu1 %v13880_v10 }
  0xee   : > { %12681 = vmatprep.subr.bf16.mxu0 %v13880_v10 }
 0x164   : > { %v973_v33 = vpop.xlane.xlu1 %972 }
 0x165   : > { %v986_v34 = vmul.f32 0.029411765, %v973_v33 }
 0x167   : > { %v993_v35 = vadd.f32 1e-05, %v986_v34  ;;  %v12694_v34 = vpack.c.bf16 %v1281_v31, %v1280_v30  ;;  %v9005_v30 = vld [vmem:[%s13916_s25 + $0xc8] sm:$0xff] }
 0x168   : > { %v977_v36 = vpop.xlane.xlu1 %976  ;;  %v975_v37 = vpop.xlane.xlu0 %974 }
 0x169   : > { %13514 = vrsqrt.f32 %v993_v35  ;;  %v988_v40 = vmul.f32 0.029411765, %v977_v36  ;;  %v987_v41 = vmul.f32 0.029411765, %v975_v37  ;;  %v1282_v37 = vld [vmem:[%s13916_s25 + $0x50] sm:$0xff] }
 0x16b   : > { %v995_v42 = vadd.f32 1e-05, %v988_v40  ;;  %v994_v43 = vadd.f32 1e-05, %v987_v41  ;;  %v1283_v40 = vld [vmem:[%s13916_s25 + $0x58] sm:$0xff] }
 0x16c   : > { %v981_v44 = vpop.xlane.xlu1 %980  ;;  %v979_v45 = vpop.xlane.xlu0 %978 }
 0x16d   : > { %13516 = vrsqrt.f32 %v995_v42  ;;  %v990_v46 = vmul.f32 0.029411765, %v981_v44  ;;  %v989_v47 = vmul.f32 0.029411765, %v979_v45  ;;  %v1285_v44 = vld [vmem:[%s13916_s25 + $0x68] sm:$0xff] }
 0x16e   : > { %13518 = vrsqrt.f32 %v994_v43  ;;  %v1284_v43 = vld [vmem:[%s13916_s25 + $0x60] sm:$0xff] }
 0x16f   : > { %v996_v50 = vadd.f32 1e-05, %v989_v47  ;;  %v997_v51 = vadd.f32 1e-05, %v990_v46  ;;  %v12700_v45 = vpack.c.bf16 %v1285_v44, %v1284_v43  ;;  %v1286_v47 = vld [vmem:[%s13916_s25 + $0x70] sm:$0xff] }
 0x170   : > { %v983_v52 = vpop.xlane.xlu0 %982  ;;  %v985_v53 = vpop.xlane.xlu1 %984 }
 0x171   : > { %v991_v54 = vmul.f32 0.029411765, %v983_v52  ;;  %13520 = vrsqrt.f32 %v996_v50  ;;  %v992_v60 = vmul.f32 0.029411765, %v985_v53  ;;  %v1287_v50 = vld [vmem:[%s13916_s25 + $0x78] sm:$0xff]  ;;  %v8964_v52 = vld [vmem:[%s13906_s17 + $0x80] sm:$0xff] }
 0x172   : > { %13522 = vrsqrt.f32 %v997_v51  ;;  %v12703_v51 = vpack.c.bf16 %v1287_v50, %v1286_v47  ;;  %v8965_v53 = vld [vmem:[%s13906_s17 + $0x88] sm:$0xff] }
 0x173   : > { %v13515_v55 = vpop.eup %13514  ;;  %v998_v62 = vadd.f32 1e-05, %v991_v54  ;;  %v999_v7 = vadd.f32 1e-05, %v992_v60  ;;  %v12727_v54 = vpack.c.bf16 %v8965_v53, %v8964_v52  ;;  %v8968_v60 = vld [vmem:[%s13906_s17 + $0xa0] sm:$0xff] }
 0x174   : > { %v1007_v59 = vmul.f32 %v13515_v55, %v14102_v38  ;;  %v8966_v55 = vld [vmem:[%s13906_s17 + $0x90] sm:$0xff] }
 0x175   : > { %13524 = vrsqrt.f32 %v998_v62  ;;  %v8969_v62 = vld [vmem:[%s13906_s17 + $0xa8] sm:$0xff] }
 0x176   : > { %v1020_v2 = vmul.f32 %v14182_v58, %v1007_v59  ;;  %13526 = vrsqrt.f32 %v999_v7  ;;  %v12733_v63 = vpack.c.bf16 %v8969_v62, %v8968_v60  ;;  %v8974_v7 = vld [vmem:[%s13906_s17 + $0xd0] sm:$0xff] }
 0x177   : > { %v13517_v3 = vpop.eup %13516 }
 0x178   : > { %v13519_v5 = vpop.eup %13518  ;;  %v14192_v6 = vadd.f32 %v14188_v1, %v1020_v2  ;;  %v1009_v38 = vmul.f32 %v13517_v3, %v14106_v39  ;;  %v12685_v39 = vpack.c.bf16 %v1275_v11, %v1274_v9  ;;  %v8972_v3 = vld [vmem:[%s13906_s17 + $0xc0] sm:$0xff]  ;;  %v8977_v11 = vld [vmem:[%s13906_s17 + $0xe8] sm:$0xff] }
 0x179   : > { %v1008_v8 = vmul.f32 %v13519_v5, %v14116_v48  ;;  %v8976_v9 = vld [vmem:[%s13906_s17 + $0xe0] sm:$0xff] }
 0x17a   : > { %10454 = vmatmul.mubr.f32.vlgmr.msra.gmra.mrb[0].mxu0 %v14192_v6  ;;  %10507 = vmatmul.mubr.f32.vlgmr.msra.gmra.mrb[0].mxu1 %v14192_v6  ;;  %v1022_v48 = vmul.f32 %v14182_v58, %v1009_v38  ;;  %v8975_v38 = vld [vmem:[%s13906_s17 + $0xd8] sm:$0xff] }
 0x17b   : > { %v1021_v12 = vmul.f32 %v14182_v58, %v1008_v8  ;;  %12683 = vmatpush3.bf16.msra.mxu0 %v12682_v4  ;;  %10456 = vmatprep.mubr.msk.f32.mxu0 %vm13881_vm1, %v13882_v32  ;;  %v13521_v13 = vpop.eup %13520  ;;  %v8973_v4 = vld [vmem:[%s13906_s17 + $0xc8] sm:$0xff]  ;;  %v12742_v8 = vpack.c.bf16 %v8975_v38, %v8974_v7 }
 0x17c   : > { %10509 = vmatprep.mubr.msk.f32.mxu1 %vm13881_vm1, %v13882_v32  ;;  %12684 = vmatprep.subr.bf16.mxu0 %v13880_v10  ;;  %v1010_v15 = vmul.f32 %v13521_v13, %v14120_v49  ;;  %v13523_v18 = vpop.eup %13522  ;;  %v14218_v20 = vadd.f32 %v14188_v1, %v1022_v48  ;;  %v1278_v49 = vld [vmem:[%s13916_s25 + $0x30] sm:$0xff]  ;;  %v12739_v5 = vpack.c.bf16 %v8973_v4, %v8972_v3 }
 0x17d   : > { %v14208_v14 = vadd.f32 %v14188_v1, %v1021_v12  ;;  %v1011_v21 = vmul.f32 %v13523_v18, %v14130_v56  ;;  %v12691_v56 = vpack.c.bf16 %v1279_v23, %v1278_v49  ;;  %v12745_v12 = vpack.c.bf16 %v8977_v11, %v8976_v9  ;;  %v8978_v13 = vld [vmem:[%s13906_s17 + $0xf0] sm:$0xff]  ;;  %v9001_v49 = vld [vmem:[%s13916_s25 + $0xa8] sm:$0xff] }
 0x17e   : > { %v1023_v22 = vmul.f32 %v14182_v58, %v1010_v15  ;;  %v8996_v15 = vld [vmem:[%s13916_s25 + $0x80] sm:$0xff]  ;;  %v8998_v18 = vld [vmem:[%s13916_s25 + $0x90] sm:$0xff] }
 0x17f   : > { %10457 = vmatmul.mubr.f32.gmra.mrb[2].mxu0 %v14208_v14  ;;  %10510 = vmatmul.mubr.f32.gmra.mrb[2].mxu1 %v14208_v14  ;;  %v13525_v24 = vpop.eup %13524  ;;  %v1024_v25 = vmul.f32 %v14182_v58, %v1011_v21  ;;  %v12775_v17 = vpack.c.bf16 %v8997_v16, %v8996_v15 }
 0x180   : > { %12686 = vmatpush3.bf16.msra.mxu0 %v12685_v39  ;;  %10459 = vmatprep.mubr.msk.f32.mxu0 %vm13881_vm1, %v13882_v32  ;;  %v14233_v28 = vadd.f32 %v14188_v1, %v1023_v22  ;;  %v1012_v29 = vmul.f32 %v13525_v24, %v14134_v57  ;;  %v13527_v33 = vpop.eup %13526  ;;  %v8979_v39 = vld [vmem:[%s13906_s17 + $0xf8] sm:$0xff]  ;;  %v9000_v22 = vld [vmem:[%s13916_s25 + $0xa0] sm:$0xff]  ;;  %v9002_v24 = vld [vmem:[%s13916_s25 + $0xb0] sm:$0xff] }
 0x181   : > { %10512 = vmatprep.mubr.msk.f32.mxu1 %vm13881_vm1, %v13882_v32  ;;  %12687 = vmatprep.subr.bf16.mxu0 %v13880_v10  ;;  %v14246_v57 = vadd.f32 %v14188_v1, %v1024_v25  ;;  %v1013_v35 = vmul.f32 %v13527_v33, %v14143_v61  ;;  %v12697_v61 = vpack.c.bf16 %v1283_v40, %v1282_v37  ;;  %v9006_v33 = vld [vmem:[%s13916_s25 + $0xd0] sm:$0xff]  ;;  %v9009_v37 = vld [vmem:[%s13916_s25 + $0xe8] sm:$0xff] }
 0x182   : > { %v1025_v36 = vmul.f32 %v14182_v58, %v1012_v29  ;;  %v12748_v48 = vpack.c.bf16 %v8979_v39, %v8978_v13  ;;  %v12781_v23 = vpack.c.bf16 %v9001_v49, %v9000_v22  ;;  %v9004_v29 = vld [vmem:[%s13916_s25 + $0xc0] sm:$0xff] }
 0x183   : > { %10460 = vmatmul.mubr.f32.gmra.mrb[4].mxu0 %v14218_v20  ;;  %10513 = vmatmul.mubr.f32.gmra.mrb[4].mxu1 %v14218_v20  ;;  %v1026_v41 = vmul.f32 %v14182_v58, %v1013_v35  ;;  %v8967_v58 = vld [vmem:[%s13906_s17 + $0x98] sm:$0xff]  ;;  %v12787_v31 = vpack.c.bf16 %v9005_v30, %v9004_v29 }
 0x184   : > { %12689 = vmatpush3.bf16.msra.mxu0 %v12688_v19  ;;  %10462 = vmatprep.mubr.msk.f32.mxu0 %vm13881_vm1, %v13882_v32  ;;  %v14261_v42 = vadd.f32 %v14188_v1, %v1025_v36  ;;  %v12730_v59 = vpack.c.bf16 %v8967_v58, %v8966_v55  ;;  %v8999_v19 = vld [vmem:[%s13916_s25 + $0x98] sm:$0xff]  ;;  %v9008_v36 = vld [vmem:[%s13916_s25 + $0xe0] sm:$0xff] }
 0x185   : > { %10515 = vmatprep.mubr.msk.f32.mxu1 %vm13881_vm1, %v13882_v32  ;;  %12690 = vmatprep.subr.bf16.mxu0 %v13880_v10  ;;  %v14273_v46 = vadd.f32 %v14188_v1, %v1026_v41  ;;  %v8971_v1 = vld [vmem:[%s13906_s17 + $0xb8] sm:$0xff]  ;;  %v12778_v21 = vpack.c.bf16 %v8999_v19, %v8998_v18  ;;  %v12793_v40 = vpack.c.bf16 %v9009_v37, %v9008_v36 }
 0x186   : > { %v12736_v2 = vpack.c.bf16 %v8971_v1, %v8970_v0  ;;  %v9011_v41 = vld [vmem:[%s13916_s25 + $0xf8] sm:$0xff] }
 0x187   : > { %10463 = vmatmul.mubr.f32.gmra.mrb[6].mxu0 %v14233_v28  ;;  %10516 = vmatmul.mubr.f32.gmra.mrb[6].mxu1 %v14233_v28 }
 0x188   : > { %12692 = vmatpush3.bf16.msra.mxu0 %v12691_v56  ;;  %10465 = vmatprep.mubr.msk.f32.mxu0 %vm13881_vm1, %v13882_v32  ;;  %v9003_v56 = vld [vmem:[%s13916_s25 + $0xb8] sm:$0xff] }
 0x189   : > { %10518 = vmatprep.mubr.msk.f32.mxu1 %vm13881_vm1, %v13882_v32  ;;  %12693 = vmatprep.subr.bf16.mxu0 %v13880_v10  ;;  %v12784_v25 = vpack.c.bf16 %v9003_v56, %v9002_v24 }
 0x18b   : > { %10466 = vmatmul.mubr.f32.gmra.mrb[8].mxu0 %v14246_v57  ;;  %10519 = vmatmul.mubr.f32.gmra.mrb[8].mxu1 %v14246_v57 }
 0x18c   : > { %12695 = vmatpush3.bf16.msra.mxu0 %v12694_v34  ;;  %10468 = vmatprep.mubr.msk.f32.mxu0 %vm13881_vm1, %v13882_v32  ;;  %v9007_v34 = vld [vmem:[%s13916_s25 + $0xd8] sm:$0xff] }
 0x18d   : > { %10521 = vmatprep.mubr.msk.f32.mxu1 %vm13881_vm1, %v13882_v32  ;;  %12696 = vmatprep.subr.bf16.mxu0 %v13880_v10  ;;  %v12790_v35 = vpack.c.bf16 %v9007_v34, %v9006_v33 }
 0x18f   : > { %10469 = vmatmul.mubr.f32.gmra.mrb[10].mxu0 %v14261_v42  ;;  %10522 = vmatmul.mubr.f32.gmra.mrb[10].mxu1 %v14261_v42 }
 0x190   : > { %12698 = vmatpush3.bf16.msra.mxu0 %v12697_v61  ;;  %10471 = vmatprep.mubr.msk.f32.mxu0 %vm13881_vm1, %v13882_v32  ;;  %v9010_v61 = vld [vmem:[%s13916_s25 + $0xf0] sm:$0xff] }
 0x191   : > { %10524 = vmatprep.mubr.msk.f32.mxu1 %vm13881_vm1, %v13882_v32  ;;  %12699 = vmatprep.subr.bf16.mxu0 %v13880_v10  ;;  %v12796_v43 = vpack.c.bf16 %v9011_v41, %v9010_v61 }
 0x193   : > { %10472 = vmatmul.mubr.f32.gmra.mrb[12].mxu0 %v14273_v46  ;;  %10525 = vmatmul.mubr.f32.gmra.mrb[12].mxu1 %v14273_v46 }
 0x194   : > { %12701 = vmatpush3.bf16.msra.mxu0 %v12700_v45  ;;  %10559 = vmatprep.mubr.msk.f32.mxu0 %vm13881_vm1, %v13882_v32 }
 0x195   : > { %12702 = vmatprep.subr.bf16.mxu0 %v13880_v10  ;;  %10594 = vmatprep.mubr.msk.f32.mxu1 %vm13881_vm1, %v13882_v32 }
 0x198   : > { %12704 = vmatpush3.bf16.msra.mxu0 %v12703_v51 }
 0x199   : > { %12726 = vmatprep.subr.bf16.mxu0 %v13880_v10 }
 0x19b   : > { %10560 = vmatmul.mubr.f32.vlgmr.msra.gmra.mrb[14].mxu0 %v14192_v6 }
 0x19c   : > { %12728 = vmatpush3.bf16.msra.mxu0 %v12727_v54  ;;  %10562 = vmatprep.mubr.msk.f32.mxu0 %vm13881_vm1, %v13882_v32 }
 0x19d   : > { %12729 = vmatprep.subr.bf16.mxu0 %v13880_v10 }
 0x19f   : > { %10563 = vmatmul.mubr.f32.gmra.mrb[16].mxu0 %v14208_v14 }
 0x1a0   : > { %12731 = vmatpush3.bf16.msra.mxu0 %v12730_v59  ;;  %10565 = vmatprep.mubr.msk.f32.mxu0 %vm13881_vm1, %v13882_v32 }
 0x1a1   : > { %12732 = vmatprep.subr.bf16.mxu0 %v13880_v10 }
 0x1a3   : > { %10566 = vmatmul.mubr.f32.gmra.mrb[18].mxu0 %v14218_v20 }
 0x1a4   : > { %12734 = vmatpush3.bf16.msra.mxu0 %v12733_v63  ;;  %10568 = vmatprep.mubr.msk.f32.mxu0 %vm13881_vm1, %v13882_v32 }
 0x1a5   : > { %12735 = vmatprep.subr.bf16.mxu0 %v13880_v10 }
 0x1a7   : > { %10569 = vmatmul.mubr.f32.gmra.mrb[20].mxu0 %v14233_v28 }
 0x1a8   : > { %12737 = vmatpush3.bf16.msra.mxu0 %v12736_v2  ;;  %10571 = vmatprep.mubr.msk.f32.mxu0 %vm13881_vm1, %v13882_v32 }
 0x1a9   : > { %12738 = vmatprep.subr.bf16.mxu0 %v13880_v10 }
 0x1ab   : > { %10572 = vmatmul.mubr.f32.gmra.mrb[22].mxu0 %v14246_v57 }
 0x1ac   : > { %12740 = vmatpush3.bf16.msra.mxu0 %v12739_v5  ;;  %10574 = vmatprep.mubr.msk.f32.mxu0 %vm13881_vm1, %v13882_v32 }
 0x1ad   : > { %12741 = vmatprep.subr.bf16.mxu0 %v13880_v10 }
 0x1af   : > { %10575 = vmatmul.mubr.f32.gmra.mrb[24].mxu0 %v14261_v42 }
 0x1b0   : > { %12743 = vmatpush3.bf16.msra.mxu0 %v12742_v8  ;;  %10577 = vmatprep.mubr.msk.f32.mxu0 %vm13881_vm1, %v13882_v32 }
 0x1b1   : > { %12744 = vmatprep.subr.bf16.mxu0 %v13880_v10 }
 0x1b3   : > { %10578 = vmatmul.mubr.f32.gmra.mrb[26].mxu0 %v14273_v46 }
 0x1b4   : > { %12746 = vmatpush3.bf16.msra.mxu0 %v12745_v12  ;;  %10682 = vmatprep.mubr.msk.f32.mxu0 %vm13881_vm1, %v13882_v32 }
 0x1b5   : > { %12747 = vmatprep.subr.bf16.mxu0 %v13880_v10 }
 0x1b8   : > { %12749 = vmatpush3.bf16.msra.mxu0 %v12748_v48 }
 0x1b9   : > { %12774 = vmatprep.subr.bf16.mxu0 %v13880_v10 }
 0x1bb   : > { %10683 = vmatmul.mubr.f32.vlgmr.msra.gmra.mrb[28].mxu0 %v14192_v6 }
 0x1bc   : > { %12776 = vmatpush3.bf16.msra.mxu0 %v12775_v17  ;;  %10685 = vmatprep.mubr.msk.f32.mxu0 %vm13881_vm1, %v13882_v32 }
 0x1bd   : > { %12777 = vmatprep.subr.bf16.mxu0 %v13880_v10 }
 0x1bf   : > { %10686 = vmatmul.mubr.f32.gmra.mrb[30].mxu0 %v14208_v14 }
 0x1c0   : > { %12779 = vmatpush3.bf16.msra.mxu0 %v12778_v21  ;;  %10688 = vmatprep.mubr.msk.f32.mxu0 %vm13881_vm1, %v13882_v32 }
 0x1c1   : > { %12780 = vmatprep.subr.bf16.mxu0 %v13880_v10 }
 0x1c3   : > { %10689 = vmatmul.mubr.f32.gmra.mrb[32].mxu0 %v14218_v20 }
 0x1c4   : > { %12782 = vmatpush3.bf16.msra.mxu0 %v12781_v23  ;;  %10691 = vmatprep.mubr.msk.f32.mxu0 %vm13881_vm1, %v13882_v32 }
 0x1c5   : > { %12783 = vmatprep.subr.bf16.mxu0 %v13880_v10 }
 0x1c7   : > { %10692 = vmatmul.mubr.f32.gmra.mrb[34].mxu0 %v14233_v28 }
 0x1c8   : > { %12785 = vmatpush3.bf16.msra.mxu0 %v12784_v25  ;;  %10694 = vmatprep.mubr.msk.f32.mxu0 %vm13881_vm1, %v13882_v32 }
 0x1c9   : > { %12786 = vmatprep.subr.bf16.mxu0 %v13880_v10 }
 0x1cb   : > { %10695 = vmatmul.mubr.f32.gmra.mrb[36].mxu0 %v14246_v57 }
 0x1cc   : > { %12788 = vmatpush3.bf16.msra.mxu0 %v12787_v31  ;;  %10697 = vmatprep.mubr.msk.f32.mxu0 %vm13881_vm1, %v13882_v32 }
 0x1cd   : > { %12789 = vmatprep.subr.bf16.mxu0 %v13880_v10 }
 0x1cf   : > { %10698 = vmatmul.mubr.f32.gmra.mrb[38].mxu0 %v14261_v42 }
 0x1d0   : > { %12791 = vmatpush3.bf16.msra.mxu0 %v12790_v35  ;;  %10700 = vmatprep.mubr.msk.f32.mxu0 %vm13881_vm1, %v13882_v32 }
 0x1d1   : > { %12792 = vmatprep.subr.bf16.mxu0 %v13880_v10 }
 0x1d3   : > { %10701 = vmatmul.mubr.f32.gmra.mrb[40].mxu0 %v14273_v46 }
 0x1d4   : > { %12794 = vmatpush3.bf16.msra.mxu0 %v12793_v40  ;;  %10788 = vmatprep.mubr.msk.f32.mxu0 %vm13881_vm1, %v13882_v32 }
 0x1d5   : > { %12795 = vmatprep.subr.bf16.mxu0 %v13880_v10 }
 0x1d8   : > { %12797 = vmatpush3.bf16.msra.mxu0 %v12796_v43 }
 0x1d9   : > { %12810 = vmatprep.subr.bf16.mxu0 %v13880_v10 }
 0x1db   : > { %10789 = vmatmul.mubr.f32.vlgmr.msra.gmra.mrb[42].mxu0 %v14192_v6 }
 0x1dc   : > { %10791 = vmatprep.mubr.msk.f32.mxu0 %vm13881_vm1, %v13882_v32 }
 0x1df   : > { %10792 = vmatmul.mubr.f32.gmra.mrb[44].mxu0 %v14208_v14 }
 0x1e0   : > { %10794 = vmatprep.mubr.msk.f32.mxu0 %vm13881_vm1, %v13882_v32 }
 0x1e3   : > { %10795 = vmatmul.mubr.f32.gmra.mrb[46].mxu0 %v14218_v20 }
 0x1e4   : > { %10797 = vmatprep.mubr.msk.f32.mxu0 %vm13881_vm1, %v13882_v32 }
 0x1e7   : > { %10798 = vmatmul.mubr.f32.gmra.mrb[48].mxu0 %v14233_v28 }
 0x1e8   : > { %10800 = vmatprep.mubr.msk.f32.mxu0 %vm13881_vm1, %v13882_v32 }
 0x1eb   : > { %10801 = vmatmul.mubr.f32.gmra.mrb[50].mxu0 %v14246_v57 }
 0x1ec   : > { %10803 = vmatprep.mubr.msk.f32.mxu0 %vm13881_vm1, %v13882_v32 }
 0x1ef   : > { %10804 = vmatmul.mubr.f32.gmra.mrb[52].mxu0 %v14261_v42 }
 0x1f0   : > { %10806 = vmatprep.mubr.msk.f32.mxu0 %vm13881_vm1, %v13882_v32 }
 0x1f3   : > { %10807 = vmatmul.mubr.f32.gmra.mrb[54].mxu0 %v14273_v46 }
 0x1f4   : > { %10858 = vmatprep.mubr.msk.f32.mxu0 %vm13881_vm1, %v13882_v32 }
 0x24d   : > { %v1122_v44 = vpop.f32.mrb[0].mxu0  ;;  %v1238_v45 = vpop.f32.mrb[0].mxu1 }
 0x24e   : > { %v10455_v47 = vpop.f32.mrb[1].mxu0  ;;  %v10508_v50 = vpop.f32.mrb[1].mxu1 }
 0x252   : > { %v1127_v51 = vpop.f32.mrb[2].mxu0  ;;  %v1243_v52 = vpop.f32.mrb[2].mxu1 }
 0x253   : > { %v12706_v54 = vpack.c.bf16 %v1243_v52, %v1238_v45  ;;  %v10458_v55 = vpop.f32.mrb[3].mxu0  ;;  %v10511_v58 = vpop.f32.mrb[3].mxu1 }
 0x255   : > { %12708 = vmatpush3.bf16.xpose.msk.msra.mxu1 %vm14401_vm3, %v12706_v54 }
 0x256   : > { %v1132_v59 = vpop.f32.mrb[4].mxu0  ;;  %v1248_v60 = vpop.f32.mrb[4].mxu1  ;;  %12709 = vmatprep.subr.bf16.mxu1 %v13880_v10 }
 0x257   : > { %v10461_v62 = vpop.f32.mrb[5].mxu0  ;;  %v10514_v63 = vpop.f32.mrb[5].mxu1 }
 0x25a   : > { %v1137_v0 = vpop.f32.mrb[6].mxu0  ;;  %v1253_v1 = vpop.f32.mrb[6].mxu1 }
 0x25b   : > { %v12710_v2 = vpack.c.bf16 %v1253_v1, %v1248_v60  ;;  %v10464_v3 = vpop.f32.mrb[7].mxu0  ;;  %v10517_v4 = vpop.f32.mrb[7].mxu1 }
 0x25d   : > { %12712 = vmatpush3.bf16.xpose.msk.msra.mxu1 %vm14401_vm3, %v12710_v2 }
 0x25e   : > { %v1142_v5 = vpop.f32.mrb[8].mxu0  ;;  %v1258_v7 = vpop.f32.mrb[8].mxu1  ;;  %12713 = vmatprep.subr.bf16.mxu1 %v13880_v10 }
 0x25f   : > { %v10467_v38 = vpop.f32.mrb[9].mxu0  ;;  %v10520_v8 = vpop.f32.mrb[9].mxu1 }
 0x262   : > { %v1147_v9 = vpop.f32.mrb[10].mxu0  ;;  %v1263_v11 = vpop.f32.mrb[10].mxu1 }
 0x263   : > { %v12714_v12 = vpack.c.bf16 %v1263_v11, %v1258_v7  ;;  %v10470_v13 = vpop.f32.mrb[11].mxu0  ;;  %v10523_v39 = vpop.f32.mrb[11].mxu1 }
 0x265   : > { %12716 = vmatpush3.bf16.xpose.msk.msra.mxu1 %vm14401_vm3, %v12714_v12 }
 0x266   : > { %v1152_v48 = vpop.f32.mrb[12].mxu0  ;;  %v1268_v15 = vpop.f32.mrb[12].mxu1  ;;  %10592 = vmatprep.subr.mxu1 %v13882_v32 }
 0x267   : > { %v10473_v16 = vpop.f32.mrb[13].mxu0  ;;  %v10526_v17 = vpop.f32.mrb[13].mxu1 }
 0x26d   : > { %10593 = vmatpush3.xpose.msk.msra.mxu1 %vm1388_vm2, %v1268_v15 }
 0x26e   : > { %v1354_v18 = vpop.f32.mrb[14].mxu0  ;;  %12717 = vmatprep.subr.bf16.mxu1 %v13880_v10 }
 0x26f   : > { %v10561_v19 = vpop.f32.mrb[15].mxu0 }
 0x270   : > { %10595 = vmatmul.mubr.msk.f32.vlgmr.msra.gmra.mrb[14].mxu1 %vm1388_vm2, %v1122_v44 }
 0x271   : > { %10597 = vmatprep.mubr.msk.f32.mxu1 %vm13881_vm1, %v13882_v32 }
 0x272   : > { %v1359_v21 = vpop.f32.mrb[16].mxu0 }
 0x273   : > { %v12718_v22 = vpack.c.bf16 %v1359_v21, %v1354_v18  ;;  %v10564_v49 = vpop.f32.mrb[17].mxu0 }
 0x274   : > { %10598 = vmatmul.mubr.msk.f32.gmra.mrb[16].mxu1 %vm1388_vm2, %v1127_v51 }
 0x275   : > { %12719 = vmatpush3.bf16.msra.mxu1 %v12718_v22  ;;  %10600 = vmatprep.mubr.msk.f32.mxu1 %vm13881_vm1, %v13882_v32 }
 0x276   : > { %v1364_v23 = vpop.f32.mrb[18].mxu0  ;;  %12720 = vmatprep.subr.bf16.mxu1 %v13880_v10 }
 0x277   : > { %v10567_v24 = vpop.f32.mrb[19].mxu0 }
 0x278   : > { %10601 = vmatmul.mubr.msk.f32.gmra.mrb[18].mxu1 %vm1388_vm2, %v1132_v59 }
 0x279   : > { %10603 = vmatprep.mubr.msk.f32.mxu1 %vm13881_vm1, %v13882_v32 }
 0x27a   : > { %v1369_v56 = vpop.f32.mrb[20].mxu0 }
 0x27b   : > { %v12721_v25 = vpack.c.bf16 %v1369_v56, %v1364_v23  ;;  %v10570_v29 = vpop.f32.mrb[21].mxu0 }
 0x27c   : > { %10604 = vmatmul.mubr.msk.f32.gmra.mrb[20].mxu1 %vm1388_vm2, %v1137_v0 }
 0x27d   : > { %12722 = vmatpush3.bf16.msra.mxu1 %v12721_v25  ;;  %10606 = vmatprep.mubr.msk.f32.mxu1 %vm13881_vm1, %v13882_v32 }
 0x27e   : > { %v1374_v30 = vpop.f32.mrb[22].mxu0  ;;  %12723 = vmatprep.subr.bf16.mxu1 %v13880_v10 }
 0x27f   : > { %v10573_v31 = vpop.f32.mrb[23].mxu0 }
 0x280   : > { %10607 = vmatmul.mubr.msk.f32.gmra.mrb[22].mxu1 %vm1388_vm2, %v1142_v5 }
 0x281   : > { %10609 = vmatprep.mubr.msk.f32.mxu1 %vm13881_vm1, %v13882_v32 }
 0x282   : > { %v1379_v33 = vpop.f32.mrb[24].mxu0 }
 0x283   : > { %v12724_v34 = vpack.c.bf16 %v1379_v33, %v1374_v30  ;;  %v10576_v35 = vpop.f32.mrb[25].mxu0 }
 0x284   : > { %10610 = vmatmul.mubr.msk.f32.gmra.mrb[24].mxu1 %vm1388_vm2, %v1147_v9 }
 0x285   : > { %12725 = vmatpush3.bf16.msra.mxu1 %v12724_v34  ;;  %10612 = vmatprep.mubr.msk.f32.mxu1 %vm13881_vm1, %v13882_v32 }
 0x286   : > { %v1384_v36 = vpop.f32.mrb[26].mxu0  ;;  %10627 = vmatprep.subr.mxu1 %v13882_v32 }
 0x287   : > { %v10579_v37 = vpop.f32.mrb[27].mxu0 }
 0x288   : > { %10613 = vmatmul.mubr.msk.f32.gmra.mrb[26].mxu1 %vm1388_vm2, %v1152_v48  ;;  %v914_v48 = vshrl.u32 %v910_v26, 7 }
 0x289   : > { %10628 = vmatpush3.msra.mxu1 %v1384_v36  ;;  %10629 = vmatprep.mubr.msk.f32.mxu1 %vm13881_vm1, %v13882_v32 }
 0x28a   : > { %12750 = vmatprep.subr.bf16.mxu1 %v13880_v10  ;;  %vm14461_vm4 = vcmp.le.s32.totalorder %v14097_v27, %v914_v48  ;;  %v915_v17 = vadd.s32 8, %v914_v48  ;;  %v916_v26 = vadd.s32 16, %v914_v48  ;;  %v917_v33 = vadd.s32 24, %v914_v48 }
 0x28c   : > { %vm14469_vm6 = vcmp.le.s32.totalorder %v14097_v27, %v915_v17  ;;  %vm14477_vm7 = vcmp.le.s32.totalorder %v14097_v27, %v916_v26  ;;  %vm14485_vm8 = vcmp.le.s32.totalorder %v14097_v27, %v917_v33 }
 0x28e   : > { %v14441_v40 = vpop.f32.mrb[28].mxu0 }
 0x28f   : > { %v10684_v61 = vpop.f32.mrb[29].mxu0 }
 0x292   : > { %v14443_v41 = vpop.f32.mrb[30].mxu0 }
 0x293   : > { %v10687_v43 = vpop.f32.mrb[31].mxu0 }
 0x296   : > { %v14445_v44 = vpop.f32.mrb[32].mxu0 }
 0x297   : > { %v10690_v45 = vpop.f32.mrb[33].mxu0 }
 0x298   : > { %v918_v45 = vadd.s32 32, %v914_v48 }
 0x29a   : > { %v14447_v47 = vpop.f32.mrb[34].mxu0  ;;  %vm14493_vm9 = vcmp.le.s32.totalorder %v14097_v27, %v918_v45 }
 0x29b   : > { %v10693_v50 = vpop.f32.mrb[35].mxu0 }
 0x29e   : > { %v14449_v51 = vpop.f32.mrb[36].mxu0 }
 0x29f   : > { %v10696_v52 = vpop.f32.mrb[37].mxu0 }
 0x2a2   : > { %v14451_v54 = vpop.f32.mrb[38].mxu0 }
 0x2a3   : > { %v10699_v55 = vpop.f32.mrb[39].mxu0 }
 0x2a6   : > { %v14453_v58 = vpop.f32.mrb[40].mxu0 }
 0x2a7   : > { %v10702_v59 = vpop.f32.mrb[41].mxu0 }
 0x2ae   : > { %v2063_v60 = vpop.f32.mrb[42].mxu0 }
 0x2af   : > { %v10790_v62 = vpop.f32.mrb[43].mxu0 }
 0x2b2   : > { %v2068_v63 = vpop.f32.mrb[44].mxu0 }
 0x2b3   : > { %v12811_v0 = vpack.c.bf16 %v2068_v63, %v2063_v60  ;;  %v10793_v1 = vpop.f32.mrb[45].mxu0  ;;  %v919_v63 = vadd.s32 40, %v914_v48 }
 0x2b5   : > { %12812 = vmatpush3.bf16.msra.mxu0 %v12811_v0  ;;  %vm14501_vm10 = vcmp.le.s32.totalorder %v14097_v27, %v919_v63 }
 0x2b6   : > { %v2073_v2 = vpop.f32.mrb[46].mxu0  ;;  %12813 = vmatprep.subr.bf16.mxu0 %v13880_v10 }
 0x2b7   : > { %v10796_v3 = vpop.f32.mrb[47].mxu0 }
 0x2ba   : > { %v2078_v4 = vpop.f32.mrb[48].mxu0 }
 0x2bb   : > { %v12814_v5 = vpack.c.bf16 %v2078_v4, %v2073_v2  ;;  %v10799_v7 = vpop.f32.mrb[49].mxu0 }
 0x2bc   : > { %v920_v7 = vadd.s32 48, %v914_v48 }
 0x2bd   : > { %12815 = vmatpush3.bf16.msra.mxu0 %v12814_v5 }
 0x2be   : > { %v2083_v38 = vpop.f32.mrb[50].mxu0  ;;  %12816 = vmatprep.subr.bf16.mxu0 %v13880_v10  ;;  %vm14509_vm11 = vcmp.le.s32.totalorder %v14097_v27, %v920_v7 }
 0x2bf   : > { %v10802_v8 = vpop.f32.mrb[51].mxu0 }
 0x2c2   : > { %v2088_v9 = vpop.f32.mrb[52].mxu0 }
 0x2c3   : > { %v12817_v11 = vpack.c.bf16 %v2088_v9, %v2083_v38  ;;  %v10805_v12 = vpop.f32.mrb[53].mxu0 }
 0x2c5   : > { %12818 = vmatpush3.bf16.msra.mxu0 %v12817_v11 }
 0x2c6   : > { %v2093_v13 = vpop.f32.mrb[54].mxu0  ;;  %10856 = vmatprep.subr.mxu0 %v13882_v32 }
 0x2c7   : > { %v10808_v39 = vpop.f32.mrb[55].mxu0 }
 0x2c9   : > { %10857 = vmatpush3.msra.mxu0 %v2093_v13 }
 0x2ca   : > { %12822 = vmatprep.subr.bf16.mxu0 %v13880_v10 }
 0x343   : > { %v1497_v15 = vpop.f32.mrb[14].mxu1 }
 0x344   : > { %v10596_v18 = vpop.f32.mrb[15].mxu1  ;;  %v1531_v19 = vmul.f32 0.25, %v1497_v15 }
 0x346   : > { %v1538_v21 = vsel %vm14461_vm4, %v1531_v19, -1e+30 }
 0x347   : > { %v1502_v22 = vpop.f32.mrb[16].mxu1  ;;  %v1546_v49 = vsel %vm1545_vm5, %v1538_v21, -inf }
 0x348   : > { %1547 = vmax.xlane.f32.xlu0 %v1546_v49  ;;  %v10599_v24 = vpop.f32.mrb[17].mxu1  ;;  %v1532_v56 = vmul.f32 0.25, %v1502_v22 }
 0x34a   : > { %v1539_v25 = vsel %vm14469_vm6, %v1532_v56, -1e+30 }
 0x34b   : > { %v1507_v29 = vpop.f32.mrb[18].mxu1  ;;  %v1549_v30 = vsel %vm1545_vm5, %v1539_v25, -inf }
 0x34c   : > { %1550 = vmax.xlane.f32.xlu1 %v1549_v30  ;;  %v10602_v34 = vpop.f32.mrb[19].mxu1  ;;  %v1533_v35 = vmul.f32 0.25, %v1507_v29 }
 0x34e   : > { %v1540_v36 = vsel %vm14477_vm7, %v1533_v35, -1e+30 }
 0x34f   : > { %v1512_v37 = vpop.f32.mrb[20].mxu1  ;;  %v1552_v61 = vsel %vm1545_vm5, %v1540_v36, -inf }
 0x350   : > { %1553 = vmax.xlane.f32.xlu0 %v1552_v61  ;;  %v10605_v50 = vpop.f32.mrb[21].mxu1  ;;  %v1534_v52 = vmul.f32 0.25, %v1512_v37 }
 0x352   : > { %v1541_v55 = vsel %vm14485_vm8, %v1534_v52, -1e+30 }
 0x353   : > { %v1517_v59 = vpop.f32.mrb[22].mxu1  ;;  %v1555_v60 = vsel %vm1545_vm5, %v1541_v55, -inf }
 0x354   : > { %1556 = vmax.xlane.f32.xlu1 %v1555_v60  ;;  %v10608_v0 = vpop.f32.mrb[23].mxu1  ;;  %v1535_v1 = vmul.f32 0.25, %v1517_v59 }
 0x356   : > { %v1542_v2 = vsel %vm14493_vm9, %v1535_v1, -1e+30 }
 0x357   : > { %v1522_v3 = vpop.f32.mrb[24].mxu1  ;;  %v1558_v4 = vsel %vm1545_vm5, %v1542_v2, -inf }
 0x358   : > { %1559 = vmax.xlane.f32.xlu0 %v1558_v4  ;;  %v10611_v38 = vpop.f32.mrb[25].mxu1  ;;  %v1536_v8 = vmul.f32 0.25, %v1522_v3 }
 0x35a   : > { %v1543_v9 = vsel %vm14501_vm10, %v1536_v8, -1e+30 }
 0x35b   : > { %v1527_v11 = vpop.f32.mrb[26].mxu1  ;;  %v1561_v12 = vsel %vm1545_vm5, %v1543_v9, -inf }
 0x35c   : > { %1562 = vmax.xlane.f32.xlu1 %v1561_v12  ;;  %v10614_v39 = vpop.f32.mrb[27].mxu1  ;;  %v1537_v15 = vmul.f32 0.25, %v1527_v11 }
 0x35e   : > { %v1544_v48 = vsel %vm14509_vm11, %v1537_v15, -1e+30 }
 0x35f   : > { %v1564_v17 = vsel %vm1545_vm5, %v1544_v48, -inf }
 0x360   : > { %1565 = vmax.xlane.f32.xlu0 %v1564_v17  ;;  %v8980_v17 = vld [vmem:[%s13911_s21 + $0x80] sm:$0xff] }
 0x3d5   : > { %v1548_v18 = vpop.xlane.xlu0 %1547 }
 0x3d6   : > { %v1567_v19 = vsub.f32 %v1538_v21, %v1548_v18  ;;  %v8981_v18 = vld [vmem:[%s13911_s21 + $0x88] sm:$0xff] }
 0x3d8   : > { %v1574_v22 = vmul.f32 1.442695, %v1567_v19 }
 0x3d9   : > { %v1551_v49 = vpop.xlane.xlu1 %1550 }
 0x3da   : > { %13528 = vpow2.f32 %v1574_v22  ;;  %v1568_v26 = vsub.f32 %v1539_v25, %v1551_v49  ;;  %v12751_v22 = vpack.c.bf16 %v8981_v18, %v8980_v17 }
 0x3dc   : > { %v1576_v24 = vmul.f32 1.442695, %v1568_v26 }
 0x3dd   : > { %v1554_v56 = vpop.xlane.xlu0 %1553 }
 0x3de   : > { %13530 = vpow2.f32 %v1576_v24  ;;  %v1569_v29 = vsub.f32 %v1540_v36, %v1554_v56  ;;  %v8982_v24 = vld [vmem:[%s13911_s21 + $0x90] sm:$0xff]  ;;  %v8983_v56 = vld [vmem:[%s13911_s21 + $0x98] sm:$0xff] }
 0x3e0   : > { %v1578_v30 = vmul.f32 1.442695, %v1569_v29 }
 0x3e1   : > { %v1557_v33 = vpop.xlane.xlu1 %1556 }
 0x3e2   : > { %13532 = vpow2.f32 %v1578_v30  ;;  %v1570_v34 = vsub.f32 %v1541_v55, %v1557_v33  ;;  %v12754_v30 = vpack.c.bf16 %v8983_v56, %v8982_v24 }
 0x3e4   : > { %v13529_v35 = vpop.eup %13528  ;;  %v1580_v37 = vmul.f32 1.442695, %v1570_v34 }
 0x3e5   : > { %v1560_v61 = vpop.xlane.xlu0 %1559  ;;  %v1588_v45 = vsel %vm1545_vm5, %v13529_v35, 0.0 }
 0x3e6   : > { %13534 = vpow2.f32 %v1580_v37  ;;  %v1571_v50 = vsub.f32 %v1542_v2, %v1560_v61  ;;  %1589 = vadd.xlane.f32.xlu1 %v1588_v45  ;;  %v8984_v37 = vld [vmem:[%s13911_s21 + $0xa0] sm:$0xff] }
 0x3e8   : > { %v13531_v21 = vpop.eup %13530  ;;  %v1582_v52 = vmul.f32 1.442695, %v1571_v50 }
 0x3e9   : > { %v1563_v59 = vpop.xlane.xlu1 %1562  ;;  %v1591_v25 = vsel %vm1545_vm5, %v13531_v21, 0.0 }
 0x3ea   : > { %13536 = vpow2.f32 %v1582_v52  ;;  %v1572_v60 = vsub.f32 %v1543_v9, %v1563_v59  ;;  %1592 = vadd.xlane.f32.xlu0 %v1591_v25  ;;  %v8986_v59 = vld [vmem:[%s13911_s21 + $0xb0] sm:$0xff]  ;;  %v8987_v25 = vld [vmem:[%s13911_s21 + $0xb8] sm:$0xff] }
 0x3ec   : > { %v13533_v36 = vpop.eup %13532  ;;  %v1584_v63 = vmul.f32 1.442695, %v1572_v60  ;;  %v12760_v60 = vpack.c.bf16 %v8987_v25, %v8986_v59 }
 0x3ed   : > { %v1566_v0 = vpop.xlane.xlu0 %1565  ;;  %v1594_v55 = vsel %vm1545_vm5, %v13533_v36, 0.0 }
 0x3ee   : > { %13538 = vpow2.f32 %v1584_v63  ;;  %v1573_v1 = vsub.f32 %v1544_v48, %v1566_v0  ;;  %1595 = vadd.xlane.f32.xlu1 %v1594_v55  ;;  %v8988_v55 = vld [vmem:[%s13911_s21 + $0xc0] sm:$0xff] }
 0x3f0   : > { %v13535_v3 = vpop.eup %13534  ;;  %v1586_v4 = vmul.f32 1.442695, %v1573_v1  ;;  %v8989_v1 = vld [vmem:[%s13911_s21 + $0xc8] sm:$0xff] }
 0x3f1   : > { %v1597_v2 = vsel %vm1545_vm5, %v13535_v3, 0.0 }
 0x3f2   : > { %13540 = vpow2.f32 %v1586_v4  ;;  %1598 = vadd.xlane.f32.xlu0 %v1597_v2  ;;  %v12763_v4 = vpack.c.bf16 %v8989_v1, %v8988_v55 }
 0x3f4   : > { %v14520_v7 = vpop.eup %13536 }
 0x3f5   : > { %v1600_v38 = vsel %vm1545_vm5, %v14520_v7, 0.0 }
 0x3f6   : > { %1601 = vadd.xlane.f32.xlu1 %v1600_v38  ;;  %v8990_v38 = vld [vmem:[%s13911_s21 + $0xd0] sm:$0xff] }
 0x3f8   : > { %v14524_v8 = vpop.eup %13538 }
 0x3f9   : > { %v1603_v9 = vsel %vm1545_vm5, %v14524_v8, 0.0 }
 0x3fa   : > { %1604 = vadd.xlane.f32.xlu0 %v1603_v9  ;;  %v8991_v9 = vld [vmem:[%s13911_s21 + $0xd8] sm:$0xff] }
 0x3fc   : > { %v14528_v11 = vpop.eup %13540 }
 0x3fd   : > { %v1606_v12 = vsel %vm1545_vm5, %v14528_v11, 0.0 }
 0x3fe   : > { %1607 = vadd.xlane.f32.xlu1 %v1606_v12  ;;  %v12766_v12 = vpack.c.bf16 %v8991_v9, %v8990_v38 }
 0x473   : > { %v1590_v39 = vpop.xlane.xlu1 %1589 }
 0x474   : > { %13542 = vrcp.f32 %v1590_v39 }
 0x477   : > { %v1593_v15 = vpop.xlane.xlu0 %1592 }
 0x478   : > { %13544 = vrcp.f32 %v1593_v15  ;;  %v8992_v15 = vld [vmem:[%s13911_s21 + $0xe0] sm:$0xff] }
 0x47b   : > { %v1596_v48 = vpop.xlane.xlu1 %1595 }
 0x47c   : > { %13546 = vrcp.f32 %v1596_v48  ;;  %v8993_v48 = vld [vmem:[%s13911_s21 + $0xe8] sm:$0xff] }
 0x47d   : > { %v12769_v17 = vpack.c.bf16 %v8993_v48, %v8992_v15 }
 0x47e   : > { %v13543_v19 = vpop.eup %13542 }
 0x47f   : > { %v1616_v49 = vmul.f32 %v13543_v19, %v13529_v35  ;;  %v1599_v26 = vpop.xlane.xlu0 %1598  ;;  %v8985_v35 = vld [vmem:[%s13911_s21 + $0xa8] sm:$0xff]  ;;  %v8994_v19 = vld [vmem:[%s13911_s21 + $0xf0] sm:$0xff] }
 0x480   : > { %13548 = vrcp.f32 %v1599_v26  ;;  %v12757_v45 = vpack.c.bf16 %v8985_v35, %v8984_v37 }
 0x481   : > { %10630 = vmatmul.mubr.msk.f32.vlgmr.msra.gmra.mrb[28].mxu1 %vm1545_vm5, %v1616_v49 }
 0x482   : > { %v13545_v29 = vpop.eup %13544  ;;  %12752 = vmatpush3.bf16.msra.mxu1 %v12751_v22  ;;  %10632 = vmatprep.mubr.msk.f32.mxu1 %vm13881_vm1, %v13882_v32  ;;  %v8995_v22 = vld [vmem:[%s13911_s21 + $0xf8] sm:$0xff] }
 0x483   : > { %v1602_v33 = vpop.xlane.xlu1 %1601  ;;  %12753 = vmatprep.subr.bf16.mxu1 %v13880_v10  ;;  %v1617_v34 = vmul.f32 %v13545_v29, %v13531_v21 }
 0x484   : > { %13550 = vrcp.f32 %v1602_v33 }
 0x485   : > { %10633 = vmatmul.mubr.msk.f32.gmra.mrb[30].mxu1 %vm1545_vm5, %v1617_v34 }
 0x486   : > { %v13547_v61 = vpop.eup %13546  ;;  %12755 = vmatpush3.bf16.msra.mxu1 %v12754_v30  ;;  %10635 = vmatprep.mubr.msk.f32.mxu1 %vm13881_vm1, %v13882_v32 }
 0x487   : > { %v1605_v50 = vpop.xlane.xlu0 %1604  ;;  %12756 = vmatprep.subr.bf16.mxu1 %v13880_v10  ;;  %v1618_v52 = vmul.f32 %v13547_v61, %v13533_v36 }
 0x488   : > { %13552 = vrcp.f32 %v1605_v50 }
 0x489   : > { %10636 = vmatmul.mubr.msk.f32.gmra.mrb[32].mxu1 %vm1545_vm5, %v1618_v52 }
 0x48a   : > { %v13549_v21 = vpop.eup %13548  ;;  %12758 = vmatpush3.bf16.msra.mxu1 %v12757_v45  ;;  %10638 = vmatprep.mubr.msk.f32.mxu1 %vm13881_vm1, %v13882_v32 }
 0x48b   : > { %v1608_v63 = vpop.xlane.xlu1 %1607  ;;  %12759 = vmatprep.subr.bf16.mxu1 %v13880_v10  ;;  %v1619_v0 = vmul.f32 %v13549_v21, %v13535_v3 }
 0x48c   : > { %13554 = vrcp.f32 %v1608_v63 }
 0x48d   : > { %10639 = vmatmul.mubr.msk.f32.gmra.mrb[34].mxu1 %vm1545_vm5, %v1619_v0 }
 0x48e   : > { %v13551_v36 = vpop.eup %13550  ;;  %12761 = vmatpush3.bf16.msra.mxu1 %v12760_v60  ;;  %10641 = vmatprep.mubr.msk.f32.mxu1 %vm13881_vm1, %v13882_v32 }
 0x48f   : > { %12762 = vmatprep.subr.bf16.mxu1 %v13880_v10  ;;  %v1620_v2 = vmul.f32 %v13551_v36, %v14520_v7 }
 0x491   : > { %10642 = vmatmul.mubr.msk.f32.gmra.mrb[36].mxu1 %vm1545_vm5, %v1620_v2 }
 0x492   : > { %v13553_v3 = vpop.eup %13552  ;;  %12764 = vmatpush3.bf16.msra.mxu1 %v12763_v4  ;;  %10644 = vmatprep.mubr.msk.f32.mxu1 %vm13881_vm1, %v13882_v32 }
 0x493   : > { %12765 = vmatprep.subr.bf16.mxu1 %v13880_v10  ;;  %v1621_v39 = vmul.f32 %v13553_v3, %v14524_v8  ;;  %v12772_v8 = vpack.c.bf16 %v8995_v22, %v8994_v19 }
 0x495   : > { %10645 = vmatmul.mubr.msk.f32.gmra.mrb[38].mxu1 %vm1545_vm5, %v1621_v39 }
 0x496   : > { %v13555_v7 = vpop.eup %13554  ;;  %12767 = vmatpush3.bf16.msra.mxu1 %v12766_v12  ;;  %10647 = vmatprep.mubr.msk.f32.mxu1 %vm13881_vm1, %v13882_v32 }
 0x497   : > { %12768 = vmatprep.subr.bf16.mxu1 %v13880_v10  ;;  %v1622_v18 = vmul.f32 %v13555_v7, %v14528_v11 }
 0x499   : > { %10648 = vmatmul.mubr.msk.f32.gmra.mrb[40].mxu1 %vm1545_vm5, %v1622_v18 }
 0x49a   : > { %12770 = vmatpush3.bf16.msra.mxu1 %v12769_v17  ;;  %10735 = vmatprep.mubr.msk.f32.mxu1 %vm13881_vm1, %v13882_v32 }
 0x49b   : > { %12771 = vmatprep.subr.bf16.mxu1 %v13880_v10 }
 0x49e   : > { %12773 = vmatpush3.bf16.msra.mxu1 %v12772_v8 }
 0x49f   : > { %12798 = vmatprep.subr.bf16.mxu1 %v13880_v10 }
 0x4a1   : > { %10736 = vmatmul.mubr.f32.vlgmr.msra.gmra.mrb[42].mxu1 %v14192_v6 }
 0x4a2   : > { %10738 = vmatprep.mubr.msk.f32.mxu1 %vm13881_vm1, %v13882_v32 }
 0x4a5   : > { %10739 = vmatmul.mubr.f32.gmra.mrb[44].mxu1 %v14208_v14 }
 0x4a6   : > { %10741 = vmatprep.mubr.msk.f32.mxu1 %vm13881_vm1, %v13882_v32 }
 0x4a9   : > { %10742 = vmatmul.mubr.f32.gmra.mrb[46].mxu1 %v14218_v20 }
 0x4aa   : > { %10744 = vmatprep.mubr.msk.f32.mxu1 %vm13881_vm1, %v13882_v32 }
 0x4ad   : > { %10745 = vmatmul.mubr.f32.gmra.mrb[48].mxu1 %v14233_v28 }
 0x4ae   : > { %10747 = vmatprep.mubr.msk.f32.mxu1 %vm13881_vm1, %v13882_v32 }
 0x4b1   : > { %10748 = vmatmul.mubr.f32.gmra.mrb[50].mxu1 %v14246_v57 }
 0x4b2   : > { %10750 = vmatprep.mubr.msk.f32.mxu1 %vm13881_vm1, %v13882_v32 }
 0x4b5   : > { %10751 = vmatmul.mubr.f32.gmra.mrb[52].mxu1 %v14261_v42 }
 0x4b6   : > { %10753 = vmatprep.mubr.msk.f32.mxu1 %vm13881_vm1, %v13882_v32 }
 0x4b9   : > { %10754 = vmatmul.mubr.f32.gmra.mrb[54].mxu1 %v14273_v46 }
 0x4ba   : > { %10823 = vmatprep.mubr.msk.f32.mxu1 %vm13881_vm1, %v13882_v32 }
 0x554   : > { %v14601_v11 = vpop.f32.mrb[28].mxu1 }
 0x555   : > { %v10631_v49 = vpop.f32.mrb[29].mxu1 }
 0x558   : > { %v14603_v26 = vpop.f32.mrb[30].mxu1 }
 0x559   : > { %v10634_v24 = vpop.f32.mrb[31].mxu1 }
 0x55c   : > { %v14605_v56 = vpop.f32.mrb[32].mxu1 }
 0x55d   : > { %v10637_v29 = vpop.f32.mrb[33].mxu1 }
 0x560   : > { %v14607_v30 = vpop.f32.mrb[34].mxu1 }
 0x561   : > { %v10640_v33 = vpop.f32.mrb[35].mxu1 }
 0x564   : > { %v14609_v34 = vpop.f32.mrb[36].mxu1 }
 0x565   : > { %v10643_v37 = vpop.f32.mrb[37].mxu1 }
 0x568   : > { %v14611_v35 = vpop.f32.mrb[38].mxu1 }
 0x569   : > { %v10646_v61 = vpop.f32.mrb[39].mxu1 }
 0x56c   : > { %v14613_v45 = vpop.f32.mrb[40].mxu1 }
 0x56d   : > { %v10649_v50 = vpop.f32.mrb[41].mxu1 }
 0x574   : > { %v1946_v52 = vpop.f32.mrb[42].mxu1 }
 0x575   : > { %v10737_v59 = vpop.f32.mrb[43].mxu1 }
 0x578   : > { %v1951_v25 = vpop.f32.mrb[44].mxu1 }
 0x579   : > { %v12799_v21 = vpack.c.bf16 %v1951_v25, %v1946_v52  ;;  %v10740_v60 = vpop.f32.mrb[45].mxu1 }
 0x57b   : > { %12801 = vmatpush3.bf16.xpose.msk.msra.mxu1 %vm14401_vm3, %v12799_v21 }
 0x57c   : > { %v1956_v63 = vpop.f32.mrb[46].mxu1  ;;  %12802 = vmatprep.subr.bf16.mxu1 %v13880_v10 }
 0x57d   : > { %v10743_v0 = vpop.f32.mrb[47].mxu1 }
 0x580   : > { %v1961_v55 = vpop.f32.mrb[48].mxu1 }
 0x581   : > { %v12803_v1 = vpack.c.bf16 %v1961_v55, %v1956_v63  ;;  %v10746_v36 = vpop.f32.mrb[49].mxu1 }
 0x583   : > { %12805 = vmatpush3.bf16.xpose.msk.msra.mxu1 %vm14401_vm3, %v12803_v1 }
 0x584   : > { %v1966_v4 = vpop.f32.mrb[50].mxu1  ;;  %12806 = vmatprep.subr.bf16.mxu1 %v13880_v10 }
 0x585   : > { %v10749_v2 = vpop.f32.mrb[51].mxu1 }
 0x588   : > { %v1971_v38 = vpop.f32.mrb[52].mxu1 }
 0x589   : > { %v12807_v9 = vpack.c.bf16 %v1971_v38, %v1966_v4  ;;  %v10752_v3 = vpop.f32.mrb[53].mxu1 }
 0x58b   : > { %12809 = vmatpush3.bf16.xpose.msk.msra.mxu1 %vm14401_vm3, %v12807_v9 }
 0x58c   : > { %v1976_v12 = vpop.f32.mrb[54].mxu1  ;;  %10821 = vmatprep.subr.mxu1 %v13882_v32 }
 0x58d   : > { %v10755_v39 = vpop.f32.mrb[55].mxu1 }
 0x593   : > { %10822 = vmatpush3.xpose.msk.msra.mxu1 %vm1388_vm2, %v1976_v12 }
 0x594   : > { %12819 = vmatprep.subr.bf16.mxu1 %v13880_v10 }
 0x596   : > { %10824 = vmatmul.mubr.msk.f32.vlgmr.msra.gmra.mrb[56].mxu1 %vm1388_vm2, %v14441_v40 }
 0x597   : > { %10826 = vmatprep.mubr.msk.f32.mxu1 %vm13881_vm1, %v13882_v32 }
 0x59a   : > { %10827 = vmatmul.mubr.msk.f32.gmra.mrb[58].mxu1 %vm1388_vm2, %v14443_v41 }
 0x59b   : > { %10829 = vmatprep.mubr.msk.f32.mxu1 %vm13881_vm1, %v13882_v32 }
 0x59e   : > { %10830 = vmatmul.mubr.msk.f32.gmra.mrb[60].mxu1 %vm1388_vm2, %v14445_v44 }
 0x59f   : > { %10832 = vmatprep.mubr.msk.f32.mxu1 %vm13881_vm1, %v13882_v32 }
 0x5a2   : > { %10833 = vmatmul.mubr.msk.f32.gmra.mrb[62].mxu1 %vm1388_vm2, %v14447_v47 }
 0x5a3   : > { %10835 = vmatprep.mubr.msk.f32.mxu1 %vm13881_vm1, %v13882_v32 }
 0x5a6   : > { %10836 = vmatmul.mubr.msk.f32.gmra.mrb[64].mxu1 %vm1388_vm2, %v14449_v51 }
 0x5a7   : > { %10838 = vmatprep.mubr.msk.f32.mxu1 %vm13881_vm1, %v13882_v32 }
 0x5aa   : > { %10839 = vmatmul.mubr.msk.f32.gmra.mrb[66].mxu1 %vm1388_vm2, %v14451_v54 }
 0x5ab   : > { %10841 = vmatprep.mubr.msk.f32.mxu1 %vm13881_vm1, %v13882_v32 }
 0x5ae   : > { %10842 = vmatmul.mubr.msk.f32.gmra.mrb[68].mxu1 %vm1388_vm2, %v14453_v58 }
 0x5af   : > { %10883 = vmatprep.mubr.msk.f32.mxu1 %vm13881_vm1, %v13882_v32 }
 0x669   : > { %v2205_v40 = vpop.f32.mrb[56].mxu1 }
 0x66a   : > { %v10825_v41 = vpop.f32.mrb[57].mxu1  ;;  %v2239_v44 = vmul.f32 0.25, %v2205_v40 }
 0x66c   : > { %v2246_v47 = vsel %vm14461_vm4, %v2239_v44, -1e+30 }
 0x66d   : > { %v2210_v51 = vpop.f32.mrb[58].mxu1  ;;  %v2253_v15 = vsel %vm1545_vm5, %v2246_v47, -inf }
 0x66e   : > { %2254 = vmax.xlane.f32.xlu0 %v2253_v15  ;;  %v10828_v54 = vpop.f32.mrb[59].mxu1  ;;  %v2240_v48 = vmul.f32 0.25, %v2210_v51 }
 0x670   : > { %v2247_v7 = vsel %vm14469_vm6, %v2240_v48, -1e+30 }
 0x671   : > { %v2215_v17 = vpop.f32.mrb[60].mxu1  ;;  %v2256_v58 = vsel %vm1545_vm5, %v2247_v7, -inf }
 0x672   : > { %2257 = vmax.xlane.f32.xlu1 %v2256_v58  ;;  %v10831_v18 = vpop.f32.mrb[61].mxu1  ;;  %v2241_v19 = vmul.f32 0.25, %v2215_v17 }
 0x674   : > { %v2248_v22 = vsel %vm14477_vm7, %v2241_v19, -1e+30 }
 0x675   : > { %v2220_v8 = vpop.f32.mrb[62].mxu1  ;;  %v2259_v49 = vsel %vm1545_vm5, %v2248_v22, -inf }
 0x676   : > { %2260 = vmax.xlane.f32.xlu0 %v2259_v49  ;;  %v10834_v24 = vpop.f32.mrb[63].mxu1  ;;  %v2242_v29 = vmul.f32 0.25, %v2220_v8 }
 0x678   : > { %v2249_v33 = vsel %vm14485_vm8, %v2242_v29, -1e+30 }
 0x679   : > { %v2225_v37 = vpop.f32.mrb[64].mxu1  ;;  %v2262_v61 = vsel %vm1545_vm5, %v2249_v33, -inf }
 0x67a   : > { %2263 = vmax.xlane.f32.xlu1 %v2262_v61  ;;  %v10837_v50 = vpop.f32.mrb[65].mxu1  ;;  %v2243_v52 = vmul.f32 0.25, %v2225_v37 }
 0x67c   : > { %v2250_v59 = vsel %vm14493_vm9, %v2243_v52, -1e+30 }
 0x67d   : > { %v2230_v25 = vpop.f32.mrb[66].mxu1  ;;  %v2265_v21 = vsel %vm1545_vm5, %v2250_v59, -inf }
 0x67e   : > { %2266 = vmax.xlane.f32.xlu0 %v2265_v21  ;;  %v10840_v60 = vpop.f32.mrb[67].mxu1  ;;  %v2244_v63 = vmul.f32 0.25, %v2230_v25 }
 0x680   : > { %v2251_v0 = vsel %vm14501_vm10, %v2244_v63, -1e+30 }
 0x681   : > { %v2235_v55 = vpop.f32.mrb[68].mxu1  ;;  %v2268_v1 = vsel %vm1545_vm5, %v2251_v0, -inf }
 0x682   : > { %2269 = vmax.xlane.f32.xlu1 %v2268_v1  ;;  %v10843_v36 = vpop.f32.mrb[69].mxu1  ;;  %v2245_v4 = vmul.f32 0.25, %v2235_v55 }
 0x683   : > { %v9033_v36 = vld [vmem:[%s13921_s29 + $0x10] sm:$0xff] }
 0x684   : > { %v2252_v2 = vsel %vm14509_vm11, %v2245_v4, -1e+30  ;;  %v9034_v4 = vld [vmem:[%s13921_s29 + $0x18] sm:$0xff] }
 0x685   : > { %v2271_v38 = vsel %vm1545_vm5, %v2252_v2, -inf }
 0x686   : > { %2272 = vmax.xlane.f32.xlu0 %v2271_v38 }
 0x6fb   : > { %v2255_v9 = vpop.xlane.xlu0 %2254 }
 0x6fc   : > { %v2274_v3 = vsub.f32 %v2246_v47, %v2255_v9 }
 0x6fe   : > { %v2281_v12 = vmul.f32 1.442695, %v2274_v3 }
 0x6ff   : > { %v2258_v39 = vpop.xlane.xlu1 %2257 }
 0x700   : > { %13556 = vpow2.f32 %v2281_v12  ;;  %v2275_v40 = vsub.f32 %v2247_v7, %v2258_v39  ;;  %v1744_v12 = vld [vmem:[%s13921_s29] sm:$0xff]  ;;  %v1745_v39 = vld [vmem:[%s13921_s29 + $0x8] sm:$0xff] }
 0x702   : > { %v2283_v41 = vmul.f32 1.442695, %v2275_v40 }
 0x703   : > { %v2261_v44 = vpop.xlane.xlu0 %2260 }
 0x704   : > { %13558 = vpow2.f32 %v2283_v41  ;;  %v2276_v51 = vsub.f32 %v2248_v22, %v2261_v44  ;;  %v12823_v41 = vpack.c.bf16 %v1745_v39, %v1744_v12 }
 0x706   : > { %v2285_v15 = vmul.f32 1.442695, %v2276_v51 }
 0x707   : > { %v2264_v54 = vpop.xlane.xlu1 %2263 }
 0x708   : > { %13560 = vpow2.f32 %v2285_v15  ;;  %v2277_v48 = vsub.f32 %v2249_v33, %v2264_v54 }
 0x70a   : > { %v13557_v17 = vpop.eup %13556  ;;  %v2287_v58 = vmul.f32 1.442695, %v2277_v48 }
 0x70b   : > { %v2267_v18 = vpop.xlane.xlu0 %2266  ;;  %v2295_v19 = vsel %vm1545_vm5, %v13557_v17, 0.0 }
 0x70c   : > { %13562 = vpow2.f32 %v2287_v58  ;;  %v2278_v8 = vsub.f32 %v2250_v59, %v2267_v18  ;;  %2296 = vadd.xlane.f32.xlu1 %v2295_v19 }
 0x70e   : > { %v13559_v47 = vpop.eup %13558  ;;  %v2289_v49 = vmul.f32 1.442695, %v2278_v8 }
 0x70f   : > { %v2270_v24 = vpop.xlane.xlu1 %2269  ;;  %v2298_v7 = vsel %vm1545_vm5, %v13559_v47, 0.0 }
 0x710   : > { %13564 = vpow2.f32 %v2289_v49  ;;  %v2279_v29 = vsub.f32 %v2251_v0, %v2270_v24  ;;  %2299 = vadd.xlane.f32.xlu0 %v2298_v7 }
 0x712   : > { %v13561_v22 = vpop.eup %13560  ;;  %v2291_v37 = vmul.f32 1.442695, %v2279_v29 }
 0x713   : > { %v2273_v61 = vpop.xlane.xlu0 %2272  ;;  %v2301_v33 = vsel %vm1545_vm5, %v13561_v22, 0.0 }
 0x714   : > { %13566 = vpow2.f32 %v2291_v37  ;;  %v2280_v50 = vsub.f32 %v2252_v2, %v2273_v61  ;;  %2302 = vadd.xlane.f32.xlu1 %v2301_v33  ;;  %v12820_v2 = vpack.c.bf16 %v9034_v4, %v9033_v36  ;;  %v9065_v61 = vld [vmem:[%s13911_s21 + $0x100] sm:$0xff]  ;;  %v9066_v33 = vld [vmem:[%s13911_s21 + $0x108] sm:$0xff]  ;;  %v9076_v4 = vld [vmem:[%s13911_s21 + $0x158] sm:$0xff] }
 0x716   : > { %v13563_v52 = vpop.eup %13562  ;;  %v2293_v59 = vmul.f32 1.442695, %v2280_v50  ;;  %12821 = vmatpush3.bf16.msra.mxu1 %v12820_v2  ;;  %v12850_v50 = vpack.c.bf16 %v9066_v33, %v9065_v61  ;;  %v9059_v33 = vld [vmem:[%s13906_s17 + $0x150] sm:$0xff] }
 0x717   : > { %v2304_v25 = vsel %vm1545_vm5, %v13563_v52, 0.0  ;;  %12825 = vmatprep.subr.bf16.mxu1 %v13880_v10 }
 0x718   : > { %13568 = vpow2.f32 %v2293_v59  ;;  %2305 = vadd.xlane.f32.xlu0 %v2304_v25  ;;  %v9068_v59 = vld [vmem:[%s13911_s21 + $0x118] sm:$0xff] }
 0x71a   : > { %v13565_v21 = vpop.eup %13564 }
 0x71b   : > { %v2307_v60 = vsel %vm1545_vm5, %v13565_v21, 0.0 }
 0x71c   : > { %2308 = vadd.xlane.f32.xlu1 %v2307_v60  ;;  %v9070_v60 = vld [vmem:[%s13911_s21 + $0x128] sm:$0xff] }
 0x71e   : > { %v13567_v63 = vpop.eup %13566 }
 0x71f   : > { %v2310_v0 = vsel %vm1545_vm5, %v13567_v63, 0.0 }
 0x720   : > { %2311 = vadd.xlane.f32.xlu0 %v2310_v0  ;;  %v9072_v0 = vld [vmem:[%s13911_s21 + $0x138] sm:$0xff] }
 0x722   : > { %v13569_v55 = vpop.eup %13568 }
 0x723   : > { %v2313_v1 = vsel %vm1545_vm5, %v13569_v55, 0.0 }
 0x724   : > { %2314 = vadd.xlane.f32.xlu1 %v2313_v1  ;;  %v9074_v1 = vld [vmem:[%s13911_s21 + $0x148] sm:$0xff] }
 0x799   : > { %v2297_v38 = vpop.xlane.xlu1 %2296 }
 0x79a   : > { %13570 = vrcp.f32 %v2297_v38  ;;  %v9078_v38 = vld [vmem:[%s13911_s21 + $0x168] sm:$0xff] }
 0x79d   : > { %v2300_v9 = vpop.xlane.xlu0 %2299 }
 0x79e   : > { %13572 = vrcp.f32 %v2300_v9 }
 0x7a1   : > { %v2303_v3 = vpop.xlane.xlu1 %2302 }
 0x7a2   : > { %13574 = vrcp.f32 %v2303_v3  ;;  %v9080_v3 = vld [vmem:[%s13911_s21 + $0x178] sm:$0xff] }
 0x7a4   : > { %v13571_v40 = vpop.eup %13570 }
 0x7a5   : > { %v2323_v44 = vmul.f32 %v13571_v40, %v13557_v17  ;;  %v2306_v51 = vpop.xlane.xlu0 %2305  ;;  %v9051_v40 = vld [vmem:[%s13906_s17 + $0x110] sm:$0xff] }
 0x7a6   : > { %13576 = vrcp.f32 %v2306_v51 }
 0x7a7   : > { %10859 = vmatmul.mubr.msk.f32.vlgmr.msra.gmra.mrb[56].mxu0 %vm1545_vm5, %v2323_v44 }
 0x7a8   : > { %v13573_v15 = vpop.eup %13572  ;;  %10861 = vmatprep.mubr.msk.f32.mxu0 %vm13881_vm1, %v13882_v32  ;;  %12824 = vmatpush3.bf16.msra.mxu0 %v12823_v41  ;;  %v9052_v41 = vld [vmem:[%s13906_s17 + $0x118] sm:$0xff] }
 0x7a9   : > { %v2309_v54 = vpop.xlane.xlu1 %2308  ;;  %v2324_v48 = vmul.f32 %v13573_v15, %v13559_v47  ;;  %12849 = vmatprep.subr.bf16.mxu0 %v13880_v10  ;;  %v12829_v15 = vpack.c.bf16 %v9052_v41, %v9051_v40  ;;  %v9086_v40 = vld [vmem:[%s13916_s25 + $0x128] sm:$0xff] }
 0x7aa   : > { %13578 = vrcp.f32 %v2309_v54  ;;  %v9053_v54 = vld [vmem:[%s13906_s17 + $0x120] sm:$0xff] }
 0x7ab   : > { %10862 = vmatmul.mubr.msk.f32.gmra.mrb[58].mxu0 %vm1545_vm5, %v2324_v48  ;;  %v9054_v48 = vld [vmem:[%s13906_s17 + $0x128] sm:$0xff] }
 0x7ac   : > { %v13575_v58 = vpop.eup %13574  ;;  %10864 = vmatprep.mubr.msk.f32.mxu0 %vm13881_vm1, %v13882_v32 }
 0x7ad   : > { %v2312_v17 = vpop.xlane.xlu0 %2311  ;;  %v2325_v18 = vmul.f32 %v13575_v58, %v13561_v22 }
 0x7ae   : > { %13580 = vrcp.f32 %v2312_v17 }
 0x7af   : > { %10865 = vmatmul.mubr.msk.f32.gmra.mrb[60].mxu0 %vm1545_vm5, %v2325_v18  ;;  %v12832_v18 = vpack.c.bf16 %v9054_v48, %v9053_v54  ;;  %v9088_v54 = vld [vmem:[%s13916_s25 + $0x138] sm:$0xff] }
 0x7b0   : > { %v13577_v19 = vpop.eup %13576  ;;  %10867 = vmatprep.mubr.msk.f32.mxu0 %vm13881_vm1, %v13882_v32 }
 0x7b1   : > { %v2315_v8 = vpop.xlane.xlu1 %2314  ;;  %v2326_v47 = vmul.f32 %v13577_v19, %v13563_v52  ;;  %v9067_v52 = vld [vmem:[%s13911_s21 + $0x110] sm:$0xff] }
 0x7b2   : > { %13582 = vrcp.f32 %v2315_v8  ;;  %v12853_v25 = vpack.c.bf16 %v9068_v59, %v9067_v52  ;;  %v9055_v19 = vld [vmem:[%s13906_s17 + $0x130] sm:$0xff]  ;;  %v9056_v8 = vld [vmem:[%s13906_s17 + $0x138] sm:$0xff] }
 0x7b3   : > { %10868 = vmatmul.mubr.msk.f32.gmra.mrb[62].mxu0 %vm1545_vm5, %v2326_v47 }
 0x7b4   : > { %v13579_v49 = vpop.eup %13578  ;;  %10870 = vmatprep.mubr.msk.f32.mxu0 %vm13881_vm1, %v13882_v32 }
 0x7b5   : > { %v2327_v24 = vmul.f32 %v13579_v49, %v13565_v21  ;;  %v9069_v21 = vld [vmem:[%s13911_s21 + $0x120] sm:$0xff] }
 0x7b7   : > { %10871 = vmatmul.mubr.msk.f32.gmra.mrb[64].mxu0 %vm1545_vm5, %v2327_v24  ;;  %v12835_v24 = vpack.c.bf16 %v9056_v8, %v9055_v19  ;;  %v9090_v19 = vld [vmem:[%s13916_s25 + $0x148] sm:$0xff] }
 0x7b8   : > { %v13581_v7 = vpop.eup %13580  ;;  %10873 = vmatprep.mubr.msk.f32.mxu0 %vm13881_vm1, %v13882_v32 }
 0x7b9   : > { %v2328_v29 = vmul.f32 %v13581_v7, %v13567_v63  ;;  %v12856_v63 = vpack.c.bf16 %v9070_v60, %v9069_v21  ;;  %v9057_v7 = vld [vmem:[%s13906_s17 + $0x140] sm:$0xff]  ;;  %v9062_v60 = vld [vmem:[%s13906_s17 + $0x168] sm:$0xff] }
 0x7ba   : > { %v9061_v21 = vld [vmem:[%s13906_s17 + $0x160] sm:$0xff] }
 0x7bb   : > { %10874 = vmatmul.mubr.msk.f32.gmra.mrb[66].mxu0 %vm1545_vm5, %v2328_v29  ;;  %v9058_v29 = vld [vmem:[%s13906_s17 + $0x148] sm:$0xff] }
 0x7bc   : > { %v13583_v22 = vpop.eup %13582  ;;  %10876 = vmatprep.mubr.msk.f32.mxu0 %vm13881_vm1, %v13882_v32  ;;  %v12838_v61 = vpack.c.bf16 %v9058_v29, %v9057_v7  ;;  %v9092_v7 = vld [vmem:[%s13916_s25 + $0x158] sm:$0xff] }
 0x7bd   : > { %v2329_v37 = vmul.f32 %v13583_v22, %v13569_v55 }
 0x7bf   : > { %10877 = vmatmul.mubr.msk.f32.gmra.mrb[68].mxu0 %vm1545_vm5, %v2329_v37 }
 0x7c0   : > { %10908 = vmatprep.mubr.msk.f32.mxu0 %vm13881_vm1, %v13882_v32 }
 0x7c3   : > { %10909 = vmatmul.mubr.msk.f32.vlgmr.msra.gmra.mrb[70].mxu0 %vm1388_vm2, %v14601_v11  ;;  %v9071_v11 = vld [vmem:[%s13911_s21 + $0x130] sm:$0xff] }
 0x7c4   : > { %12851 = vmatpush3.bf16.msra.mxu0 %v12850_v50  ;;  %10911 = vmatprep.mubr.msk.f32.mxu0 %vm13881_vm1, %v13882_v32  ;;  %v12859_v55 = vpack.c.bf16 %v9072_v0, %v9071_v11  ;;  %v9060_v50 = vld [vmem:[%s13906_s17 + $0x158] sm:$0xff]  ;;  %v12844_v0 = vpack.c.bf16 %v9062_v60, %v9061_v21 }
 0x7c5   : > { %12852 = vmatprep.subr.bf16.mxu0 %v13880_v10  ;;  %v9096_v21 = vld [vmem:[%s13916_s25 + $0x178] sm:$0xff] }
 0x7c7   : > { %10912 = vmatmul.mubr.msk.f32.gmra.mrb[72].mxu0 %vm1388_vm2, %v14603_v26  ;;  %v9073_v26 = vld [vmem:[%s13911_s21 + $0x140] sm:$0xff] }
 0x7c8   : > { %12854 = vmatpush3.bf16.msra.mxu0 %v12853_v25  ;;  %10914 = vmatprep.mubr.msk.f32.mxu0 %vm13881_vm1, %v13882_v32  ;;  %v12862_v36 = vpack.c.bf16 %v9074_v1, %v9073_v26  ;;  %v12841_v25 = vpack.c.bf16 %v9060_v50, %v9059_v33  ;;  %v9064_v26 = vld [vmem:[%s13906_s17 + $0x178] sm:$0xff]  ;;  %v9094_v33 = vld [vmem:[%s13916_s25 + $0x168] sm:$0xff] }
 0x7c9   : > { %12855 = vmatprep.subr.bf16.mxu0 %v13880_v10 }
 0x7cb   : > { %10915 = vmatmul.mubr.msk.f32.gmra.mrb[74].mxu0 %vm1388_vm2, %v14605_v56  ;;  %v9075_v56 = vld [vmem:[%s13911_s21 + $0x150] sm:$0xff] }
 0x7cc   : > { %12857 = vmatpush3.bf16.msra.mxu0 %v12856_v63  ;;  %10917 = vmatprep.mubr.msk.f32.mxu0 %vm13881_vm1, %v13882_v32  ;;  %v12865_v2 = vpack.c.bf16 %v9076_v4, %v9075_v56  ;;  %v9081_v4 = vld [vmem:[%s13916_s25 + $0x100] sm:$0xff] }
 0x7cd   : > { %12858 = vmatprep.subr.bf16.mxu0 %v13880_v10 }
 0x7cf   : > { %10918 = vmatmul.mubr.msk.f32.gmra.mrb[76].mxu0 %vm1388_vm2, %v14607_v30  ;;  %v9077_v30 = vld [vmem:[%s13911_s21 + $0x160] sm:$0xff] }
 0x7d0   : > { %12860 = vmatpush3.bf16.msra.mxu0 %v12859_v55  ;;  %10920 = vmatprep.mubr.msk.f32.mxu0 %vm13881_vm1, %v13882_v32  ;;  %v12868_v9 = vpack.c.bf16 %v9078_v38, %v9077_v30  ;;  %v9063_v55 = vld [vmem:[%s13906_s17 + $0x170] sm:$0xff] }
 0x7d1   : > { %12861 = vmatprep.subr.bf16.mxu0 %v13880_v10  ;;  %v12847_v56 = vpack.c.bf16 %v9064_v26, %v9063_v55 }
 0x7d3   : > { %10921 = vmatmul.mubr.msk.f32.gmra.mrb[78].mxu0 %vm1388_vm2, %v14609_v34  ;;  %v9079_v34 = vld [vmem:[%s13911_s21 + $0x170] sm:$0xff] }
 0x7d4   : > { %12863 = vmatpush3.bf16.msra.mxu0 %v12862_v36  ;;  %10923 = vmatprep.mubr.msk.f32.mxu0 %vm13881_vm1, %v13882_v32  ;;  %v12871_v12 = vpack.c.bf16 %v9080_v3, %v9079_v34  ;;  %v9083_v34 = vld [vmem:[%s13916_s25 + $0x110] sm:$0xff]  ;;  %v9084_v3 = vld [vmem:[%s13916_s25 + $0x118] sm:$0xff] }
 0x7d5   : > { %12864 = vmatprep.subr.bf16.mxu0 %v13880_v10 }
 0x7d7   : > { %10924 = vmatmul.mubr.msk.f32.gmra.mrb[80].mxu0 %vm1388_vm2, %v14611_v35  ;;  %v9049_v35 = vld [vmem:[%s13906_s17 + $0x100] sm:$0xff] }
 0x7d8   : > { %12866 = vmatpush3.bf16.msra.mxu0 %v12865_v2  ;;  %10926 = vmatprep.mubr.msk.f32.mxu0 %vm13881_vm1, %v13882_v32  ;;  %v9082_v2 = vld [vmem:[%s13916_s25 + $0x108] sm:$0xff] }
 0x7d9   : > { %12867 = vmatprep.subr.bf16.mxu0 %v13880_v10 }
 0x7db   : > { %10927 = vmatmul.mubr.msk.f32.gmra.mrb[82].mxu0 %vm1388_vm2, %v14613_v45  ;;  %v9050_v45 = vld [vmem:[%s13906_s17 + $0x108] sm:$0xff] }
 0x7dc   : > { %12869 = vmatpush3.bf16.msra.mxu0 %v12868_v9  ;;  %11014 = vmatprep.mubr.msk.f32.mxu0 %vm13881_vm1, %v13882_v32  ;;  %v12826_v39 = vpack.c.bf16 %v9050_v45, %v9049_v35  ;;  %v12874_v9 = vpack.c.bf16 %v9082_v2, %v9081_v4  ;;  %v12877_v45 = vpack.c.bf16 %v9084_v3, %v9083_v34 }
 0x7dd   : > { %12870 = vmatprep.subr.bf16.mxu0 %v13880_v10 }
 0x7e0   : > { %12872 = vmatpush3.bf16.msra.mxu0 %v12871_v12 }
 0x7e1   : > { %12897 = vmatprep.subr.bf16.mxu0 %v13880_v10 }
 0x7e3   : > { %11015 = vmatmul.mubr.f32.vlgmr.msra.gmra.mrb[84].mxu0 %v14192_v6 }
 0x7e4   : > { %11017 = vmatprep.mubr.msk.f32.mxu0 %vm13881_vm1, %v13882_v32 }
 0x7e7   : > { %11018 = vmatmul.mubr.f32.gmra.mrb[86].mxu0 %v14208_v14 }
 0x7e8   : > { %11020 = vmatprep.mubr.msk.f32.mxu0 %vm13881_vm1, %v13882_v32 }
 0x7eb   : > { %11021 = vmatmul.mubr.f32.gmra.mrb[88].mxu0 %v14218_v20 }
 0x7ec   : > { %11023 = vmatprep.mubr.msk.f32.mxu0 %vm13881_vm1, %v13882_v32 }
 0x7ef   : > { %11024 = vmatmul.mubr.f32.gmra.mrb[90].mxu0 %v14233_v28 }
 0x7f0   : > { %11026 = vmatprep.mubr.msk.f32.mxu0 %vm13881_vm1, %v13882_v32 }
 0x7f3   : > { %11027 = vmatmul.mubr.f32.gmra.mrb[92].mxu0 %v14246_v57 }
 0x7f4   : > { %11029 = vmatprep.mubr.msk.f32.mxu0 %vm13881_vm1, %v13882_v32 }
 0x7f7   : > { %11030 = vmatmul.mubr.f32.gmra.mrb[94].mxu0 %v14261_v42 }
 0x7f8   : > { %11032 = vmatprep.mubr.msk.f32.mxu0 %vm13881_vm1, %v13882_v32 }
 0x7fb   : > { %11033 = vmatmul.mubr.f32.gmra.mrb[96].mxu0 %v14273_v46 }
 0x7fc   : > { %11102 = vmatprep.mubr.msk.f32.mxu0 %vm13881_vm1, %v13882_v32 }
 0x87a   : > { %v2417_v44 = vpop.f32.mrb[56].mxu0 }
 0x87b   : > { %v10860_v51 = vpop.f32.mrb[57].mxu0  ;;  %10884 = vmatmul.mubr.msk.f32.vlgmr.msra.gmra.mrb[70].mxu1 %vm1388_vm2, %v2417_v44 }
 0x87c   : > { %12827 = vmatpush3.bf16.msra.mxu1 %v12826_v39  ;;  %10886 = vmatprep.mubr.msk.f32.mxu1 %vm13881_vm1, %v13882_v32  ;;  %v9085_v39 = vld [vmem:[%s13916_s25 + $0x120] sm:$0xff] }
 0x87d   : > { %12828 = vmatprep.subr.bf16.mxu1 %v13880_v10  ;;  %v12880_v51 = vpack.c.bf16 %v9086_v40, %v9085_v39 }
 0x87e   : > { %v2422_v58 = vpop.f32.mrb[58].mxu0 }
 0x87f   : > { %v10863_v17 = vpop.f32.mrb[59].mxu0  ;;  %10887 = vmatmul.mubr.msk.f32.gmra.mrb[72].mxu1 %vm1388_vm2, %v2422_v58 }
 0x880   : > { %12830 = vmatpush3.bf16.msra.mxu1 %v12829_v15  ;;  %10889 = vmatprep.mubr.msk.f32.mxu1 %vm13881_vm1, %v13882_v32  ;;  %v9087_v15 = vld [vmem:[%s13916_s25 + $0x130] sm:$0xff] }
 0x881   : > { %12831 = vmatprep.subr.bf16.mxu1 %v13880_v10  ;;  %v12883_v17 = vpack.c.bf16 %v9088_v54, %v9087_v15 }
 0x882   : > { %v2427_v47 = vpop.f32.mrb[60].mxu0 }
 0x883   : > { %v10866_v49 = vpop.f32.mrb[61].mxu0  ;;  %10890 = vmatmul.mubr.msk.f32.gmra.mrb[74].mxu1 %vm1388_vm2, %v2427_v47 }
 0x884   : > { %12833 = vmatpush3.bf16.msra.mxu1 %v12832_v18  ;;  %10892 = vmatprep.mubr.msk.f32.mxu1 %vm13881_vm1, %v13882_v32  ;;  %v9089_v18 = vld [vmem:[%s13916_s25 + $0x140] sm:$0xff] }
 0x885   : > { %12834 = vmatprep.subr.bf16.mxu1 %v13880_v10  ;;  %v12886_v49 = vpack.c.bf16 %v9090_v19, %v9089_v18 }
 0x886   : > { %v2432_v22 = vpop.f32.mrb[62].mxu0 }
 0x887   : > { %v10869_v37 = vpop.f32.mrb[63].mxu0  ;;  %10893 = vmatmul.mubr.msk.f32.gmra.mrb[76].mxu1 %vm1388_vm2, %v2432_v22 }
 0x888   : > { %12836 = vmatpush3.bf16.msra.mxu1 %v12835_v24  ;;  %10895 = vmatprep.mubr.msk.f32.mxu1 %vm13881_vm1, %v13882_v32  ;;  %v9091_v24 = vld [vmem:[%s13916_s25 + $0x150] sm:$0xff] }
 0x889   : > { %12837 = vmatprep.subr.bf16.mxu1 %v13880_v10  ;;  %v12889_v37 = vpack.c.bf16 %v9092_v7, %v9091_v24 }
 0x88a   : > { %v2437_v52 = vpop.f32.mrb[64].mxu0 }
 0x88b   : > { %v10872_v59 = vpop.f32.mrb[65].mxu0  ;;  %10896 = vmatmul.mubr.msk.f32.gmra.mrb[78].mxu1 %vm1388_vm2, %v2437_v52 }
 0x88c   : > { %12839 = vmatpush3.bf16.msra.mxu1 %v12838_v61  ;;  %10898 = vmatprep.mubr.msk.f32.mxu1 %vm13881_vm1, %v13882_v32  ;;  %v9093_v61 = vld [vmem:[%s13916_s25 + $0x160] sm:$0xff] }
 0x88d   : > { %12840 = vmatprep.subr.bf16.mxu1 %v13880_v10  ;;  %v12892_v59 = vpack.c.bf16 %v9094_v33, %v9093_v61 }
 0x88e   : > { %v2442_v63 = vpop.f32.mrb[66].mxu0 }
 0x88f   : > { %v10875_v11 = vpop.f32.mrb[67].mxu0  ;;  %10899 = vmatmul.mubr.msk.f32.gmra.mrb[80].mxu1 %vm1388_vm2, %v2442_v63 }
 0x890   : > { %12842 = vmatpush3.bf16.msra.mxu1 %v12841_v25  ;;  %10901 = vmatprep.mubr.msk.f32.mxu1 %vm13881_vm1, %v13882_v32  ;;  %v9095_v25 = vld [vmem:[%s13916_s25 + $0x170] sm:$0xff] }
 0x891   : > { %12843 = vmatprep.subr.bf16.mxu1 %v13880_v10  ;;  %v12895_v60 = vpack.c.bf16 %v9096_v21, %v9095_v25 }
 0x892   : > { %v2447_v1 = vpop.f32.mrb[68].mxu0 }
 0x893   : > { %v10878_v36 = vpop.f32.mrb[69].mxu0  ;;  %10902 = vmatmul.mubr.msk.f32.gmra.mrb[82].mxu1 %vm1388_vm2, %v2447_v1 }
 0x894   : > { %12845 = vmatpush3.bf16.msra.mxu1 %v12844_v0  ;;  %10961 = vmatprep.mubr.msk.f32.mxu1 %vm13881_vm1, %v13882_v32 }
 0x895   : > { %12846 = vmatprep.subr.bf16.mxu1 %v13880_v10 }
 0x896   : > { %v14828_v30 = vpop.f32.mrb[70].mxu0 }
 0x897   : > { %v10910_v38 = vpop.f32.mrb[71].mxu0 }
 0x898   : > { %12848 = vmatpush3.bf16.msra.mxu1 %v12847_v56 }
 0x899   : > { %12873 = vmatprep.subr.bf16.mxu1 %v13880_v10 }
 0x89a   : > { %v14833_v12 = vpop.f32.mrb[72].mxu0 }
 0x89b   : > { %10962 = vmatmul.mubr.f32.vlgmr.msra.gmra.mrb[84].mxu1 %v14192_v6  ;;  %v10913_v35 = vpop.f32.mrb[73].mxu0 }
 0x89c   : > { %12875 = vmatpush3.bf16.msra.mxu1 %v12874_v9  ;;  %10964 = vmatprep.mubr.msk.f32.mxu1 %vm13881_vm1, %v13882_v32 }
 0x89d   : > { %12876 = vmatprep.subr.bf16.mxu1 %v13880_v10 }
 0x89e   : > { %v14841_v41 = vpop.f32.mrb[74].mxu0 }
 0x89f   : > { %10965 = vmatmul.mubr.f32.gmra.mrb[86].mxu1 %v14208_v14  ;;  %v10916_v44 = vpop.f32.mrb[75].mxu0 }
 0x8a0   : > { %12878 = vmatpush3.bf16.msra.mxu1 %v12877_v45  ;;  %10967 = vmatprep.mubr.msk.f32.mxu1 %vm13881_vm1, %v13882_v32 }
 0x8a1   : > { %12879 = vmatprep.subr.bf16.mxu1 %v13880_v10 }
 0x8a2   : > { %v14849_v48 = vpop.f32.mrb[76].mxu0 }
 0x8a3   : > { %10968 = vmatmul.mubr.f32.gmra.mrb[88].mxu1 %v14218_v20  ;;  %v10919_v58 = vpop.f32.mrb[77].mxu0 }
 0x8a4   : > { %12881 = vmatpush3.bf16.msra.mxu1 %v12880_v51  ;;  %10970 = vmatprep.mubr.msk.f32.mxu1 %vm13881_vm1, %v13882_v32 }
 0x8a5   : > { %12882 = vmatprep.subr.bf16.mxu1 %v13880_v10 }
 0x8a6   : > { %v14857_v8 = vpop.f32.mrb[78].mxu0 }
 0x8a7   : > { %10971 = vmatmul.mubr.f32.gmra.mrb[90].mxu1 %v14233_v28  ;;  %v10922_v47 = vpop.f32.mrb[79].mxu0 }
 0x8a8   : > { %12884 = vmatpush3.bf16.msra.mxu1 %v12883_v17  ;;  %10973 = vmatprep.mubr.msk.f32.mxu1 %vm13881_vm1, %v13882_v32 }
 0x8a9   : > { %12885 = vmatprep.subr.bf16.mxu1 %v13880_v10 }
 0x8aa   : > { %v14865_v29 = vpop.f32.mrb[80].mxu0 }
 0x8ab   : > { %10974 = vmatmul.mubr.f32.gmra.mrb[92].mxu1 %v14246_v57  ;;  %v10925_v22 = vpop.f32.mrb[81].mxu0 }
 0x8ac   : > { %12887 = vmatpush3.bf16.msra.mxu1 %v12886_v49  ;;  %10976 = vmatprep.mubr.msk.f32.mxu1 %vm13881_vm1, %v13882_v32 }
 0x8ad   : > { %12888 = vmatprep.subr.bf16.mxu1 %v13880_v10 }
 0x8ae   : > { %v14873_v50 = vpop.f32.mrb[82].mxu0 }
 0x8af   : > { %10977 = vmatmul.mubr.f32.gmra.mrb[94].mxu1 %v14261_v42  ;;  %v10928_v52 = vpop.f32.mrb[83].mxu0 }
 0x8b0   : > { %12890 = vmatpush3.bf16.msra.mxu1 %v12889_v37  ;;  %10979 = vmatprep.mubr.msk.f32.mxu1 %vm13881_vm1, %v13882_v32 }
 0x8b1   : > { %12891 = vmatprep.subr.bf16.mxu1 %v13880_v10 }
 0x8b3   : > { %10980 = vmatmul.mubr.f32.gmra.mrb[96].mxu1 %v14273_v46 }
 0x8b4   : > { %12893 = vmatpush3.bf16.msra.mxu1 %v12892_v59  ;;  %11067 = vmatprep.mubr.msk.f32.mxu1 %vm13881_vm1, %v13882_v32 }
 0x8b5   : > { %12894 = vmatprep.subr.bf16.mxu1 %v13880_v10 }
 0x8b6   : > { %v2896_v63 = vpop.f32.mrb[84].mxu0 }
 0x8b7   : > { %v11016_v11 = vpop.f32.mrb[85].mxu0 }
 0x8b8   : > { %12896 = vmatpush3.bf16.msra.mxu1 %v12895_v60 }
 0x8b9   : > { %12909 = vmatprep.subr.bf16.mxu1 %v13880_v10 }
 0x8ba   : > { %v2901_v0 = vpop.f32.mrb[86].mxu0 }
 0x8bb   : > { %v12898_v55 = vpack.c.bf16 %v2901_v0, %v2896_v63  ;;  %v11019_v26 = vpop.f32.mrb[87].mxu0  ;;  %11068 = vmatmul.mubr.f32.vlgmr.msra.gmra.mrb[98].mxu1 %v14192_v6 }
 0x8bc   : > { %11070 = vmatprep.mubr.msk.f32.mxu1 %vm13881_vm1, %v13882_v32 }
 0x8bd   : > { %12900 = vmatpush3.bf16.xpose.msk.msra.mxu0 %vm14401_vm3, %v12898_v55 }
 0x8be   : > { %v2906_v1 = vpop.f32.mrb[88].mxu0  ;;  %12901 = vmatprep.subr.bf16.mxu0 %v13880_v10 }
 0x8bf   : > { %v11022_v36 = vpop.f32.mrb[89].mxu0  ;;  %11071 = vmatmul.mubr.f32.gmra.mrb[100].mxu1 %v14208_v14 }
 0x8c0   : > { %11073 = vmatprep.mubr.msk.f32.mxu1 %vm13881_vm1, %v13882_v32 }
 0x8c2   : > { %v2911_v56 = vpop.f32.mrb[90].mxu0 }
 0x8c3   : > { %v12902_v4 = vpack.c.bf16 %v2911_v56, %v2906_v1  ;;  %v11025_v2 = vpop.f32.mrb[91].mxu0  ;;  %11074 = vmatmul.mubr.f32.gmra.mrb[102].mxu1 %v14218_v20 }
 0x8c4   : > { %11076 = vmatprep.mubr.msk.f32.mxu1 %vm13881_vm1, %v13882_v32 }
 0x8c5   : > { %12904 = vmatpush3.bf16.xpose.msk.msra.mxu0 %vm14401_vm3, %v12902_v4 }
 0x8c6   : > { %v2916_v38 = vpop.f32.mrb[92].mxu0  ;;  %12905 = vmatprep.subr.bf16.mxu0 %v13880_v10 }
 0x8c7   : > { %v11028_v9 = vpop.f32.mrb[93].mxu0  ;;  %11077 = vmatmul.mubr.f32.gmra.mrb[104].mxu1 %v14233_v28 }
 0x8c8   : > { %11079 = vmatprep.mubr.msk.f32.mxu1 %vm13881_vm1, %v13882_v32 }
 0x8ca   : > { %v2921_v34 = vpop.f32.mrb[94].mxu0 }
 0x8cb   : > { %v12906_v3 = vpack.c.bf16 %v2921_v34, %v2916_v38  ;;  %v11031_v35 = vpop.f32.mrb[95].mxu0  ;;  %11080 = vmatmul.mubr.f32.gmra.mrb[106].mxu1 %v14246_v57 }
 0x8cc   : > { %11082 = vmatprep.mubr.msk.f32.mxu1 %vm13881_vm1, %v13882_v32 }
 0x8cd   : > { %12908 = vmatpush3.bf16.xpose.msk.msra.mxu0 %vm14401_vm3, %v12906_v3 }
 0x8ce   : > { %v2926_v45 = vpop.f32.mrb[96].mxu0  ;;  %11100 = vmatprep.subr.mxu0 %v13882_v32 }
 0x8cf   : > { %v11034_v39 = vpop.f32.mrb[97].mxu0  ;;  %11083 = vmatmul.mubr.f32.gmra.mrb[108].mxu1 %v14261_v42 }
 0x8d0   : > { %11085 = vmatprep.mubr.msk.f32.mxu1 %vm13881_vm1, %v13882_v32 }
 0x8d3   : > { %11086 = vmatmul.mubr.f32.gmra.mrb[110].mxu1 %v14273_v46 }
 0x8d4   : > { %11137 = vmatprep.mubr.msk.f32.mxu1 %vm13881_vm1, %v13882_v32 }
 0x8d5   : > { %11101 = vmatpush3.xpose.msk.msra.mxu0 %vm1388_vm2, %v2926_v45 }
 0x8d6   : > { %12918 = vmatprep.subr.bf16.mxu0 %v13880_v10 }
 0x94e   : > { %v2541_v40 = vpop.f32.mrb[70].mxu1 }
 0x94f   : > { %v10885_v44 = vpop.f32.mrb[71].mxu1  ;;  %v14919_v51 = vadd.f32 %v14828_v30, %v2541_v40 }
 0x952   : > { %v2546_v15 = vpop.f32.mrb[72].mxu1 }
 0x953   : > { %v10888_v54 = vpop.f32.mrb[73].mxu1  ;;  %v14922_v58 = vadd.f32 %v14833_v12, %v2546_v15 }
 0x956   : > { %v2551_v17 = vpop.f32.mrb[74].mxu1 }
 0x957   : > { %v10891_v18 = vpop.f32.mrb[75].mxu1  ;;  %v14925_v19 = vadd.f32 %v14841_v41, %v2551_v17 }
 0x95a   : > { %v2556_v47 = vpop.f32.mrb[76].mxu1 }
 0x95b   : > { %v10894_v49 = vpop.f32.mrb[77].mxu1  ;;  %v14928_v24 = vadd.f32 %v14849_v48, %v2556_v47 }
 0x95e   : > { %v2561_v7 = vpop.f32.mrb[78].mxu1 }
 0x95f   : > { %v10897_v22 = vpop.f32.mrb[79].mxu1  ;;  %v14931_v30 = vadd.f32 %v14857_v8, %v2561_v7 }
 0x962   : > { %v2566_v37 = vpop.f32.mrb[80].mxu1 }
 0x963   : > { %v10900_v61 = vpop.f32.mrb[81].mxu1  ;;  %v14934_v12 = vadd.f32 %v14865_v29, %v2566_v37 }
 0x966   : > { %v2571_v33 = vpop.f32.mrb[82].mxu1 }
 0x967   : > { %v10903_v52 = vpop.f32.mrb[83].mxu1  ;;  %v14937_v41 = vadd.f32 %v14873_v50, %v2571_v33 }
 0x96e   : > { %v2779_v59 = vpop.f32.mrb[84].mxu1 }
 0x96f   : > { %v10963_v25 = vpop.f32.mrb[85].mxu1  ;;  %11103 = vmatmul.mubr.msk.f32.vlgmr.msra.gmra.mrb[98].mxu0 %vm1388_vm2, %v2779_v59 }
 0x970   : > { %11105 = vmatprep.mubr.msk.f32.mxu0 %vm13881_vm1, %v13882_v32 }
 0x972   : > { %v2784_v48 = vpop.f32.mrb[86].mxu1 }
 0x973   : > { %v10966_v8 = vpop.f32.mrb[87].mxu1  ;;  %11106 = vmatmul.mubr.msk.f32.gmra.mrb[100].mxu0 %vm1388_vm2, %v2784_v48 }
 0x974   : > { %11108 = vmatprep.mubr.msk.f32.mxu0 %vm13881_vm1, %v13882_v32 }
 0x976   : > { %v2789_v29 = vpop.f32.mrb[88].mxu1 }
 0x977   : > { %v10969_v21 = vpop.f32.mrb[89].mxu1  ;;  %11109 = vmatmul.mubr.msk.f32.gmra.mrb[102].mxu0 %vm1388_vm2, %v2789_v29 }
 0x978   : > { %11111 = vmatprep.mubr.msk.f32.mxu0 %vm13881_vm1, %v13882_v32 }
 0x97a   : > { %v2794_v50 = vpop.f32.mrb[90].mxu1 }
 0x97b   : > { %v10972_v60 = vpop.f32.mrb[91].mxu1  ;;  %11112 = vmatmul.mubr.msk.f32.gmra.mrb[104].mxu0 %vm1388_vm2, %v2794_v50 }
 0x97c   : > { %11114 = vmatprep.mubr.msk.f32.mxu0 %vm13881_vm1, %v13882_v32 }
 0x97e   : > { %v2799_v63 = vpop.f32.mrb[92].mxu1 }
 0x97f   : > { %v10975_v11 = vpop.f32.mrb[93].mxu1  ;;  %11115 = vmatmul.mubr.msk.f32.gmra.mrb[106].mxu0 %vm1388_vm2, %v2799_v63 }
 0x980   : > { %11117 = vmatprep.mubr.msk.f32.mxu0 %vm13881_vm1, %v13882_v32 }
 0x982   : > { %v2804_v0 = vpop.f32.mrb[94].mxu1 }
 0x983   : > { %v10978_v55 = vpop.f32.mrb[95].mxu1  ;;  %11118 = vmatmul.mubr.msk.f32.gmra.mrb[108].mxu0 %vm1388_vm2, %v2804_v0 }
 0x984   : > { %11120 = vmatprep.mubr.msk.f32.mxu0 %vm13881_vm1, %v13882_v32 }
 0x986   : > { %v2809_v26 = vpop.f32.mrb[96].mxu1 }
 0x987   : > { %v10981_v1 = vpop.f32.mrb[97].mxu1  ;;  %11121 = vmatmul.mubr.msk.f32.gmra.mrb[110].mxu0 %vm1388_vm2, %v2809_v26 }
 0x988   : > { %11162 = vmatprep.mubr.msk.f32.mxu0 %vm13881_vm1, %v13882_v32 }
 0x98e   : > { %v3013_v36 = vpop.f32.mrb[98].mxu1 }
 0x98f   : > { %v11069_v56 = vpop.f32.mrb[99].mxu1 }
 0x992   : > { %v3018_v4 = vpop.f32.mrb[100].mxu1 }
 0x993   : > { %v12910_v2 = vpack.c.bf16 %v3018_v4, %v3013_v36  ;;  %v11072_v38 = vpop.f32.mrb[101].mxu1 }
 0x995   : > { %12911 = vmatpush3.bf16.msra.mxu1 %v12910_v2 }
 0x996   : > { %v3023_v9 = vpop.f32.mrb[102].mxu1  ;;  %12912 = vmatprep.subr.bf16.mxu1 %v13880_v10 }
 0x997   : > { %v11075_v34 = vpop.f32.mrb[103].mxu1 }
 0x99a   : > { %v3028_v3 = vpop.f32.mrb[104].mxu1 }
 0x99b   : > { %v12913_v35 = vpack.c.bf16 %v3028_v3, %v3023_v9  ;;  %v11078_v45 = vpop.f32.mrb[105].mxu1 }
 0x99d   : > { %12914 = vmatpush3.bf16.msra.mxu1 %v12913_v35 }
 0x99e   : > { %v3033_v39 = vpop.f32.mrb[106].mxu1  ;;  %12915 = vmatprep.subr.bf16.mxu1 %v13880_v10 }
 0x99f   : > { %v11081_v40 = vpop.f32.mrb[107].mxu1 }
 0x9a2   : > { %v3038_v44 = vpop.f32.mrb[108].mxu1 }
 0x9a3   : > { %v12916_v15 = vpack.c.bf16 %v3038_v44, %v3033_v39  ;;  %v11084_v54 = vpop.f32.mrb[109].mxu1 }
 0x9a5   : > { %12917 = vmatpush3.bf16.msra.mxu1 %v12916_v15 }
 0x9a6   : > { %v3043_v17 = vpop.f32.mrb[110].mxu1  ;;  %11135 = vmatprep.subr.mxu1 %v13882_v32 }
 0x9a7   : > { %v11087_v18 = vpop.f32.mrb[111].mxu1 }
 0x9a9   : > { %11136 = vmatpush3.msra.mxu1 %v3043_v17 }
 0x9aa   : > { %12921 = vmatprep.subr.bf16.mxu1 %v13880_v10 }
 0xa42   : > { %v3155_v47 = vpop.f32.mrb[98].mxu0 }
 0xa43   : > { %v11104_v49 = vpop.f32.mrb[99].mxu0  ;;  %v3189_v7 = vmul.f32 0.25, %v3155_v47 }
 0xa45   : > { %v3196_v22 = vsel %vm14461_vm4, %v3189_v7, -1e+30 }
 0xa46   : > { %v3160_v37 = vpop.f32.mrb[100].mxu0  ;;  %v3203_v61 = vsel %vm1545_vm5, %v3196_v22, -inf }
 0xa47   : > { %3204 = vmax.xlane.f32.xlu0 %v3203_v61  ;;  %v11107_v33 = vpop.f32.mrb[101].mxu0  ;;  %v3190_v52 = vmul.f32 0.25, %v3160_v37 }
 0xa49   : > { %v3197_v59 = vsel %vm14469_vm6, %v3190_v52, -1e+30 }
 0xa4a   : > { %v3165_v25 = vpop.f32.mrb[102].mxu0  ;;  %v3206_v48 = vsel %vm1545_vm5, %v3197_v59, -inf }
 0xa4b   : > { %3207 = vmax.xlane.f32.xlu1 %v3206_v48  ;;  %v11110_v8 = vpop.f32.mrb[103].mxu0  ;;  %v3191_v29 = vmul.f32 0.25, %v3165_v25 }
 0xa4d   : > { %v3198_v21 = vsel %vm14477_vm7, %v3191_v29, -1e+30 }
 0xa4e   : > { %v3170_v50 = vpop.f32.mrb[104].mxu0  ;;  %v3209_v60 = vsel %vm1545_vm5, %v3198_v21, -inf }
 0xa4f   : > { %3210 = vmax.xlane.f32.xlu0 %v3209_v60  ;;  %v11113_v63 = vpop.f32.mrb[105].mxu0  ;;  %v3192_v11 = vmul.f32 0.25, %v3170_v50 }
 0xa51   : > { %v3199_v0 = vsel %vm14485_vm8, %v3192_v11, -1e+30 }
 0xa52   : > { %v3175_v55 = vpop.f32.mrb[106].mxu0  ;;  %v3212_v26 = vsel %vm1545_vm5, %v3199_v0, -inf }
 0xa53   : > { %3213 = vmax.xlane.f32.xlu1 %v3212_v26  ;;  %v11116_v1 = vpop.f32.mrb[107].mxu0  ;;  %v3193_v36 = vmul.f32 0.25, %v3175_v55 }
 0xa55   : > { %v3200_v56 = vsel %vm14493_vm9, %v3193_v36, -1e+30 }
 0xa56   : > { %v3180_v4 = vpop.f32.mrb[108].mxu0  ;;  %v3215_v2 = vsel %vm1545_vm5, %v3200_v56, -inf }
 0xa57   : > { %v3194_v38 = vmul.f32 0.25, %v3180_v4  ;;  %3216 = vmax.xlane.f32.xlu0 %v3215_v2  ;;  %v11119_v9 = vpop.f32.mrb[109].mxu0 }
 0xa59   : > { %v3201_v34 = vsel %vm14501_vm10, %v3194_v38, -1e+30 }
 0xa5a   : > { %v3185_v3 = vpop.f32.mrb[110].mxu0  ;;  %v3218_v35 = vsel %vm1545_vm5, %v3201_v34, -inf }
 0xa5b   : > { %v3195_v45 = vmul.f32 0.25, %v3185_v3  ;;  %3219 = vmax.xlane.f32.xlu1 %v3218_v35  ;;  %v11122_v39 = vpop.f32.mrb[111].mxu0 }
 0xa5c   : > { %v9119_v39 = vld [vmem:[%s13921_s29 + $0x28] sm:$0xff] }
 0xa5d   : > { %v3202_v40 = vsel %vm14509_vm11, %v3195_v45, -1e+30  ;;  %v9118_v45 = vld [vmem:[%s13921_s29 + $0x20] sm:$0xff] }
 0xa5e   : > { %v3221_v44 = vsel %vm1545_vm5, %v3202_v40, -inf }
 0xa5f   : > { %3222 = vmax.xlane.f32.xlu0 %v3221_v44 }
 0xad4   : > { %v3205_v15 = vpop.xlane.xlu0 %3204 }
 0xad5   : > { %v3224_v54 = vsub.f32 %v3196_v22, %v3205_v15 }
 0xad7   : > { %v3231_v17 = vmul.f32 1.442695, %v3224_v54 }
 0xad8   : > { %v3208_v18 = vpop.xlane.xlu1 %3207 }
 0xad9   : > { %13584 = vpow2.f32 %v3231_v17  ;;  %v3225_v47 = vsub.f32 %v3197_v59, %v3208_v18  ;;  %v9127_v17 = vld [vmem:[%s13906_s17 + $0x180] sm:$0xff]  ;;  %v9128_v18 = vld [vmem:[%s13906_s17 + $0x188] sm:$0xff] }
 0xadb   : > { %v3233_v49 = vmul.f32 1.442695, %v3225_v47 }
 0xadc   : > { %v3211_v7 = vpop.xlane.xlu0 %3210 }
 0xadd   : > { %13586 = vpow2.f32 %v3233_v49  ;;  %v3226_v37 = vsub.f32 %v3198_v21, %v3211_v7  ;;  %v12922_v49 = vpack.c.bf16 %v9128_v18, %v9127_v17 }
 0xadf   : > { %v3235_v61 = vmul.f32 1.442695, %v3226_v37 }
 0xae0   : > { %v3214_v33 = vpop.xlane.xlu1 %3213 }
 0xae1   : > { %13588 = vpow2.f32 %v3235_v61  ;;  %v3227_v52 = vsub.f32 %v3199_v0, %v3214_v33  ;;  %v9129_v61 = vld [vmem:[%s13906_s17 + $0x190] sm:$0xff]  ;;  %v9130_v33 = vld [vmem:[%s13906_s17 + $0x198] sm:$0xff] }
 0xae3   : > { %v13585_v25 = vpop.eup %13584  ;;  %v3237_v48 = vmul.f32 1.442695, %v3227_v52 }
 0xae4   : > { %v3217_v8 = vpop.xlane.xlu0 %3216  ;;  %v3245_v29 = vsel %vm1545_vm5, %v13585_v25, 0.0 }
 0xae5   : > { %13590 = vpow2.f32 %v3237_v48  ;;  %v3228_v50 = vsub.f32 %v3200_v56, %v3217_v8  ;;  %3246 = vadd.xlane.f32.xlu1 %v3245_v29  ;;  %v12925_v48 = vpack.c.bf16 %v9130_v33, %v9129_v61  ;;  %v9162_v33 = vld [vmem:[%s13916_s25 + $0x198] sm:$0xff] }
 0xae7   : > { %v13587_v22 = vpop.eup %13586  ;;  %v3239_v60 = vmul.f32 1.442695, %v3228_v50  ;;  %v9131_v50 = vld [vmem:[%s13906_s17 + $0x1a0] sm:$0xff] }
 0xae8   : > { %v3220_v63 = vpop.xlane.xlu1 %3219  ;;  %v3248_v59 = vsel %vm1545_vm5, %v13587_v22, 0.0 }
 0xae9   : > { %13592 = vpow2.f32 %v3239_v60  ;;  %v3229_v11 = vsub.f32 %v3201_v34, %v3220_v63  ;;  %3249 = vadd.xlane.f32.xlu0 %v3248_v59 }
 0xaeb   : > { %v13589_v21 = vpop.eup %13588  ;;  %v3241_v55 = vmul.f32 1.442695, %v3229_v11 }
 0xaec   : > { %v3223_v26 = vpop.xlane.xlu0 %3222  ;;  %v3251_v0 = vsel %vm1545_vm5, %v13589_v21, 0.0 }
 0xaed   : > { %13594 = vpow2.f32 %v3241_v55  ;;  %v3230_v1 = vsub.f32 %v3202_v40, %v3223_v26  ;;  %3252 = vadd.xlane.f32.xlu1 %v3251_v0  ;;  %v12919_v40 = vpack.c.bf16 %v9119_v39, %v9118_v45  ;;  %v9133_v55 = vld [vmem:[%s13906_s17 + $0x1b0] sm:$0xff]  ;;  %v9134_v26 = vld [vmem:[%s13906_s17 + $0x1b8] sm:$0xff] }
 0xaee   : > { %v12931_v0 = vpack.c.bf16 %v9134_v26, %v9133_v55  ;;  %v9137_v45 = vld [vmem:[%s13906_s17 + $0x1d0] sm:$0xff]  ;;  %v9138_v39 = vld [vmem:[%s13906_s17 + $0x1d8] sm:$0xff] }
 0xaef   : > { %v14988_v36 = vpop.eup %13590  ;;  %v3243_v56 = vmul.f32 1.442695, %v3230_v1  ;;  %12920 = vmatpush3.bf16.msra.mxu0 %v12919_v40  ;;  %v12937_v40 = vpack.c.bf16 %v9138_v39, %v9137_v45  ;;  %v9169_v55 = vld [vmem:[%s13916_s25 + $0x1d0] sm:$0xff]  ;;  %v9170_v26 = vld [vmem:[%s13916_s25 + $0x1d8] sm:$0xff] }
 0xaf0   : > { %v3254_v4 = vsel %vm1545_vm5, %v14988_v36, 0.0  ;;  %12945 = vmatprep.subr.bf16.mxu0 %v13880_v10  ;;  %v9145_v39 = vld [vmem:[%s13911_s21 + $0x190] sm:$0xff] }
 0xaf1   : > { %13596 = vpow2.f32 %v3243_v56  ;;  %3255 = vadd.xlane.f32.xlu0 %v3254_v4  ;;  %v9135_v4 = vld [vmem:[%s13906_s17 + $0x1c0] sm:$0xff] }
 0xaf3   : > { %v14992_v2 = vpop.eup %13592 }
 0xaf4   : > { %v3257_v38 = vsel %vm1545_vm5, %v14992_v2, 0.0 }
 0xaf5   : > { %3258 = vadd.xlane.f32.xlu1 %v3257_v38 }
 0xaf7   : > { %v14996_v9 = vpop.eup %13594 }
 0xaf8   : > { %v3260_v34 = vsel %vm1545_vm5, %v14996_v9, 0.0 }
 0xaf9   : > { %3261 = vadd.xlane.f32.xlu0 %v3260_v34 }
 0xafb   : > { %v15000_v3 = vpop.eup %13596 }
 0xafc   : > { %v3263_v35 = vsel %vm1545_vm5, %v15000_v3, 0.0 }
 0xafd   : > { %3264 = vadd.xlane.f32.xlu1 %v3263_v35 }
 0xb72   : > { %v3247_v44 = vpop.xlane.xlu1 %3246 }
 0xb73   : > { %13598 = vrcp.f32 %v3247_v44 }
 0xb76   : > { %v3250_v15 = vpop.xlane.xlu0 %3249 }
 0xb77   : > { %13600 = vrcp.f32 %v3250_v15  ;;  %v9139_v15 = vld [vmem:[%s13906_s17 + $0x1e0] sm:$0xff] }
 0xb7a   : > { %v3253_v54 = vpop.xlane.xlu1 %3252 }
 0xb7b   : > { %13602 = vrcp.f32 %v3253_v54  ;;  %v9140_v54 = vld [vmem:[%s13906_s17 + $0x1e8] sm:$0xff] }
 0xb7c   : > { %v12940_v17 = vpack.c.bf16 %v9140_v54, %v9139_v15  ;;  %v9147_v54 = vld [vmem:[%s13911_s21 + $0x1a0] sm:$0xff] }
 0xb7d   : > { %v13599_v47 = vpop.eup %13598 }
 0xb7e   : > { %v3273_v7 = vmul.f32 %v13599_v47, %v13585_v25  ;;  %v3256_v37 = vpop.xlane.xlu0 %3255  ;;  %v9132_v25 = vld [vmem:[%s13906_s17 + $0x1a8] sm:$0xff]  ;;  %v9141_v47 = vld [vmem:[%s13906_s17 + $0x1f0] sm:$0xff] }
 0xb7f   : > { %13604 = vrcp.f32 %v3256_v37  ;;  %v12928_v63 = vpack.c.bf16 %v9132_v25, %v9131_v50  ;;  %v9160_v37 = vld [vmem:[%s13916_s25 + $0x188] sm:$0xff]  ;;  %v9165_v50 = vld [vmem:[%s13916_s25 + $0x1b0] sm:$0xff]  ;;  %v9166_v25 = vld [vmem:[%s13916_s25 + $0x1b8] sm:$0xff] }
 0xb80   : > { %11138 = vmatmul.mubr.msk.f32.vlgmr.msra.gmra.mrb[112].mxu1 %vm1545_vm5, %v3273_v7  ;;  %v9159_v7 = vld [vmem:[%s13916_s25 + $0x180] sm:$0xff] }
 0xb81   : > { %v13601_v52 = vpop.eup %13600  ;;  %12923 = vmatpush3.bf16.msra.mxu1 %v12922_v49  ;;  %11140 = vmatprep.mubr.msk.f32.mxu1 %vm13881_vm1, %v13882_v32  ;;  %v12970_v61 = vpack.c.bf16 %v9160_v37, %v9159_v7 }
 0xb82   : > { %v3259_v8 = vpop.xlane.xlu1 %3258  ;;  %12924 = vmatprep.subr.bf16.mxu1 %v13880_v10  ;;  %v3274_v29 = vmul.f32 %v13601_v52, %v13587_v22 }
 0xb83   : > { %13606 = vrcp.f32 %v3259_v8  ;;  %v9164_v8 = vld [vmem:[%s13916_s25 + $0x1a8] sm:$0xff] }
 0xb84   : > { %11141 = vmatmul.mubr.msk.f32.gmra.mrb[114].mxu1 %vm1545_vm5, %v3274_v29 }
 0xb85   : > { %v13603_v60 = vpop.eup %13602  ;;  %12926 = vmatpush3.bf16.msra.mxu1 %v12925_v48  ;;  %11143 = vmatprep.mubr.msk.f32.mxu1 %vm13881_vm1, %v13882_v32  ;;  %v9163_v48 = vld [vmem:[%s13916_s25 + $0x1a0] sm:$0xff] }
 0xb86   : > { %v3262_v59 = vpop.xlane.xlu0 %3261  ;;  %12927 = vmatprep.subr.bf16.mxu1 %v13880_v10  ;;  %v3275_v11 = vmul.f32 %v13603_v60, %v13589_v21  ;;  %v9136_v21 = vld [vmem:[%s13906_s17 + $0x1c8] sm:$0xff]  ;;  %v12976_v29 = vpack.c.bf16 %v9164_v8, %v9163_v48  ;;  %v12979_v60 = vpack.c.bf16 %v9166_v25, %v9165_v50  ;;  %v9154_v50 = vld [vmem:[%s13911_s21 + $0x1d8] sm:$0xff] }
 0xb87   : > { %13608 = vrcp.f32 %v3262_v59  ;;  %v12934_v34 = vpack.c.bf16 %v9136_v21, %v9135_v4  ;;  %v9168_v59 = vld [vmem:[%s13916_s25 + $0x1c8] sm:$0xff]  ;;  %v9173_v4 = vld [vmem:[%s13916_s25 + $0x1f0] sm:$0xff]  ;;  %v9174_v21 = vld [vmem:[%s13916_s25 + $0x1f8] sm:$0xff] }
 0xb88   : > { %11144 = vmatmul.mubr.msk.f32.gmra.mrb[116].mxu1 %vm1545_vm5, %v3275_v11 }
 0xb89   : > { %v13605_v22 = vpop.eup %13604  ;;  %12929 = vmatpush3.bf16.msra.mxu1 %v12928_v63  ;;  %11146 = vmatprep.mubr.msk.f32.mxu1 %vm13881_vm1, %v13882_v32  ;;  %v9167_v63 = vld [vmem:[%s13916_s25 + $0x1c0] sm:$0xff] }
 0xb8a   : > { %v3265_v1 = vpop.xlane.xlu1 %3264  ;;  %12930 = vmatprep.subr.bf16.mxu1 %v13880_v10  ;;  %v3276_v56 = vmul.f32 %v13605_v22, %v14988_v36  ;;  %v12982_v11 = vpack.c.bf16 %v9168_v59, %v9167_v63  ;;  %v12985_v22 = vpack.c.bf16 %v9170_v26, %v9169_v55  ;;  %v9155_v59 = vld [vmem:[%s13911_s21 + $0x1e0] sm:$0xff] }
 0xb8b   : > { %13610 = vrcp.f32 %v3265_v1  ;;  %v9172_v1 = vld [vmem:[%s13916_s25 + $0x1e8] sm:$0xff] }
 0xb8c   : > { %11147 = vmatmul.mubr.msk.f32.gmra.mrb[118].mxu1 %vm1545_vm5, %v3276_v56 }
 0xb8d   : > { %v13607_v38 = vpop.eup %13606  ;;  %12932 = vmatpush3.bf16.msra.mxu1 %v12931_v0  ;;  %11149 = vmatprep.mubr.msk.f32.mxu1 %vm13881_vm1, %v13882_v32  ;;  %v9171_v0 = vld [vmem:[%s13916_s25 + $0x1e0] sm:$0xff] }
 0xb8e   : > { %12933 = vmatprep.subr.bf16.mxu1 %v13880_v10  ;;  %v3277_v35 = vmul.f32 %v13607_v38, %v14992_v2  ;;  %v12988_v56 = vpack.c.bf16 %v9172_v1, %v9171_v0  ;;  %v12991_v38 = vpack.c.bf16 %v9174_v21, %v9173_v4  ;;  %v9157_v0 = vld [vmem:[%s13911_s21 + $0x1f0] sm:$0xff]  ;;  %v9158_v1 = vld [vmem:[%s13911_s21 + $0x1f8] sm:$0xff] }
 0xb8f   : > { %v12967_v21 = vpack.c.bf16 %v9158_v1, %v9157_v0 }
 0xb90   : > { %11150 = vmatmul.mubr.msk.f32.gmra.mrb[120].mxu1 %vm1545_vm5, %v3277_v35  ;;  %v9144_v35 = vld [vmem:[%s13911_s21 + $0x188] sm:$0xff] }
 0xb91   : > { %v13609_v36 = vpop.eup %13608  ;;  %12935 = vmatpush3.bf16.msra.mxu1 %v12934_v34  ;;  %11152 = vmatprep.mubr.msk.f32.mxu1 %vm13881_vm1, %v13882_v32  ;;  %v9143_v34 = vld [vmem:[%s13911_s21 + $0x180] sm:$0xff] }
 0xb92   : > { %12936 = vmatprep.subr.bf16.mxu1 %v13880_v10  ;;  %v3278_v44 = vmul.f32 %v13609_v36, %v14996_v9  ;;  %v9142_v9 = vld [vmem:[%s13906_s17 + $0x1f8] sm:$0xff]  ;;  %v12946_v45 = vpack.c.bf16 %v9144_v35, %v9143_v34 }
 0xb93   : > { %v12943_v49 = vpack.c.bf16 %v9142_v9, %v9141_v47  ;;  %v9146_v36 = vld [vmem:[%s13911_s21 + $0x198] sm:$0xff]  ;;  %v9149_v9 = vld [vmem:[%s13911_s21 + $0x1b0] sm:$0xff] }
 0xb94   : > { %11153 = vmatmul.mubr.msk.f32.gmra.mrb[122].mxu1 %vm1545_vm5, %v3278_v44  ;;  %v12949_v15 = vpack.c.bf16 %v9146_v36, %v9145_v39 }
 0xb95   : > { %v13611_v2 = vpop.eup %13610  ;;  %12938 = vmatpush3.bf16.msra.mxu1 %v12937_v40  ;;  %11155 = vmatprep.mubr.msk.f32.mxu1 %vm13881_vm1, %v13882_v32 }
 0xb96   : > { %12939 = vmatprep.subr.bf16.mxu1 %v13880_v10  ;;  %v3279_v18 = vmul.f32 %v13611_v2, %v15000_v3  ;;  %v9161_v3 = vld [vmem:[%s13916_s25 + $0x190] sm:$0xff]  ;;  %v9148_v2 = vld [vmem:[%s13911_s21 + $0x1a8] sm:$0xff] }
 0xb97   : > { %v12973_v52 = vpack.c.bf16 %v9162_v33, %v9161_v3  ;;  %v12952_v47 = vpack.c.bf16 %v9148_v2, %v9147_v54  ;;  %v9151_v3 = vld [vmem:[%s13911_s21 + $0x1c0] sm:$0xff]  ;;  %v9152_v33 = vld [vmem:[%s13911_s21 + $0x1c8] sm:$0xff] }
 0xb98   : > { %11156 = vmatmul.mubr.msk.f32.gmra.mrb[124].mxu1 %vm1545_vm5, %v3279_v18  ;;  %v12958_v8 = vpack.c.bf16 %v9152_v33, %v9151_v3 }
 0xb99   : > { %12941 = vmatpush3.bf16.msra.mxu1 %v12940_v17  ;;  %11215 = vmatprep.mubr.msk.f32.mxu1 %vm13881_vm1, %v13882_v32 }
 0xb9a   : > { %12942 = vmatprep.subr.bf16.mxu1 %v13880_v10 }
 0xb9d   : > { %12944 = vmatpush3.bf16.msra.mxu1 %v12943_v49  ;;  %v9150_v49 = vld [vmem:[%s13911_s21 + $0x1b8] sm:$0xff] }
 0xb9e   : > { %12969 = vmatprep.subr.bf16.mxu1 %v13880_v10 }
 0xba0   : > { %11216 = vmatmul.mubr.f32.vlgmr.msra.gmra.mrb[126].mxu1 %v14192_v6 }
 0xba1   : > { %12971 = vmatpush3.bf16.msra.mxu1 %v12970_v61  ;;  %11218 = vmatprep.mubr.msk.f32.mxu1 %vm13881_vm1, %v13882_v32  ;;  %v12955_v61 = vpack.c.bf16 %v9150_v49, %v9149_v9 }
 0xba2   : > { %12972 = vmatprep.subr.bf16.mxu1 %v13880_v10 }
 0xba4   : > { %11219 = vmatmul.mubr.f32.gmra.mrb[128].mxu1 %v14208_v14 }
 0xba5   : > { %12974 = vmatpush3.bf16.msra.mxu1 %v12973_v52  ;;  %11221 = vmatprep.mubr.msk.f32.mxu1 %vm13881_vm1, %v13882_v32 }
 0xba6   : > { %12975 = vmatprep.subr.bf16.mxu1 %v13880_v10 }
 0xba8   : > { %11222 = vmatmul.mubr.f32.gmra.mrb[130].mxu1 %v14218_v20 }
 0xba9   : > { %12977 = vmatpush3.bf16.msra.mxu1 %v12976_v29  ;;  %11224 = vmatprep.mubr.msk.f32.mxu1 %vm13881_vm1, %v13882_v32  ;;  %v9153_v29 = vld [vmem:[%s13911_s21 + $0x1d0] sm:$0xff] }
 0xbaa   : > { %12978 = vmatprep.subr.bf16.mxu1 %v13880_v10  ;;  %v12961_v63 = vpack.c.bf16 %v9154_v50, %v9153_v29 }
 0xbac   : > { %11225 = vmatmul.mubr.f32.gmra.mrb[132].mxu1 %v14233_v28 }
 0xbad   : > { %12980 = vmatpush3.bf16.msra.mxu1 %v12979_v60  ;;  %11227 = vmatprep.mubr.msk.f32.mxu1 %vm13881_vm1, %v13882_v32 }
 0xbae   : > { %12981 = vmatprep.subr.bf16.mxu1 %v13880_v10 }
 0xbb0   : > { %11228 = vmatmul.mubr.f32.gmra.mrb[134].mxu1 %v14246_v57 }
 0xbb1   : > { %12983 = vmatpush3.bf16.msra.mxu1 %v12982_v11  ;;  %11230 = vmatprep.mubr.msk.f32.mxu1 %vm13881_vm1, %v13882_v32  ;;  %v9156_v11 = vld [vmem:[%s13911_s21 + $0x1e8] sm:$0xff] }
 0xbb2   : > { %12984 = vmatprep.subr.bf16.mxu1 %v13880_v10 }
 0xbb4   : > { %11231 = vmatmul.mubr.f32.gmra.mrb[136].mxu1 %v14261_v42 }
 0xbb5   : > { %12986 = vmatpush3.bf16.msra.mxu1 %v12985_v22  ;;  %11233 = vmatprep.mubr.msk.f32.mxu1 %vm13881_vm1, %v13882_v32  ;;  %v12964_v22 = vpack.c.bf16 %v9156_v11, %v9155_v59 }
 0xbb6   : > { %12987 = vmatprep.subr.bf16.mxu1 %v13880_v10 }
 0xbb8   : > { %11234 = vmatmul.mubr.f32.gmra.mrb[138].mxu1 %v14273_v46 }
 0xbb9   : > { %12989 = vmatpush3.bf16.msra.mxu1 %v12988_v56  ;;  %11321 = vmatprep.mubr.msk.f32.mxu1 %vm13881_vm1, %v13882_v32 }
 0xbba   : > { %12990 = vmatprep.subr.bf16.mxu1 %v13880_v10 }
 0xbbd   : > { %12992 = vmatpush3.bf16.msra.mxu1 %v12991_v38 }
 0xbbe   : > { %13014 = vmatprep.subr.bf16.mxu1 %v13880_v10 }
 0xbc0   : > { %11322 = vmatmul.mubr.f32.vlgmr.msra.gmra.mrb[140].mxu1 %v14192_v6 }
 0xbc1   : > { %11324 = vmatprep.mubr.msk.f32.mxu1 %vm13881_vm1, %v13882_v32 }
 0xbc4   : > { %11325 = vmatmul.mubr.f32.gmra.mrb[142].mxu1 %v14208_v14 }
 0xbc5   : > { %11327 = vmatprep.mubr.msk.f32.mxu1 %vm13881_vm1, %v13882_v32 }
 0xbc8   : > { %11328 = vmatmul.mubr.f32.gmra.mrb[144].mxu1 %v14218_v20 }
 0xbc9   : > { %11330 = vmatprep.mubr.msk.f32.mxu1 %vm13881_vm1, %v13882_v32 }
 0xbcc   : > { %11331 = vmatmul.mubr.f32.gmra.mrb[146].mxu1 %v14233_v28 }
 0xbcd   : > { %11333 = vmatprep.mubr.msk.f32.mxu1 %vm13881_vm1, %v13882_v32 }
 0xbd0   : > { %11334 = vmatmul.mubr.f32.gmra.mrb[148].mxu1 %v14246_v57 }
 0xbd1   : > { %11336 = vmatprep.mubr.msk.f32.mxu1 %vm13881_vm1, %v13882_v32 }
 0xbd4   : > { %11337 = vmatmul.mubr.f32.gmra.mrb[150].mxu1 %v14261_v42 }
 0xbd5   : > { %11339 = vmatprep.mubr.msk.f32.mxu1 %vm13881_vm1, %v13882_v32 }
 0xbd8   : > { %11340 = vmatmul.mubr.f32.gmra.mrb[152].mxu1 %v14273_v46 }
 0xbd9   : > { %11416 = vmatprep.mubr.msk.f32.mxu1 %vm13881_vm1, %v13882_v32 }
 0xc53   : > { %v3367_v40 = vpop.f32.mrb[112].mxu1 }
 0xc54   : > { %v11139_v44 = vpop.f32.mrb[113].mxu1  ;;  %11163 = vmatmul.mubr.msk.f32.vlgmr.msra.gmra.mrb[112].mxu0 %vm1388_vm2, %v3367_v40 }
 0xc55   : > { %12947 = vmatpush3.bf16.msra.mxu0 %v12946_v45  ;;  %11165 = vmatprep.mubr.msk.f32.mxu0 %vm13881_vm1, %v13882_v32 }
 0xc56   : > { %12948 = vmatprep.subr.bf16.mxu0 %v13880_v10 }
 0xc57   : > { %v3372_v17 = vpop.f32.mrb[114].mxu1 }
 0xc58   : > { %v11142_v18 = vpop.f32.mrb[115].mxu1  ;;  %11166 = vmatmul.mubr.msk.f32.gmra.mrb[114].mxu0 %vm1388_vm2, %v3372_v17 }
 0xc59   : > { %12950 = vmatpush3.bf16.msra.mxu0 %v12949_v15  ;;  %11168 = vmatprep.mubr.msk.f32.mxu0 %vm13881_vm1, %v13882_v32 }
 0xc5a   : > { %12951 = vmatprep.subr.bf16.mxu0 %v13880_v10 }
 0xc5b   : > { %v3377_v7 = vpop.f32.mrb[116].mxu1 }
 0xc5c   : > { %v11145_v37 = vpop.f32.mrb[117].mxu1  ;;  %11169 = vmatmul.mubr.msk.f32.gmra.mrb[116].mxu0 %vm1388_vm2, %v3377_v7 }
 0xc5d   : > { %12953 = vmatpush3.bf16.msra.mxu0 %v12952_v47  ;;  %11171 = vmatprep.mubr.msk.f32.mxu0 %vm13881_vm1, %v13882_v32 }
 0xc5e   : > { %12954 = vmatprep.subr.bf16.mxu0 %v13880_v10 }
 0xc5f   : > { %v3382_v52 = vpop.f32.mrb[118].mxu1 }
 0xc60   : > { %v11148_v48 = vpop.f32.mrb[119].mxu1  ;;  %11172 = vmatmul.mubr.msk.f32.gmra.mrb[118].mxu0 %vm1388_vm2, %v3382_v52 }
 0xc61   : > { %12956 = vmatpush3.bf16.msra.mxu0 %v12955_v61  ;;  %11174 = vmatprep.mubr.msk.f32.mxu0 %vm13881_vm1, %v13882_v32 }
 0xc62   : > { %12957 = vmatprep.subr.bf16.mxu0 %v13880_v10 }
 0xc63   : > { %v3387_v25 = vpop.f32.mrb[120].mxu1 }
 0xc64   : > { %v11151_v60 = vpop.f32.mrb[121].mxu1  ;;  %11175 = vmatmul.mubr.msk.f32.gmra.mrb[120].mxu0 %vm1388_vm2, %v3387_v25 }
 0xc65   : > { %12959 = vmatpush3.bf16.msra.mxu0 %v12958_v8  ;;  %11177 = vmatprep.mubr.msk.f32.mxu0 %vm13881_vm1, %v13882_v32 }
 0xc66   : > { %12960 = vmatprep.subr.bf16.mxu0 %v13880_v10 }
 0xc67   : > { %v3392_v55 = vpop.f32.mrb[122].mxu1 }
 0xc68   : > { %v11154_v26 = vpop.f32.mrb[123].mxu1  ;;  %11178 = vmatmul.mubr.msk.f32.gmra.mrb[122].mxu0 %vm1388_vm2, %v3392_v55 }
 0xc69   : > { %12962 = vmatpush3.bf16.msra.mxu0 %v12961_v63  ;;  %11180 = vmatprep.mubr.msk.f32.mxu0 %vm13881_vm1, %v13882_v32 }
 0xc6a   : > { %12963 = vmatprep.subr.bf16.mxu0 %v13880_v10 }
 0xc6b   : > { %v3397_v56 = vpop.f32.mrb[124].mxu1 }
 0xc6c   : > { %v11157_v4 = vpop.f32.mrb[125].mxu1  ;;  %11181 = vmatmul.mubr.msk.f32.gmra.mrb[124].mxu0 %vm1388_vm2, %v3397_v56 }
 0xc6d   : > { %12965 = vmatpush3.bf16.msra.mxu0 %v12964_v22  ;;  %11268 = vmatprep.mubr.msk.f32.mxu0 %vm13881_vm1, %v13882_v32 }
 0xc6e   : > { %12966 = vmatprep.subr.bf16.mxu0 %v13880_v10 }
 0xc71   : > { %12968 = vmatpush3.bf16.msra.mxu0 %v12967_v21 }
 0xc72   : > { %12993 = vmatprep.subr.bf16.mxu0 %v13880_v10 }
 0xc73   : > { %v15167_v38 = vpop.f32.mrb[126].mxu1 }
 0xc74   : > { %v11217_v34 = vpop.f32.mrb[127].mxu1  ;;  %11269 = vmatmul.mubr.f32.vlgmr.msra.gmra.mrb[126].mxu0 %v14192_v6 }
 0xc75   : > { %11271 = vmatprep.mubr.msk.f32.mxu0 %vm13881_vm1, %v13882_v32 }
 0xc77   : > { %v15172_v35 = vpop.f32.mrb[128].mxu1 }
 0xc78   : > { %v11220_v45 = vpop.f32.mrb[129].mxu1  ;;  %11272 = vmatmul.mubr.f32.gmra.mrb[128].mxu0 %v14208_v14 }
 0xc79   : > { %11274 = vmatprep.mubr.msk.f32.mxu0 %vm13881_vm1, %v13882_v32 }
 0xc7b   : > { %v15177_v39 = vpop.f32.mrb[130].mxu1 }
 0xc7c   : > { %v11223_v36 = vpop.f32.mrb[131].mxu1  ;;  %11275 = vmatmul.mubr.f32.gmra.mrb[130].mxu0 %v14218_v20 }
 0xc7d   : > { %11277 = vmatprep.mubr.msk.f32.mxu0 %vm13881_vm1, %v13882_v32 }
 0xc7f   : > { %v15182_v6 = vpop.f32.mrb[132].mxu1 }
 0xc80   : > { %v11226_v40 = vpop.f32.mrb[133].mxu1  ;;  %11278 = vmatmul.mubr.f32.gmra.mrb[132].mxu0 %v14233_v28 }
 0xc81   : > { %11280 = vmatprep.mubr.msk.f32.mxu0 %vm13881_vm1, %v13882_v32 }
 0xc83   : > { %v15187_v14 = vpop.f32.mrb[134].mxu1 }
 0xc84   : > { %v11229_v44 = vpop.f32.mrb[135].mxu1  ;;  %11281 = vmatmul.mubr.f32.gmra.mrb[134].mxu0 %v14246_v57 }
 0xc85   : > { %11283 = vmatprep.mubr.msk.f32.mxu0 %vm13881_vm1, %v13882_v32 }
 0xc87   : > { %v15192_v20 = vpop.f32.mrb[136].mxu1 }
 0xc88   : > { %v11232_v15 = vpop.f32.mrb[137].mxu1  ;;  %11284 = vmatmul.mubr.f32.gmra.mrb[136].mxu0 %v14261_v42 }
 0xc89   : > { %11286 = vmatprep.mubr.msk.f32.mxu0 %vm13881_vm1, %v13882_v32 }
 0xc8b   : > { %v15197_v28 = vpop.f32.mrb[138].mxu1 }
 0xc8c   : > { %v11235_v54 = vpop.f32.mrb[139].mxu1  ;;  %11287 = vmatmul.mubr.f32.gmra.mrb[138].mxu0 %v14273_v46 }
 0xc8d   : > { %11356 = vmatprep.mubr.msk.f32.mxu0 %vm13881_vm1, %v13882_v32 }
 0xc93   : > { %v15202_v57 = vpop.f32.mrb[140].mxu1 }
 0xc94   : > { %v11323_v2 = vpop.f32.mrb[141].mxu1 }
 0xc97   : > { %v3854_v17 = vpop.f32.mrb[142].mxu1 }
 0xc98   : > { %v13006_v18 = vpack.c.bf16 %v3854_v17, %v15202_v57  ;;  %v11326_v47 = vpop.f32.mrb[143].mxu1 }
 0xc9b   : > { %v15205_v9 = vpop.f32.mrb[144].mxu1 }
 0xc9c   : > { %v11329_v42 = vpop.f32.mrb[145].mxu1 }
 0xc9f   : > { %v3864_v49 = vpop.f32.mrb[146].mxu1 }
 0xca0   : > { %v13009_v7 = vpack.c.bf16 %v3864_v49, %v15205_v9  ;;  %v11332_v37 = vpop.f32.mrb[147].mxu1 }
 0xca3   : > { %v3869_v61 = vpop.f32.mrb[148].mxu1 }
 0xca4   : > { %v11335_v3 = vpop.f32.mrb[149].mxu1 }
 0xca7   : > { %v3874_v46 = vpop.f32.mrb[150].mxu1 }
 0xca8   : > { %v13012_v33 = vpack.c.bf16 %v3874_v46, %v3869_v61  ;;  %v11338_v52 = vpop.f32.mrb[151].mxu1 }
 0xcab   : > { %v3879_v48 = vpop.f32.mrb[152].mxu1 }
 0xcac   : > { %v11341_v8 = vpop.f32.mrb[153].mxu1 }
 0xd27   : > { %v3491_v29 = vpop.f32.mrb[112].mxu0 }
 0xd28   : > { %v15209_v50 = vadd.f32 %v3491_v29, %v14919_v51  ;;  %v11164_v25 = vpop.f32.mrb[113].mxu0 }
 0xd2b   : > { %v3496_v60 = vpop.f32.mrb[114].mxu0 }
 0xd2c   : > { %v15212_v63 = vadd.f32 %v3496_v60, %v14922_v58  ;;  %v11167_v59 = vpop.f32.mrb[115].mxu0 }
 0xd2f   : > { %v3501_v11 = vpop.f32.mrb[116].mxu0 }
 0xd30   : > { %v15215_v55 = vadd.f32 %v3501_v11, %v14925_v19  ;;  %v11170_v26 = vpop.f32.mrb[117].mxu0 }
 0xd33   : > { %v3506_v22 = vpop.f32.mrb[118].mxu0 }
 0xd34   : > { %v15218_v0 = vadd.f32 %v3506_v22, %v14928_v24  ;;  %v11173_v1 = vpop.f32.mrb[119].mxu0 }
 0xd37   : > { %v3511_v56 = vpop.f32.mrb[120].mxu0 }
 0xd38   : > { %v15221_v51 = vadd.f32 %v3511_v56, %v14931_v30  ;;  %v11176_v4 = vpop.f32.mrb[121].mxu0 }
 0xd3b   : > { %v3516_v21 = vpop.f32.mrb[122].mxu0 }
 0xd3c   : > { %v15224_v58 = vadd.f32 %v3516_v21, %v14934_v12  ;;  %v11179_v34 = vpop.f32.mrb[123].mxu0 }
 0xd3f   : > { %v3521_v45 = vpop.f32.mrb[124].mxu0 }
 0xd40   : > { %v15227_v19 = vadd.f32 %v3521_v45, %v14937_v41  ;;  %v11182_v36 = vpop.f32.mrb[125].mxu0 }
 0xd47   : > { %v3732_v40 = vpop.f32.mrb[126].mxu0 }
 0xd48   : > { %v11270_v44 = vpop.f32.mrb[127].mxu0 }
 0xd4b   : > { %v3737_v24 = vpop.f32.mrb[128].mxu0 }
 0xd4c   : > { %v12994_v15 = vpack.c.bf16 %v3737_v24, %v3732_v40  ;;  %v11273_v54 = vpop.f32.mrb[129].mxu0 }
 0xd4e   : > { %12996 = vmatpush3.bf16.xpose.msk.msra.mxu0 %vm14401_vm3, %v12994_v15 }
 0xd4f   : > { %v3742_v30 = vpop.f32.mrb[130].mxu0  ;;  %12997 = vmatprep.subr.bf16.mxu0 %v13880_v10 }
 0xd50   : > { %v11276_v57 = vpop.f32.mrb[131].mxu0 }
 0xd53   : > { %v3747_v12 = vpop.f32.mrb[132].mxu0 }
 0xd54   : > { %v12998_v2 = vpack.c.bf16 %v3747_v12, %v3742_v30  ;;  %v11279_v17 = vpop.f32.mrb[133].mxu0 }
 0xd56   : > { %13000 = vmatpush3.bf16.xpose.msk.msra.mxu0 %vm14401_vm3, %v12998_v2 }
 0xd57   : > { %v3752_v41 = vpop.f32.mrb[134].mxu0  ;;  %13001 = vmatprep.subr.bf16.mxu0 %v13880_v10 }
 0xd58   : > { %v11282_v47 = vpop.f32.mrb[135].mxu0 }
 0xd5b   : > { %v3757_v9 = vpop.f32.mrb[136].mxu0 }
 0xd5c   : > { %v13002_v42 = vpack.c.bf16 %v3757_v9, %v3752_v41  ;;  %v11285_v49 = vpop.f32.mrb[137].mxu0 }
 0xd5e   : > { %13004 = vmatpush3.bf16.xpose.msk.msra.mxu0 %vm14401_vm3, %v13002_v42 }
 0xd5f   : > { %v3762_v37 = vpop.f32.mrb[138].mxu0  ;;  %11354 = vmatprep.subr.mxu0 %v13882_v32 }
 0xd60   : > { %v11288_v61 = vpop.f32.mrb[139].mxu0 }
 0xd66   : > { %11355 = vmatpush3.xpose.msk.msra.mxu0 %vm1388_vm2, %v3762_v37 }
 0xd67   : > { %13005 = vmatprep.subr.bf16.mxu0 %v13880_v10 }
 0xd69   : > { %11357 = vmatmul.mubr.msk.f32.vlgmr.msra.gmra.mrb[140].mxu0 %vm1388_vm2, %v15167_v38 }
 0xd6a   : > { %13007 = vmatpush3.bf16.msra.mxu0 %v13006_v18  ;;  %11359 = vmatprep.mubr.msk.f32.mxu0 %vm13881_vm1, %v13882_v32 }
 0xd6b   : > { %13008 = vmatprep.subr.bf16.mxu0 %v13880_v10 }
 0xd6d   : > { %11360 = vmatmul.mubr.msk.f32.gmra.mrb[142].mxu0 %vm1388_vm2, %v15172_v35 }
 0xd6e   : > { %13010 = vmatpush3.bf16.msra.mxu0 %v13009_v7  ;;  %11362 = vmatprep.mubr.msk.f32.mxu0 %vm13881_vm1, %v13882_v32 }
 0xd6f   : > { %13011 = vmatprep.subr.bf16.mxu0 %v13880_v10 }
 0xd71   : > { %11363 = vmatmul.mubr.msk.f32.gmra.mrb[144].mxu0 %vm1388_vm2, %v15177_v39 }
 0xd72   : > { %13013 = vmatpush3.bf16.msra.mxu0 %v13012_v33  ;;  %11365 = vmatprep.mubr.msk.f32.mxu0 %vm13881_vm1, %v13882_v32 }
 0xd73   : > { %11389 = vmatprep.subr.mxu0 %v13882_v32 }
 0xd75   : > { %11366 = vmatmul.mubr.msk.f32.gmra.mrb[146].mxu0 %vm1388_vm2, %v15182_v6 }
 0xd76   : > { %11390 = vmatpush3.msra.mxu0 %v3879_v48  ;;  %11368 = vmatprep.mubr.msk.f32.mxu0 %vm13881_vm1, %v13882_v32 }
 0xd77   : > { %13017 = vmatprep.subr.bf16.mxu0 %v13880_v10 }
 0xd79   : > { %11369 = vmatmul.mubr.msk.f32.gmra.mrb[148].mxu0 %vm1388_vm2, %v15187_v14 }
 0xd7a   : > { %11371 = vmatprep.mubr.msk.f32.mxu0 %vm13881_vm1, %v13882_v32 }
 0xd7d   : > { %11372 = vmatmul.mubr.msk.f32.gmra.mrb[150].mxu0 %vm1388_vm2, %v15192_v20 }
 0xd7e   : > { %11374 = vmatprep.mubr.msk.f32.mxu0 %vm13881_vm1, %v13882_v32 }
 0xd81   : > { %11375 = vmatmul.mubr.msk.f32.gmra.mrb[152].mxu0 %vm1388_vm2, %v15197_v28 }
 0xd82   : > { %11391 = vmatprep.mubr.msk.f32.mxu0 %vm13881_vm1, %v13882_v32 }
 0xe3c   : > { %v3991_v38 = vpop.f32.mrb[140].mxu0 }
 0xe3d   : > { %v4025_v35 = vmul.f32 0.25, %v3991_v38  ;;  %v11358_v39 = vpop.f32.mrb[141].mxu0 }
 0xe3f   : > { %v4032_v6 = vsel %vm14461_vm4, %v4025_v35, -1e+30 }
 0xe40   : > { %v3996_v14 = vpop.f32.mrb[142].mxu0  ;;  %v4039_v18 = vsel %vm1545_vm5, %v4032_v6, -inf }
 0xe41   : > { %v4026_v7 = vmul.f32 0.25, %v3996_v14  ;;  %4040 = vmax.xlane.f32.xlu0 %v4039_v18  ;;  %v11361_v20 = vpop.f32.mrb[143].mxu0 }
 0xe43   : > { %v4033_v3 = vsel %vm14469_vm6, %v4026_v7, -1e+30 }
 0xe44   : > { %v4001_v46 = vpop.f32.mrb[144].mxu0  ;;  %v4042_v28 = vsel %vm1545_vm5, %v4033_v3, -inf }
 0xe45   : > { %v4027_v33 = vmul.f32 0.25, %v4001_v46  ;;  %4043 = vmax.xlane.f32.xlu1 %v4042_v28  ;;  %v11364_v52 = vpop.f32.mrb[145].mxu0 }
 0xe47   : > { %v4034_v48 = vsel %vm14477_vm7, %v4027_v33, -1e+30 }
 0xe48   : > { %v4006_v8 = vpop.f32.mrb[146].mxu0  ;;  %v4045_v29 = vsel %vm1545_vm5, %v4034_v48, -inf }
 0xe49   : > { %v4028_v25 = vmul.f32 0.25, %v4006_v8  ;;  %4046 = vmax.xlane.f32.xlu0 %v4045_v29  ;;  %v11367_v60 = vpop.f32.mrb[147].mxu0 }
 0xe4b   : > { %v4035_v59 = vsel %vm14485_vm8, %v4028_v25, -1e+30 }
 0xe4c   : > { %v4011_v11 = vpop.f32.mrb[148].mxu0  ;;  %v4048_v26 = vsel %vm1545_vm5, %v4035_v59, -inf }
 0xe4d   : > { %v4029_v22 = vmul.f32 0.25, %v4011_v11  ;;  %4049 = vmax.xlane.f32.xlu1 %v4048_v26  ;;  %v11370_v1 = vpop.f32.mrb[149].mxu0 }
 0xe4f   : > { %v4036_v56 = vsel %vm14493_vm9, %v4029_v22, -1e+30 }
 0xe50   : > { %v4016_v4 = vpop.f32.mrb[150].mxu0  ;;  %v4051_v21 = vsel %vm1545_vm5, %v4036_v56, -inf }
 0xe51   : > { %v4030_v34 = vmul.f32 0.25, %v4016_v4  ;;  %4052 = vmax.xlane.f32.xlu0 %v4051_v21  ;;  %v11373_v45 = vpop.f32.mrb[151].mxu0  ;;  %v9196_v4 = vld [vmem:[%s13921_s29 + $0x30] sm:$0xff]  ;;  %v9197_v21 = vld [vmem:[%s13921_s29 + $0x38] sm:$0xff] }
 0xe53   : > { %v4037_v36 = vsel %vm14501_vm10, %v4030_v34, -1e+30  ;;  %v13015_v34 = vpack.c.bf16 %v9197_v21, %v9196_v4 }
 0xe54   : > { %v4021_v40 = vpop.f32.mrb[152].mxu0  ;;  %v4054_v44 = vsel %vm1545_vm5, %v4037_v36, -inf }
 0xe55   : > { %v4031_v24 = vmul.f32 0.25, %v4021_v40  ;;  %4055 = vmax.xlane.f32.xlu1 %v4054_v44  ;;  %v11376_v15 = vpop.f32.mrb[153].mxu0  ;;  %13016 = vmatpush3.bf16.msra.mxu1 %v13015_v34  ;;  %v13837_v34 = vld [vmem:[%s14052_s11 + $0x8] sm:$0xff] }
 0xe56   : > { %13041 = vmatprep.subr.bf16.mxu1 %v13880_v10 }
 0xe57   : > { %v4038_v54 = vsel %vm14509_vm11, %v4031_v24, -1e+30 }
 0xe58   : > { %v4057_v30 = vsel %vm1545_vm5, %v4038_v54, -inf }
 0xe59   : > { %4058 = vmax.xlane.f32.xlu0 %v4057_v30 }
 0xece   : > { %v4041_v57 = vpop.xlane.xlu0 %4040 }
 0xecf   : > { %v4060_v12 = vsub.f32 %v4032_v6, %v4041_v57 }
 0xed1   : > { %v4067_v2 = vmul.f32 1.442695, %v4060_v12 }
 0xed2   : > { %v4044_v17 = vpop.xlane.xlu1 %4043 }
 0xed3   : > { %13612 = vpow2.f32 %v4067_v2  ;;  %v4061_v41 = vsub.f32 %v4033_v3, %v4044_v17 }
 0xed5   : > { %v4069_v47 = vmul.f32 1.442695, %v4061_v41 }
 0xed6   : > { %v4047_v9 = vpop.xlane.xlu0 %4046 }
 0xed7   : > { %13614 = vpow2.f32 %v4069_v47  ;;  %v4062_v42 = vsub.f32 %v4034_v48, %v4047_v9 }
 0xed9   : > { %v4071_v49 = vmul.f32 1.442695, %v4062_v42 }
 0xeda   : > { %v4050_v37 = vpop.xlane.xlu1 %4049 }
 0xedb   : > { %13616 = vpow2.f32 %v4071_v49  ;;  %v4063_v61 = vsub.f32 %v4035_v59, %v4050_v37 }
 0xedd   : > { %v13613_v38 = vpop.eup %13612  ;;  %v4073_v35 = vmul.f32 1.442695, %v4063_v61 }
 0xede   : > { %v4053_v39 = vpop.xlane.xlu0 %4052  ;;  %v4081_v14 = vsel %vm1545_vm5, %v13613_v38, 0.0 }
 0xedf   : > { %13618 = vpow2.f32 %v4073_v35  ;;  %v4064_v18 = vsub.f32 %v4036_v56, %v4053_v39  ;;  %4082 = vadd.xlane.f32.xlu1 %v4081_v14 }
 0xee1   : > { %v13615_v6 = vpop.eup %13614  ;;  %v4075_v7 = vmul.f32 1.442695, %v4064_v18 }
 0xee2   : > { %v4056_v20 = vpop.xlane.xlu1 %4055  ;;  %v4084_v3 = vsel %vm1545_vm5, %v13615_v6, 0.0 }
 0xee3   : > { %13620 = vpow2.f32 %v4075_v7  ;;  %v4065_v46 = vsub.f32 %v4037_v36, %v4056_v20  ;;  %4085 = vadd.xlane.f32.xlu0 %v4084_v3 }
 0xee5   : > { %v13617_v28 = vpop.eup %13616  ;;  %v4077_v33 = vmul.f32 1.442695, %v4065_v46 }
 0xee6   : > { %v4059_v52 = vpop.xlane.xlu0 %4058  ;;  %v4087_v48 = vsel %vm1545_vm5, %v13617_v28, 0.0 }
 0xee7   : > { %13622 = vpow2.f32 %v4077_v33  ;;  %v4066_v8 = vsub.f32 %v4038_v54, %v4059_v52  ;;  %4088 = vadd.xlane.f32.xlu1 %v4087_v48 }
 0xee9   : > { %v13619_v29 = vpop.eup %13618  ;;  %v4079_v25 = vmul.f32 1.442695, %v4066_v8 }
 0xeea   : > { %v4090_v60 = vsel %vm1545_vm5, %v13619_v29, 0.0 }
 0xeeb   : > { %13624 = vpow2.f32 %v4079_v25  ;;  %4091 = vadd.xlane.f32.xlu0 %v4090_v60 }
 0xeed   : > { %v13621_v59 = vpop.eup %13620 }
 0xeee   : > { %v4093_v11 = vsel %vm1545_vm5, %v13621_v59, 0.0 }
 0xeef   : > { %4094 = vadd.xlane.f32.xlu1 %v4093_v11  ;;  %v9205_v11 = vld [vmem:[%s13926_s3] ss:$0 sm:$0xff] }
 0xef1   : > { %v13623_v26 = vpop.eup %13622 }
 0xef2   : > { %v4096_v22 = vsel %vm1545_vm5, %v13623_v26, 0.0 }
 0xef3   : > { %4097 = vadd.xlane.f32.xlu0 %v4096_v22 }
 0xef5   : > { %v13625_v1 = vpop.eup %13624 }
 0xef6   : > { %v4099_v56 = vsel %vm1545_vm5, %v13625_v1, 0.0 }
 0xef7   : > { %4100 = vadd.xlane.f32.xlu1 %v4099_v56 }
 0xf6c   : > { %v4083_v45 = vpop.xlane.xlu1 %4082 }
 0xf6d   : > { %13626 = vrcp.f32 %v4083_v45 }
 0xf70   : > { %v4086_v36 = vpop.xlane.xlu0 %4085 }
 0xf71   : > { %13628 = vrcp.f32 %v4086_v36 }
 0xf74   : > { %v4089_v40 = vpop.xlane.xlu1 %4088 }
 0xf75   : > { %13630 = vrcp.f32 %v4089_v40 }
 0xf77   : > { %v13627_v44 = vpop.eup %13626 }
 0xf78   : > { %v4109_v24 = vmul.f32 %v13627_v44, %v13613_v38  ;;  %v4092_v15 = vpop.xlane.xlu0 %4091 }
 0xf79   : > { %13632 = vrcp.f32 %v4092_v15 }
 0xf7a   : > { %11392 = vmatmul.mubr.msk.f32.vlgmr.msra.gmra.mrb[154].mxu0 %vm1545_vm5, %v4109_v24  ;;  %v13838_v24 = vld [vmem:[%s14052_s11 + $0x10] sm:$0xff] }
 0xf7b   : > { %v13629_v54 = vpop.eup %13628  ;;  %11394 = vmatprep.mubr.msk.f32.mxu0 %vm13881_vm1, %v13882_v32 }
 0xf7c   : > { %v4095_v30 = vpop.xlane.xlu1 %4094  ;;  %v4110_v57 = vmul.f32 %v13629_v54, %v13615_v6 }
 0xf7d   : > { %13634 = vrcp.f32 %v4095_v30 }
 0xf7e   : > { %11395 = vmatmul.mubr.msk.f32.gmra.mrb[156].mxu0 %vm1545_vm5, %v4110_v57 }
 0xf7f   : > { %v13631_v12 = vpop.eup %13630  ;;  %11397 = vmatprep.mubr.msk.f32.mxu0 %vm13881_vm1, %v13882_v32 }
 0xf80   : > { %v4098_v2 = vpop.xlane.xlu0 %4097  ;;  %v4111_v17 = vmul.f32 %v13631_v12, %v13617_v28  ;;  %v13839_v12 = vld [vmem:[%s14052_s11 + $0x18] sm:$0xff] }
 0xf81   : > { %13636 = vrcp.f32 %v4098_v2 }
 0xf82   : > { %11398 = vmatmul.mubr.msk.f32.gmra.mrb[158].mxu0 %vm1545_vm5, %v4111_v17 }
 0xf83   : > { %v13633_v41 = vpop.eup %13632  ;;  %11400 = vmatprep.mubr.msk.f32.mxu0 %vm13881_vm1, %v13882_v32 }
 0xf84   : > { %v4101_v47 = vpop.xlane.xlu1 %4100  ;;  %v4112_v9 = vmul.f32 %v13633_v41, %v13619_v29 }
 0xf85   : > { %13638 = vrcp.f32 %v4101_v47 }
 0xf86   : > { %11401 = vmatmul.mubr.msk.f32.gmra.mrb[160].mxu0 %vm1545_vm5, %v4112_v9  ;;  %v13840_v9 = vld [vmem:[%s14052_s11 + $0x20] sm:$0xff] }
 0xf87   : > { %v13635_v42 = vpop.eup %13634  ;;  %11403 = vmatprep.mubr.msk.f32.mxu0 %vm13881_vm1, %v13882_v32 }
 0xf88   : > { %v4113_v49 = vmul.f32 %v13635_v42, %v13621_v59 }
 0xf8a   : > { %11404 = vmatmul.mubr.msk.f32.gmra.mrb[162].mxu0 %vm1545_vm5, %v4113_v49 }
 0xf8b   : > { %v13637_v37 = vpop.eup %13636  ;;  %11406 = vmatprep.mubr.msk.f32.mxu0 %vm13881_vm1, %v13882_v32 }
 0xf8c   : > { %v4114_v61 = vmul.f32 %v13637_v37, %v13623_v26  ;;  %v13836_v26 = vld [vmem:[%s14052_s11] sm:$0xff] }
 0xf8e   : > { %11407 = vmatmul.mubr.msk.f32.gmra.mrb[164].mxu0 %vm1545_vm5, %v4114_v61 }
 0xf8f   : > { %v13639_v38 = vpop.eup %13638  ;;  %11409 = vmatprep.mubr.msk.f32.mxu0 %vm13881_vm1, %v13882_v32 }
 0xf90   : > { %v4115_v35 = vmul.f32 %v13639_v38, %v13625_v1  ;;  %v13841_v38 = vld [vmem:[%s14052_s11 + $0x28] sm:$0xff] }
 0xf92   : > { %11410 = vmatmul.mubr.msk.f32.gmra.mrb[166].mxu0 %vm1545_vm5, %v4115_v35 }
 0xf93   : > { %11469 = vmatprep.mubr.msk.f32.mxu0 %vm13881_vm1, %v13882_v32 }
0x104d   : > { %v4203_v39 = vpop.f32.mrb[154].mxu0 }
0x104e   : > { %v11393_v14 = vpop.f32.mrb[155].mxu0  ;;  %11417 = vmatmul.mubr.msk.f32.vlgmr.msra.gmra.mrb[154].mxu1 %vm1388_vm2, %v4203_v39 }
0x104f   : > { %11419 = vmatprep.mubr.msk.f32.mxu1 %vm13881_vm1, %v13882_v32 }
0x1051   : > { %v4208_v18 = vpop.f32.mrb[156].mxu0 }
0x1052   : > { %v11396_v6 = vpop.f32.mrb[157].mxu0  ;;  %11420 = vmatmul.mubr.msk.f32.gmra.mrb[156].mxu1 %vm1388_vm2, %v4208_v18 }
0x1053   : > { %11422 = vmatprep.mubr.msk.f32.mxu1 %vm13881_vm1, %v13882_v32  ;;  %v13842_v6 = vld [vmem:[%s14052_s11 + $0x30] sm:$0xff]  ;;  %s17018_s11 = sld [smem:[#allocation10_spill]] }
0x1055   : > { %v4213_v7 = vpop.f32.mrb[158].mxu0 }
0x1056   : > { %v11399_v20 = vpop.f32.mrb[159].mxu0  ;;  %11423 = vmatmul.mubr.msk.f32.gmra.mrb[158].mxu1 %vm1388_vm2, %v4213_v7 }
0x1057   : > { %11425 = vmatprep.mubr.msk.f32.mxu1 %vm13881_vm1, %v13882_v32  ;;  %v4501_v20 = vld [vmem:[%s13941_s19] sm:$0xff] }
0x1059   : > { %v4218_v3 = vpop.f32.mrb[160].mxu0 }
0x105a   : > { %v11402_v46 = vpop.f32.mrb[161].mxu0  ;;  %11426 = vmatmul.mubr.msk.f32.gmra.mrb[160].mxu1 %vm1388_vm2, %v4218_v3  ;;  %v4502_v3 = vld [vmem:[%s13941_s19 + $0x8] sm:$0xff] }
0x105b   : > { %11428 = vmatprep.mubr.msk.f32.mxu1 %vm13881_vm1, %v13882_v32  ;;  %v4503_v46 = vld [vmem:[%s13941_s19 + $0x10] sm:$0xff] }
0x105d   : > { %v4223_v28 = vpop.f32.mrb[162].mxu0 }
0x105e   : > { %v11405_v33 = vpop.f32.mrb[163].mxu0  ;;  %11429 = vmatmul.mubr.msk.f32.gmra.mrb[162].mxu1 %vm1388_vm2, %v4223_v28  ;;  %v13018_v28 = vpack.c.bf16 %v4502_v3, %v4501_v20 }
0x105f   : > { %11431 = vmatprep.mubr.msk.f32.mxu1 %vm13881_vm1, %v13882_v32  ;;  %v4504_v33 = vld [vmem:[%s13941_s19 + $0x18] sm:$0xff] }
0x1060   : > { %13019 = vmatpush3.bf16.msra.mxu0 %v13018_v28  ;;  %v4511_v28 = vld [vmem:[%s13941_s19 + $0x50] sm:$0xff] }
0x1061   : > { %v4228_v52 = vpop.f32.mrb[164].mxu0  ;;  %13020 = vmatprep.subr.bf16.mxu0 %v13880_v10 }
0x1062   : > { %v11408_v48 = vpop.f32.mrb[165].mxu0  ;;  %11432 = vmatmul.mubr.msk.f32.gmra.mrb[164].mxu1 %vm1388_vm2, %v4228_v52  ;;  %v4505_v52 = vld [vmem:[%s13941_s19 + $0x20] sm:$0xff] }
0x1063   : > { %11434 = vmatprep.mubr.msk.f32.mxu1 %vm13881_vm1, %v13882_v32  ;;  %v4506_v48 = vld [vmem:[%s13941_s19 + $0x28] sm:$0xff] }
0x1065   : > { %v4233_v8 = vpop.f32.mrb[166].mxu0 }
0x1066   : > { %v11411_v29 = vpop.f32.mrb[167].mxu0  ;;  %11435 = vmatmul.mubr.msk.f32.gmra.mrb[166].mxu1 %vm1388_vm2, %v4233_v8  ;;  %v13024_v8 = vpack.c.bf16 %v4506_v48, %v4505_v52  ;;  %v4513_v48 = vld [vmem:[%s13941_s19 + $0x60] sm:$0xff] }
0x1067   : > { %11506 = vmatprep.mubr.msk.f32.mxu1 %vm13881_vm1, %v13882_v32 }
0x1121   : > { %v4327_v25 = vpop.f32.mrb[154].mxu1 }
0x1122   : > { %v4361_v60 = vadd.f32 %v4327_v25, %v15209_v50  ;;  %v11418_v59 = vpop.f32.mrb[155].mxu1 }
0x1124   : > { %v4368_v22 = vadd.f32 %v13836_v26, %v4361_v60 }
0x1125   : > { %v4332_v1 = vpop.f32.mrb[156].mxu1 }
0x1126   : > { %v4362_v56 = vadd.f32 %v4332_v1, %v15212_v63  ;;  %v11421_v4 = vpop.f32.mrb[157].mxu1  ;;  %v15349_v21 = vadd.f32 %v9205_v11, %v4368_v22 }
0x1128   : > { %v4369_v45 = vadd.f32 %v13837_v34, %v4362_v56  ;;  %4391 = vadd.xlane.f32.xlu0 %v15349_v21 }
0x1129   : > { %v4337_v36 = vpop.f32.mrb[158].mxu1 }
0x112a   : > { %v4363_v40 = vadd.f32 %v4337_v36, %v15215_v55  ;;  %v11424_v50 = vpop.f32.mrb[159].mxu1  ;;  %v15354_v44 = vadd.f32 %v9205_v11, %v4369_v45 }
0x112c   : > { %v4370_v15 = vadd.f32 %v13838_v24, %v4363_v40  ;;  %4393 = vadd.xlane.f32.xlu1 %v15354_v44 }
0x112d   : > { %v4342_v63 = vpop.f32.mrb[160].mxu1 }
0x112e   : > { %v4364_v54 = vadd.f32 %v4342_v63, %v15218_v0  ;;  %v11427_v30 = vpop.f32.mrb[161].mxu1  ;;  %v15359_v57 = vadd.f32 %v9205_v11, %v4370_v15 }
0x1130   : > { %v4371_v2 = vadd.f32 %v13839_v12, %v4364_v54  ;;  %4395 = vadd.xlane.f32.xlu0 %v15359_v57 }
0x1131   : > { %v4347_v55 = vpop.f32.mrb[162].mxu1 }
0x1132   : > { %v4365_v17 = vadd.f32 %v4347_v55, %v15221_v51  ;;  %v11430_v41 = vpop.f32.mrb[163].mxu1  ;;  %v15364_v47 = vadd.f32 %v9205_v11, %v4371_v2 }
0x1134   : > { %v4372_v42 = vadd.f32 %v13840_v9, %v4365_v17  ;;  %4397 = vadd.xlane.f32.xlu1 %v15364_v47 }
0x1135   : > { %v4352_v0 = vpop.f32.mrb[164].mxu1 }
0x1136   : > { %v4366_v49 = vadd.f32 %v4352_v0, %v15224_v58  ;;  %v11433_v37 = vpop.f32.mrb[165].mxu1  ;;  %v15369_v61 = vadd.f32 %v9205_v11, %v4372_v42  ;;  %v4507_v42 = vld [vmem:[%s13941_s19 + $0x30] sm:$0xff]  ;;  %v4508_v0 = vld [vmem:[%s13941_s19 + $0x38] sm:$0xff] }
0x1137   : > { %v13027_v37 = vpack.c.bf16 %v4508_v0, %v4507_v42  ;;  %v9207_v42 = vld [vmem:[%s13936_s14] ss:$0 sm:$0xff] }
0x1138   : > { %v4373_v51 = vadd.f32 %v13841_v38, %v4366_v49  ;;  %4399 = vadd.xlane.f32.xlu0 %v15369_v61 }
0x1139   : > { %v4357_v35 = vpop.f32.mrb[166].mxu1 }
0x113a   : > { %v4367_v39 = vadd.f32 %v4357_v35, %v15227_v19  ;;  %v11436_v14 = vpop.f32.mrb[167].mxu1  ;;  %v15374_v18 = vadd.f32 %v9205_v11, %v4373_v51  ;;  %v13021_v19 = vpack.c.bf16 %v4504_v33, %v4503_v46  ;;  %v4512_v33 = vld [vmem:[%s13941_s19 + $0x58] sm:$0xff] }
0x113b   : > { %v4509_v14 = vld [vmem:[%s13941_s19 + $0x40] sm:$0xff]  ;;  %v13033_v52 = vpack.c.bf16 %v4512_v33, %v4511_v28 }
0x113c   : > { %v4374_v58 = vadd.f32 %v13842_v6, %v4367_v39  ;;  %4401 = vadd.xlane.f32.xlu1 %v15374_v18  ;;  %13022 = vmatpush3.bf16.msra.mxu0 %v13021_v19  ;;  %v4510_v6 = vld [vmem:[%s13941_s19 + $0x48] sm:$0xff] }
0x113d   : > { %13023 = vmatprep.subr.bf16.mxu0 %v13880_v10  ;;  %v13030_v20 = vpack.c.bf16 %v4510_v6, %v4509_v14 }
0x113e   : > { %v15378_v7 = vadd.f32 %v9205_v11, %v4374_v58 }
0x1140   : > { %4403 = vadd.xlane.f32.xlu0 %v15378_v7  ;;  %13025 = vmatpush3.bf16.msra.mxu0 %v13024_v8  ;;  %v4514_v8 = vld [vmem:[%s13941_s19 + $0x68] sm:$0xff] }
0x1141   : > { %13026 = vmatprep.subr.bf16.mxu0 %v13880_v10 }
0x1144   : > { %13028 = vmatpush3.bf16.msra.mxu0 %v13027_v37 }
0x1145   : > { %13029 = vmatprep.subr.bf16.mxu0 %v13880_v10 }
0x1148   : > { %13031 = vmatpush3.bf16.msra.mxu0 %v13030_v20 }
0x1149   : > { %13032 = vmatprep.subr.bf16.mxu0 %v13880_v10 }
0x114c   : > { %13034 = vmatpush3.bf16.msra.mxu0 %v13033_v52 }
0x114d   : > { %13035 = vmatprep.subr.bf16.mxu0 %v13880_v10 }
0x11b5   : > { %v4392_v29 = vpop.xlane.xlu0 %4391 }
0x11b6   : > { %v4405_v25 = vmul.f32 0.029411765, %v4392_v29  ;;  %v13036_v29 = vpack.c.bf16 %v4514_v8, %v4513_v48 }
0x11b8   : > { %v4412_v60 = vsub.f32 %v15349_v21, %v4405_v25  ;;  %13037 = vmatpush3.bf16.msra.mxu0 %v13036_v29  ;;  %v4515_v25 = vld [vmem:[%s13941_s19 + $0x70] sm:$0xff] }
0x11b9   : > { %v4394_v59 = vpop.xlane.xlu1 %4393  ;;  %13038 = vmatprep.subr.bf16.mxu0 %v13880_v10 }
0x11ba   : > { %v4406_v11 = vmul.f32 0.029411765, %v4394_v59  ;;  %v15393_v26 = vsel %vm912_vm0, %v4412_v60, 0.0  ;;  %v4516_v60 = vld [vmem:[%s13941_s19 + $0x78] sm:$0xff] }
0x11bb   : > { %v4426_v22 = vmul.f32 %v15393_v26, %v15393_v26  ;;  %v13039_v59 = vpack.c.bf16 %v4516_v60, %v4515_v25 }
0x11bc   : > { %v4413_v1 = vsub.f32 %v15354_v44, %v4406_v11 }
0x11bd   : > { %v4396_v56 = vpop.xlane.xlu0 %4395  ;;  %4433 = vadd.xlane.f32.xlu1 %v4426_v22  ;;  %13040 = vmatpush3.bf16.msra.mxu0 %v13039_v59 }
0x11be   : > { %v4407_v4 = vmul.f32 0.029411765, %v4396_v56  ;;  %v15400_v34 = vsel %vm912_vm0, %v4413_v1, 0.0  ;;  %13077 = vmatprep.subr.bf16.mxu0 %v13880_v10 }
0x11bf   : > { %v4427_v45 = vmul.f32 %v15400_v34, %v15400_v34 }
0x11c0   : > { %v4414_v36 = vsub.f32 %v15359_v57, %v4407_v4 }
0x11c1   : > { %v4398_v40 = vpop.xlane.xlu1 %4397  ;;  %4435 = vadd.xlane.f32.xlu0 %v4427_v45 }
0x11c2   : > { %v4408_v50 = vmul.f32 0.029411765, %v4398_v40  ;;  %v15407_v24 = vsel %vm912_vm0, %v4414_v36, 0.0 }
0x11c3   : > { %v4428_v15 = vmul.f32 %v15407_v24, %v15407_v24 }
0x11c4   : > { %v4415_v63 = vsub.f32 %v15364_v47, %v4408_v50 }
0x11c5   : > { %v4400_v54 = vpop.xlane.xlu0 %4399  ;;  %4437 = vadd.xlane.f32.xlu1 %v4428_v15 }
0x11c6   : > { %v4409_v30 = vmul.f32 0.029411765, %v4400_v54  ;;  %v15414_v12 = vsel %vm912_vm0, %v4415_v63, 0.0 }
0x11c7   : > { %v4429_v2 = vmul.f32 %v15414_v12, %v15414_v12 }
0x11c8   : > { %v4416_v55 = vsub.f32 %v15369_v61, %v4409_v30 }
0x11c9   : > { %v4402_v17 = vpop.xlane.xlu1 %4401  ;;  %4439 = vadd.xlane.f32.xlu0 %v4429_v2  ;;  %v9206_v2 = vld [vmem:[%s13931_s8] ss:$0 sm:$0xff] }
0x11ca   : > { %v4410_v41 = vmul.f32 0.029411765, %v4402_v17  ;;  %v15421_v9 = vsel %vm912_vm0, %v4416_v55, 0.0 }
0x11cb   : > { %v4430_v49 = vmul.f32 %v15421_v9, %v15421_v9 }
0x11cc   : > { %v4417_v38 = vsub.f32 %v15374_v18, %v4410_v41 }
0x11cd   : > { %4441 = vadd.xlane.f32.xlu1 %v4430_v49  ;;  %v4404_v51 = vpop.xlane.xlu0 %4403 }
0x11ce   : > { %v4411_v35 = vmul.f32 0.029411765, %v4404_v51  ;;  %v15430_v39 = vsel %vm912_vm0, %v4417_v38, 0.0 }
0x11cf   : > { %v4431_v58 = vmul.f32 %v15430_v39, %v15430_v39 }
0x11d0   : > { %v4418_v3 = vsub.f32 %v15378_v7, %v4411_v35 }
0x11d1   : > { %4443 = vadd.xlane.f32.xlu0 %v4431_v58 }
0x11d2   : > { %v15440_v46 = vsel %vm912_vm0, %v4418_v3, 0.0 }
0x11d3   : > { %v4432_v19 = vmul.f32 %v15440_v46, %v15440_v46 }
0x11d5   : > { %4445 = vadd.xlane.f32.xlu1 %v4432_v19 }
0x124a   : > { %v4434_v11 = vpop.xlane.xlu1 %4433 }
0x124b   : > { %v4447_v22 = vmul.f32 0.029411765, %v4434_v11 }
0x124d   : > { %v4454_v1 = vadd.f32 1e-05, %v4447_v22 }
0x124e   : > { %v4436_v56 = vpop.xlane.xlu0 %4435 }
0x124f   : > { %13640 = vrsqrt.f32 %v4454_v1  ;;  %v4448_v4 = vmul.f32 0.029411765, %v4436_v56 }
0x1251   : > { %v4455_v45 = vadd.f32 1e-05, %v4448_v4 }
0x1252   : > { %v4438_v36 = vpop.xlane.xlu1 %4437 }
0x1253   : > { %13642 = vrsqrt.f32 %v4455_v45  ;;  %v4449_v40 = vmul.f32 0.029411765, %v4438_v36 }
0x1255   : > { %v4456_v50 = vadd.f32 1e-05, %v4449_v40  ;;  %v4688_v40 = vld [vmem:[%s13951_s30 + $0x8] sm:$0xff] }
0x1256   : > { %v4440_v15 = vpop.xlane.xlu0 %4439 }
0x1257   : > { %13644 = vrsqrt.f32 %v4456_v50  ;;  %v4450_v63 = vmul.f32 0.029411765, %v4440_v15  ;;  %v4690_v15 = vld [vmem:[%s13951_s30 + $0x18] sm:$0xff] }
0x1259   : > { %v13641_v54 = vpop.eup %13640  ;;  %v4457_v30 = vadd.f32 1e-05, %v4450_v63 }
0x125a   : > { %v4468_v55 = vmul.f32 %v13641_v54, %v15393_v26  ;;  %v4442_v17 = vpop.xlane.xlu1 %4441  ;;  %v4691_v54 = vld [vmem:[%s13951_s30 + $0x20] sm:$0xff] }
0x125b   : > { %13646 = vrsqrt.f32 %v4457_v30  ;;  %v4451_v41 = vmul.f32 0.029411765, %v4442_v17  ;;  %v4692_v30 = vld [vmem:[%s13951_s30 + $0x28] sm:$0xff]  ;;  %v4694_v17 = vld [vmem:[%s13951_s30 + $0x38] sm:$0xff] }
0x125c   : > { %v4481_v0 = vmul.f32 %v9206_v2, %v4468_v55  ;;  %v4693_v55 = vld [vmem:[%s13951_s30 + $0x30] sm:$0xff] }
0x125d   : > { %v13643_v49 = vpop.eup %13642  ;;  %v4458_v37 = vadd.f32 1e-05, %v4451_v41  ;;  %v13051_v41 = vpack.c.bf16 %v4694_v17, %v4693_v55 }
0x125e   : > { %v4444_v38 = vpop.xlane.xlu0 %4443  ;;  %v4494_v51 = vadd.f32 %v9207_v42, %v4481_v0  ;;  %v4469_v35 = vmul.f32 %v13643_v49, %v15400_v34 }
0x125f   : > { %13648 = vrsqrt.f32 %v4458_v37  ;;  %v4452_v14 = vmul.f32 0.029411765, %v4444_v38 }
0x1260   : > { %11470 = vmatmul.mubr.f32.vlgmr.msra.gmra.mrb[168].mxu0 %v4494_v51  ;;  %v4482_v6 = vmul.f32 %v9206_v2, %v4469_v35 }
0x1261   : > { %v13645_v58 = vpop.eup %13644  ;;  %v4459_v20 = vadd.f32 1e-05, %v4452_v14  ;;  %11472 = vmatprep.mubr.msk.f32.mxu0 %vm13881_vm1, %v13882_v32 }
0x1262   : > { %v4446_v26 = vpop.xlane.xlu1 %4445  ;;  %v4495_v3 = vadd.f32 %v9207_v42, %v4482_v6  ;;  %v4470_v28 = vmul.f32 %v13645_v58, %v15407_v24 }
0x1263   : > { %13650 = vrsqrt.f32 %v4459_v20  ;;  %v4453_v33 = vmul.f32 0.029411765, %v4446_v26 }
0x1264   : > { %11473 = vmatmul.mubr.f32.gmra.mrb[170].mxu0 %v4495_v3  ;;  %v4483_v19 = vmul.f32 %v9206_v2, %v4470_v28 }
0x1265   : > { %v13647_v52 = vpop.eup %13646  ;;  %v4460_v48 = vadd.f32 1e-05, %v4453_v33  ;;  %11475 = vmatprep.mubr.msk.f32.mxu0 %vm13881_vm1, %v13882_v32 }
0x1266   : > { %v4496_v34 = vadd.f32 %v9207_v42, %v4483_v19  ;;  %v4471_v8 = vmul.f32 %v13647_v52, %v15414_v12 }
0x1267   : > { %13652 = vrsqrt.f32 %v4460_v48 }
0x1268   : > { %11476 = vmatmul.mubr.f32.gmra.mrb[172].mxu0 %v4496_v34  ;;  %v4484_v29 = vmul.f32 %v9206_v2, %v4471_v8 }
0x1269   : > { %v13649_v25 = vpop.eup %13648  ;;  %11478 = vmatprep.mubr.msk.f32.mxu0 %vm13881_vm1, %v13882_v32 }
0x126a   : > { %v4497_v24 = vadd.f32 %v9207_v42, %v4484_v29  ;;  %v4472_v60 = vmul.f32 %v13649_v25, %v15421_v9 }
0x126c   : > { %11479 = vmatmul.mubr.f32.gmra.mrb[174].mxu0 %v4497_v24  ;;  %v4485_v59 = vmul.f32 %v9206_v2, %v4472_v60 }
0x126d   : > { %v13651_v11 = vpop.eup %13650  ;;  %11481 = vmatprep.mubr.msk.f32.mxu0 %vm13881_vm1, %v13882_v32 }
0x126e   : > { %v4498_v22 = vadd.f32 %v9207_v42, %v4485_v59  ;;  %v4473_v12 = vmul.f32 %v13651_v11, %v15430_v39  ;;  %v4687_v39 = vld [vmem:[%s13951_s30] sm:$0xff] }
0x126f   : > { %v13042_v50 = vpack.c.bf16 %v4688_v40, %v4687_v39 }
0x1270   : > { %11482 = vmatmul.mubr.f32.gmra.mrb[176].mxu0 %v4498_v22  ;;  %v4486_v1 = vmul.f32 %v9206_v2, %v4473_v12 }
0x1271   : > { %v13653_v56 = vpop.eup %13652  ;;  %11484 = vmatprep.mubr.msk.f32.mxu0 %vm13881_vm1, %v13882_v32  ;;  %13043 = vmatpush3.bf16.msra.mxu1 %v13042_v50 }
0x1272   : > { %v4499_v9 = vadd.f32 %v9207_v42, %v4486_v1  ;;  %v4474_v4 = vmul.f32 %v13653_v56, %v15440_v46  ;;  %13044 = vmatprep.subr.bf16.mxu1 %v13880_v10  ;;  %v4689_v46 = vld [vmem:[%s13951_s30 + $0x10] sm:$0xff] }
0x1273   : > { %v13045_v63 = vpack.c.bf16 %v4690_v15, %v4689_v46 }
0x1274   : > { %11485 = vmatmul.mubr.f32.gmra.mrb[178].mxu0 %v4499_v9  ;;  %v4487_v45 = vmul.f32 %v9206_v2, %v4474_v4  ;;  %v13048_v2 = vpack.c.bf16 %v4692_v30, %v4691_v54 }
0x1275   : > { %11487 = vmatprep.mubr.msk.f32.mxu0 %vm13881_vm1, %v13882_v32  ;;  %13046 = vmatpush3.bf16.msra.mxu1 %v13045_v63 }
0x1276   : > { %v4500_v36 = vadd.f32 %v9207_v42, %v4487_v45  ;;  %13047 = vmatprep.subr.bf16.mxu1 %v13880_v10  ;;  %v9208_v42 = vld [vmem:[%s13946_s24] ss:$0 sm:$0xff] }
0x1278   : > { %11488 = vmatmul.mubr.f32.gmra.mrb[180].mxu0 %v4500_v36 }
0x1279   : > { %11612 = vmatprep.mubr.msk.f32.mxu0 %vm13881_vm1, %v13882_v32  ;;  %13049 = vmatpush3.bf16.msra.mxu1 %v13048_v2 }
0x127a   : > { %13050 = vmatprep.subr.bf16.mxu1 %v13880_v10 }
0x127d   : > { %13052 = vmatpush3.bf16.msra.mxu1 %v13051_v41 }
0x127e   : > { %13053 = vmatprep.subr.bf16.mxu1 %v13880_v10 }
0x1333   : > { %v4590_v0 = vpop.f32.mrb[168].mxu0 }
0x1334   : > { %v4591_v49 = vadd.f32 %v9208_v42, %v4590_v0  ;;  %v11471_v37 = vpop.f32.mrb[169].mxu0 }
0x1336   : > { %v4631_v38 = vmul.f32 0.044715, %v4591_v49  ;;  %v4624_v17 = vmul.f32 0.5, %v4591_v49 }
0x1337   : > { %v4595_v51 = vpop.f32.mrb[170].mxu0 }
0x1338   : > { %v4638_v35 = vmul.f32 %v4631_v38, %v4591_v49  ;;  %v4596_v14 = vadd.f32 %v9208_v42, %v4595_v51  ;;  %v11474_v6 = vpop.f32.mrb[171].mxu0 }
0x133a   : > { %v4645_v58 = vmul.f32 %v4638_v35, %v4591_v49  ;;  %v4632_v20 = vmul.f32 0.044715, %v4596_v14 }
0x133b   : > { %v4600_v26 = vpop.f32.mrb[172].mxu0 }
0x133c   : > { %v4652_v3 = vadd.f32 %v4645_v58, %v4591_v49  ;;  %v4639_v28 = vmul.f32 %v4632_v20, %v4596_v14  ;;  %v4601_v33 = vadd.f32 %v9208_v42, %v4600_v26  ;;  %v11477_v19 = vpop.f32.mrb[173].mxu0 }
0x133e   : > { %v4659_v52 = vmul.f32 0.7978846, %v4652_v3  ;;  %v4646_v48 = vmul.f32 %v4639_v28, %v4596_v14  ;;  %v4633_v34 = vmul.f32 0.044715, %v4601_v33  ;;  %v4625_v28 = vmul.f32 0.5, %v4596_v14 }
0x133f   : > { %v4605_v8 = vpop.f32.mrb[174].mxu0 }
0x1340   : > { %13654 = vtanh.f32 %v4659_v52  ;;  %v4653_v29 = vadd.f32 %v4646_v48, %v4596_v14  ;;  %v4640_v25 = vmul.f32 %v4633_v34, %v4601_v33  ;;  %v4606_v24 = vadd.f32 %v9208_v42, %v4605_v8  ;;  %v11480_v60 = vpop.f32.mrb[175].mxu0 }
0x1342   : > { %v4647_v59 = vmul.f32 %v4640_v25, %v4601_v33  ;;  %v4634_v11 = vmul.f32 0.044715, %v4606_v24  ;;  %v4660_v22 = vmul.f32 0.7978846, %v4653_v29  ;;  %v4626_v29 = vmul.f32 0.5, %v4601_v33 }
0x1343   : > { %v4610_v12 = vpop.f32.mrb[176].mxu0 }
0x1344   : > { %v4654_v1 = vadd.f32 %v4647_v59, %v4601_v33  ;;  %v4641_v56 = vmul.f32 %v4634_v11, %v4606_v24  ;;  %v4611_v9 = vadd.f32 %v9208_v42, %v4610_v12  ;;  %v11483_v4 = vpop.f32.mrb[177].mxu0  ;;  %13656 = vtanh.f32 %v4660_v22 }
0x1345   : > { %v4627_v22 = vmul.f32 0.5, %v4606_v24 }
0x1346   : > { %v4648_v45 = vmul.f32 %v4641_v56, %v4606_v24  ;;  %v4635_v36 = vmul.f32 0.044715, %v4611_v9  ;;  %v4661_v39 = vmul.f32 0.7978846, %v4654_v1  ;;  %v4628_v33 = vmul.f32 0.5, %v4611_v9 }
0x1347   : > { %v4615_v40 = vpop.f32.mrb[178].mxu0 }
0x1348   : > { %v4655_v50 = vadd.f32 %v4648_v45, %v4606_v24  ;;  %v4642_v46 = vmul.f32 %v4635_v36, %v4611_v9  ;;  %v4616_v15 = vadd.f32 %v9208_v42, %v4615_v40  ;;  %v11486_v63 = vpop.f32.mrb[179].mxu0  ;;  %13658 = vtanh.f32 %v4661_v39 }
0x134a   : > { %v13655_v54 = vpop.eup %13654  ;;  %v4649_v30 = vmul.f32 %v4642_v46, %v4611_v9  ;;  %v4636_v2 = vmul.f32 0.044715, %v4616_v15  ;;  %v4662_v55 = vmul.f32 0.7978846, %v4655_v50  ;;  %v4629_v24 = vmul.f32 0.5, %v4616_v15 }
0x134b   : > { %v4673_v41 = vadd.f32 1.0, %v13655_v54  ;;  %v4620_v0 = vpop.f32.mrb[180].mxu0 }
0x134c   : > { %v4656_v37 = vadd.f32 %v4649_v30, %v4611_v9  ;;  %v4643_v38 = vmul.f32 %v4636_v2, %v4616_v15  ;;  %v4621_v51 = vadd.f32 %v9208_v42, %v4620_v0  ;;  %v11489_v35 = vpop.f32.mrb[181].mxu0  ;;  %13660 = vtanh.f32 %v4662_v55 }
0x134d   : > { %v4680_v6 = vmul.f32 %v4673_v41, %v4624_v17 }
0x134e   : > { %v13657_v58 = vpop.eup %13656  ;;  %v4650_v20 = vmul.f32 %v4643_v38, %v4616_v15  ;;  %v4637_v26 = vmul.f32 0.044715, %v4621_v51  ;;  %v4663_v3 = vmul.f32 0.7978846, %v4656_v37  ;;  %v4630_v46 = vmul.f32 0.5, %v4621_v51 }
0x134f   : > { %11507 = vmatmul.mubr.msk.f32.vlgmr.msra.gmra.mrb[168].mxu1 %vm4702_vm12, %v4680_v6  ;;  %v4674_v19 = vadd.f32 1.0, %v13657_v58 }
0x1350   : > { %v4657_v52 = vadd.f32 %v4650_v20, %v4616_v15  ;;  %v4644_v48 = vmul.f32 %v4637_v26, %v4621_v51  ;;  %11509 = vmatprep.mubr.msk.f32.mxu1 %vm13881_vm1, %v13882_v32  ;;  %13662 = vtanh.f32 %v4663_v3  ;;  %v9209_v15 = vld [vmem:[%s13956_s6] ss:$0 sm:$0xff] }
0x1351   : > { %v4681_v49 = vmul.f32 %v4674_v19, %v4625_v28 }
0x1352   : > { %v13659_v34 = vpop.eup %13658  ;;  %v4651_v42 = vmul.f32 %v4644_v48, %v4621_v51  ;;  %v4664_v8 = vmul.f32 0.7978846, %v4657_v52 }
0x1353   : > { %11510 = vmatmul.mubr.msk.f32.gmra.mrb[170].mxu1 %vm4702_vm12, %v4681_v49  ;;  %v4675_v25 = vadd.f32 1.0, %v13659_v34 }
0x1354   : > { %v4658_v60 = vadd.f32 %v4651_v42, %v4621_v51  ;;  %11512 = vmatprep.mubr.msk.f32.mxu1 %vm13881_vm1, %v13882_v32  ;;  %13664 = vtanh.f32 %v4664_v8  ;;  %v4943_v8 = vld [vmem:[%s17009_s15] sm:$0xff] }
0x1355   : > { %v4682_v14 = vmul.f32 %v4675_v25, %v4626_v29  ;;  %v4944_v29 = vld [vmem:[%s17009_s15 + $0x8] sm:$0xff]  ;;  %v5059_v25 = vld [vmem:[%s17010_s16] sm:$0xff] }
0x1356   : > { %v13661_v59 = vpop.eup %13660  ;;  %v4665_v11 = vmul.f32 0.7978846, %v4658_v60  ;;  %v13054_v60 = vpack.c.bf16 %v4944_v29, %v4943_v8  ;;  %v5065_v29 = vld [vmem:[%s17010_s16 + $0x30] sm:$0xff] }
0x1357   : > { %11513 = vmatmul.mubr.msk.f32.gmra.mrb[172].mxu1 %vm4702_vm12, %v4682_v14  ;;  %v4676_v12 = vadd.f32 1.0, %v13661_v59  ;;  %v4945_v14 = vld [vmem:[%s17009_s15 + $0x10] sm:$0xff]  ;;  %v4946_v59 = vld [vmem:[%s17009_s15 + $0x18] sm:$0xff] }
0x1358   : > { %11515 = vmatprep.mubr.msk.f32.mxu1 %vm13881_vm1, %v13882_v32  ;;  %13666 = vtanh.f32 %v4665_v11  ;;  %13055 = vmatpush3.bf16.msra.mxu1 %v13054_v60 }
0x1359   : > { %v4683_v1 = vmul.f32 %v4676_v12, %v4627_v22  ;;  %v5061_v22 = vld [vmem:[%s17010_s16 + $0x10] sm:$0xff]  ;;  %v5062_v12 = vld [vmem:[%s17010_s16 + $0x18] sm:$0xff]  ;;  %13056 = vmatprep.subr.bf16.mxu1 %v13880_v10 }
0x135a   : > { %v13663_v56 = vpop.eup %13662 }
0x135b   : > { %11516 = vmatmul.mubr.msk.f32.gmra.mrb[174].mxu1 %vm4702_vm12, %v4683_v1  ;;  %v4677_v4 = vadd.f32 1.0, %v13663_v56  ;;  %v13057_v1 = vpack.c.bf16 %v4946_v59, %v4945_v14  ;;  %v4947_v56 = vld [vmem:[%s17009_s15 + $0x20] sm:$0xff] }
0x135c   : > { %11518 = vmatprep.mubr.msk.f32.mxu1 %vm13881_vm1, %v13882_v32 }
0x135d   : > { %v4684_v45 = vmul.f32 %v4677_v4, %v4628_v33  ;;  %v4948_v33 = vld [vmem:[%s17009_s15 + $0x28] sm:$0xff]  ;;  %v5063_v4 = vld [vmem:[%s17010_s16 + $0x20] sm:$0xff]  ;;  %13058 = vmatpush3.bf16.msra.mxu1 %v13057_v1 }
0x135e   : > { %v13665_v36 = vpop.eup %13664  ;;  %13059 = vmatprep.subr.bf16.mxu1 %v13880_v10 }
0x135f   : > { %11519 = vmatmul.mubr.msk.f32.gmra.mrb[176].mxu1 %vm4702_vm12, %v4684_v45  ;;  %v4678_v39 = vadd.f32 1.0, %v13665_v36  ;;  %v5064_v45 = vld [vmem:[%s17010_s16 + $0x28] sm:$0xff]  ;;  %v13060_v36 = vpack.c.bf16 %v4948_v33, %v4947_v56  ;;  %v5067_v56 = vld [vmem:[%s17010_s16 + $0x40] sm:$0xff] }
0x1360   : > { %11521 = vmatprep.mubr.msk.f32.mxu1 %vm13881_vm1, %v13882_v32  ;;  %v5068_v33 = vld [vmem:[%s17010_s16 + $0x48] sm:$0xff] }
0x1361   : > { %v4685_v40 = vmul.f32 %v4678_v39, %v4629_v24  ;;  %v13084_v24 = vpack.c.bf16 %v5064_v45, %v5063_v4  ;;  %13061 = vmatpush3.bf16.msra.mxu1 %v13060_v36  ;;  %v13090_v45 = vpack.c.bf16 %v5068_v33, %v5067_v56  ;;  %v5175_v33 = vld [vmem:[%s17012_s22] sm:$0xff] }
0x1362   : > { %v13667_v50 = vpop.eup %13666  ;;  %13062 = vmatprep.subr.bf16.mxu1 %v13880_v10 }
0x1363   : > { %11522 = vmatmul.mubr.msk.f32.gmra.mrb[178].mxu1 %vm4702_vm12, %v4685_v40  ;;  %v4679_v9 = vadd.f32 1.0, %v13667_v50 }
0x1364   : > { %11524 = vmatprep.mubr.msk.f32.mxu1 %vm13881_vm1, %v13882_v32 }
0x1365   : > { %v4686_v63 = vmul.f32 %v4679_v9, %v4630_v46 }
0x1367   : > { %11525 = vmatmul.mubr.msk.f32.gmra.mrb[180].mxu1 %vm4702_vm12, %v4686_v63 }
0x1368   : > { %11559 = vmatprep.mubr.msk.f32.mxu1 %vm13881_vm1, %v13882_v32 }
0x1422   : > { %v4790_v54 = vpop.f32.mrb[168].mxu1 }
0x1423   : > { %v4791_v30 = vadd.f32 %v9209_v15, %v4790_v54  ;;  %v11508_v2 = vpop.f32.mrb[169].mxu1 }
0x1425   : > { %v15513_v55 = vadd.f32 %v4791_v30, %v15349_v21 }
0x1426   : > { %v4795_v17 = vpop.f32.mrb[170].mxu1 }
0x1427   : > { %v4796_v41 = vadd.f32 %v9209_v15, %v4795_v17  ;;  %4833 = vadd.xlane.f32.xlu0 %v15513_v55  ;;  %v11511_v0 = vpop.f32.mrb[171].mxu1 }
0x1429   : > { %v15517_v37 = vadd.f32 %v4796_v41, %v15354_v44 }
0x142a   : > { %v4800_v38 = vpop.f32.mrb[172].mxu1 }
0x142b   : > { %v4801_v51 = vadd.f32 %v9209_v15, %v4800_v38  ;;  %4835 = vadd.xlane.f32.xlu1 %v15517_v37  ;;  %v11514_v35 = vpop.f32.mrb[173].mxu1 }
0x142d   : > { %v15521_v6 = vadd.f32 %v4801_v51, %v15359_v57 }
0x142e   : > { %v4805_v58 = vpop.f32.mrb[174].mxu1 }
0x142f   : > { %v4806_v20 = vadd.f32 %v9209_v15, %v4805_v58  ;;  %4837 = vadd.xlane.f32.xlu0 %v15521_v6  ;;  %v11517_v21 = vpop.f32.mrb[175].mxu1 }
0x1431   : > { %v15525_v26 = vadd.f32 %v4806_v20, %v15364_v47 }
0x1432   : > { %v4810_v3 = vpop.f32.mrb[176].mxu1 }
0x1433   : > { %v4811_v44 = vadd.f32 %v9209_v15, %v4810_v3  ;;  %4839 = vadd.xlane.f32.xlu1 %v15525_v26  ;;  %v11520_v28 = vpop.f32.mrb[177].mxu1 }
0x1435   : > { %v15529_v19 = vadd.f32 %v4811_v44, %v15369_v61 }
0x1436   : > { %v4815_v57 = vpop.f32.mrb[178].mxu1 }
0x1437   : > { %v4816_v52 = vadd.f32 %v9209_v15, %v4815_v57  ;;  %4841 = vadd.xlane.f32.xlu0 %v15529_v19  ;;  %v11523_v47 = vpop.f32.mrb[179].mxu1 }
0x1438   : > { %v4949_v47 = vld [vmem:[%s17009_s15 + $0x30] sm:$0xff] }
0x1439   : > { %v15533_v48 = vadd.f32 %v4816_v52, %v15374_v18  ;;  %v5060_v18 = vld [vmem:[%s17010_s16 + $0x8] sm:$0xff] }
0x143a   : > { %v4820_v49 = vpop.f32.mrb[180].mxu1  ;;  %v13078_v11 = vpack.c.bf16 %v5060_v18, %v5059_v25  ;;  %v5066_v25 = vld [vmem:[%s17010_s16 + $0x38] sm:$0xff] }
0x143b   : > { %v4821_v34 = vadd.f32 %v9209_v15, %v4820_v49  ;;  %4843 = vadd.xlane.f32.xlu1 %v15533_v48  ;;  %v11526_v42 = vpop.f32.mrb[181].mxu1  ;;  %v4950_v49 = vld [vmem:[%s17009_s15 + $0x38] sm:$0xff]  ;;  %v13087_v18 = vpack.c.bf16 %v5066_v25, %v5065_v29 }
0x143c   : > { %13079 = vmatpush3.bf16.msra.mxu0 %v13078_v11  ;;  %v13063_v8 = vpack.c.bf16 %v4950_v49, %v4949_v47  ;;  %v4951_v11 = vld [vmem:[%s17009_s15 + $0x40] sm:$0xff] }
0x143d   : > { %v15537_v61 = vadd.f32 %v4821_v34, %v15378_v7  ;;  %v13081_v7 = vpack.c.bf16 %v5062_v12, %v5061_v22  ;;  %13080 = vmatprep.subr.bf16.mxu0 %v13880_v10  ;;  %v4952_v22 = vld [vmem:[%s17009_s15 + $0x48] sm:$0xff] }
0x143e   : > { %13064 = vmatpush3.bf16.msra.mxu1 %v13063_v8 }
0x143f   : > { %4845 = vadd.xlane.f32.xlu0 %v15537_v61  ;;  %13065 = vmatprep.subr.bf16.mxu1 %v13880_v10 }
0x1440   : > { %13082 = vmatpush3.bf16.msra.mxu0 %v13081_v7  ;;  %v13066_v7 = vpack.c.bf16 %v4952_v22, %v4951_v11  ;;  %v15638_v22 = vld [vmem:[%s17011_s18] ss:$0 sm:$0xff]  ;;  %s17019_s18 = sld [smem:[#allocation13_spill]] }
0x1441   : > { %13083 = vmatprep.subr.bf16.mxu0 %v13880_v10 }
0x1442   : > { %13067 = vmatpush3.bf16.msra.mxu1 %v13066_v7 }
0x1443   : > { %13068 = vmatprep.subr.bf16.mxu1 %v13880_v10 }
0x1444   : > { %13085 = vmatpush3.bf16.msra.mxu0 %v13084_v24  ;;  %v4953_v24 = vld [vmem:[%s17009_s15 + $0x50] sm:$0xff] }
0x1445   : > { %13086 = vmatprep.subr.bf16.mxu0 %v13880_v10 }
0x1448   : > { %13088 = vmatpush3.bf16.msra.mxu0 %v13087_v18 }
0x1449   : > { %13089 = vmatprep.subr.bf16.mxu0 %v13880_v10 }
0x144c   : > { %13091 = vmatpush3.bf16.msra.mxu0 %v13090_v45  ;;  %v15644_v45 = vld [vmem:[%s17013_s23] ss:$0 sm:$0xff]  ;;  %s17020_s23 = sld [smem:[#allocation12_spill]] }
0x144d   : > { %13092 = vmatprep.subr.bf16.mxu0 %v13880_v10 }
0x14b4   : > { %v4834_v39 = vpop.xlane.xlu0 %4833 }
0x14b5   : > { %v4847_v40 = vmul.f32 0.029411765, %v4834_v39  ;;  %v4954_v39 = vld [vmem:[%s17009_s15 + $0x58] sm:$0xff] }
0x14b7   : > { %v4854_v50 = vsub.f32 %v15513_v55, %v4847_v40 }
0x14b8   : > { %v4836_v46 = vpop.xlane.xlu1 %4835 }
0x14b9   : > { %v4848_v9 = vmul.f32 0.029411765, %v4836_v46  ;;  %v15561_v63 = vsel %vm912_vm0, %v4854_v50, 0.0  ;;  %v13069_v50 = vpack.c.bf16 %v4954_v39, %v4953_v24  ;;  %v5069_v46 = vld [vmem:[%s17010_s16 + $0x50] sm:$0xff] }
0x14ba   : > { %v4868_v15 = vmul.f32 %v15561_v63, %v15561_v63 }
0x14bb   : > { %v4855_v54 = vsub.f32 %v15517_v37, %v4848_v9  ;;  %v5070_v9 = vld [vmem:[%s17010_s16 + $0x58] sm:$0xff]  ;;  %13070 = vmatpush3.bf16.msra.mxu1 %v13069_v50 }
0x14bc   : > { %v4838_v30 = vpop.xlane.xlu0 %4837  ;;  %4875 = vadd.xlane.f32.xlu1 %v4868_v15  ;;  %13071 = vmatprep.subr.bf16.mxu1 %v13880_v10 }
0x14bd   : > { %v4849_v2 = vmul.f32 0.029411765, %v4838_v30  ;;  %v15568_v17 = vsel %vm912_vm0, %v4855_v54, 0.0  ;;  %v13093_v54 = vpack.c.bf16 %v5070_v9, %v5069_v46  ;;  %v4955_v30 = vld [vmem:[%s17009_s15 + $0x60] sm:$0xff] }
0x14be   : > { %v4869_v41 = vmul.f32 %v15568_v17, %v15568_v17 }
0x14bf   : > { %v4856_v0 = vsub.f32 %v15521_v6, %v4849_v2  ;;  %13094 = vmatpush3.bf16.msra.mxu0 %v13093_v54  ;;  %v4956_v2 = vld [vmem:[%s17009_s15 + $0x68] sm:$0xff] }
0x14c0   : > { %v4840_v38 = vpop.xlane.xlu1 %4839  ;;  %4877 = vadd.xlane.f32.xlu0 %v4869_v41  ;;  %v13072_v41 = vpack.c.bf16 %v4956_v2, %v4955_v30  ;;  %13095 = vmatprep.subr.bf16.mxu0 %v13880_v10  ;;  %v5177_v30 = vld [vmem:[%s17012_s22 + $0x10] sm:$0xff] }
0x14c1   : > { %v4850_v51 = vmul.f32 0.029411765, %v4840_v38  ;;  %v15575_v35 = vsel %vm912_vm0, %v4856_v0, 0.0  ;;  %v5071_v0 = vld [vmem:[%s17010_s16 + $0x60] sm:$0xff]  ;;  %v5072_v38 = vld [vmem:[%s17010_s16 + $0x68] sm:$0xff] }
0x14c2   : > { %v4870_v58 = vmul.f32 %v15575_v35, %v15575_v35  ;;  %13073 = vmatpush3.bf16.msra.mxu1 %v13072_v41 }
0x14c3   : > { %v4857_v20 = vsub.f32 %v15525_v26, %v4850_v51  ;;  %v13096_v51 = vpack.c.bf16 %v5072_v38, %v5071_v0  ;;  %13074 = vmatprep.subr.bf16.mxu1 %v13880_v10 }
0x14c4   : > { %v4842_v21 = vpop.xlane.xlu0 %4841  ;;  %4879 = vadd.xlane.f32.xlu1 %v4870_v58  ;;  %v4957_v58 = vld [vmem:[%s17009_s15 + $0x70] sm:$0xff] }
0x14c5   : > { %v4851_v3 = vmul.f32 0.029411765, %v4842_v21  ;;  %v15582_v44 = vsel %vm912_vm0, %v4857_v20, 0.0  ;;  %13097 = vmatpush3.bf16.msra.mxu0 %v13096_v51  ;;  %v4958_v20 = vld [vmem:[%s17009_s15 + $0x78] sm:$0xff] }
0x14c6   : > { %v4871_v28 = vmul.f32 %v15582_v44, %v15582_v44  ;;  %v13075_v21 = vpack.c.bf16 %v4958_v20, %v4957_v58  ;;  %13098 = vmatprep.subr.bf16.mxu0 %v13880_v10 }
0x14c7   : > { %v4858_v57 = vsub.f32 %v15529_v19, %v4851_v3  ;;  %v5073_v3 = vld [vmem:[%s17010_s16 + $0x70] sm:$0xff] }
0x14c8   : > { %v4844_v52 = vpop.xlane.xlu1 %4843  ;;  %4881 = vadd.xlane.f32.xlu0 %v4871_v28  ;;  %v5074_v28 = vld [vmem:[%s17010_s16 + $0x78] sm:$0xff]  ;;  %13076 = vmatpush3.bf16.msra.mxu1 %v13075_v21  ;;  %v5179_v21 = vld [vmem:[%s17012_s22 + $0x20] sm:$0xff] }
0x14c9   : > { %v4852_v34 = vmul.f32 0.029411765, %v4844_v52  ;;  %v15591_v42 = vsel %vm912_vm0, %v4858_v57, 0.0  ;;  %v13099_v57 = vpack.c.bf16 %v5074_v28, %v5073_v3  ;;  %13101 = vmatprep.subr.bf16.mxu1 %v13880_v10  ;;  %v5180_v3 = vld [vmem:[%s17012_s22 + $0x28] sm:$0xff] }
0x14ca   : > { %v4872_v60 = vmul.f32 %v15591_v42, %v15591_v42 }
0x14cb   : > { %v4859_v14 = vsub.f32 %v15533_v48, %v4852_v34  ;;  %13100 = vmatpush3.bf16.msra.mxu0 %v13099_v57 }
0x14cc   : > { %4883 = vadd.xlane.f32.xlu1 %v4872_v60  ;;  %v4846_v59 = vpop.xlane.xlu0 %4845  ;;  %13125 = vmatprep.subr.bf16.mxu0 %v13880_v10 }
0x14cd   : > { %v4853_v12 = vmul.f32 0.029411765, %v4846_v59  ;;  %v15602_v1 = vsel %vm912_vm0, %v4859_v14, 0.0 }
0x14ce   : > { %v4873_v4 = vmul.f32 %v15602_v1, %v15602_v1 }
0x14cf   : > { %v4860_v36 = vsub.f32 %v15537_v61, %v4853_v12 }
0x14d0   : > { %4885 = vadd.xlane.f32.xlu0 %v4873_v4  ;;  %v5176_v4 = vld [vmem:[%s17012_s22 + $0x8] sm:$0xff] }
0x14d1   : > { %v15615_v40 = vsel %vm912_vm0, %v4860_v36, 0.0  ;;  %v13102_v46 = vpack.c.bf16 %v5176_v4, %v5175_v33  ;;  %v5185_v4 = vld [vmem:[%s17012_s22 + $0x50] sm:$0xff] }
0x14d2   : > { %v4874_v15 = vmul.f32 %v15615_v40, %v15615_v40 }
0x14d4   : > { %4887 = vadd.xlane.f32.xlu1 %v4874_v15 }
0x1549   : > { %v4876_v52 = vpop.xlane.xlu1 %4875 }
0x154a   : > { %v4889_v47 = vmul.f32 0.029411765, %v4876_v52 }
0x154c   : > { %v4896_v49 = vadd.f32 1e-05, %v4889_v47  ;;  %v13108_v47 = vpack.c.bf16 %v5180_v3, %v5179_v21  ;;  %v9244_v21 = vld [vmem:[%s17009_s15 + $0xa0] sm:$0xff]  ;;  %v9245_v3 = vld [vmem:[%s17009_s15 + $0xa8] sm:$0xff] }
0x154d   : > { %v4878_v34 = vpop.xlane.xlu0 %4877 }
0x154e   : > { %13668 = vrsqrt.f32 %v4896_v49  ;;  %v4890_v8 = vmul.f32 0.029411765, %v4878_v34 }
0x1550   : > { %v4897_v29 = vadd.f32 1e-05, %v4890_v8  ;;  %v5181_v8 = vld [vmem:[%s17012_s22 + $0x30] sm:$0xff] }
0x1551   : > { %v4880_v25 = vpop.xlane.xlu1 %4879 }
0x1552   : > { %13670 = vrsqrt.f32 %v4897_v29  ;;  %v4891_v60 = vmul.f32 0.029411765, %v4880_v25  ;;  %v5182_v29 = vld [vmem:[%s17012_s22 + $0x38] sm:$0xff] }
0x1554   : > { %v4898_v18 = vadd.f32 1e-05, %v4891_v60 }
0x1555   : > { %v4882_v14 = vpop.xlane.xlu0 %4881 }
0x1556   : > { %13672 = vrsqrt.f32 %v4898_v18  ;;  %v4892_v59 = vmul.f32 0.029411765, %v4882_v14 }
0x1558   : > { %v13669_v11 = vpop.eup %13668  ;;  %v4899_v12 = vadd.f32 1e-05, %v4892_v59  ;;  %v5183_v59 = vld [vmem:[%s17012_s22 + $0x40] sm:$0xff] }
0x1559   : > { %v4910_v7 = vmul.f32 %v13669_v11, %v15561_v63  ;;  %v4884_v56 = vpop.xlane.xlu1 %4883  ;;  %v5178_v63 = vld [vmem:[%s17012_s22 + $0x18] sm:$0xff]  ;;  %v5184_v11 = vld [vmem:[%s17012_s22 + $0x48] sm:$0xff] }
0x155a   : > { %13674 = vrsqrt.f32 %v4899_v12  ;;  %v4893_v36 = vmul.f32 0.029411765, %v4884_v56 }
0x155b   : > { %v4923_v24 = vmul.f32 %v15638_v22, %v4910_v7 }
0x155c   : > { %v13671_v39 = vpop.eup %13670  ;;  %v4900_v50 = vadd.f32 1e-05, %v4893_v36  ;;  %v5186_v36 = vld [vmem:[%s17012_s22 + $0x58] sm:$0xff] }
0x155d   : > { %v15648_v9 = vadd.f32 %v15644_v45, %v4923_v24  ;;  %v4911_v15 = vmul.f32 %v13671_v39, %v15568_v17  ;;  %v4886_v54 = vpop.xlane.xlu0 %4885  ;;  %v13105_v17 = vpack.c.bf16 %v5178_v63, %v5177_v30 }
0x155e   : > { %13676 = vrsqrt.f32 %v4900_v50  ;;  %v4894_v2 = vmul.f32 0.029411765, %v4886_v54  ;;  %v5188_v54 = vld [vmem:[%s17012_s22 + $0x68] sm:$0xff] }
0x155f   : > { %v4924_v41 = vmul.f32 %v15638_v22, %v4911_v15  ;;  %11560 = vmatmul.mubr.f32.vlgmr.msra.gmra.mrb[182].mxu1 %v15648_v9  ;;  %11613 = vmatmul.mubr.f32.vlgmr.msra.gmra.mrb[182].mxu0 %v15648_v9  ;;  %v5187_v15 = vld [vmem:[%s17012_s22 + $0x60] sm:$0xff] }
0x1560   : > { %v13673_v0 = vpop.eup %13672  ;;  %v4901_v38 = vadd.f32 1e-05, %v4894_v2  ;;  %13103 = vmatpush3.bf16.msra.mxu1 %v13102_v46  ;;  %11562 = vmatprep.mubr.msk.f32.mxu1 %vm13881_vm1, %v13882_v32  ;;  %v5190_v2 = vld [vmem:[%s17012_s22 + $0x78] sm:$0xff] }
0x1561   : > { %v15659_v51 = vadd.f32 %v15644_v45, %v4924_v41  ;;  %v4912_v58 = vmul.f32 %v13673_v0, %v15575_v35  ;;  %v4888_v20 = vpop.xlane.xlu1 %4887  ;;  %11615 = vmatprep.mubr.msk.f32.mxu0 %vm13881_vm1, %v13882_v32  ;;  %13104 = vmatprep.subr.bf16.mxu1 %v13880_v10  ;;  %v9241_v0 = vld [vmem:[%s17009_s15 + $0x88] sm:$0xff] }
0x1562   : > { %13678 = vrsqrt.f32 %v4901_v38  ;;  %v4895_v28 = vmul.f32 0.029411765, %v4888_v20 }
0x1563   : > { %v4925_v57 = vmul.f32 %v15638_v22, %v4912_v58  ;;  %11563 = vmatmul.mubr.f32.gmra.mrb[184].mxu1 %v15659_v51  ;;  %11616 = vmatmul.mubr.f32.gmra.mrb[184].mxu0 %v15659_v51  ;;  %v9243_v58 = vld [vmem:[%s17009_s15 + $0x98] sm:$0xff] }
0x1564   : > { %v13675_v52 = vpop.eup %13674  ;;  %v4902_v35 = vadd.f32 1e-05, %v4895_v28  ;;  %13106 = vmatpush3.bf16.msra.mxu1 %v13105_v17  ;;  %11565 = vmatprep.mubr.msk.f32.mxu1 %vm13881_vm1, %v13882_v32  ;;  %v9242_v17 = vld [vmem:[%s17009_s15 + $0x90] sm:$0xff]  ;;  %v13153_v28 = vpack.c.bf16 %v9245_v3, %v9244_v21  ;;  %v9287_v3 = vld [vmem:[%s17012_s22 + $0xf8] sm:$0xff] }
0x1565   : > { %v15673_v49 = vadd.f32 %v15644_v45, %v4925_v57  ;;  %v4913_v34 = vmul.f32 %v13675_v52, %v15582_v44  ;;  %11618 = vmatprep.mubr.msk.f32.mxu0 %vm13881_vm1, %v13882_v32  ;;  %13107 = vmatprep.subr.bf16.mxu1 %v13880_v10  ;;  %v13111_v44 = vpack.c.bf16 %v5182_v29, %v5181_v8  ;;  %v9246_v57 = vld [vmem:[%s17009_s15 + $0xb0] sm:$0xff]  ;;  %v9247_v52 = vld [vmem:[%s17009_s15 + $0xb8] sm:$0xff] }
0x1566   : > { %13680 = vrsqrt.f32 %v4902_v35  ;;  %v13150_v20 = vpack.c.bf16 %v9243_v58, %v9242_v17  ;;  %v13156_v35 = vpack.c.bf16 %v9247_v52, %v9246_v57  ;;  %v9250_v29 = vld [vmem:[%s17009_s15 + $0xd0] sm:$0xff]  ;;  %v9284_v17 = vld [vmem:[%s17012_s22 + $0xe0] sm:$0xff]  ;;  %v9285_v58 = vld [vmem:[%s17012_s22 + $0xe8] sm:$0xff] }
0x1567   : > { %v4926_v25 = vmul.f32 %v15638_v22, %v4913_v34  ;;  %11566 = vmatmul.mubr.f32.gmra.mrb[186].mxu1 %v15673_v49  ;;  %11619 = vmatmul.mubr.f32.gmra.mrb[186].mxu0 %v15673_v49  ;;  %v9249_v34 = vld [vmem:[%s17009_s15 + $0xc8] sm:$0xff]  ;;  %v9286_v21 = vld [vmem:[%s17012_s22 + $0xf0] sm:$0xff] }
0x1568   : > { %v13677_v60 = vpop.eup %13676  ;;  %13109 = vmatpush3.bf16.msra.mxu1 %v13108_v47  ;;  %11568 = vmatprep.mubr.msk.f32.mxu1 %vm13881_vm1, %v13882_v32  ;;  %v9248_v47 = vld [vmem:[%s17009_s15 + $0xc0] sm:$0xff] }
0x1569   : > { %v15687_v18 = vadd.f32 %v15644_v45, %v4926_v25  ;;  %v4914_v14 = vmul.f32 %v13677_v60, %v15591_v42  ;;  %11621 = vmatprep.mubr.msk.f32.mxu0 %vm13881_vm1, %v13882_v32  ;;  %13110 = vmatprep.subr.bf16.mxu1 %v13880_v10  ;;  %v13114_v42 = vpack.c.bf16 %v5184_v11, %v5183_v59  ;;  %v9251_v25 = vld [vmem:[%s17009_s15 + $0xd8] sm:$0xff]  ;;  %v9254_v11 = vld [vmem:[%s17009_s15 + $0xf0] sm:$0xff] }
0x156a   : > { %v13159_v8 = vpack.c.bf16 %v9249_v34, %v9248_v47  ;;  %v13162_v60 = vpack.c.bf16 %v9251_v25, %v9250_v29 }
0x156b   : > { %v4927_v12 = vmul.f32 %v15638_v22, %v4914_v14  ;;  %11569 = vmatmul.mubr.f32.gmra.mrb[188].mxu1 %v15687_v18  ;;  %11622 = vmatmul.mubr.f32.gmra.mrb[188].mxu0 %v15687_v18  ;;  %v9253_v14 = vld [vmem:[%s17009_s15 + $0xe8] sm:$0xff] }
0x156c   : > { %v13679_v7 = vpop.eup %13678  ;;  %13112 = vmatpush3.bf16.msra.mxu1 %v13111_v44  ;;  %11571 = vmatprep.mubr.msk.f32.mxu1 %vm13881_vm1, %v13882_v32  ;;  %v9252_v44 = vld [vmem:[%s17009_s15 + $0xe0] sm:$0xff] }
0x156d   : > { %v15701_v56 = vadd.f32 %v15644_v45, %v4927_v12  ;;  %v4915_v33 = vmul.f32 %v13679_v7, %v15602_v1  ;;  %11624 = vmatprep.mubr.msk.f32.mxu0 %vm13881_vm1, %v13882_v32  ;;  %13113 = vmatprep.subr.bf16.mxu1 %v13880_v10  ;;  %v13117_v1 = vpack.c.bf16 %v5186_v36, %v5185_v4  ;;  %v9255_v12 = vld [vmem:[%s17009_s15 + $0xf8] sm:$0xff]  ;;  %v9274_v36 = vld [vmem:[%s17012_s22 + $0x90] sm:$0xff] }
0x156e   : > { %v13165_v59 = vpack.c.bf16 %v9253_v14, %v9252_v44  ;;  %v13168_v7 = vpack.c.bf16 %v9255_v12, %v9254_v11 }
0x156f   : > { %v4928_v24 = vmul.f32 %v15638_v22, %v4915_v33  ;;  %11572 = vmatmul.mubr.f32.gmra.mrb[190].mxu1 %v15701_v56  ;;  %11625 = vmatmul.mubr.f32.gmra.mrb[190].mxu0 %v15701_v56  ;;  %v9273_v33 = vld [vmem:[%s17012_s22 + $0x88] sm:$0xff] }
0x1570   : > { %v13681_v39 = vpop.eup %13680  ;;  %13115 = vmatpush3.bf16.msra.mxu1 %v13114_v42  ;;  %11574 = vmatprep.mubr.msk.f32.mxu1 %vm13881_vm1, %v13882_v32  ;;  %v9272_v42 = vld [vmem:[%s17012_s22 + $0x80] sm:$0xff] }
0x1571   : > { %v15715_v50 = vadd.f32 %v15644_v45, %v4928_v24  ;;  %v4916_v46 = vmul.f32 %v13681_v39, %v15615_v40  ;;  %11627 = vmatprep.mubr.msk.f32.mxu0 %vm13881_vm1, %v13882_v32  ;;  %13116 = vmatprep.subr.bf16.mxu1 %v13880_v10  ;;  %v13120_v40 = vpack.c.bf16 %v5188_v54, %v5187_v15  ;;  %v9275_v24 = vld [vmem:[%s17012_s22 + $0x98] sm:$0xff]  ;;  %v9278_v54 = vld [vmem:[%s17012_s22 + $0xb0] sm:$0xff] }
0x1572   : > { %v13195_v4 = vpack.c.bf16 %v9273_v33, %v9272_v42  ;;  %v13198_v39 = vpack.c.bf16 %v9275_v24, %v9274_v36 }
0x1573   : > { %v4929_v30 = vmul.f32 %v15638_v22, %v4916_v46  ;;  %11575 = vmatmul.mubr.f32.gmra.mrb[192].mxu1 %v15715_v50  ;;  %11628 = vmatmul.mubr.f32.gmra.mrb[192].mxu0 %v15715_v50  ;;  %v5189_v22 = vld [vmem:[%s17012_s22 + $0x70] sm:$0xff]  ;;  %v9277_v46 = vld [vmem:[%s17012_s22 + $0xa8] sm:$0xff] }
0x1574   : > { %13118 = vmatpush3.bf16.msra.mxu1 %v13117_v1  ;;  %11577 = vmatprep.mubr.msk.f32.mxu1 %vm13881_vm1, %v13882_v32  ;;  %v13123_v41 = vpack.c.bf16 %v5190_v2, %v5189_v22  ;;  %v9276_v1 = vld [vmem:[%s17012_s22 + $0xa0] sm:$0xff]  ;;  %v9281_v2 = vld [vmem:[%s17012_s22 + $0xc8] sm:$0xff] }
0x1575   : > { %v15729_v63 = vadd.f32 %v15644_v45, %v4929_v30  ;;  %11630 = vmatprep.mubr.msk.f32.mxu0 %vm13881_vm1, %v13882_v32  ;;  %13119 = vmatprep.subr.bf16.mxu1 %v13880_v10  ;;  %v9240_v45 = vld [vmem:[%s17009_s15 + $0x80] sm:$0xff]  ;;  %v13201_v15 = vpack.c.bf16 %v9277_v46, %v9276_v1  ;;  %v9279_v30 = vld [vmem:[%s17012_s22 + $0xb8] sm:$0xff] }
0x1576   : > { %v13147_v38 = vpack.c.bf16 %v9241_v0, %v9240_v45  ;;  %v9280_v22 = vld [vmem:[%s17012_s22 + $0xc0] sm:$0xff]  ;;  %v9282_v45 = vld [vmem:[%s17012_s22 + $0xd0] sm:$0xff]  ;;  %v9283_v0 = vld [vmem:[%s17012_s22 + $0xd8] sm:$0xff] }
0x1577   : > { %11578 = vmatmul.mubr.f32.gmra.mrb[194].mxu1 %v15729_v63  ;;  %11631 = vmatmul.mubr.f32.gmra.mrb[194].mxu0 %v15729_v63 }
0x1578   : > { %13121 = vmatpush3.bf16.msra.mxu1 %v13120_v40  ;;  %11665 = vmatprep.mubr.msk.f32.mxu1 %vm13881_vm1, %v13882_v32  ;;  %v13204_v40 = vpack.c.bf16 %v9279_v30, %v9278_v54 }
0x1579   : > { %13122 = vmatprep.subr.bf16.mxu1 %v13880_v10  ;;  %11700 = vmatprep.mubr.msk.f32.mxu0 %vm13881_vm1, %v13882_v32 }
0x157c   : > { %13124 = vmatpush3.bf16.msra.mxu1 %v13123_v41  ;;  %v13207_v41 = vpack.c.bf16 %v9281_v2, %v9280_v22 }
0x157d   : > { %13146 = vmatprep.subr.bf16.mxu1 %v13880_v10 }
0x157f   : > { %11666 = vmatmul.mubr.f32.vlgmr.msra.gmra.mrb[196].mxu1 %v15648_v9 }
0x1580   : > { %13148 = vmatpush3.bf16.msra.mxu1 %v13147_v38  ;;  %11668 = vmatprep.mubr.msk.f32.mxu1 %vm13881_vm1, %v13882_v32  ;;  %v13210_v38 = vpack.c.bf16 %v9283_v0, %v9282_v45 }
0x1581   : > { %13149 = vmatprep.subr.bf16.mxu1 %v13880_v10 }
0x1583   : > { %11669 = vmatmul.mubr.f32.gmra.mrb[198].mxu1 %v15659_v51 }
0x1584   : > { %13151 = vmatpush3.bf16.msra.mxu1 %v13150_v20  ;;  %11671 = vmatprep.mubr.msk.f32.mxu1 %vm13881_vm1, %v13882_v32  ;;  %v13213_v20 = vpack.c.bf16 %v9285_v58, %v9284_v17 }
0x1585   : > { %13152 = vmatprep.subr.bf16.mxu1 %v13880_v10 }
0x1587   : > { %11672 = vmatmul.mubr.f32.gmra.mrb[200].mxu1 %v15673_v49 }
0x1588   : > { %13154 = vmatpush3.bf16.msra.mxu1 %v13153_v28  ;;  %11674 = vmatprep.mubr.msk.f32.mxu1 %vm13881_vm1, %v13882_v32  ;;  %v13216_v28 = vpack.c.bf16 %v9287_v3, %v9286_v21 }
0x1589   : > { %13155 = vmatprep.subr.bf16.mxu1 %v13880_v10 }
0x158b   : > { %11675 = vmatmul.mubr.f32.gmra.mrb[202].mxu1 %v15687_v18 }
0x158c   : > { %13157 = vmatpush3.bf16.msra.mxu1 %v13156_v35  ;;  %11677 = vmatprep.mubr.msk.f32.mxu1 %vm13881_vm1, %v13882_v32 }
0x158d   : > { %13158 = vmatprep.subr.bf16.mxu1 %v13880_v10 }
0x158f   : > { %11678 = vmatmul.mubr.f32.gmra.mrb[204].mxu1 %v15701_v56 }
0x1590   : > { %13160 = vmatpush3.bf16.msra.mxu1 %v13159_v8  ;;  %11680 = vmatprep.mubr.msk.f32.mxu1 %vm13881_vm1, %v13882_v32 }
0x1591   : > { %13161 = vmatprep.subr.bf16.mxu1 %v13880_v10 }
0x1593   : > { %11681 = vmatmul.mubr.f32.gmra.mrb[206].mxu1 %v15715_v50 }
0x1594   : > { %13163 = vmatpush3.bf16.msra.mxu1 %v13162_v60  ;;  %11683 = vmatprep.mubr.msk.f32.mxu1 %vm13881_vm1, %v13882_v32 }
0x1595   : > { %13164 = vmatprep.subr.bf16.mxu1 %v13880_v10 }
0x1597   : > { %11684 = vmatmul.mubr.f32.gmra.mrb[208].mxu1 %v15729_v63 }
0x1598   : > { %13166 = vmatpush3.bf16.msra.mxu1 %v13165_v59  ;;  %11788 = vmatprep.mubr.msk.f32.mxu1 %vm13881_vm1, %v13882_v32 }
0x1599   : > { %13167 = vmatprep.subr.bf16.mxu1 %v13880_v10 }
0x159c   : > { %13169 = vmatpush3.bf16.msra.mxu1 %v13168_v7 }
0x159d   : > { %13194 = vmatprep.subr.bf16.mxu1 %v13880_v10 }
0x159f   : > { %11789 = vmatmul.mubr.f32.vlgmr.msra.gmra.mrb[210].mxu1 %v15648_v9 }
0x15a0   : > { %13196 = vmatpush3.bf16.msra.mxu1 %v13195_v4  ;;  %11791 = vmatprep.mubr.msk.f32.mxu1 %vm13881_vm1, %v13882_v32 }
0x15a1   : > { %13197 = vmatprep.subr.bf16.mxu1 %v13880_v10 }
0x15a3   : > { %11792 = vmatmul.mubr.f32.gmra.mrb[212].mxu1 %v15659_v51 }
0x15a4   : > { %13199 = vmatpush3.bf16.msra.mxu1 %v13198_v39  ;;  %11794 = vmatprep.mubr.msk.f32.mxu1 %vm13881_vm1, %v13882_v32 }
0x15a5   : > { %13200 = vmatprep.subr.bf16.mxu1 %v13880_v10 }
0x15a7   : > { %11795 = vmatmul.mubr.f32.gmra.mrb[214].mxu1 %v15673_v49 }
0x15a8   : > { %13202 = vmatpush3.bf16.msra.mxu1 %v13201_v15  ;;  %11797 = vmatprep.mubr.msk.f32.mxu1 %vm13881_vm1, %v13882_v32 }
0x15a9   : > { %13203 = vmatprep.subr.bf16.mxu1 %v13880_v10 }
0x15ab   : > { %11798 = vmatmul.mubr.f32.gmra.mrb[216].mxu1 %v15687_v18 }
0x15ac   : > { %13205 = vmatpush3.bf16.msra.mxu1 %v13204_v40  ;;  %11800 = vmatprep.mubr.msk.f32.mxu1 %vm13881_vm1, %v13882_v32 }
0x15ad   : > { %13206 = vmatprep.subr.bf16.mxu1 %v13880_v10 }
0x15af   : > { %11801 = vmatmul.mubr.f32.gmra.mrb[218].mxu1 %v15701_v56 }
0x15b0   : > { %13208 = vmatpush3.bf16.msra.mxu1 %v13207_v41  ;;  %11803 = vmatprep.mubr.msk.f32.mxu1 %vm13881_vm1, %v13882_v32 }
0x15b1   : > { %13209 = vmatprep.subr.bf16.mxu1 %v13880_v10 }
0x15b3   : > { %11804 = vmatmul.mubr.f32.gmra.mrb[220].mxu1 %v15715_v50 }
0x15b4   : > { %13211 = vmatpush3.bf16.msra.mxu1 %v13210_v38  ;;  %11806 = vmatprep.mubr.msk.f32.mxu1 %vm13881_vm1, %v13882_v32 }
0x15b5   : > { %13212 = vmatprep.subr.bf16.mxu1 %v13880_v10 }
0x15b7   : > { %11807 = vmatmul.mubr.f32.gmra.mrb[222].mxu1 %v15729_v63 }
0x15b8   : > { %13214 = vmatpush3.bf16.msra.mxu1 %v13213_v20  ;;  %11894 = vmatprep.mubr.msk.f32.mxu1 %vm13881_vm1, %v13882_v32 }
0x15b9   : > { %13215 = vmatprep.subr.bf16.mxu1 %v13880_v10 }
0x15bc   : > { %13217 = vmatpush3.bf16.msra.mxu1 %v13216_v28 }
0x15bd   : > { %13230 = vmatprep.subr.bf16.mxu1 %v13880_v10 }
0x15bf   : > { %11895 = vmatmul.mubr.f32.vlgmr.msra.gmra.mrb[224].mxu1 %v15648_v9 }
0x15c0   : > { %11897 = vmatprep.mubr.msk.f32.mxu1 %vm13881_vm1, %v13882_v32 }
0x15c3   : > { %11898 = vmatmul.mubr.f32.gmra.mrb[226].mxu1 %v15659_v51 }
0x15c4   : > { %11900 = vmatprep.mubr.msk.f32.mxu1 %vm13881_vm1, %v13882_v32 }
0x15c7   : > { %11901 = vmatmul.mubr.f32.gmra.mrb[228].mxu1 %v15673_v49 }
0x15c8   : > { %11903 = vmatprep.mubr.msk.f32.mxu1 %vm13881_vm1, %v13882_v32 }
0x15cb   : > { %11904 = vmatmul.mubr.f32.gmra.mrb[230].mxu1 %v15687_v18 }
0x15cc   : > { %11906 = vmatprep.mubr.msk.f32.mxu1 %vm13881_vm1, %v13882_v32 }
0x15cf   : > { %11907 = vmatmul.mubr.f32.gmra.mrb[232].mxu1 %v15701_v56 }
0x15d0   : > { %11909 = vmatprep.mubr.msk.f32.mxu1 %vm13881_vm1, %v13882_v32 }
0x15d3   : > { %11910 = vmatmul.mubr.f32.gmra.mrb[234].mxu1 %v15715_v50 }
0x15d4   : > { %11912 = vmatprep.mubr.msk.f32.mxu1 %vm13881_vm1, %v13882_v32 }
0x15d7   : > { %11913 = vmatmul.mubr.f32.gmra.mrb[236].mxu1 %v15729_v63 }
0x15d8   : > { %11964 = vmatprep.mubr.msk.f32.mxu1 %vm13881_vm1, %v13882_v32 }
0x1632   : > { %v5025_v57 = vpop.f32.mrb[182].mxu1  ;;  %v5141_v52 = vpop.f32.mrb[182].mxu0 }
0x1633   : > { %v11561_v35 = vpop.f32.mrb[183].mxu1  ;;  %v11614_v47 = vpop.f32.mrb[183].mxu0 }
0x1636   : > { %v5030_v34 = vpop.f32.mrb[184].mxu1  ;;  %v5146_v8 = vpop.f32.mrb[184].mxu0 }
0x1637   : > { %v13126_v29 = vpack.c.bf16 %v5146_v8, %v5141_v52  ;;  %v11564_v25 = vpop.f32.mrb[185].mxu1  ;;  %v11617_v60 = vpop.f32.mrb[185].mxu0 }
0x1639   : > { %13128 = vmatpush3.bf16.xpose.msk.msra.mxu0 %vm14401_vm3, %v13126_v29 }
0x163a   : > { %v5035_v44 = vpop.f32.mrb[186].mxu1  ;;  %v5151_v14 = vpop.f32.mrb[186].mxu0  ;;  %13129 = vmatprep.subr.bf16.mxu0 %v13880_v10 }
0x163b   : > { %v11567_v59 = vpop.f32.mrb[187].mxu1  ;;  %v11620_v11 = vpop.f32.mrb[187].mxu0 }
0x163e   : > { %v5040_v12 = vpop.f32.mrb[188].mxu1  ;;  %v5156_v7 = vpop.f32.mrb[188].mxu0 }
0x163f   : > { %v13130_v42 = vpack.c.bf16 %v5156_v7, %v5151_v14  ;;  %v11570_v33 = vpop.f32.mrb[189].mxu1  ;;  %v11623_v4 = vpop.f32.mrb[189].mxu0 }
0x1641   : > { %13132 = vmatpush3.bf16.xpose.msk.msra.mxu0 %vm14401_vm3, %v13130_v42 }
0x1642   : > { %v5045_v36 = vpop.f32.mrb[190].mxu1  ;;  %v5161_v24 = vpop.f32.mrb[190].mxu0  ;;  %13133 = vmatprep.subr.bf16.mxu0 %v13880_v10 }
0x1643   : > { %v11573_v39 = vpop.f32.mrb[191].mxu1  ;;  %v11626_v1 = vpop.f32.mrb[191].mxu0 }
0x1646   : > { %v5050_v46 = vpop.f32.mrb[192].mxu1  ;;  %v5166_v15 = vpop.f32.mrb[192].mxu0 }
0x1647   : > { %v13134_v54 = vpack.c.bf16 %v5166_v15, %v5161_v24  ;;  %v11576_v30 = vpop.f32.mrb[193].mxu1  ;;  %v11629_v40 = vpop.f32.mrb[193].mxu0 }
0x1649   : > { %13136 = vmatpush3.bf16.xpose.msk.msra.mxu0 %vm14401_vm3, %v13134_v54 }
0x164a   : > { %v5055_v22 = vpop.f32.mrb[194].mxu1  ;;  %v5171_v2 = vpop.f32.mrb[194].mxu0  ;;  %11698 = vmatprep.subr.mxu0 %v13882_v32 }
0x164b   : > { %v11579_v41 = vpop.f32.mrb[195].mxu1  ;;  %v11632_v45 = vpop.f32.mrb[195].mxu0 }
0x1651   : > { %11699 = vmatpush3.xpose.msk.msra.mxu0 %vm1388_vm2, %v5171_v2 }
0x1652   : > { %v5257_v0 = vpop.f32.mrb[196].mxu1  ;;  %13137 = vmatprep.subr.bf16.mxu0 %v13880_v10 }
0x1653   : > { %v11667_v38 = vpop.f32.mrb[197].mxu1 }
0x1654   : > { %11701 = vmatmul.mubr.msk.f32.vlgmr.msra.gmra.mrb[196].mxu0 %vm1388_vm2, %v5025_v57 }
0x1655   : > { %11703 = vmatprep.mubr.msk.f32.mxu0 %vm13881_vm1, %v13882_v32 }
0x1656   : > { %v5262_v17 = vpop.f32.mrb[198].mxu1 }
0x1657   : > { %v13138_v58 = vpack.c.bf16 %v5262_v17, %v5257_v0  ;;  %v11670_v20 = vpop.f32.mrb[199].mxu1 }
0x1658   : > { %11704 = vmatmul.mubr.msk.f32.gmra.mrb[198].mxu0 %vm1388_vm2, %v5030_v34 }
0x1659   : > { %13139 = vmatpush3.bf16.msra.mxu0 %v13138_v58  ;;  %11706 = vmatprep.mubr.msk.f32.mxu0 %vm13881_vm1, %v13882_v32 }
0x165a   : > { %v5267_v21 = vpop.f32.mrb[200].mxu1  ;;  %13140 = vmatprep.subr.bf16.mxu0 %v13880_v10 }
0x165b   : > { %v11673_v3 = vpop.f32.mrb[201].mxu1 }
0x165c   : > { %11707 = vmatmul.mubr.msk.f32.gmra.mrb[200].mxu0 %vm1388_vm2, %v5035_v44 }
0x165d   : > { %11709 = vmatprep.mubr.msk.f32.mxu0 %vm13881_vm1, %v13882_v32 }
0x165e   : > { %v5272_v28 = vpop.f32.mrb[202].mxu1 }
0x165f   : > { %v13141_v57 = vpack.c.bf16 %v5272_v28, %v5267_v21  ;;  %v11676_v52 = vpop.f32.mrb[203].mxu1 }
0x1660   : > { %11710 = vmatmul.mubr.msk.f32.gmra.mrb[202].mxu0 %vm1388_vm2, %v5040_v12 }
0x1661   : > { %13142 = vmatpush3.bf16.msra.mxu0 %v13141_v57  ;;  %11712 = vmatprep.mubr.msk.f32.mxu0 %vm13881_vm1, %v13882_v32 }
0x1662   : > { %v5277_v35 = vpop.f32.mrb[204].mxu1  ;;  %13143 = vmatprep.subr.bf16.mxu0 %v13880_v10 }
0x1663   : > { %v11679_v47 = vpop.f32.mrb[205].mxu1 }
0x1664   : > { %11713 = vmatmul.mubr.msk.f32.gmra.mrb[204].mxu0 %vm1388_vm2, %v5045_v36 }
0x1665   : > { %11715 = vmatprep.mubr.msk.f32.mxu0 %vm13881_vm1, %v13882_v32 }
0x1666   : > { %v5282_v34 = vpop.f32.mrb[206].mxu1 }
0x1667   : > { %v13144_v8 = vpack.c.bf16 %v5282_v34, %v5277_v35  ;;  %v11682_v29 = vpop.f32.mrb[207].mxu1 }
0x1668   : > { %11716 = vmatmul.mubr.msk.f32.gmra.mrb[206].mxu0 %vm1388_vm2, %v5050_v46 }
0x1669   : > { %13145 = vmatpush3.bf16.msra.mxu0 %v13144_v8  ;;  %11718 = vmatprep.mubr.msk.f32.mxu0 %vm13881_vm1, %v13882_v32 }
0x166a   : > { %v5287_v25 = vpop.f32.mrb[208].mxu1  ;;  %11733 = vmatprep.subr.mxu0 %v13882_v32 }
0x166b   : > { %v11685_v60 = vpop.f32.mrb[209].mxu1 }
0x166c   : > { %11719 = vmatmul.mubr.msk.f32.gmra.mrb[208].mxu0 %vm1388_vm2, %v5055_v22 }
0x166d   : > { %11734 = vmatpush3.msra.mxu0 %v5287_v25  ;;  %11735 = vmatprep.mubr.msk.f32.mxu0 %vm13881_vm1, %v13882_v32 }
0x166e   : > { %13170 = vmatprep.subr.bf16.mxu0 %v13880_v10 }
0x1672   : > { %v15891_v44 = vpop.f32.mrb[210].mxu1 }
0x1673   : > { %v11790_v14 = vpop.f32.mrb[211].mxu1 }
0x1676   : > { %v15893_v59 = vpop.f32.mrb[212].mxu1 }
0x1677   : > { %v11793_v11 = vpop.f32.mrb[213].mxu1 }
0x167a   : > { %v15895_v12 = vpop.f32.mrb[214].mxu1 }
0x167b   : > { %v11796_v7 = vpop.f32.mrb[215].mxu1 }
0x167e   : > { %v15897_v42 = vpop.f32.mrb[216].mxu1 }
0x167f   : > { %v11799_v33 = vpop.f32.mrb[217].mxu1 }
0x1682   : > { %v15899_v4 = vpop.f32.mrb[218].mxu1 }
0x1683   : > { %v11802_v36 = vpop.f32.mrb[219].mxu1 }
0x1686   : > { %v15901_v24 = vpop.f32.mrb[220].mxu1 }
0x1687   : > { %v11805_v39 = vpop.f32.mrb[221].mxu1 }
0x168a   : > { %v15903_v1 = vpop.f32.mrb[222].mxu1 }
0x168b   : > { %v11808_v46 = vpop.f32.mrb[223].mxu1 }
0x1692   : > { %v5964_v15 = vpop.f32.mrb[224].mxu1 }
0x1693   : > { %v11896_v54 = vpop.f32.mrb[225].mxu1 }
0x1696   : > { %v5969_v30 = vpop.f32.mrb[226].mxu1 }
0x1697   : > { %v13231_v40 = vpack.c.bf16 %v5969_v30, %v5964_v15  ;;  %v11899_v22 = vpop.f32.mrb[227].mxu1 }
0x1699   : > { %13232 = vmatpush3.bf16.msra.mxu1 %v13231_v40 }
0x169a   : > { %v5974_v2 = vpop.f32.mrb[228].mxu1  ;;  %13233 = vmatprep.subr.bf16.mxu1 %v13880_v10 }
0x169b   : > { %v11902_v41 = vpop.f32.mrb[229].mxu1 }
0x169e   : > { %v5979_v45 = vpop.f32.mrb[230].mxu1 }
0x169f   : > { %v13234_v0 = vpack.c.bf16 %v5979_v45, %v5974_v2  ;;  %v11905_v38 = vpop.f32.mrb[231].mxu1 }
0x16a1   : > { %13235 = vmatpush3.bf16.msra.mxu1 %v13234_v0 }
0x16a2   : > { %v5984_v17 = vpop.f32.mrb[232].mxu1  ;;  %13236 = vmatprep.subr.bf16.mxu1 %v13880_v10 }
0x16a3   : > { %v11908_v58 = vpop.f32.mrb[233].mxu1 }
0x16a6   : > { %v5989_v20 = vpop.f32.mrb[234].mxu1 }
0x16a7   : > { %v13237_v21 = vpack.c.bf16 %v5989_v20, %v5984_v17  ;;  %v11911_v3 = vpop.f32.mrb[235].mxu1 }
0x16a9   : > { %13238 = vmatpush3.bf16.msra.mxu1 %v13237_v21 }
0x16aa   : > { %v5994_v28 = vpop.f32.mrb[236].mxu1  ;;  %11962 = vmatprep.subr.mxu1 %v13882_v32 }
0x16ab   : > { %v11914_v57 = vpop.f32.mrb[237].mxu1 }
0x16ad   : > { %11963 = vmatpush3.msra.mxu1 %v5994_v28 }
0x16ae   : > { %13242 = vmatprep.subr.bf16.mxu1 %v13880_v10 }
0x1727   : > { %v5399_v52 = vpop.f32.mrb[196].mxu0 }
0x1728   : > { %v5433_v35 = vmul.f32 0.25, %v5399_v52  ;;  %v11702_v47 = vpop.f32.mrb[197].mxu0 }
0x172a   : > { %v5440_v34 = vsel %vm14461_vm4, %v5433_v35, -1e+30 }
0x172b   : > { %v5404_v8 = vpop.f32.mrb[198].mxu0  ;;  %v5447_v29 = vsel %vm1545_vm5, %v5440_v34, -inf }
0x172c   : > { %v5434_v25 = vmul.f32 0.25, %v5404_v8  ;;  %5448 = vmax.xlane.f32.xlu0 %v5447_v29  ;;  %v11705_v60 = vpop.f32.mrb[199].mxu0 }
0x172e   : > { %v5441_v14 = vsel %vm14469_vm6, %v5434_v25, -1e+30 }
0x172f   : > { %v5409_v11 = vpop.f32.mrb[200].mxu0  ;;  %v5450_v7 = vsel %vm1545_vm5, %v5441_v14, -inf }
0x1730   : > { %v5435_v33 = vmul.f32 0.25, %v5409_v11  ;;  %5451 = vmax.xlane.f32.xlu1 %v5450_v7  ;;  %v11708_v36 = vpop.f32.mrb[201].mxu0 }
0x1732   : > { %v5442_v39 = vsel %vm14477_vm7, %v5435_v33, -1e+30 }
0x1733   : > { %v5414_v46 = vpop.f32.mrb[202].mxu0  ;;  %v5453_v15 = vsel %vm1545_vm5, %v5442_v39, -inf }
0x1734   : > { %v5436_v54 = vmul.f32 0.25, %v5414_v46  ;;  %5454 = vmax.xlane.f32.xlu0 %v5453_v15  ;;  %v11711_v30 = vpop.f32.mrb[203].mxu0 }
0x1736   : > { %v5443_v40 = vsel %vm14485_vm8, %v5436_v54, -1e+30 }
0x1737   : > { %v5419_v22 = vpop.f32.mrb[204].mxu0  ;;  %v5456_v2 = vsel %vm1545_vm5, %v5443_v40, -inf }
0x1738   : > { %v5437_v41 = vmul.f32 0.25, %v5419_v22  ;;  %5457 = vmax.xlane.f32.xlu1 %v5456_v2  ;;  %v11714_v45 = vpop.f32.mrb[205].mxu0 }
0x173a   : > { %v5444_v0 = vsel %vm14493_vm9, %v5437_v41, -1e+30 }
0x173b   : > { %v5424_v38 = vpop.f32.mrb[206].mxu0  ;;  %v5459_v17 = vsel %vm1545_vm5, %v5444_v0, -inf }
0x173c   : > { %v5438_v58 = vmul.f32 0.25, %v5424_v38  ;;  %5460 = vmax.xlane.f32.xlu0 %v5459_v17  ;;  %v11717_v20 = vpop.f32.mrb[207].mxu0 }
0x173e   : > { %v5445_v21 = vsel %vm14501_vm10, %v5438_v58, -1e+30 }
0x173f   : > { %v5429_v3 = vpop.f32.mrb[208].mxu0  ;;  %v5462_v28 = vsel %vm1545_vm5, %v5445_v21, -inf }
0x1740   : > { %v5439_v57 = vmul.f32 0.25, %v5429_v3  ;;  %5463 = vmax.xlane.f32.xlu1 %v5462_v28  ;;  %v11720_v52 = vpop.f32.mrb[209].mxu0 }
0x1742   : > { %v5446_v35 = vsel %vm14509_vm11, %v5439_v57, -1e+30 }
0x1743   : > { %v5465_v47 = vsel %vm1545_vm5, %v5446_v35, -inf }
0x1744   : > { %5466 = vmax.xlane.f32.xlu0 %v5465_v47 }
0x17b9   : > { %v5449_v8 = vpop.xlane.xlu0 %5448 }
0x17ba   : > { %v5468_v29 = vsub.f32 %v5440_v34, %v5449_v8 }
0x17bc   : > { %v5475_v25 = vmul.f32 1.442695, %v5468_v29 }
0x17bd   : > { %v5452_v60 = vpop.xlane.xlu1 %5451 }
0x17be   : > { %13682 = vpow2.f32 %v5475_v25  ;;  %v5469_v11 = vsub.f32 %v5441_v14, %v5452_v60 }
0x17c0   : > { %v5477_v7 = vmul.f32 1.442695, %v5469_v11 }
0x17c1   : > { %v5455_v33 = vpop.xlane.xlu0 %5454 }
0x17c2   : > { %13684 = vpow2.f32 %v5477_v7  ;;  %v5470_v36 = vsub.f32 %v5442_v39, %v5455_v33  ;;  %v9256_v33 = vld [vmem:[%s17010_s16 + $0x80] sm:$0xff] }
0x17c4   : > { %v5479_v46 = vmul.f32 1.442695, %v5470_v36  ;;  %v9257_v36 = vld [vmem:[%s17010_s16 + $0x88] sm:$0xff] }
0x17c5   : > { %v5458_v15 = vpop.xlane.xlu1 %5457 }
0x17c6   : > { %13686 = vpow2.f32 %v5479_v46  ;;  %v5471_v54 = vsub.f32 %v5443_v40, %v5458_v15  ;;  %v13171_v15 = vpack.c.bf16 %v9257_v36, %v9256_v33  ;;  %v9266_v36 = vld [vmem:[%s17010_s16 + $0xd0] sm:$0xff] }
0x17c8   : > { %v13683_v30 = vpop.eup %13682  ;;  %v5481_v22 = vmul.f32 1.442695, %v5471_v54 }
0x17c9   : > { %v5461_v2 = vpop.xlane.xlu0 %5460  ;;  %v5489_v41 = vsel %vm1545_vm5, %v13683_v30, 0.0 }
0x17ca   : > { %13688 = vpow2.f32 %v5481_v22  ;;  %v5472_v45 = vsub.f32 %v5444_v0, %v5461_v2  ;;  %5490 = vadd.xlane.f32.xlu1 %v5489_v41  ;;  %v9258_v2 = vld [vmem:[%s17010_s16 + $0x90] sm:$0xff]  ;;  %v9259_v41 = vld [vmem:[%s17010_s16 + $0x98] sm:$0xff] }
0x17cc   : > { %v13685_v34 = vpop.eup %13684  ;;  %v5483_v38 = vmul.f32 1.442695, %v5472_v45 }
0x17cd   : > { %v5464_v17 = vpop.xlane.xlu1 %5463  ;;  %v5492_v14 = vsel %vm1545_vm5, %v13685_v34, 0.0 }
0x17ce   : > { %13690 = vpow2.f32 %v5483_v38  ;;  %v5473_v58 = vsub.f32 %v5445_v21, %v5464_v17  ;;  %5493 = vadd.xlane.f32.xlu0 %v5492_v14  ;;  %v13174_v38 = vpack.c.bf16 %v9259_v41, %v9258_v2  ;;  %v9269_v2 = vld [vmem:[%s17010_s16 + $0xe8] sm:$0xff] }
0x17d0   : > { %v13687_v39 = vpop.eup %13686  ;;  %v5485_v20 = vmul.f32 1.442695, %v5473_v58  ;;  %v9260_v58 = vld [vmem:[%s17010_s16 + $0xa0] sm:$0xff] }
0x17d1   : > { %v5467_v3 = vpop.xlane.xlu0 %5466  ;;  %v5495_v40 = vsel %vm1545_vm5, %v13687_v39, 0.0 }
0x17d2   : > { %13692 = vpow2.f32 %v5485_v20  ;;  %v5474_v28 = vsub.f32 %v5446_v35, %v5467_v3  ;;  %5496 = vadd.xlane.f32.xlu1 %v5495_v40 }
0x17d4   : > { %v13689_v57 = vpop.eup %13688  ;;  %v5487_v52 = vmul.f32 1.442695, %v5474_v28 }
0x17d5   : > { %v5498_v0 = vsel %vm1545_vm5, %v13689_v57, 0.0 }
0x17d6   : > { %13694 = vpow2.f32 %v5487_v52  ;;  %5499 = vadd.xlane.f32.xlu0 %v5498_v0  ;;  %v9262_v52 = vld [vmem:[%s17010_s16 + $0xb0] sm:$0xff]  ;;  %v9263_v0 = vld [vmem:[%s17010_s16 + $0xb8] sm:$0xff] }
0x17d8   : > { %v15934_v47 = vpop.eup %13690 }
0x17d9   : > { %v5501_v21 = vsel %vm1545_vm5, %v15934_v47, 0.0 }
0x17da   : > { %5502 = vadd.xlane.f32.xlu1 %v5501_v21  ;;  %v13180_v21 = vpack.c.bf16 %v9263_v0, %v9262_v52 }
0x17dc   : > { %v15938_v8 = vpop.eup %13692 }
0x17dd   : > { %v5504_v35 = vsel %vm1545_vm5, %v15938_v8, 0.0 }
0x17de   : > { %5505 = vadd.xlane.f32.xlu0 %v5504_v35 }
0x17e0   : > { %v15942_v29 = vpop.eup %13694 }
0x17e1   : > { %v5507_v25 = vsel %vm1545_vm5, %v15942_v29, 0.0 }
0x17e2   : > { %5508 = vadd.xlane.f32.xlu1 %v5507_v25 }
0x1857   : > { %v5491_v60 = vpop.xlane.xlu1 %5490 }
0x1858   : > { %13696 = vrcp.f32 %v5491_v60  ;;  %v9264_v60 = vld [vmem:[%s17010_s16 + $0xc0] sm:$0xff] }
0x185b   : > { %v5494_v11 = vpop.xlane.xlu0 %5493 }
0x185c   : > { %13698 = vrcp.f32 %v5494_v11  ;;  %v9265_v11 = vld [vmem:[%s17010_s16 + $0xc8] sm:$0xff] }
0x185f   : > { %v5497_v7 = vpop.xlane.xlu1 %5496 }
0x1860   : > { %13700 = vrcp.f32 %v5497_v7  ;;  %v13183_v7 = vpack.c.bf16 %v9265_v11, %v9264_v60 }
0x1862   : > { %v13697_v46 = vpop.eup %13696 }
0x1863   : > { %v5517_v54 = vmul.f32 %v13697_v46, %v13683_v30  ;;  %v5500_v22 = vpop.xlane.xlu0 %5499  ;;  %v9261_v30 = vld [vmem:[%s17010_s16 + $0xa8] sm:$0xff]  ;;  %v9267_v46 = vld [vmem:[%s17010_s16 + $0xd8] sm:$0xff] }
0x1864   : > { %13702 = vrcp.f32 %v5500_v22  ;;  %v13177_v3 = vpack.c.bf16 %v9261_v30, %v9260_v58  ;;  %v9268_v22 = vld [vmem:[%s17010_s16 + $0xe0] sm:$0xff] }
0x1865   : > { %11736 = vmatmul.mubr.msk.f32.vlgmr.msra.gmra.mrb[210].mxu0 %vm1545_vm5, %v5517_v54  ;;  %v13189_v41 = vpack.c.bf16 %v9269_v2, %v9268_v22 }
0x1866   : > { %v13699_v45 = vpop.eup %13698  ;;  %13172 = vmatpush3.bf16.msra.mxu0 %v13171_v15  ;;  %11738 = vmatprep.mubr.msk.f32.mxu0 %vm13881_vm1, %v13882_v32  ;;  %v13186_v15 = vpack.c.bf16 %v9267_v46, %v9266_v36 }
0x1867   : > { %v5503_v17 = vpop.xlane.xlu1 %5502  ;;  %13173 = vmatprep.subr.bf16.mxu0 %v13880_v10  ;;  %v5518_v14 = vmul.f32 %v13699_v45, %v13685_v34 }
0x1868   : > { %13704 = vrcp.f32 %v5503_v17  ;;  %v9271_v17 = vld [vmem:[%s17010_s16 + $0xf8] sm:$0xff] }
0x1869   : > { %11739 = vmatmul.mubr.msk.f32.gmra.mrb[212].mxu0 %vm1545_vm5, %v5518_v14 }
0x186a   : > { %v13701_v20 = vpop.eup %13700  ;;  %13175 = vmatpush3.bf16.msra.mxu0 %v13174_v38  ;;  %11741 = vmatprep.mubr.msk.f32.mxu0 %vm13881_vm1, %v13882_v32  ;;  %v9270_v38 = vld [vmem:[%s17010_s16 + $0xf0] sm:$0xff] }
0x186b   : > { %v5506_v40 = vpop.xlane.xlu0 %5505  ;;  %13176 = vmatprep.subr.bf16.mxu0 %v13880_v10  ;;  %v5519_v28 = vmul.f32 %v13701_v20, %v13687_v39 }
0x186c   : > { %13706 = vrcp.f32 %v5506_v40 }
0x186d   : > { %11742 = vmatmul.mubr.msk.f32.gmra.mrb[214].mxu0 %vm1545_vm5, %v5519_v28 }
0x186e   : > { %v13703_v34 = vpop.eup %13702  ;;  %13178 = vmatpush3.bf16.msra.mxu0 %v13177_v3  ;;  %11744 = vmatprep.mubr.msk.f32.mxu0 %vm13881_vm1, %v13882_v32 }
0x186f   : > { %v5509_v35 = vpop.xlane.xlu1 %5508  ;;  %13179 = vmatprep.subr.bf16.mxu0 %v13880_v10  ;;  %v5520_v25 = vmul.f32 %v13703_v34, %v13689_v57 }
0x1870   : > { %13708 = vrcp.f32 %v5509_v35 }
0x1871   : > { %11745 = vmatmul.mubr.msk.f32.gmra.mrb[216].mxu0 %vm1545_vm5, %v5520_v25 }
0x1872   : > { %v13705_v39 = vpop.eup %13704  ;;  %13181 = vmatpush3.bf16.msra.mxu0 %v13180_v21  ;;  %11747 = vmatprep.mubr.msk.f32.mxu0 %vm13881_vm1, %v13882_v32 }
0x1873   : > { %13182 = vmatprep.subr.bf16.mxu0 %v13880_v10  ;;  %v5521_v33 = vmul.f32 %v13705_v39, %v15934_v47 }
0x1875   : > { %11748 = vmatmul.mubr.msk.f32.gmra.mrb[218].mxu0 %vm1545_vm5, %v5521_v33 }
0x1876   : > { %v13707_v57 = vpop.eup %13706  ;;  %13184 = vmatpush3.bf16.msra.mxu0 %v13183_v7  ;;  %11750 = vmatprep.mubr.msk.f32.mxu0 %vm13881_vm1, %v13882_v32 }
0x1877   : > { %13185 = vmatprep.subr.bf16.mxu0 %v13880_v10  ;;  %v5522_v54 = vmul.f32 %v13707_v57, %v15938_v8  ;;  %v13192_v8 = vpack.c.bf16 %v9271_v17, %v9270_v38 }
0x1879   : > { %11751 = vmatmul.mubr.msk.f32.gmra.mrb[220].mxu0 %vm1545_vm5, %v5522_v54 }
0x187a   : > { %v13709_v47 = vpop.eup %13708  ;;  %13187 = vmatpush3.bf16.msra.mxu0 %v13186_v15  ;;  %11753 = vmatprep.mubr.msk.f32.mxu0 %vm13881_vm1, %v13882_v32 }
0x187b   : > { %13188 = vmatprep.subr.bf16.mxu0 %v13880_v10  ;;  %v5523_v45 = vmul.f32 %v13709_v47, %v15942_v29 }
0x187d   : > { %11754 = vmatmul.mubr.msk.f32.gmra.mrb[222].mxu0 %vm1545_vm5, %v5523_v45 }
0x187e   : > { %13190 = vmatpush3.bf16.msra.mxu0 %v13189_v41  ;;  %11841 = vmatprep.mubr.msk.f32.mxu0 %vm13881_vm1, %v13882_v32 }
0x187f   : > { %13191 = vmatprep.subr.bf16.mxu0 %v13880_v10 }
0x1882   : > { %13193 = vmatpush3.bf16.msra.mxu0 %v13192_v8 }
0x1883   : > { %13218 = vmatprep.subr.bf16.mxu0 %v13880_v10 }
0x1885   : > { %11842 = vmatmul.mubr.f32.vlgmr.msra.gmra.mrb[224].mxu0 %v15648_v9 }
0x1886   : > { %11844 = vmatprep.mubr.msk.f32.mxu0 %vm13881_vm1, %v13882_v32 }
0x1889   : > { %11845 = vmatmul.mubr.f32.gmra.mrb[226].mxu0 %v15659_v51 }
0x188a   : > { %11847 = vmatprep.mubr.msk.f32.mxu0 %vm13881_vm1, %v13882_v32 }
0x188d   : > { %11848 = vmatmul.mubr.f32.gmra.mrb[228].mxu0 %v15673_v49 }
0x188e   : > { %11850 = vmatprep.mubr.msk.f32.mxu0 %vm13881_vm1, %v13882_v32 }
0x1891   : > { %11851 = vmatmul.mubr.f32.gmra.mrb[230].mxu0 %v15687_v18 }
0x1892   : > { %11853 = vmatprep.mubr.msk.f32.mxu0 %vm13881_vm1, %v13882_v32 }
0x1895   : > { %11854 = vmatmul.mubr.f32.gmra.mrb[232].mxu0 %v15701_v56 }
0x1896   : > { %11856 = vmatprep.mubr.msk.f32.mxu0 %vm13881_vm1, %v13882_v32 }
0x1899   : > { %11857 = vmatmul.mubr.f32.gmra.mrb[234].mxu0 %v15715_v50 }
0x189a   : > { %11859 = vmatprep.mubr.msk.f32.mxu0 %vm13881_vm1, %v13882_v32 }
0x189d   : > { %11860 = vmatmul.mubr.f32.gmra.mrb[236].mxu0 %v15729_v63 }
0x189e   : > { %11929 = vmatprep.mubr.msk.f32.mxu0 %vm13881_vm1, %v13882_v32 }
0x1938   : > { %v16015_v29 = vpop.f32.mrb[210].mxu0 }
0x1939   : > { %v11737_v14 = vpop.f32.mrb[211].mxu0 }
0x193c   : > { %v16017_v58 = vpop.f32.mrb[212].mxu0 }
0x193d   : > { %v11740_v30 = vpop.f32.mrb[213].mxu0 }
0x1940   : > { %v16019_v20 = vpop.f32.mrb[214].mxu0 }
0x1941   : > { %v11743_v3 = vpop.f32.mrb[215].mxu0 }
0x1944   : > { %v16021_v40 = vpop.f32.mrb[216].mxu0 }
0x1945   : > { %v11746_v28 = vpop.f32.mrb[217].mxu0 }
0x1948   : > { %v16023_v52 = vpop.f32.mrb[218].mxu0 }
0x1949   : > { %v11749_v0 = vpop.f32.mrb[219].mxu0 }
0x194c   : > { %v16025_v34 = vpop.f32.mrb[220].mxu0 }
0x194d   : > { %v11752_v21 = vpop.f32.mrb[221].mxu0 }
0x1950   : > { %v16027_v35 = vpop.f32.mrb[222].mxu0 }
0x1951   : > { %v11755_v25 = vpop.f32.mrb[223].mxu0 }
0x1958   : > { %v5847_v60 = vpop.f32.mrb[224].mxu0 }
0x1959   : > { %v11843_v11 = vpop.f32.mrb[225].mxu0 }
0x195c   : > { %v5852_v39 = vpop.f32.mrb[226].mxu0 }
0x195d   : > { %v13219_v7 = vpack.c.bf16 %v5852_v39, %v5847_v60  ;;  %v11846_v33 = vpop.f32.mrb[227].mxu0 }
0x195f   : > { %13221 = vmatpush3.bf16.xpose.msk.msra.mxu0 %vm14401_vm3, %v13219_v7 }
0x1960   : > { %v5857_v36 = vpop.f32.mrb[228].mxu0  ;;  %13222 = vmatprep.subr.bf16.mxu0 %v13880_v10 }
0x1961   : > { %v11849_v46 = vpop.f32.mrb[229].mxu0 }
0x1964   : > { %v5862_v57 = vpop.f32.mrb[230].mxu0 }
0x1965   : > { %v13223_v15 = vpack.c.bf16 %v5862_v57, %v5857_v36  ;;  %v11852_v54 = vpop.f32.mrb[231].mxu0 }
0x1967   : > { %13225 = vmatpush3.bf16.xpose.msk.msra.mxu0 %vm14401_vm3, %v13223_v15 }
0x1968   : > { %v5867_v22 = vpop.f32.mrb[232].mxu0  ;;  %13226 = vmatprep.subr.bf16.mxu0 %v13880_v10 }
0x1969   : > { %v11855_v2 = vpop.f32.mrb[233].mxu0 }
0x196c   : > { %v5872_v47 = vpop.f32.mrb[234].mxu0 }
0x196d   : > { %v13227_v41 = vpack.c.bf16 %v5872_v47, %v5867_v22  ;;  %v11858_v45 = vpop.f32.mrb[235].mxu0 }
0x196f   : > { %13229 = vmatpush3.bf16.xpose.msk.msra.mxu0 %vm14401_vm3, %v13227_v41 }
0x1970   : > { %v5877_v38 = vpop.f32.mrb[236].mxu0  ;;  %11927 = vmatprep.subr.mxu0 %v13882_v32 }
0x1971   : > { %v11861_v17 = vpop.f32.mrb[237].mxu0 }
0x1977   : > { %11928 = vmatpush3.xpose.msk.msra.mxu0 %vm1388_vm2, %v5877_v38 }
0x1978   : > { %13239 = vmatprep.subr.bf16.mxu0 %v13880_v10 }
0x197a   : > { %11930 = vmatmul.mubr.msk.f32.vlgmr.msra.gmra.mrb[238].mxu0 %vm1388_vm2, %v15891_v44 }
0x197b   : > { %11932 = vmatprep.mubr.msk.f32.mxu0 %vm13881_vm1, %v13882_v32 }
0x197e   : > { %11933 = vmatmul.mubr.msk.f32.gmra.mrb[240].mxu0 %vm1388_vm2, %v15893_v59 }
0x197f   : > { %11935 = vmatprep.mubr.msk.f32.mxu0 %vm13881_vm1, %v13882_v32 }
0x1982   : > { %11936 = vmatmul.mubr.msk.f32.gmra.mrb[242].mxu0 %vm1388_vm2, %v15895_v12 }
0x1983   : > { %11938 = vmatprep.mubr.msk.f32.mxu0 %vm13881_vm1, %v13882_v32 }
0x1986   : > { %11939 = vmatmul.mubr.msk.f32.gmra.mrb[244].mxu0 %vm1388_vm2, %v15897_v42 }
0x1987   : > { %11941 = vmatprep.mubr.msk.f32.mxu0 %vm13881_vm1, %v13882_v32 }
0x198a   : > { %11942 = vmatmul.mubr.msk.f32.gmra.mrb[246].mxu0 %vm1388_vm2, %v15899_v4 }
0x198b   : > { %11944 = vmatprep.mubr.msk.f32.mxu0 %vm13881_vm1, %v13882_v32 }
0x198e   : > { %11945 = vmatmul.mubr.msk.f32.gmra.mrb[248].mxu0 %vm1388_vm2, %v15901_v24 }
0x198f   : > { %11947 = vmatprep.mubr.msk.f32.mxu0 %vm13881_vm1, %v13882_v32 }
0x1992   : > { %11948 = vmatmul.mubr.msk.f32.gmra.mrb[250].mxu0 %vm1388_vm2, %v15903_v1 }
0x1993   : > { %11989 = vmatprep.mubr.msk.f32.mxu0 %vm13881_vm1, %v13882_v32 }
0x1a4d   : > { %v6106_v44 = vpop.f32.mrb[238].mxu0 }
0x1a4e   : > { %v6140_v59 = vmul.f32 0.25, %v6106_v44  ;;  %v11931_v12 = vpop.f32.mrb[239].mxu0 }
0x1a50   : > { %v6147_v42 = vsel %vm14461_vm4, %v6140_v59, -1e+30 }
0x1a51   : > { %v6111_v4 = vpop.f32.mrb[240].mxu0  ;;  %v6154_v8 = vsel %vm1545_vm5, %v6147_v42, -inf }
0x1a52   : > { %v6141_v14 = vmul.f32 0.25, %v6111_v4  ;;  %6155 = vmax.xlane.f32.xlu0 %v6154_v8  ;;  %v11934_v24 = vpop.f32.mrb[241].mxu0 }
0x1a54   : > { %v6148_v30 = vsel %vm14469_vm6, %v6141_v14, -1e+30 }
0x1a55   : > { %v6116_v3 = vpop.f32.mrb[242].mxu0  ;;  %v6157_v1 = vsel %vm1545_vm5, %v6148_v30, -inf }
0x1a56   : > { %v6142_v28 = vmul.f32 0.25, %v6116_v3  ;;  %6158 = vmax.xlane.f32.xlu1 %v6157_v1  ;;  %v11937_v0 = vpop.f32.mrb[243].mxu0 }
0x1a58   : > { %v6149_v21 = vsel %vm14477_vm7, %v6142_v28, -1e+30 }
0x1a59   : > { %v6121_v25 = vpop.f32.mrb[244].mxu0  ;;  %v6160_v60 = vsel %vm1545_vm5, %v6149_v21, -inf }
0x1a5a   : > { %v6143_v11 = vmul.f32 0.25, %v6121_v25  ;;  %6161 = vmax.xlane.f32.xlu0 %v6160_v60  ;;  %v11940_v39 = vpop.f32.mrb[245].mxu0 }
0x1a5c   : > { %v6150_v7 = vsel %vm14485_vm8, %v6143_v11, -1e+30 }
0x1a5d   : > { %v6126_v33 = vpop.f32.mrb[246].mxu0  ;;  %v6163_v36 = vsel %vm1545_vm5, %v6150_v7, -inf }
0x1a5e   : > { %v6144_v46 = vmul.f32 0.25, %v6126_v33  ;;  %6164 = vmax.xlane.f32.xlu1 %v6163_v36  ;;  %v11943_v57 = vpop.f32.mrb[247].mxu0 }
0x1a60   : > { %v6151_v15 = vsel %vm14493_vm9, %v6144_v46, -1e+30 }
0x1a61   : > { %v6131_v54 = vpop.f32.mrb[248].mxu0  ;;  %v6166_v22 = vsel %vm1545_vm5, %v6151_v15, -inf }
0x1a62   : > { %v6145_v2 = vmul.f32 0.25, %v6131_v54  ;;  %6167 = vmax.xlane.f32.xlu0 %v6166_v22  ;;  %v11946_v47 = vpop.f32.mrb[249].mxu0 }
0x1a64   : > { %v6152_v41 = vsel %vm14501_vm10, %v6145_v2, -1e+30 }
0x1a65   : > { %v6136_v45 = vpop.f32.mrb[250].mxu0  ;;  %v6169_v38 = vsel %vm1545_vm5, %v6152_v41, -inf }
0x1a66   : > { %v6146_v17 = vmul.f32 0.25, %v6136_v45  ;;  %6170 = vmax.xlane.f32.xlu1 %v6169_v38  ;;  %v11949_v44 = vpop.f32.mrb[251].mxu0 }
0x1a68   : > { %v6153_v59 = vsel %vm14509_vm11, %v6146_v17, -1e+30 }
0x1a69   : > { %v6172_v12 = vsel %vm1545_vm5, %v6153_v59, -inf }
0x1a6a   : > { %6173 = vmax.xlane.f32.xlu0 %v6172_v12 }
0x1adf   : > { %v6156_v4 = vpop.xlane.xlu0 %6155 }
0x1ae0   : > { %v6175_v8 = vsub.f32 %v6147_v42, %v6156_v4 }
0x1ae2   : > { %v6182_v14 = vmul.f32 1.442695, %v6175_v8 }
0x1ae3   : > { %v6159_v24 = vpop.xlane.xlu1 %6158 }
0x1ae4   : > { %13710 = vpow2.f32 %v6182_v14  ;;  %v6176_v3 = vsub.f32 %v6148_v30, %v6159_v24  ;;  %v9309_v24 = vld [vmem:[%s17014_s26 + $0x10] sm:$0xff] }
0x1ae6   : > { %v6184_v1 = vmul.f32 1.442695, %v6176_v3  ;;  %v9310_v3 = vld [vmem:[%s17014_s26 + $0x18] sm:$0xff] }
0x1ae7   : > { %v6162_v28 = vpop.xlane.xlu0 %6161 }
0x1ae8   : > { %13712 = vpow2.f32 %v6184_v1  ;;  %v6177_v0 = vsub.f32 %v6149_v21, %v6162_v28  ;;  %v13240_v1 = vpack.c.bf16 %v9310_v3, %v9309_v24  ;;  %v9344_v24 = vld [vmem:[%s17010_s16 + $0x118] sm:$0xff]  ;;  %v9345_v3 = vld [vmem:[%s17010_s16 + $0x120] sm:$0xff] }
0x1aea   : > { %v6186_v25 = vmul.f32 1.442695, %v6177_v0  ;;  %13241 = vmatpush3.bf16.msra.mxu0 %v13240_v1  ;;  %v9346_v1 = vld [vmem:[%s17010_s16 + $0x128] sm:$0xff] }
0x1aeb   : > { %v6165_v60 = vpop.xlane.xlu1 %6164  ;;  %13245 = vmatprep.subr.bf16.mxu0 %v13880_v10 }
0x1aec   : > { %13714 = vpow2.f32 %v6186_v25  ;;  %v6178_v11 = vsub.f32 %v6150_v7, %v6165_v60  ;;  %v5645_v60 = vld [vmem:[%s17014_s26] sm:$0xff] }
0x1aee   : > { %v13711_v39 = vpop.eup %13710  ;;  %v6188_v33 = vmul.f32 1.442695, %v6178_v11  ;;  %v5646_v11 = vld [vmem:[%s17014_s26 + $0x8] sm:$0xff] }
0x1aef   : > { %v6168_v36 = vpop.xlane.xlu0 %6167  ;;  %v6196_v46 = vsel %vm1545_vm5, %v13711_v39, 0.0 }
0x1af0   : > { %13716 = vpow2.f32 %v6188_v33  ;;  %v6179_v57 = vsub.f32 %v6151_v15, %v6168_v36  ;;  %6197 = vadd.xlane.f32.xlu1 %v6196_v46  ;;  %v13243_v36 = vpack.c.bf16 %v5646_v11, %v5645_v60  ;;  %v9350_v60 = vld [vmem:[%s17010_s16 + $0x148] sm:$0xff] }
0x1af2   : > { %v13713_v42 = vpop.eup %13712  ;;  %v6190_v54 = vmul.f32 1.442695, %v6179_v57 }
0x1af3   : > { %v6171_v22 = vpop.xlane.xlu1 %6170  ;;  %v6199_v30 = vsel %vm1545_vm5, %v13713_v42, 0.0 }
0x1af4   : > { %13718 = vpow2.f32 %v6190_v54  ;;  %v6180_v2 = vsub.f32 %v6152_v41, %v6171_v22  ;;  %6200 = vadd.xlane.f32.xlu0 %v6199_v30 }
0x1af6   : > { %v13715_v21 = vpop.eup %13714  ;;  %v6192_v47 = vmul.f32 1.442695, %v6180_v2 }
0x1af7   : > { %v6174_v45 = vpop.xlane.xlu0 %6173  ;;  %v6202_v7 = vsel %vm1545_vm5, %v13715_v21, 0.0 }
0x1af8   : > { %13720 = vpow2.f32 %v6192_v47  ;;  %v6181_v38 = vsub.f32 %v6153_v59, %v6174_v45  ;;  %6203 = vadd.xlane.f32.xlu1 %v6202_v7 }
0x1afa   : > { %v13717_v15 = vpop.eup %13716  ;;  %v6194_v17 = vmul.f32 1.442695, %v6181_v38 }
0x1afb   : > { %v6205_v44 = vsel %vm1545_vm5, %v13717_v15, 0.0 }
0x1afc   : > { %13722 = vpow2.f32 %v6194_v17  ;;  %6206 = vadd.xlane.f32.xlu0 %v6205_v44 }
0x1afe   : > { %v13719_v12 = vpop.eup %13718 }
0x1aff   : > { %v6208_v41 = vsel %vm1545_vm5, %v13719_v12, 0.0 }
0x1b00   : > { %6209 = vadd.xlane.f32.xlu1 %v6208_v41 }
0x1b02   : > { %v13721_v4 = vpop.eup %13720 }
0x1b03   : > { %v6211_v8 = vsel %vm1545_vm5, %v13721_v4, 0.0 }
0x1b04   : > { %6212 = vadd.xlane.f32.xlu0 %v6211_v8  ;;  %v9341_v8 = vld [vmem:[%s17010_s16 + $0x100] sm:$0xff] }
0x1b06   : > { %v13723_v59 = vpop.eup %13722 }
0x1b07   : > { %v6214_v14 = vsel %vm1545_vm5, %v13723_v59, 0.0 }
0x1b08   : > { %6215 = vadd.xlane.f32.xlu1 %v6214_v14  ;;  %v9342_v14 = vld [vmem:[%s17010_s16 + $0x108] sm:$0xff] }
0x1b7d   : > { %v6198_v28 = vpop.xlane.xlu1 %6197 }
0x1b7e   : > { %13724 = vrcp.f32 %v6198_v28  ;;  %v13276_v28 = vpack.c.bf16 %v9346_v1, %v9345_v3 }
0x1b81   : > { %v6201_v0 = vpop.xlane.xlu0 %6200 }
0x1b82   : > { %13726 = vrcp.f32 %v6201_v0  ;;  %v9348_v0 = vld [vmem:[%s17010_s16 + $0x138] sm:$0xff] }
0x1b85   : > { %v6204_v25 = vpop.xlane.xlu1 %6203 }
0x1b86   : > { %13728 = vrcp.f32 %v6204_v25 }
0x1b88   : > { %v13725_v33 = vpop.eup %13724 }
0x1b89   : > { %v6224_v46 = vmul.f32 %v13725_v33, %v13711_v39  ;;  %v6207_v57 = vpop.xlane.xlu0 %6206  ;;  %v9352_v33 = vld [vmem:[%s17010_s16 + $0x158] sm:$0xff] }
0x1b8a   : > { %13730 = vrcp.f32 %v6207_v57 }
0x1b8b   : > { %11965 = vmatmul.mubr.msk.f32.vlgmr.msra.gmra.mrb[238].mxu1 %vm1545_vm5, %v6224_v46  ;;  %v9354_v46 = vld [vmem:[%s17010_s16 + $0x168] sm:$0xff] }
0x1b8c   : > { %v13727_v54 = vpop.eup %13726  ;;  %11967 = vmatprep.mubr.msk.f32.mxu1 %vm13881_vm1, %v13882_v32  ;;  %13244 = vmatpush3.bf16.msra.mxu1 %v13243_v36 }
0x1b8d   : > { %v6210_v22 = vpop.xlane.xlu1 %6209  ;;  %v6225_v30 = vmul.f32 %v13727_v54, %v13713_v42  ;;  %13269 = vmatprep.subr.bf16.mxu1 %v13880_v10  ;;  %v9356_v54 = vld [vmem:[%s17010_s16 + $0x178] sm:$0xff] }
0x1b8e   : > { %13732 = vrcp.f32 %v6210_v22 }
0x1b8f   : > { %11968 = vmatmul.mubr.msk.f32.gmra.mrb[240].mxu1 %vm1545_vm5, %v6225_v30 }
0x1b90   : > { %v13729_v2 = vpop.eup %13728  ;;  %11970 = vmatprep.mubr.msk.f32.mxu1 %vm13881_vm1, %v13882_v32 }
0x1b91   : > { %v6213_v39 = vpop.xlane.xlu0 %6212  ;;  %v6226_v47 = vmul.f32 %v13729_v2, %v13715_v21  ;;  %v9327_v2 = vld [vmem:[%s17009_s15 + $0x110] sm:$0xff] }
0x1b92   : > { %13734 = vrcp.f32 %v6213_v39  ;;  %v9328_v39 = vld [vmem:[%s17009_s15 + $0x118] sm:$0xff] }
0x1b93   : > { %11971 = vmatmul.mubr.msk.f32.gmra.mrb[242].mxu1 %vm1545_vm5, %v6226_v47 }
0x1b94   : > { %v13731_v45 = vpop.eup %13730  ;;  %11973 = vmatprep.mubr.msk.f32.mxu1 %vm13881_vm1, %v13882_v32 }
0x1b95   : > { %v6216_v42 = vpop.xlane.xlu1 %6215  ;;  %v6227_v7 = vmul.f32 %v13731_v45, %v13717_v15 }
0x1b96   : > { %13736 = vrcp.f32 %v6216_v42  ;;  %v13249_v42 = vpack.c.bf16 %v9328_v39, %v9327_v2  ;;  %v9359_v39 = vld [vmem:[%s17012_s22 + $0x110] sm:$0xff] }
0x1b97   : > { %11974 = vmatmul.mubr.msk.f32.gmra.mrb[244].mxu1 %vm1545_vm5, %v6227_v7  ;;  %v9329_v7 = vld [vmem:[%s17009_s15 + $0x120] sm:$0xff] }
0x1b98   : > { %v13733_v38 = vpop.eup %13732  ;;  %11976 = vmatprep.mubr.msk.f32.mxu1 %vm13881_vm1, %v13882_v32 }
0x1b99   : > { %v6228_v21 = vmul.f32 %v13733_v38, %v13719_v12  ;;  %v13270_v12 = vpack.c.bf16 %v9342_v14, %v9341_v8  ;;  %v9330_v38 = vld [vmem:[%s17009_s15 + $0x128] sm:$0xff] }
0x1b9b   : > { %11977 = vmatmul.mubr.msk.f32.gmra.mrb[246].mxu1 %vm1545_vm5, %v6228_v21 }
0x1b9c   : > { %v13735_v17 = vpop.eup %13734  ;;  %11979 = vmatprep.mubr.msk.f32.mxu1 %vm13881_vm1, %v13882_v32 }
0x1b9d   : > { %v6229_v44 = vmul.f32 %v13735_v17, %v13721_v4  ;;  %v9343_v4 = vld [vmem:[%s17010_s16 + $0x110] sm:$0xff] }
0x1b9f   : > { %11980 = vmatmul.mubr.msk.f32.gmra.mrb[248].mxu1 %vm1545_vm5, %v6229_v44  ;;  %v13252_v44 = vpack.c.bf16 %v9330_v38, %v9329_v7  ;;  %v9361_v38 = vld [vmem:[%s17012_s22 + $0x120] sm:$0xff] }
0x1ba0   : > { %v13737_v15 = vpop.eup %13736  ;;  %11982 = vmatprep.mubr.msk.f32.mxu1 %vm13881_vm1, %v13882_v32 }
0x1ba1   : > { %v6230_v41 = vmul.f32 %v13737_v15, %v13723_v59  ;;  %v13273_v59 = vpack.c.bf16 %v9344_v24, %v9343_v4  ;;  %v9331_v15 = vld [vmem:[%s17009_s15 + $0x130] sm:$0xff]  ;;  %v9333_v4 = vld [vmem:[%s17009_s15 + $0x140] sm:$0xff]  ;;  %v9334_v24 = vld [vmem:[%s17009_s15 + $0x148] sm:$0xff] }
0x1ba2   : > { %v13258_v1 = vpack.c.bf16 %v9334_v24, %v9333_v4  ;;  %v9365_v24 = vld [vmem:[%s17012_s22 + $0x140] sm:$0xff] }
0x1ba3   : > { %11983 = vmatmul.mubr.msk.f32.gmra.mrb[250].mxu1 %vm1545_vm5, %v6230_v41  ;;  %v9332_v41 = vld [vmem:[%s17009_s15 + $0x138] sm:$0xff] }
0x1ba4   : > { %12014 = vmatprep.mubr.msk.f32.mxu1 %vm13881_vm1, %v13882_v32 }
0x1ba7   : > { %12015 = vmatmul.mubr.msk.f32.vlgmr.msra.gmra.mrb[252].mxu1 %vm1388_vm2, %v16015_v29  ;;  %v9347_v29 = vld [vmem:[%s17010_s16 + $0x130] sm:$0xff] }
0x1ba8   : > { %13271 = vmatpush3.bf16.msra.mxu1 %v13270_v12  ;;  %12017 = vmatprep.mubr.msk.f32.mxu1 %vm13881_vm1, %v13882_v32  ;;  %v13279_v25 = vpack.c.bf16 %v9348_v0, %v9347_v29  ;;  %v13255_v12 = vpack.c.bf16 %v9332_v41, %v9331_v15  ;;  %v9336_v29 = vld [vmem:[%s17009_s15 + $0x158] sm:$0xff]  ;;  %v9363_v41 = vld [vmem:[%s17012_s22 + $0x130] sm:$0xff] }
0x1ba9   : > { %13272 = vmatprep.subr.bf16.mxu1 %v13880_v10 }
0x1bab   : > { %12018 = vmatmul.mubr.msk.f32.gmra.mrb[254].mxu1 %vm1388_vm2, %v16017_v58  ;;  %v9349_v58 = vld [vmem:[%s17010_s16 + $0x140] sm:$0xff] }
0x1bac   : > { %13274 = vmatpush3.bf16.msra.mxu1 %v13273_v59  ;;  %12020 = vmatprep.mubr.msk.f32.mxu1 %vm13881_vm1, %v13882_v32  ;;  %v13282_v11 = vpack.c.bf16 %v9350_v60, %v9349_v58  ;;  %v9337_v60 = vld [vmem:[%s17009_s15 + $0x160] sm:$0xff] }
0x1bad   : > { %13275 = vmatprep.subr.bf16.mxu1 %v13880_v10 }
0x1baf   : > { %12021 = vmatmul.mubr.msk.f32.gmra.mrb[0].mxu1 %vm1388_vm2, %v16019_v20  ;;  %v9351_v20 = vld [vmem:[%s17010_s16 + $0x150] sm:$0xff] }
0x1bb0   : > { %13277 = vmatpush3.bf16.msra.mxu1 %v13276_v28  ;;  %12023 = vmatprep.mubr.msk.f32.mxu1 %vm13881_vm1, %v13882_v32  ;;  %v13285_v36 = vpack.c.bf16 %v9352_v33, %v9351_v20  ;;  %v9335_v28 = vld [vmem:[%s17009_s15 + $0x150] sm:$0xff] }
0x1bb1   : > { %13278 = vmatprep.subr.bf16.mxu1 %v13880_v10  ;;  %v13261_v58 = vpack.c.bf16 %v9336_v29, %v9335_v28  ;;  %v9367_v29 = vld [vmem:[%s17012_s22 + $0x150] sm:$0xff] }
0x1bb3   : > { %12024 = vmatmul.mubr.msk.f32.gmra.mrb[2].mxu1 %vm1388_vm2, %v16021_v40  ;;  %v9353_v40 = vld [vmem:[%s17010_s16 + $0x160] sm:$0xff] }
0x1bb4   : > { %13280 = vmatpush3.bf16.msra.mxu1 %v13279_v25  ;;  %12026 = vmatprep.mubr.msk.f32.mxu1 %vm13881_vm1, %v13882_v32  ;;  %v13288_v57 = vpack.c.bf16 %v9354_v46, %v9353_v40  ;;  %v9339_v40 = vld [vmem:[%s17009_s15 + $0x170] sm:$0xff]  ;;  %v9340_v46 = vld [vmem:[%s17009_s15 + $0x178] sm:$0xff] }
0x1bb5   : > { %13281 = vmatprep.subr.bf16.mxu1 %v13880_v10 }
0x1bb7   : > { %12027 = vmatmul.mubr.msk.f32.gmra.mrb[4].mxu1 %vm1388_vm2, %v16023_v52  ;;  %v9355_v52 = vld [vmem:[%s17010_s16 + $0x170] sm:$0xff] }
0x1bb8   : > { %13283 = vmatpush3.bf16.msra.mxu1 %v13282_v11  ;;  %12029 = vmatprep.mubr.msk.f32.mxu1 %vm13881_vm1, %v13882_v32  ;;  %v13291_v22 = vpack.c.bf16 %v9356_v54, %v9355_v52  ;;  %v9338_v11 = vld [vmem:[%s17009_s15 + $0x168] sm:$0xff]  ;;  %v13267_v54 = vpack.c.bf16 %v9340_v46, %v9339_v40  ;;  %v9371_v46 = vld [vmem:[%s17012_s22 + $0x170] sm:$0xff] }
0x1bb9   : > { %13284 = vmatprep.subr.bf16.mxu1 %v13880_v10 }
0x1bbb   : > { %12030 = vmatmul.mubr.msk.f32.gmra.mrb[6].mxu1 %vm1388_vm2, %v16025_v34  ;;  %v9325_v34 = vld [vmem:[%s17009_s15 + $0x100] sm:$0xff] }
0x1bbc   : > { %13286 = vmatpush3.bf16.msra.mxu1 %v13285_v36  ;;  %12032 = vmatprep.mubr.msk.f32.mxu1 %vm13881_vm1, %v13882_v32  ;;  %v13264_v36 = vpack.c.bf16 %v9338_v11, %v9337_v60  ;;  %v9369_v11 = vld [vmem:[%s17012_s22 + $0x160] sm:$0xff] }
0x1bbd   : > { %13287 = vmatprep.subr.bf16.mxu1 %v13880_v10 }
0x1bbf   : > { %12033 = vmatmul.mubr.msk.f32.gmra.mrb[8].mxu1 %vm1388_vm2, %v16027_v35  ;;  %v9326_v35 = vld [vmem:[%s17009_s15 + $0x108] sm:$0xff] }
0x1bc0   : > { %13289 = vmatpush3.bf16.msra.mxu1 %v13288_v57  ;;  %12120 = vmatprep.mubr.msk.f32.mxu1 %vm13881_vm1, %v13882_v32  ;;  %v13246_v30 = vpack.c.bf16 %v9326_v35, %v9325_v34  ;;  %v9358_v34 = vld [vmem:[%s17012_s22 + $0x108] sm:$0xff] }
0x1bc1   : > { %13290 = vmatprep.subr.bf16.mxu1 %v13880_v10 }
0x1bc4   : > { %13292 = vmatpush3.bf16.msra.mxu1 %v13291_v22  ;;  %v9357_v22 = vld [vmem:[%s17012_s22 + $0x100] sm:$0xff] }
0x1bc5   : > { %13317 = vmatprep.subr.bf16.mxu1 %v13880_v10  ;;  %v13294_v2 = vpack.c.bf16 %v9358_v34, %v9357_v22 }
0x1bc7   : > { %12121 = vmatmul.mubr.f32.vlgmr.msra.gmra.mrb[10].mxu1 %v15648_v9 }
0x1bc8   : > { %12123 = vmatprep.mubr.msk.f32.mxu1 %vm13881_vm1, %v13882_v32 }
0x1bcb   : > { %12124 = vmatmul.mubr.f32.gmra.mrb[12].mxu1 %v15659_v51 }
0x1bcc   : > { %12126 = vmatprep.mubr.msk.f32.mxu1 %vm13881_vm1, %v13882_v32 }
0x1bcf   : > { %12127 = vmatmul.mubr.f32.gmra.mrb[14].mxu1 %v15673_v49 }
0x1bd0   : > { %12129 = vmatprep.mubr.msk.f32.mxu1 %vm13881_vm1, %v13882_v32 }
0x1bd3   : > { %12130 = vmatmul.mubr.f32.gmra.mrb[16].mxu1 %v15687_v18 }
0x1bd4   : > { %12132 = vmatprep.mubr.msk.f32.mxu1 %vm13881_vm1, %v13882_v32 }
0x1bd7   : > { %12133 = vmatmul.mubr.f32.gmra.mrb[18].mxu1 %v15701_v56 }
0x1bd8   : > { %12135 = vmatprep.mubr.msk.f32.mxu1 %vm13881_vm1, %v13882_v32 }
0x1bdb   : > { %12136 = vmatmul.mubr.f32.gmra.mrb[20].mxu1 %v15715_v50 }
0x1bdc   : > { %12138 = vmatprep.mubr.msk.f32.mxu1 %vm13881_vm1, %v13882_v32 }
0x1bdf   : > { %12139 = vmatmul.mubr.f32.gmra.mrb[22].mxu1 %v15729_v63 }
0x1be0   : > { %12208 = vmatprep.mubr.msk.f32.mxu1 %vm13881_vm1, %v13882_v32 }
0x1c5e   : > { %v6318_v47 = vpop.f32.mrb[238].mxu1 }
0x1c5f   : > { %v11966_v45 = vpop.f32.mrb[239].mxu1  ;;  %11990 = vmatmul.mubr.msk.f32.vlgmr.msra.gmra.mrb[252].mxu0 %vm1388_vm2, %v6318_v47  ;;  %v9360_v47 = vld [vmem:[%s17012_s22 + $0x118] sm:$0xff] }
0x1c60   : > { %13247 = vmatpush3.bf16.msra.mxu0 %v13246_v30  ;;  %11992 = vmatprep.mubr.msk.f32.mxu0 %vm13881_vm1, %v13882_v32  ;;  %v13297_v7 = vpack.c.bf16 %v9360_v47, %v9359_v39 }
0x1c61   : > { %13248 = vmatprep.subr.bf16.mxu0 %v13880_v10 }
0x1c62   : > { %v6323_v21 = vpop.f32.mrb[240].mxu1 }
0x1c63   : > { %v11969_v17 = vpop.f32.mrb[241].mxu1  ;;  %11993 = vmatmul.mubr.msk.f32.gmra.mrb[254].mxu0 %vm1388_vm2, %v6323_v21  ;;  %v9362_v21 = vld [vmem:[%s17012_s22 + $0x128] sm:$0xff] }
0x1c64   : > { %13250 = vmatpush3.bf16.msra.mxu0 %v13249_v42  ;;  %11995 = vmatprep.mubr.msk.f32.mxu0 %vm13881_vm1, %v13882_v32  ;;  %v13300_v15 = vpack.c.bf16 %v9362_v21, %v9361_v38 }
0x1c65   : > { %13251 = vmatprep.subr.bf16.mxu0 %v13880_v10 }
0x1c66   : > { %v6328_v8 = vpop.f32.mrb[242].mxu1 }
0x1c67   : > { %v11972_v14 = vpop.f32.mrb[243].mxu1  ;;  %11996 = vmatmul.mubr.msk.f32.gmra.mrb[0].mxu0 %vm1388_vm2, %v6328_v8  ;;  %v9364_v8 = vld [vmem:[%s17012_s22 + $0x138] sm:$0xff] }
0x1c68   : > { %13253 = vmatpush3.bf16.msra.mxu0 %v13252_v44  ;;  %11998 = vmatprep.mubr.msk.f32.mxu0 %vm13881_vm1, %v13882_v32  ;;  %v13303_v4 = vpack.c.bf16 %v9364_v8, %v9363_v41 }
0x1c69   : > { %13254 = vmatprep.subr.bf16.mxu0 %v13880_v10 }
0x1c6a   : > { %v6333_v59 = vpop.f32.mrb[244].mxu1 }
0x1c6b   : > { %v11975_v3 = vpop.f32.mrb[245].mxu1  ;;  %11999 = vmatmul.mubr.msk.f32.gmra.mrb[2].mxu0 %vm1388_vm2, %v6333_v59  ;;  %v9366_v59 = vld [vmem:[%s17012_s22 + $0x148] sm:$0xff] }
0x1c6c   : > { %13256 = vmatpush3.bf16.msra.mxu0 %v13255_v12  ;;  %12001 = vmatprep.mubr.msk.f32.mxu0 %vm13881_vm1, %v13882_v32  ;;  %v13306_v28 = vpack.c.bf16 %v9366_v59, %v9365_v24 }
0x1c6d   : > { %13257 = vmatprep.subr.bf16.mxu0 %v13880_v10 }
0x1c6e   : > { %v6338_v0 = vpop.f32.mrb[246].mxu1 }
0x1c6f   : > { %v11978_v25 = vpop.f32.mrb[247].mxu1  ;;  %12002 = vmatmul.mubr.msk.f32.gmra.mrb[4].mxu0 %vm1388_vm2, %v6338_v0  ;;  %v9368_v0 = vld [vmem:[%s17012_s22 + $0x158] sm:$0xff] }
0x1c70   : > { %13259 = vmatpush3.bf16.msra.mxu0 %v13258_v1  ;;  %12004 = vmatprep.mubr.msk.f32.mxu0 %vm13881_vm1, %v13882_v32  ;;  %v13309_v60 = vpack.c.bf16 %v9368_v0, %v9367_v29 }
0x1c71   : > { %13260 = vmatprep.subr.bf16.mxu0 %v13880_v10 }
0x1c72   : > { %v6343_v20 = vpop.f32.mrb[248].mxu1 }
0x1c73   : > { %v11981_v33 = vpop.f32.mrb[249].mxu1  ;;  %12005 = vmatmul.mubr.msk.f32.gmra.mrb[6].mxu0 %vm1388_vm2, %v6343_v20  ;;  %v9370_v20 = vld [vmem:[%s17012_s22 + $0x168] sm:$0xff] }
0x1c74   : > { %13262 = vmatpush3.bf16.msra.mxu0 %v13261_v58  ;;  %12007 = vmatprep.mubr.msk.f32.mxu0 %vm13881_vm1, %v13882_v32  ;;  %v13312_v40 = vpack.c.bf16 %v9370_v20, %v9369_v11 }
0x1c75   : > { %13263 = vmatprep.subr.bf16.mxu0 %v13880_v10 }
0x1c76   : > { %v6348_v57 = vpop.f32.mrb[250].mxu1 }
0x1c77   : > { %v11984_v52 = vpop.f32.mrb[251].mxu1  ;;  %12008 = vmatmul.mubr.msk.f32.gmra.mrb[8].mxu0 %vm1388_vm2, %v6348_v57  ;;  %v9372_v57 = vld [vmem:[%s17012_s22 + $0x178] sm:$0xff] }
0x1c78   : > { %13265 = vmatpush3.bf16.msra.mxu0 %v13264_v36  ;;  %12067 = vmatprep.mubr.msk.f32.mxu0 %vm13881_vm1, %v13882_v32  ;;  %v13315_v52 = vpack.c.bf16 %v9372_v57, %v9371_v46 }
0x1c79   : > { %13266 = vmatprep.subr.bf16.mxu0 %v13880_v10 }
0x1c7a   : > { %v16242_v35 = vpop.f32.mrb[252].mxu1 }
0x1c7b   : > { %v12016_v30 = vpop.f32.mrb[253].mxu1 }
0x1c7c   : > { %13268 = vmatpush3.bf16.msra.mxu0 %v13267_v54 }
0x1c7d   : > { %13293 = vmatprep.subr.bf16.mxu0 %v13880_v10 }
0x1c7e   : > { %v16247_v45 = vpop.f32.mrb[254].mxu1 }
0x1c7f   : > { %12068 = vmatmul.mubr.f32.vlgmr.msra.gmra.mrb[10].mxu0 %v15648_v9  ;;  %v12019_v42 = vpop.f32.mrb[255].mxu1 }
0x1c80   : > { %13295 = vmatpush3.bf16.msra.mxu0 %v13294_v2  ;;  %12070 = vmatprep.mubr.msk.f32.mxu0 %vm13881_vm1, %v13882_v32 }
0x1c81   : > { %13296 = vmatprep.subr.bf16.mxu0 %v13880_v10 }
0x1c82   : > { %v16255_v17 = vpop.f32.mrb[0].mxu1 }
0x1c83   : > { %12071 = vmatmul.mubr.f32.gmra.mrb[12].mxu0 %v15659_v51  ;;  %v12022_v44 = vpop.f32.mrb[1].mxu1 }
0x1c84   : > { %13298 = vmatpush3.bf16.msra.mxu0 %v13297_v7  ;;  %12073 = vmatprep.mubr.msk.f32.mxu0 %vm13881_vm1, %v13882_v32 }
0x1c85   : > { %13299 = vmatprep.subr.bf16.mxu0 %v13880_v10 }
0x1c86   : > { %v16263_v14 = vpop.f32.mrb[2].mxu1 }
0x1c87   : > { %12074 = vmatmul.mubr.f32.gmra.mrb[14].mxu0 %v15673_v49  ;;  %v12025_v12 = vpop.f32.mrb[3].mxu1 }
0x1c88   : > { %13301 = vmatpush3.bf16.msra.mxu0 %v13300_v15  ;;  %12076 = vmatprep.mubr.msk.f32.mxu0 %vm13881_vm1, %v13882_v32 }
0x1c89   : > { %13302 = vmatprep.subr.bf16.mxu0 %v13880_v10 }
0x1c8a   : > { %v16271_v3 = vpop.f32.mrb[4].mxu1 }
0x1c8b   : > { %12077 = vmatmul.mubr.f32.gmra.mrb[16].mxu0 %v15687_v18  ;;  %v12028_v1 = vpop.f32.mrb[5].mxu1 }
0x1c8c   : > { %13304 = vmatpush3.bf16.msra.mxu0 %v13303_v4  ;;  %12079 = vmatprep.mubr.msk.f32.mxu0 %vm13881_vm1, %v13882_v32 }
0x1c8d   : > { %13305 = vmatprep.subr.bf16.mxu0 %v13880_v10 }
0x1c8e   : > { %v16279_v25 = vpop.f32.mrb[6].mxu1 }
0x1c8f   : > { %12080 = vmatmul.mubr.f32.gmra.mrb[18].mxu0 %v15701_v56  ;;  %v12031_v58 = vpop.f32.mrb[7].mxu1 }
0x1c90   : > { %13307 = vmatpush3.bf16.msra.mxu0 %v13306_v28  ;;  %12082 = vmatprep.mubr.msk.f32.mxu0 %vm13881_vm1, %v13882_v32 }
0x1c91   : > { %13308 = vmatprep.subr.bf16.mxu0 %v13880_v10 }
0x1c92   : > { %v16287_v33 = vpop.f32.mrb[8].mxu1 }
0x1c93   : > { %12083 = vmatmul.mubr.f32.gmra.mrb[20].mxu0 %v15715_v50  ;;  %v12034_v36 = vpop.f32.mrb[9].mxu1 }
0x1c94   : > { %13310 = vmatpush3.bf16.msra.mxu0 %v13309_v60  ;;  %12085 = vmatprep.mubr.msk.f32.mxu0 %vm13881_vm1, %v13882_v32 }
0x1c95   : > { %13311 = vmatprep.subr.bf16.mxu0 %v13880_v10 }
0x1c97   : > { %12086 = vmatmul.mubr.f32.gmra.mrb[22].mxu0 %v15729_v63 }
0x1c98   : > { %13313 = vmatpush3.bf16.msra.mxu0 %v13312_v40  ;;  %12173 = vmatprep.mubr.msk.f32.mxu0 %vm13881_vm1, %v13882_v32 }
0x1c99   : > { %13314 = vmatprep.subr.bf16.mxu0 %v13880_v10 }
0x1c9a   : > { %v6797_v54 = vpop.f32.mrb[10].mxu1 }
0x1c9b   : > { %v12122_v22 = vpop.f32.mrb[11].mxu1 }
0x1c9c   : > { %13316 = vmatpush3.bf16.msra.mxu0 %v13315_v52 }
0x1c9d   : > { %13329 = vmatprep.subr.bf16.mxu0 %v13880_v10 }
0x1c9e   : > { %v6802_v34 = vpop.f32.mrb[12].mxu1 }
0x1c9f   : > { %v13318_v30 = vpack.c.bf16 %v6802_v34, %v6797_v54  ;;  %v12125_v2 = vpop.f32.mrb[13].mxu1  ;;  %12174 = vmatmul.mubr.f32.vlgmr.msra.gmra.mrb[24].mxu0 %v15648_v9 }
0x1ca0   : > { %12176 = vmatprep.mubr.msk.f32.mxu0 %vm13881_vm1, %v13882_v32 }
0x1ca1   : > { %13320 = vmatpush3.bf16.xpose.msk.msra.mxu1 %vm14401_vm3, %v13318_v30 }
0x1ca2   : > { %v6807_v39 = vpop.f32.mrb[14].mxu1  ;;  %13321 = vmatprep.subr.bf16.mxu1 %v13880_v10 }
0x1ca3   : > { %v12128_v47 = vpop.f32.mrb[15].mxu1  ;;  %12177 = vmatmul.mubr.f32.gmra.mrb[26].mxu0 %v15659_v51 }
0x1ca4   : > { %12179 = vmatprep.mubr.msk.f32.mxu0 %vm13881_vm1, %v13882_v32 }
0x1ca6   : > { %v6812_v42 = vpop.f32.mrb[16].mxu1 }
0x1ca7   : > { %v13322_v7 = vpack.c.bf16 %v6812_v42, %v6807_v39  ;;  %v12131_v38 = vpop.f32.mrb[17].mxu1  ;;  %12180 = vmatmul.mubr.f32.gmra.mrb[28].mxu0 %v15673_v49 }
0x1ca8   : > { %12182 = vmatprep.mubr.msk.f32.mxu0 %vm13881_vm1, %v13882_v32 }
0x1ca9   : > { %13324 = vmatpush3.bf16.xpose.msk.msra.mxu1 %vm14401_vm3, %v13322_v7 }
0x1caa   : > { %v6817_v21 = vpop.f32.mrb[18].mxu1  ;;  %13325 = vmatprep.subr.bf16.mxu1 %v13880_v10 }
0x1cab   : > { %v12134_v44 = vpop.f32.mrb[19].mxu1  ;;  %12183 = vmatmul.mubr.f32.gmra.mrb[30].mxu0 %v15687_v18 }
0x1cac   : > { %12185 = vmatprep.mubr.msk.f32.mxu0 %vm13881_vm1, %v13882_v32 }
0x1cae   : > { %v6822_v15 = vpop.f32.mrb[20].mxu1 }
0x1caf   : > { %v13326_v41 = vpack.c.bf16 %v6822_v15, %v6817_v21  ;;  %v12137_v8 = vpop.f32.mrb[21].mxu1  ;;  %12186 = vmatmul.mubr.f32.gmra.mrb[32].mxu0 %v15701_v56 }
0x1cb0   : > { %12188 = vmatprep.mubr.msk.f32.mxu0 %vm13881_vm1, %v13882_v32 }
0x1cb1   : > { %13328 = vmatpush3.bf16.xpose.msk.msra.mxu1 %vm14401_vm3, %v13326_v41 }
0x1cb2   : > { %v6827_v12 = vpop.f32.mrb[22].mxu1  ;;  %12206 = vmatprep.subr.mxu1 %v13882_v32 }
0x1cb3   : > { %v12140_v4 = vpop.f32.mrb[23].mxu1  ;;  %12189 = vmatmul.mubr.f32.gmra.mrb[34].mxu0 %v15715_v50 }
0x1cb4   : > { %12191 = vmatprep.mubr.msk.f32.mxu0 %vm13881_vm1, %v13882_v32 }
0x1cb7   : > { %12192 = vmatmul.mubr.f32.gmra.mrb[36].mxu0 %v15729_v63 }
0x1cb8   : > { %12243 = vmatprep.mubr.msk.f32.mxu0 %vm13881_vm1, %v13882_v32 }
0x1cb9   : > { %12207 = vmatpush3.xpose.msk.msra.mxu1 %vm1388_vm2, %v6827_v12 }
0x1cba   : > { %13338 = vmatprep.subr.bf16.mxu1 %v13880_v10 }
0x1d32   : > { %v6442_v24 = vpop.f32.mrb[252].mxu0 }
0x1d33   : > { %v16333_v59 = vadd.f32 %v16242_v35, %v6442_v24  ;;  %v11991_v1 = vpop.f32.mrb[253].mxu0 }
0x1d36   : > { %v6447_v28 = vpop.f32.mrb[254].mxu0 }
0x1d37   : > { %v16336_v29 = vadd.f32 %v16247_v45, %v6447_v28  ;;  %v11994_v0 = vpop.f32.mrb[255].mxu0 }
0x1d3a   : > { %v6452_v58 = vpop.f32.mrb[0].mxu0 }
0x1d3b   : > { %v16339_v60 = vadd.f32 %v16255_v17, %v6452_v58  ;;  %v11997_v11 = vpop.f32.mrb[1].mxu0 }
0x1d3e   : > { %v6457_v20 = vpop.f32.mrb[2].mxu0 }
0x1d3f   : > { %v16342_v36 = vadd.f32 %v16263_v14, %v6457_v20  ;;  %v12000_v40 = vpop.f32.mrb[3].mxu0 }
0x1d42   : > { %v6462_v46 = vpop.f32.mrb[4].mxu0 }
0x1d43   : > { %v16345_v35 = vadd.f32 %v16271_v3, %v6462_v46  ;;  %v12003_v57 = vpop.f32.mrb[5].mxu0 }
0x1d46   : > { %v6467_v52 = vpop.f32.mrb[6].mxu0 }
0x1d47   : > { %v16348_v45 = vadd.f32 %v16279_v25, %v6467_v52  ;;  %v12006_v54 = vpop.f32.mrb[7].mxu0 }
0x1d4a   : > { %v6472_v22 = vpop.f32.mrb[8].mxu0 }
0x1d4b   : > { %v16351_v17 = vadd.f32 %v16287_v33, %v6472_v22  ;;  %v12009_v34 = vpop.f32.mrb[9].mxu0 }
0x1d52   : > { %v6680_v30 = vpop.f32.mrb[10].mxu0 }
0x1d53   : > { %v12069_v2 = vpop.f32.mrb[11].mxu0  ;;  %12209 = vmatmul.mubr.msk.f32.vlgmr.msra.gmra.mrb[24].mxu1 %vm1388_vm2, %v6680_v30 }
0x1d54   : > { %12211 = vmatprep.mubr.msk.f32.mxu1 %vm13881_vm1, %v13882_v32 }
0x1d56   : > { %v6685_v14 = vpop.f32.mrb[12].mxu0 }
0x1d57   : > { %v12072_v3 = vpop.f32.mrb[13].mxu0  ;;  %12212 = vmatmul.mubr.msk.f32.gmra.mrb[26].mxu1 %vm1388_vm2, %v6685_v14 }
0x1d58   : > { %12214 = vmatprep.mubr.msk.f32.mxu1 %vm13881_vm1, %v13882_v32 }
0x1d5a   : > { %v6690_v25 = vpop.f32.mrb[14].mxu0 }
0x1d5b   : > { %v12075_v39 = vpop.f32.mrb[15].mxu0  ;;  %12215 = vmatmul.mubr.msk.f32.gmra.mrb[28].mxu1 %vm1388_vm2, %v6690_v25 }
0x1d5c   : > { %12217 = vmatprep.mubr.msk.f32.mxu1 %vm13881_vm1, %v13882_v32 }
0x1d5e   : > { %v6695_v33 = vpop.f32.mrb[16].mxu0 }
0x1d5f   : > { %v12078_v47 = vpop.f32.mrb[17].mxu0  ;;  %12218 = vmatmul.mubr.msk.f32.gmra.mrb[30].mxu1 %vm1388_vm2, %v6695_v33 }
0x1d60   : > { %12220 = vmatprep.mubr.msk.f32.mxu1 %vm13881_vm1, %v13882_v32 }
0x1d62   : > { %v6700_v42 = vpop.f32.mrb[18].mxu0 }
0x1d63   : > { %v12081_v7 = vpop.f32.mrb[19].mxu0  ;;  %12221 = vmatmul.mubr.msk.f32.gmra.mrb[32].mxu1 %vm1388_vm2, %v6700_v42 }
0x1d64   : > { %12223 = vmatprep.mubr.msk.f32.mxu1 %vm13881_vm1, %v13882_v32 }
0x1d66   : > { %v6705_v38 = vpop.f32.mrb[20].mxu0 }
0x1d67   : > { %v12084_v21 = vpop.f32.mrb[21].mxu0  ;;  %12224 = vmatmul.mubr.msk.f32.gmra.mrb[34].mxu1 %vm1388_vm2, %v6705_v38 }
0x1d68   : > { %12226 = vmatprep.mubr.msk.f32.mxu1 %vm13881_vm1, %v13882_v32 }
0x1d6a   : > { %v6710_v44 = vpop.f32.mrb[22].mxu0 }
0x1d6b   : > { %v12087_v15 = vpop.f32.mrb[23].mxu0  ;;  %12227 = vmatmul.mubr.msk.f32.gmra.mrb[36].mxu1 %vm1388_vm2, %v6710_v44 }
0x1d6c   : > { %12268 = vmatprep.mubr.msk.f32.mxu1 %vm13881_vm1, %v13882_v32 }
0x1d72   : > { %v6914_v41 = vpop.f32.mrb[24].mxu0 }
0x1d73   : > { %v12175_v8 = vpop.f32.mrb[25].mxu0 }
0x1d76   : > { %v6919_v12 = vpop.f32.mrb[26].mxu0 }
0x1d77   : > { %v13330_v4 = vpack.c.bf16 %v6919_v12, %v6914_v41  ;;  %v12178_v24 = vpop.f32.mrb[27].mxu0 }
0x1d79   : > { %13331 = vmatpush3.bf16.msra.mxu0 %v13330_v4 }
0x1d7a   : > { %v6924_v1 = vpop.f32.mrb[28].mxu0  ;;  %13332 = vmatprep.subr.bf16.mxu0 %v13880_v10 }
0x1d7b   : > { %v12181_v28 = vpop.f32.mrb[29].mxu0 }
0x1d7e   : > { %v6929_v0 = vpop.f32.mrb[30].mxu0 }
0x1d7f   : > { %v13333_v58 = vpack.c.bf16 %v6929_v0, %v6924_v1  ;;  %v12184_v11 = vpop.f32.mrb[31].mxu0 }
0x1d81   : > { %13334 = vmatpush3.bf16.msra.mxu0 %v13333_v58 }
0x1d82   : > { %v6934_v20 = vpop.f32.mrb[32].mxu0  ;;  %13335 = vmatprep.subr.bf16.mxu0 %v13880_v10 }
0x1d83   : > { %v12187_v40 = vpop.f32.mrb[33].mxu0 }
0x1d86   : > { %v6939_v46 = vpop.f32.mrb[34].mxu0 }
0x1d87   : > { %v13336_v57 = vpack.c.bf16 %v6939_v46, %v6934_v20  ;;  %v12190_v52 = vpop.f32.mrb[35].mxu0 }
0x1d89   : > { %13337 = vmatpush3.bf16.msra.mxu0 %v13336_v57 }
0x1d8a   : > { %v6944_v54 = vpop.f32.mrb[36].mxu0  ;;  %12241 = vmatprep.subr.mxu0 %v13882_v32 }
0x1d8b   : > { %v12193_v22 = vpop.f32.mrb[37].mxu0 }
0x1d8d   : > { %12242 = vmatpush3.msra.mxu0 %v6944_v54 }
0x1d8e   : > { %13341 = vmatprep.subr.bf16.mxu0 %v13880_v10 }
0x1e26   : > { %v7056_v34 = vpop.f32.mrb[24].mxu1 }
0x1e27   : > { %v7090_v30 = vmul.f32 0.25, %v7056_v34  ;;  %v12210_v2 = vpop.f32.mrb[25].mxu1 }
0x1e29   : > { %v7097_v14 = vsel %vm14461_vm4, %v7090_v30, -1e+30 }
0x1e2a   : > { %v7061_v3 = vpop.f32.mrb[26].mxu1  ;;  %v7104_v25 = vsel %vm1545_vm5, %v7097_v14, -inf }
0x1e2b   : > { %v7091_v39 = vmul.f32 0.25, %v7061_v3  ;;  %7105 = vmax.xlane.f32.xlu0 %v7104_v25  ;;  %v12213_v33 = vpop.f32.mrb[27].mxu1 }
0x1e2d   : > { %v7098_v47 = vsel %vm14469_vm6, %v7091_v39, -1e+30 }
0x1e2e   : > { %v7066_v42 = vpop.f32.mrb[28].mxu1  ;;  %v7107_v7 = vsel %vm1545_vm5, %v7098_v47, -inf }
0x1e2f   : > { %v7092_v38 = vmul.f32 0.25, %v7066_v42  ;;  %7108 = vmax.xlane.f32.xlu1 %v7107_v7  ;;  %v12216_v21 = vpop.f32.mrb[29].mxu1 }
0x1e31   : > { %v7099_v44 = vsel %vm14477_vm7, %v7092_v38, -1e+30 }
0x1e32   : > { %v7071_v15 = vpop.f32.mrb[30].mxu1  ;;  %v7110_v41 = vsel %vm1545_vm5, %v7099_v44, -inf }
0x1e33   : > { %v7093_v8 = vmul.f32 0.25, %v7071_v15  ;;  %7111 = vmax.xlane.f32.xlu0 %v7110_v41  ;;  %v12219_v12 = vpop.f32.mrb[31].mxu1 }
0x1e35   : > { %v7100_v4 = vsel %vm14485_vm8, %v7093_v8, -1e+30 }
0x1e36   : > { %v7076_v24 = vpop.f32.mrb[32].mxu1  ;;  %v7113_v1 = vsel %vm1545_vm5, %v7100_v4, -inf }
0x1e37   : > { %v7094_v28 = vmul.f32 0.25, %v7076_v24  ;;  %7114 = vmax.xlane.f32.xlu1 %v7113_v1  ;;  %v12222_v0 = vpop.f32.mrb[33].mxu1 }
0x1e39   : > { %v7101_v58 = vsel %vm14493_vm9, %v7094_v28, -1e+30 }
0x1e3a   : > { %v7081_v11 = vpop.f32.mrb[34].mxu1  ;;  %v7116_v20 = vsel %vm1545_vm5, %v7101_v58, -inf }
0x1e3b   : > { %v7095_v40 = vmul.f32 0.25, %v7081_v11  ;;  %7117 = vmax.xlane.f32.xlu0 %v7116_v20  ;;  %v12225_v46 = vpop.f32.mrb[35].mxu1 }
0x1e3d   : > { %v7102_v57 = vsel %vm14501_vm10, %v7095_v40, -1e+30 }
0x1e3e   : > { %v7086_v52 = vpop.f32.mrb[36].mxu1  ;;  %v7119_v54 = vsel %vm1545_vm5, %v7102_v57, -inf }
0x1e3f   : > { %v7096_v22 = vmul.f32 0.25, %v7086_v52  ;;  %7120 = vmax.xlane.f32.xlu1 %v7119_v54  ;;  %v12228_v34 = vpop.f32.mrb[37].mxu1 }
0x1e41   : > { %v7103_v30 = vsel %vm14509_vm11, %v7096_v22, -1e+30 }
0x1e42   : > { %v7122_v2 = vsel %vm1545_vm5, %v7103_v30, -inf }
0x1e43   : > { %7123 = vmax.xlane.f32.xlu0 %v7122_v2 }
0x1eb8   : > { %v7106_v3 = vpop.xlane.xlu0 %7105 }
0x1eb9   : > { %v7125_v25 = vsub.f32 %v7097_v14, %v7106_v3 }
0x1ebb   : > { %v7132_v39 = vmul.f32 1.442695, %v7125_v25 }
0x1ebc   : > { %v7109_v33 = vpop.xlane.xlu1 %7108 }
0x1ebd   : > { %13738 = vpow2.f32 %v7132_v39  ;;  %v7126_v42 = vsub.f32 %v7098_v47, %v7109_v33  ;;  %v9394_v33 = vld [vmem:[%s17014_s26 + $0x20] sm:$0xff] }
0x1ebf   : > { %v7134_v7 = vmul.f32 1.442695, %v7126_v42  ;;  %v9395_v42 = vld [vmem:[%s17014_s26 + $0x28] sm:$0xff] }
0x1ec0   : > { %v7112_v38 = vpop.xlane.xlu0 %7111 }
0x1ec1   : > { %13740 = vpow2.f32 %v7134_v7  ;;  %v7127_v21 = vsub.f32 %v7099_v44, %v7112_v38  ;;  %v13339_v7 = vpack.c.bf16 %v9395_v42, %v9394_v33 }
0x1ec3   : > { %v7136_v15 = vmul.f32 1.442695, %v7127_v21  ;;  %13340 = vmatpush3.bf16.msra.mxu1 %v13339_v7 }
0x1ec4   : > { %v7115_v41 = vpop.xlane.xlu1 %7114  ;;  %13365 = vmatprep.subr.bf16.mxu1 %v13880_v10 }
0x1ec5   : > { %13742 = vpow2.f32 %v7136_v15  ;;  %v7128_v8 = vsub.f32 %v7100_v4, %v7115_v41  ;;  %v9403_v41 = vld [vmem:[%s17009_s15 + $0x180] sm:$0xff] }
0x1ec7   : > { %v13739_v12 = vpop.eup %13738  ;;  %v7138_v24 = vmul.f32 1.442695, %v7128_v8  ;;  %v9404_v8 = vld [vmem:[%s17009_s15 + $0x188] sm:$0xff] }
0x1ec8   : > { %v7118_v1 = vpop.xlane.xlu0 %7117  ;;  %v7146_v28 = vsel %vm1545_vm5, %v13739_v12, 0.0 }
0x1ec9   : > { %13744 = vpow2.f32 %v7138_v24  ;;  %v7129_v0 = vsub.f32 %v7101_v58, %v7118_v1  ;;  %7147 = vadd.xlane.f32.xlu1 %v7146_v28  ;;  %v13342_v1 = vpack.c.bf16 %v9404_v8, %v9403_v41  ;;  %v9414_v8 = vld [vmem:[%s17009_s15 + $0x1d8] sm:$0xff] }
0x1ecb   : > { %v13741_v14 = vpop.eup %13740  ;;  %v7140_v11 = vmul.f32 1.442695, %v7129_v0 }
0x1ecc   : > { %v7121_v20 = vpop.xlane.xlu1 %7120  ;;  %v7149_v47 = vsel %vm1545_vm5, %v13741_v14, 0.0 }
0x1ecd   : > { %13746 = vpow2.f32 %v7140_v11  ;;  %v7130_v40 = vsub.f32 %v7102_v57, %v7121_v20  ;;  %7150 = vadd.xlane.f32.xlu0 %v7149_v47  ;;  %v9405_v11 = vld [vmem:[%s17009_s15 + $0x190] sm:$0xff]  ;;  %v9406_v20 = vld [vmem:[%s17009_s15 + $0x198] sm:$0xff] }
0x1ecf   : > { %v13743_v44 = vpop.eup %13742  ;;  %v7142_v46 = vmul.f32 1.442695, %v7130_v40  ;;  %v13345_v40 = vpack.c.bf16 %v9406_v20, %v9405_v11 }
0x1ed0   : > { %v7124_v52 = vpop.xlane.xlu0 %7123  ;;  %v7152_v4 = vsel %vm1545_vm5, %v13743_v44, 0.0 }
0x1ed1   : > { %13748 = vpow2.f32 %v7142_v46  ;;  %v7131_v54 = vsub.f32 %v7103_v30, %v7124_v52  ;;  %7153 = vadd.xlane.f32.xlu1 %v7152_v4  ;;  %v9407_v4 = vld [vmem:[%s17009_s15 + $0x1a0] sm:$0xff] }
0x1ed3   : > { %v13745_v58 = vpop.eup %13744  ;;  %v7144_v22 = vmul.f32 1.442695, %v7131_v54 }
0x1ed4   : > { %v7155_v34 = vsel %vm1545_vm5, %v13745_v58, 0.0 }
0x1ed5   : > { %13750 = vpow2.f32 %v7144_v22  ;;  %7156 = vadd.xlane.f32.xlu0 %v7155_v34 }
0x1ed7   : > { %v16403_v2 = vpop.eup %13746 }
0x1ed8   : > { %v7158_v57 = vsel %vm1545_vm5, %v16403_v2, 0.0 }
0x1ed9   : > { %7159 = vadd.xlane.f32.xlu1 %v7158_v57 }
0x1edb   : > { %v16407_v3 = vpop.eup %13748 }
0x1edc   : > { %v7161_v30 = vsel %vm1545_vm5, %v16407_v3, 0.0 }
0x1edd   : > { %7162 = vadd.xlane.f32.xlu0 %v7161_v30  ;;  %v9410_v30 = vld [vmem:[%s17009_s15 + $0x1b8] sm:$0xff] }
0x1edf   : > { %v16411_v25 = vpop.eup %13750 }
0x1ee0   : > { %v7164_v39 = vsel %vm1545_vm5, %v16411_v25, 0.0 }
0x1ee1   : > { %7165 = vadd.xlane.f32.xlu1 %v7164_v39 }
0x1f56   : > { %v7148_v38 = vpop.xlane.xlu1 %7147 }
0x1f57   : > { %13752 = vrcp.f32 %v7148_v38  ;;  %v9412_v38 = vld [vmem:[%s17009_s15 + $0x1c8] sm:$0xff] }
0x1f5a   : > { %v7151_v21 = vpop.xlane.xlu0 %7150 }
0x1f5b   : > { %13754 = vrcp.f32 %v7151_v21 }
0x1f5e   : > { %v7154_v15 = vpop.xlane.xlu1 %7153 }
0x1f5f   : > { %13756 = vrcp.f32 %v7154_v15 }
0x1f61   : > { %v13753_v24 = vpop.eup %13752 }
0x1f62   : > { %v7174_v28 = vmul.f32 %v13753_v24, %v13739_v12  ;;  %v7157_v0 = vpop.xlane.xlu0 %7156  ;;  %v9408_v12 = vld [vmem:[%s17009_s15 + $0x1a8] sm:$0xff] }
0x1f63   : > { %13758 = vrcp.f32 %v7157_v0  ;;  %v13348_v22 = vpack.c.bf16 %v9408_v12, %v9407_v4  ;;  %v9415_v0 = vld [vmem:[%s17009_s15 + $0x1e0] sm:$0xff]  ;;  %v9436_v4 = vld [vmem:[%s17012_s22 + $0x188] sm:$0xff] }
0x1f64   : > { %12244 = vmatmul.mubr.msk.f32.vlgmr.msra.gmra.mrb[38].mxu0 %vm1545_vm5, %v7174_v28 }
0x1f65   : > { %v13755_v47 = vpop.eup %13754  ;;  %13343 = vmatpush3.bf16.msra.mxu0 %v13342_v1  ;;  %12246 = vmatprep.mubr.msk.f32.mxu0 %vm13881_vm1, %v13882_v32 }
0x1f66   : > { %v7175_v46 = vmul.f32 %v13755_v47, %v13741_v14  ;;  %v7160_v52 = vpop.xlane.xlu1 %7159  ;;  %13344 = vmatprep.subr.bf16.mxu0 %v13880_v10  ;;  %v9409_v14 = vld [vmem:[%s17009_s15 + $0x1b0] sm:$0xff] }
0x1f67   : > { %13760 = vrcp.f32 %v7160_v52  ;;  %v13351_v33 = vpack.c.bf16 %v9410_v30, %v9409_v14  ;;  %v9435_v52 = vld [vmem:[%s17012_s22 + $0x180] sm:$0xff]  ;;  %v9441_v30 = vld [vmem:[%s17012_s22 + $0x1b0] sm:$0xff] }
0x1f68   : > { %12247 = vmatmul.mubr.msk.f32.gmra.mrb[40].mxu0 %vm1545_vm5, %v7175_v46  ;;  %v13390_v12 = vpack.c.bf16 %v9436_v4, %v9435_v52  ;;  %v9423_v52 = vld [vmem:[%s17010_s16 + $0x1a0] sm:$0xff]  ;;  %v9424_v4 = vld [vmem:[%s17010_s16 + $0x1a8] sm:$0xff] }
0x1f69   : > { %v13757_v54 = vpop.eup %13756  ;;  %13346 = vmatpush3.bf16.msra.mxu0 %v13345_v40  ;;  %12249 = vmatprep.mubr.msk.f32.mxu0 %vm13881_vm1, %v13882_v32  ;;  %v9418_v40 = vld [vmem:[%s17009_s15 + $0x1f8] sm:$0xff] }
0x1f6a   : > { %v7176_v34 = vmul.f32 %v13757_v54, %v13743_v44  ;;  %v7163_v57 = vpop.xlane.xlu0 %7162  ;;  %13347 = vmatprep.subr.bf16.mxu0 %v13880_v10  ;;  %v9411_v44 = vld [vmem:[%s17009_s15 + $0x1c0] sm:$0xff]  ;;  %v9438_v54 = vld [vmem:[%s17012_s22 + $0x198] sm:$0xff] }
0x1f6b   : > { %13762 = vrcp.f32 %v7163_v57  ;;  %v13354_v15 = vpack.c.bf16 %v9412_v38, %v9411_v44  ;;  %v9440_v57 = vld [vmem:[%s17012_s22 + $0x1a8] sm:$0xff]  ;;  %v9445_v38 = vld [vmem:[%s17012_s22 + $0x1d0] sm:$0xff] }
0x1f6c   : > { %12250 = vmatmul.mubr.msk.f32.gmra.mrb[42].mxu0 %vm1545_vm5, %v7176_v34  ;;  %v9439_v34 = vld [vmem:[%s17012_s22 + $0x1a0] sm:$0xff] }
0x1f6d   : > { %v13759_v39 = vpop.eup %13758  ;;  %13349 = vmatpush3.bf16.msra.mxu0 %v13348_v22  ;;  %12252 = vmatprep.mubr.msk.f32.mxu0 %vm13881_vm1, %v13882_v32  ;;  %v13396_v14 = vpack.c.bf16 %v9440_v57, %v9439_v34  ;;  %v9426_v34 = vld [vmem:[%s17010_s16 + $0x1b8] sm:$0xff] }
0x1f6e   : > { %v7177_v42 = vmul.f32 %v13759_v39, %v13745_v58  ;;  %v7166_v7 = vpop.xlane.xlu1 %7165  ;;  %13350 = vmatprep.subr.bf16.mxu0 %v13880_v10  ;;  %v9413_v58 = vld [vmem:[%s17009_s15 + $0x1d0] sm:$0xff]  ;;  %v9442_v39 = vld [vmem:[%s17012_s22 + $0x1b8] sm:$0xff] }
0x1f6f   : > { %13764 = vrcp.f32 %v7166_v7  ;;  %v13357_v1 = vpack.c.bf16 %v9414_v8, %v9413_v58  ;;  %v9444_v7 = vld [vmem:[%s17012_s22 + $0x1c8] sm:$0xff] }
0x1f70   : > { %12253 = vmatmul.mubr.msk.f32.gmra.mrb[44].mxu0 %vm1545_vm5, %v7177_v42  ;;  %v9443_v42 = vld [vmem:[%s17012_s22 + $0x1c0] sm:$0xff]  ;;  %v9448_v58 = vld [vmem:[%s17012_s22 + $0x1e8] sm:$0xff] }
0x1f71   : > { %v13761_v21 = vpop.eup %13760  ;;  %13352 = vmatpush3.bf16.msra.mxu0 %v13351_v33  ;;  %12255 = vmatprep.mubr.msk.f32.mxu0 %vm13881_vm1, %v13882_v32  ;;  %v13399_v33 = vpack.c.bf16 %v9442_v39, %v9441_v30  ;;  %v13402_v44 = vpack.c.bf16 %v9444_v7, %v9443_v42  ;;  %v9427_v39 = vld [vmem:[%s17010_s16 + $0x1c0] sm:$0xff] }
0x1f72   : > { %v7178_v41 = vmul.f32 %v13761_v21, %v16403_v2  ;;  %13353 = vmatprep.subr.bf16.mxu0 %v13880_v10  ;;  %v9416_v2 = vld [vmem:[%s17009_s15 + $0x1e8] sm:$0xff]  ;;  %v9446_v21 = vld [vmem:[%s17012_s22 + $0x1d8] sm:$0xff] }
0x1f73   : > { %v13360_v20 = vpack.c.bf16 %v9416_v2, %v9415_v0  ;;  %v9419_v0 = vld [vmem:[%s17010_s16 + $0x180] sm:$0xff]  ;;  %v9420_v2 = vld [vmem:[%s17010_s16 + $0x188] sm:$0xff] }
0x1f74   : > { %12256 = vmatmul.mubr.msk.f32.gmra.mrb[46].mxu0 %vm1545_vm5, %v7178_v41  ;;  %v9447_v41 = vld [vmem:[%s17012_s22 + $0x1e0] sm:$0xff] }
0x1f75   : > { %v13763_v24 = vpop.eup %13762  ;;  %13355 = vmatpush3.bf16.msra.mxu0 %v13354_v15  ;;  %12258 = vmatprep.mubr.msk.f32.mxu0 %vm13881_vm1, %v13882_v32  ;;  %v13405_v15 = vpack.c.bf16 %v9446_v21, %v9445_v38  ;;  %v13408_v8 = vpack.c.bf16 %v9448_v58, %v9447_v41  ;;  %v9429_v38 = vld [vmem:[%s17010_s16 + $0x1d0] sm:$0xff]  ;;  %v9430_v21 = vld [vmem:[%s17010_s16 + $0x1d8] sm:$0xff] }
0x1f76   : > { %v7179_v28 = vmul.f32 %v13763_v24, %v16407_v3  ;;  %13356 = vmatprep.subr.bf16.mxu0 %v13880_v10  ;;  %v9417_v3 = vld [vmem:[%s17009_s15 + $0x1f0] sm:$0xff]  ;;  %v13381_v58 = vpack.c.bf16 %v9430_v21, %v9429_v38 }
0x1f77   : > { %v13363_v46 = vpack.c.bf16 %v9418_v40, %v9417_v3  ;;  %v9449_v24 = vld [vmem:[%s17012_s22 + $0x1f0] sm:$0xff] }
0x1f78   : > { %12259 = vmatmul.mubr.msk.f32.gmra.mrb[48].mxu0 %vm1545_vm5, %v7179_v28 }
0x1f79   : > { %v13765_v11 = vpop.eup %13764  ;;  %13358 = vmatpush3.bf16.msra.mxu0 %v13357_v1  ;;  %12261 = vmatprep.mubr.msk.f32.mxu0 %vm13881_vm1, %v13882_v32  ;;  %v9450_v1 = vld [vmem:[%s17012_s22 + $0x1f8] sm:$0xff] }
0x1f7a   : > { %v7180_v47 = vmul.f32 %v13765_v11, %v16411_v25  ;;  %13359 = vmatprep.subr.bf16.mxu0 %v13880_v10  ;;  %v9437_v25 = vld [vmem:[%s17012_s22 + $0x190] sm:$0xff]  ;;  %v13411_v28 = vpack.c.bf16 %v9450_v1, %v9449_v24  ;;  %v13366_v11 = vpack.c.bf16 %v9420_v2, %v9419_v0  ;;  %v9432_v24 = vld [vmem:[%s17010_s16 + $0x1e8] sm:$0xff] }
0x1f7b   : > { %v13393_v22 = vpack.c.bf16 %v9438_v54, %v9437_v25  ;;  %v13372_v54 = vpack.c.bf16 %v9424_v4, %v9423_v52  ;;  %v9433_v2 = vld [vmem:[%s17010_s16 + $0x1f0] sm:$0xff] }
0x1f7c   : > { %12262 = vmatmul.mubr.msk.f32.gmra.mrb[50].mxu0 %vm1545_vm5, %v7180_v47  ;;  %v9422_v47 = vld [vmem:[%s17010_s16 + $0x198] sm:$0xff] }
0x1f7d   : > { %13361 = vmatpush3.bf16.msra.mxu0 %v13360_v20  ;;  %12321 = vmatprep.mubr.msk.f32.mxu0 %vm13881_vm1, %v13882_v32  ;;  %v9421_v20 = vld [vmem:[%s17010_s16 + $0x190] sm:$0xff] }
0x1f7e   : > { %13362 = vmatprep.subr.bf16.mxu0 %v13880_v10 }
0x1f81   : > { %13364 = vmatpush3.bf16.msra.mxu0 %v13363_v46  ;;  %v13369_v46 = vpack.c.bf16 %v9422_v47, %v9421_v20 }
0x1f82   : > { %13389 = vmatprep.subr.bf16.mxu0 %v13880_v10 }
0x1f84   : > { %12322 = vmatmul.mubr.f32.vlgmr.msra.gmra.mrb[52].mxu0 %v15648_v9 }
0x1f85   : > { %13391 = vmatpush3.bf16.msra.mxu0 %v13390_v12  ;;  %12324 = vmatprep.mubr.msk.f32.mxu0 %vm13881_vm1, %v13882_v32 }
0x1f86   : > { %13392 = vmatprep.subr.bf16.mxu0 %v13880_v10 }
0x1f88   : > { %12325 = vmatmul.mubr.f32.gmra.mrb[54].mxu0 %v15659_v51 }
0x1f89   : > { %13394 = vmatpush3.bf16.msra.mxu0 %v13393_v22  ;;  %12327 = vmatprep.mubr.msk.f32.mxu0 %vm13881_vm1, %v13882_v32  ;;  %v9425_v22 = vld [vmem:[%s17010_s16 + $0x1b0] sm:$0xff] }
0x1f8a   : > { %13395 = vmatprep.subr.bf16.mxu0 %v13880_v10  ;;  %v13375_v30 = vpack.c.bf16 %v9426_v34, %v9425_v22 }
0x1f8c   : > { %12328 = vmatmul.mubr.f32.gmra.mrb[56].mxu0 %v15673_v49 }
0x1f8d   : > { %13397 = vmatpush3.bf16.msra.mxu0 %v13396_v14  ;;  %12330 = vmatprep.mubr.msk.f32.mxu0 %vm13881_vm1, %v13882_v32 }
0x1f8e   : > { %13398 = vmatprep.subr.bf16.mxu0 %v13880_v10 }
0x1f90   : > { %12331 = vmatmul.mubr.f32.gmra.mrb[58].mxu0 %v15687_v18 }
0x1f91   : > { %13400 = vmatpush3.bf16.msra.mxu0 %v13399_v33  ;;  %12333 = vmatprep.mubr.msk.f32.mxu0 %vm13881_vm1, %v13882_v32  ;;  %v9428_v33 = vld [vmem:[%s17010_s16 + $0x1c8] sm:$0xff] }
0x1f92   : > { %13401 = vmatprep.subr.bf16.mxu0 %v13880_v10 }
0x1f94   : > { %12334 = vmatmul.mubr.f32.gmra.mrb[60].mxu0 %v15701_v56 }
0x1f95   : > { %13403 = vmatpush3.bf16.msra.mxu0 %v13402_v44  ;;  %12336 = vmatprep.mubr.msk.f32.mxu0 %vm13881_vm1, %v13882_v32  ;;  %v13378_v44 = vpack.c.bf16 %v9428_v33, %v9427_v39 }
0x1f96   : > { %13404 = vmatprep.subr.bf16.mxu0 %v13880_v10 }
0x1f98   : > { %12337 = vmatmul.mubr.f32.gmra.mrb[62].mxu0 %v15715_v50 }
0x1f99   : > { %13406 = vmatpush3.bf16.msra.mxu0 %v13405_v15  ;;  %12339 = vmatprep.mubr.msk.f32.mxu0 %vm13881_vm1, %v13882_v32 }
0x1f9a   : > { %13407 = vmatprep.subr.bf16.mxu0 %v13880_v10 }
0x1f9c   : > { %12340 = vmatmul.mubr.f32.gmra.mrb[64].mxu0 %v15729_v63 }
0x1f9d   : > { %13409 = vmatpush3.bf16.msra.mxu0 %v13408_v8  ;;  %12427 = vmatprep.mubr.msk.f32.mxu0 %vm13881_vm1, %v13882_v32  ;;  %v9431_v8 = vld [vmem:[%s17010_s16 + $0x1e0] sm:$0xff] }
0x1f9e   : > { %13410 = vmatprep.subr.bf16.mxu0 %v13880_v10  ;;  %v13384_v0 = vpack.c.bf16 %v9432_v24, %v9431_v8 }
0x1fa1   : > { %13412 = vmatpush3.bf16.msra.mxu0 %v13411_v28 }
0x1fa2   : > { %13434 = vmatprep.subr.bf16.mxu0 %v13880_v10 }
0x1fa4   : > { %12428 = vmatmul.mubr.f32.vlgmr.msra.gmra.mrb[66].mxu0 %v15648_v9 }
0x1fa5   : > { %12430 = vmatprep.mubr.msk.f32.mxu0 %vm13881_vm1, %v13882_v32 }
0x1fa8   : > { %12431 = vmatmul.mubr.f32.gmra.mrb[68].mxu0 %v15659_v51 }
0x1fa9   : > { %12433 = vmatprep.mubr.msk.f32.mxu0 %vm13881_vm1, %v13882_v32 }
0x1fac   : > { %12434 = vmatmul.mubr.f32.gmra.mrb[70].mxu0 %v15673_v49 }
0x1fad   : > { %12436 = vmatprep.mubr.msk.f32.mxu0 %vm13881_vm1, %v13882_v32 }
0x1fb0   : > { %12437 = vmatmul.mubr.f32.gmra.mrb[72].mxu0 %v15687_v18 }
0x1fb1   : > { %12439 = vmatprep.mubr.msk.f32.mxu0 %vm13881_vm1, %v13882_v32 }
0x1fb4   : > { %12440 = vmatmul.mubr.f32.gmra.mrb[74].mxu0 %v15701_v56 }
0x1fb5   : > { %12442 = vmatprep.mubr.msk.f32.mxu0 %vm13881_vm1, %v13882_v32 }
0x1fb8   : > { %12443 = vmatmul.mubr.f32.gmra.mrb[76].mxu0 %v15715_v50 }
0x1fb9   : > { %12445 = vmatprep.mubr.msk.f32.mxu0 %vm13881_vm1, %v13882_v32 }
0x1fbc   : > { %12446 = vmatmul.mubr.f32.gmra.mrb[78].mxu0 %v15729_v63 }
0x1fbd   : > { %12522 = vmatprep.mubr.msk.f32.mxu0 %vm13881_vm1, %v13882_v32 }
0x2037   : > { %v7268_v3 = vpop.f32.mrb[38].mxu0 }
0x2038   : > { %v12245_v40 = vpop.f32.mrb[39].mxu0  ;;  %12269 = vmatmul.mubr.msk.f32.vlgmr.msra.gmra.mrb[38].mxu1 %vm1388_vm2, %v7268_v3 }
0x2039   : > { %13367 = vmatpush3.bf16.msra.mxu1 %v13366_v11  ;;  %12271 = vmatprep.mubr.msk.f32.mxu1 %vm13881_vm1, %v13882_v32  ;;  %v9434_v11 = vld [vmem:[%s17010_s16 + $0x1f8] sm:$0xff] }
0x203a   : > { %13368 = vmatprep.subr.bf16.mxu1 %v13880_v10  ;;  %v13387_v3 = vpack.c.bf16 %v9434_v11, %v9433_v2 }
0x203b   : > { %v7273_v12 = vpop.f32.mrb[40].mxu0 }
0x203c   : > { %v12248_v25 = vpop.f32.mrb[41].mxu0  ;;  %12272 = vmatmul.mubr.msk.f32.gmra.mrb[40].mxu1 %vm1388_vm2, %v7273_v12 }
0x203d   : > { %13370 = vmatpush3.bf16.msra.mxu1 %v13369_v46  ;;  %12274 = vmatprep.mubr.msk.f32.mxu1 %vm13881_vm1, %v13882_v32 }
0x203e   : > { %13371 = vmatprep.subr.bf16.mxu1 %v13880_v10 }
0x203f   : > { %v7278_v57 = vpop.f32.mrb[42].mxu0 }
0x2040   : > { %v12251_v14 = vpop.f32.mrb[43].mxu0  ;;  %12275 = vmatmul.mubr.msk.f32.gmra.mrb[42].mxu1 %vm1388_vm2, %v7278_v57 }
0x2041   : > { %13373 = vmatpush3.bf16.msra.mxu1 %v13372_v54  ;;  %12277 = vmatprep.mubr.msk.f32.mxu1 %vm13881_vm1, %v13882_v32 }
0x2042   : > { %13374 = vmatprep.subr.bf16.mxu1 %v13880_v10 }
0x2043   : > { %v7283_v42 = vpop.f32.mrb[44].mxu0 }
0x2044   : > { %v12254_v7 = vpop.f32.mrb[45].mxu0  ;;  %12278 = vmatmul.mubr.msk.f32.gmra.mrb[44].mxu1 %vm1388_vm2, %v7283_v42 }
0x2045   : > { %13376 = vmatpush3.bf16.msra.mxu1 %v13375_v30  ;;  %12280 = vmatprep.mubr.msk.f32.mxu1 %vm13881_vm1, %v13882_v32 }
0x2046   : > { %13377 = vmatprep.subr.bf16.mxu1 %v13880_v10 }
0x2047   : > { %v7288_v15 = vpop.f32.mrb[46].mxu0 }
0x2048   : > { %v12257_v41 = vpop.f32.mrb[47].mxu0  ;;  %12281 = vmatmul.mubr.msk.f32.gmra.mrb[46].mxu1 %vm1388_vm2, %v7288_v15 }
0x2049   : > { %13379 = vmatpush3.bf16.msra.mxu1 %v13378_v44  ;;  %12283 = vmatprep.mubr.msk.f32.mxu1 %vm13881_vm1, %v13882_v32 }
0x204a   : > { %13380 = vmatprep.subr.bf16.mxu1 %v13880_v10 }
0x204b   : > { %v7293_v1 = vpop.f32.mrb[48].mxu0 }
0x204c   : > { %v12260_v28 = vpop.f32.mrb[49].mxu0  ;;  %12284 = vmatmul.mubr.msk.f32.gmra.mrb[48].mxu1 %vm1388_vm2, %v7293_v1 }
0x204d   : > { %13382 = vmatpush3.bf16.msra.mxu1 %v13381_v58  ;;  %12286 = vmatprep.mubr.msk.f32.mxu1 %vm13881_vm1, %v13882_v32 }
0x204e   : > { %13383 = vmatprep.subr.bf16.mxu1 %v13880_v10 }
0x204f   : > { %v7298_v20 = vpop.f32.mrb[50].mxu0 }
0x2050   : > { %v12263_v47 = vpop.f32.mrb[51].mxu0  ;;  %12287 = vmatmul.mubr.msk.f32.gmra.mrb[50].mxu1 %vm1388_vm2, %v7298_v20 }
0x2051   : > { %13385 = vmatpush3.bf16.msra.mxu1 %v13384_v0  ;;  %12374 = vmatprep.mubr.msk.f32.mxu1 %vm13881_vm1, %v13882_v32 }
0x2052   : > { %13386 = vmatprep.subr.bf16.mxu1 %v13880_v10 }
0x2055   : > { %13388 = vmatpush3.bf16.msra.mxu1 %v13387_v3 }
0x2056   : > { %13413 = vmatprep.subr.bf16.mxu1 %v13880_v10 }
0x2057   : > { %v16577_v40 = vpop.f32.mrb[52].mxu0 }
0x2058   : > { %v12323_v46 = vpop.f32.mrb[53].mxu0  ;;  %12375 = vmatmul.mubr.f32.vlgmr.msra.gmra.mrb[52].mxu1 %v15648_v9 }
0x2059   : > { %12377 = vmatprep.mubr.msk.f32.mxu1 %vm13881_vm1, %v13882_v32 }
0x205b   : > { %v16582_v52 = vpop.f32.mrb[54].mxu0 }
0x205c   : > { %v12326_v4 = vpop.f32.mrb[55].mxu0  ;;  %12378 = vmatmul.mubr.f32.gmra.mrb[54].mxu1 %v15659_v51 }
0x205d   : > { %12380 = vmatprep.mubr.msk.f32.mxu1 %vm13881_vm1, %v13882_v32 }
0x205f   : > { %v16587_v12 = vpop.f32.mrb[56].mxu0 }
0x2060   : > { %v12329_v25 = vpop.f32.mrb[57].mxu0  ;;  %12381 = vmatmul.mubr.f32.gmra.mrb[56].mxu1 %v15673_v49 }
0x2061   : > { %12383 = vmatprep.mubr.msk.f32.mxu1 %vm13881_vm1, %v13882_v32 }
0x2063   : > { %v16592_v9 = vpop.f32.mrb[58].mxu0 }
0x2064   : > { %v12332_v54 = vpop.f32.mrb[59].mxu0  ;;  %12384 = vmatmul.mubr.f32.gmra.mrb[58].mxu1 %v15687_v18 }
0x2065   : > { %12386 = vmatprep.mubr.msk.f32.mxu1 %vm13881_vm1, %v13882_v32 }
0x2067   : > { %v16597_v51 = vpop.f32.mrb[60].mxu0 }
0x2068   : > { %v12335_v22 = vpop.f32.mrb[61].mxu0  ;;  %12387 = vmatmul.mubr.f32.gmra.mrb[60].mxu1 %v15701_v56 }
0x2069   : > { %12389 = vmatprep.mubr.msk.f32.mxu1 %vm13881_vm1, %v13882_v32 }
0x206b   : > { %v16602_v49 = vpop.f32.mrb[62].mxu0 }
0x206c   : > { %v12338_v34 = vpop.f32.mrb[63].mxu0  ;;  %12390 = vmatmul.mubr.f32.gmra.mrb[62].mxu1 %v15715_v50 }
0x206d   : > { %12392 = vmatprep.mubr.msk.f32.mxu1 %vm13881_vm1, %v13882_v32 }
0x206f   : > { %v16607_v18 = vpop.f32.mrb[64].mxu0 }
0x2070   : > { %v12341_v57 = vpop.f32.mrb[65].mxu0  ;;  %12393 = vmatmul.mubr.f32.gmra.mrb[64].mxu1 %v15729_v63 }
0x2071   : > { %12462 = vmatprep.mubr.msk.f32.mxu1 %vm13881_vm1, %v13882_v32 }
0x2077   : > { %v16612_v56 = vpop.f32.mrb[66].mxu0 }
0x2078   : > { %v12429_v14 = vpop.f32.mrb[67].mxu0 }
0x207b   : > { %v7755_v30 = vpop.f32.mrb[68].mxu0 }
0x207c   : > { %v13426_v39 = vpack.c.bf16 %v7755_v30, %v16612_v56  ;;  %v12432_v33 = vpop.f32.mrb[69].mxu0 }
0x207f   : > { %v16615_v42 = vpop.f32.mrb[70].mxu0 }
0x2080   : > { %v12435_v50 = vpop.f32.mrb[71].mxu0 }
0x2083   : > { %v7765_v7 = vpop.f32.mrb[72].mxu0 }
0x2084   : > { %v13429_v44 = vpack.c.bf16 %v7765_v7, %v16615_v42  ;;  %v12438_v38 = vpop.f32.mrb[73].mxu0 }
0x2087   : > { %v7770_v21 = vpop.f32.mrb[74].mxu0 }
0x2088   : > { %v12441_v15 = vpop.f32.mrb[75].mxu0 }
0x208b   : > { %v7775_v63 = vpop.f32.mrb[76].mxu0 }
0x208c   : > { %v13432_v41 = vpack.c.bf16 %v7775_v63, %v7770_v21  ;;  %v12444_v58 = vpop.f32.mrb[77].mxu0 }
0x208f   : > { %v7780_v8 = vpop.f32.mrb[78].mxu0 }
0x2090   : > { %v12447_v24 = vpop.f32.mrb[79].mxu0 }
0x210b   : > { %v7392_v1 = vpop.f32.mrb[38].mxu1 }
0x210c   : > { %v16619_v28 = vadd.f32 %v7392_v1, %v16333_v59  ;;  %v12270_v0 = vpop.f32.mrb[39].mxu1 }
0x210f   : > { %v7397_v2 = vpop.f32.mrb[40].mxu1 }
0x2110   : > { %v16622_v11 = vadd.f32 %v7397_v2, %v16336_v29  ;;  %v12273_v20 = vpop.f32.mrb[41].mxu1 }
0x2113   : > { %v7402_v47 = vpop.f32.mrb[42].mxu1 }
0x2114   : > { %v16625_v3 = vadd.f32 %v7402_v47, %v16339_v60  ;;  %v12276_v46 = vpop.f32.mrb[43].mxu1 }
0x2117   : > { %v7407_v4 = vpop.f32.mrb[44].mxu1 }
0x2118   : > { %v16628_v25 = vadd.f32 %v7407_v4, %v16342_v36  ;;  %v12279_v54 = vpop.f32.mrb[45].mxu1 }
0x211b   : > { %v7412_v22 = vpop.f32.mrb[46].mxu1 }
0x211c   : > { %v16631_v59 = vadd.f32 %v7412_v22, %v16345_v35  ;;  %v12282_v34 = vpop.f32.mrb[47].mxu1 }
0x211f   : > { %v7417_v57 = vpop.f32.mrb[48].mxu1 }
0x2120   : > { %v16634_v29 = vadd.f32 %v7417_v57, %v16348_v45  ;;  %v12285_v56 = vpop.f32.mrb[49].mxu1 }
0x2123   : > { %v7422_v14 = vpop.f32.mrb[50].mxu1 }
0x2124   : > { %v16637_v60 = vadd.f32 %v7422_v14, %v16351_v17  ;;  %v12288_v30 = vpop.f32.mrb[51].mxu1 }
0x212b   : > { %v7633_v33 = vpop.f32.mrb[52].mxu1 }
0x212c   : > { %v12376_v42 = vpop.f32.mrb[53].mxu1 }
0x212f   : > { %v7638_v36 = vpop.f32.mrb[54].mxu1 }
0x2130   : > { %v13414_v50 = vpack.c.bf16 %v7638_v36, %v7633_v33  ;;  %v12379_v7 = vpop.f32.mrb[55].mxu1 }
0x2132   : > { %13416 = vmatpush3.bf16.xpose.msk.msra.mxu1 %vm14401_vm3, %v13414_v50 }
0x2133   : > { %v7643_v35 = vpop.f32.mrb[56].mxu1  ;;  %13417 = vmatprep.subr.bf16.mxu1 %v13880_v10 }
0x2134   : > { %v12382_v38 = vpop.f32.mrb[57].mxu1 }
0x2137   : > { %v7648_v45 = vpop.f32.mrb[58].mxu1 }
0x2138   : > { %v13418_v21 = vpack.c.bf16 %v7648_v45, %v7643_v35  ;;  %v12385_v15 = vpop.f32.mrb[59].mxu1 }
0x213a   : > { %13420 = vmatpush3.bf16.xpose.msk.msra.mxu1 %vm14401_vm3, %v13418_v21 }
0x213b   : > { %v7653_v17 = vpop.f32.mrb[60].mxu1  ;;  %13421 = vmatprep.subr.bf16.mxu1 %v13880_v10 }
0x213c   : > { %v12388_v63 = vpop.f32.mrb[61].mxu1 }
0x213f   : > { %v7658_v58 = vpop.f32.mrb[62].mxu1 }
0x2140   : > { %v13422_v24 = vpack.c.bf16 %v7658_v58, %v7653_v17  ;;  %v12391_v1 = vpop.f32.mrb[63].mxu1 }
0x2142   : > { %13424 = vmatpush3.bf16.xpose.msk.msra.mxu1 %vm14401_vm3, %v13422_v24 }
0x2143   : > { %v7663_v0 = vpop.f32.mrb[64].mxu1  ;;  %12460 = vmatprep.subr.mxu1 %v13882_v32 }
0x2144   : > { %v12394_v2 = vpop.f32.mrb[65].mxu1 }
0x214a   : > { %12461 = vmatpush3.xpose.msk.msra.mxu1 %vm1388_vm2, %v7663_v0 }
0x214b   : > { %13425 = vmatprep.subr.bf16.mxu1 %v13880_v10 }
0x214d   : > { %12463 = vmatmul.mubr.msk.f32.vlgmr.msra.gmra.mrb[66].mxu1 %vm1388_vm2, %v16577_v40 }
0x214e   : > { %13427 = vmatpush3.bf16.msra.mxu1 %v13426_v39  ;;  %12465 = vmatprep.mubr.msk.f32.mxu1 %vm13881_vm1, %v13882_v32 }
0x214f   : > { %13428 = vmatprep.subr.bf16.mxu1 %v13880_v10 }
0x2151   : > { %12466 = vmatmul.mubr.msk.f32.gmra.mrb[68].mxu1 %vm1388_vm2, %v16582_v52 }
0x2152   : > { %13430 = vmatpush3.bf16.msra.mxu1 %v13429_v44  ;;  %12468 = vmatprep.mubr.msk.f32.mxu1 %vm13881_vm1, %v13882_v32 }
0x2153   : > { %13431 = vmatprep.subr.bf16.mxu1 %v13880_v10 }
0x2155   : > { %12469 = vmatmul.mubr.msk.f32.gmra.mrb[70].mxu1 %vm1388_vm2, %v16587_v12 }
0x2156   : > { %13433 = vmatpush3.bf16.msra.mxu1 %v13432_v41  ;;  %12471 = vmatprep.mubr.msk.f32.mxu1 %vm13881_vm1, %v13882_v32 }
0x2157   : > { %12495 = vmatprep.subr.mxu1 %v13882_v32 }
0x2159   : > { %12472 = vmatmul.mubr.msk.f32.gmra.mrb[72].mxu1 %vm1388_vm2, %v16592_v9 }
0x215a   : > { %12496 = vmatpush3.msra.mxu1 %v7780_v8  ;;  %12474 = vmatprep.mubr.msk.f32.mxu1 %vm13881_vm1, %v13882_v32 }
0x215b   : > { %13437 = vmatprep.subr.bf16.mxu1 %v13880_v10 }
0x215d   : > { %12475 = vmatmul.mubr.msk.f32.gmra.mrb[74].mxu1 %vm1388_vm2, %v16597_v51 }
0x215e   : > { %12477 = vmatprep.mubr.msk.f32.mxu1 %vm13881_vm1, %v13882_v32 }
0x2161   : > { %12478 = vmatmul.mubr.msk.f32.gmra.mrb[76].mxu1 %vm1388_vm2, %v16602_v49 }
0x2162   : > { %12480 = vmatprep.mubr.msk.f32.mxu1 %vm13881_vm1, %v13882_v32 }
0x2165   : > { %12481 = vmatmul.mubr.msk.f32.gmra.mrb[78].mxu1 %vm1388_vm2, %v16607_v18 }
0x2166   : > { %12497 = vmatprep.mubr.msk.f32.mxu1 %vm13881_vm1, %v13882_v32 }
0x2220   : > { %v7892_v53 = vpop.f32.mrb[66].mxu1 }
0x2221   : > { %v7926_v40 = vmul.f32 0.25, %v7892_v53  ;;  %v12464_v52 = vpop.f32.mrb[67].mxu1 }
0x2223   : > { %v7933_v12 = vsel %vm14461_vm4, %v7926_v40, -1e+30 }
0x2224   : > { %v7897_v9 = vpop.f32.mrb[68].mxu1  ;;  %v7940_v51 = vsel %vm1545_vm5, %v7933_v12, -inf }
0x2225   : > { %v7927_v39 = vmul.f32 0.25, %v7897_v9  ;;  %7941 = vmax.xlane.f32.xlu0 %v7940_v51  ;;  %v12467_v49 = vpop.f32.mrb[69].mxu1 }
0x2227   : > { %v7934_v44 = vsel %vm14469_vm6, %v7927_v39, -1e+30 }
0x2228   : > { %v7902_v41 = vpop.f32.mrb[70].mxu1  ;;  %v7943_v18 = vsel %vm1545_vm5, %v7934_v44, -inf }
0x2229   : > { %v7928_v8 = vmul.f32 0.25, %v7902_v41  ;;  %7944 = vmax.xlane.f32.xlu1 %v7943_v18  ;;  %v12470_v20 = vpop.f32.mrb[71].mxu1 }
0x222b   : > { %v7935_v47 = vsel %vm14477_vm7, %v7928_v8, -1e+30 }
0x222c   : > { %v7907_v16 = vpop.f32.mrb[72].mxu1  ;;  %v7946_v46 = vsel %vm1545_vm5, %v7935_v47, -inf }
0x222d   : > { %v7929_v4 = vmul.f32 0.25, %v7907_v16  ;;  %7947 = vmax.xlane.f32.xlu0 %v7946_v46  ;;  %v12473_v54 = vpop.f32.mrb[73].mxu1 }
0x222f   : > { %v7936_v22 = vsel %vm14485_vm8, %v7929_v4, -1e+30 }
0x2230   : > { %v7912_v23 = vpop.f32.mrb[74].mxu1  ;;  %v7949_v34 = vsel %vm1545_vm5, %v7936_v22, -inf }
0x2231   : > { %v7930_v57 = vmul.f32 0.25, %v7912_v23  ;;  %7950 = vmax.xlane.f32.xlu1 %v7949_v34  ;;  %v12476_v56 = vpop.f32.mrb[75].mxu1 }
0x2233   : > { %v7937_v14 = vsel %vm14493_vm9, %v7930_v57, -1e+30 }
0x2234   : > { %v7917_v31 = vpop.f32.mrb[76].mxu1  ;;  %v7952_v30 = vsel %vm1545_vm5, %v7937_v14, -inf }
0x2235   : > { %v7931_v33 = vmul.f32 0.25, %v7917_v31  ;;  %7953 = vmax.xlane.f32.xlu0 %v7952_v30  ;;  %v12479_v42 = vpop.f32.mrb[77].mxu1  ;;  %v9473_v31 = vld [vmem:[%s17014_s26 + $0x38] sm:$0xff] }
0x2237   : > { %v7938_v36 = vsel %vm14501_vm10, %v7931_v33, -1e+30 }
0x2238   : > { %v7922_v43 = vpop.f32.mrb[78].mxu1  ;;  %v7955_v50 = vsel %vm1545_vm5, %v7938_v36, -inf }
0x2239   : > { %v7932_v7 = vmul.f32 0.25, %v7922_v43  ;;  %7956 = vmax.xlane.f32.xlu1 %v7955_v50  ;;  %v12482_v35 = vpop.f32.mrb[79].mxu1 }
0x223b   : > { %v7939_v38 = vsel %vm14509_vm11, %v7932_v7, -1e+30 }
0x223c   : > { %v7958_v62 = vsel %vm1545_vm5, %v7939_v38, -inf }
0x223d   : > { %7959 = vmax.xlane.f32.xlu0 %v7958_v62 }
0x22b2   : > { %v7942_v45 = vpop.xlane.xlu0 %7941 }
0x22b3   : > { %v7961_v21 = vsub.f32 %v7933_v12, %v7942_v45 }
0x22b5   : > { %v7968_v15 = vmul.f32 1.442695, %v7961_v21 }
0x22b6   : > { %v7945_v17 = vpop.xlane.xlu1 %7944 }
0x22b7   : > { %13766 = vpow2.f32 %v7968_v15  ;;  %v7962_v63 = vsub.f32 %v7934_v44, %v7945_v17 }
0x22b9   : > { %v7970_v5 = vmul.f32 1.442695, %v7962_v63 }
0x22ba   : > { %v7948_v58 = vpop.xlane.xlu0 %7947 }
0x22bb   : > { %13768 = vpow2.f32 %v7970_v5  ;;  %v7963_v24 = vsub.f32 %v7935_v47, %v7948_v58 }
0x22bd   : > { %v7972_v1 = vmul.f32 1.442695, %v7963_v24 }
0x22be   : > { %v7951_v0 = vpop.xlane.xlu1 %7950 }
0x22bf   : > { %13770 = vpow2.f32 %v7972_v1  ;;  %v7964_v2 = vsub.f32 %v7936_v22, %v7951_v0 }
0x22c1   : > { %v13767_v53 = vpop.eup %13766  ;;  %v7974_v13 = vmul.f32 1.442695, %v7964_v2 }
0x22c2   : > { %v7954_v40 = vpop.xlane.xlu0 %7953  ;;  %v7982_v52 = vsel %vm1545_vm5, %v13767_v53, 0.0 }
0x22c3   : > { %13772 = vpow2.f32 %v7974_v13  ;;  %v7965_v9 = vsub.f32 %v7937_v14, %v7954_v40  ;;  %7983 = vadd.xlane.f32.xlu1 %v7982_v52  ;;  %v9472_v14 = vld [vmem:[%s17014_s26 + $0x30] sm:$0xff] }
0x22c4   : > { %v13435_v30 = vpack.c.bf16 %v9473_v31, %v9472_v14 }
0x22c5   : > { %v13769_v12 = vpop.eup %13768  ;;  %v7976_v51 = vmul.f32 1.442695, %v7965_v9 }
0x22c6   : > { %v7957_v39 = vpop.xlane.xlu1 %7956  ;;  %v7985_v49 = vsel %vm1545_vm5, %v13769_v12, 0.0  ;;  %13436 = vmatpush3.bf16.msra.mxu0 %v13435_v30 }
0x22c7   : > { %13774 = vpow2.f32 %v7976_v51  ;;  %v7966_v44 = vsub.f32 %v7938_v36, %v7957_v39  ;;  %7986 = vadd.xlane.f32.xlu0 %v7985_v49  ;;  %13461 = vmatprep.subr.bf16.mxu0 %v13880_v10 }
0x22c9   : > { %v13771_v41 = vpop.eup %13770  ;;  %v7978_v18 = vmul.f32 1.442695, %v7966_v44 }
0x22ca   : > { %v7960_v8 = vpop.xlane.xlu0 %7959  ;;  %v7988_v20 = vsel %vm1545_vm5, %v13771_v41, 0.0 }
0x22cb   : > { %13776 = vpow2.f32 %v7978_v18  ;;  %v7967_v47 = vsub.f32 %v7939_v38, %v7960_v8  ;;  %7989 = vadd.xlane.f32.xlu1 %v7988_v20 }
0x22cd   : > { %v13773_v16 = vpop.eup %13772  ;;  %v7980_v46 = vmul.f32 1.442695, %v7967_v47 }
0x22ce   : > { %v7991_v4 = vsel %vm1545_vm5, %v13773_v16, 0.0 }
0x22cf   : > { %13778 = vpow2.f32 %v7980_v46  ;;  %7992 = vadd.xlane.f32.xlu0 %v7991_v4 }
0x22d1   : > { %v13775_v54 = vpop.eup %13774 }
0x22d2   : > { %v7994_v22 = vsel %vm1545_vm5, %v13775_v54, 0.0 }
0x22d3   : > { %7995 = vadd.xlane.f32.xlu1 %v7994_v22 }
0x22d5   : > { %v13777_v23 = vpop.eup %13776 }
0x22d6   : > { %v7997_v34 = vsel %vm1545_vm5, %v13777_v23, 0.0 }
0x22d7   : > { %7998 = vadd.xlane.f32.xlu0 %v7997_v34 }
0x22d9   : > { %v13779_v57 = vpop.eup %13778 }
0x22da   : > { %v8000_v56 = vsel %vm1545_vm5, %v13779_v57, 0.0 }
0x22db   : > { %8001 = vadd.xlane.f32.xlu1 %v8000_v56 }
0x2350   : > { %v7984_v33 = vpop.xlane.xlu1 %7983 }
0x2351   : > { %13780 = vrcp.f32 %v7984_v33 }
0x2354   : > { %v7987_v42 = vpop.xlane.xlu0 %7986 }
0x2355   : > { %13782 = vrcp.f32 %v7987_v42 }
0x2358   : > { %v7990_v36 = vpop.xlane.xlu1 %7989 }
0x2359   : > { %13784 = vrcp.f32 %v7990_v36 }
0x235b   : > { %v13781_v43 = vpop.eup %13780 }
0x235c   : > { %v8010_v50 = vmul.f32 %v13781_v43, %v13767_v53  ;;  %v7993_v7 = vpop.xlane.xlu0 %7992 }
0x235d   : > { %13786 = vrcp.f32 %v7993_v7 }
0x235e   : > { %12498 = vmatmul.mubr.msk.f32.vlgmr.msra.gmra.mrb[80].mxu1 %vm1545_vm5, %v8010_v50 }
0x235f   : > { %v13783_v35 = vpop.eup %13782  ;;  %12500 = vmatprep.mubr.msk.f32.mxu1 %vm13881_vm1, %v13882_v32 }
0x2360   : > { %v8011_v38 = vmul.f32 %v13783_v35, %v13769_v12  ;;  %v7996_v62 = vpop.xlane.xlu1 %7995 }
0x2361   : > { %13788 = vrcp.f32 %v7996_v62 }
0x2362   : > { %12501 = vmatmul.mubr.msk.f32.gmra.mrb[82].mxu1 %vm1545_vm5, %v8011_v38 }
0x2363   : > { %v13785_v45 = vpop.eup %13784  ;;  %12503 = vmatprep.mubr.msk.f32.mxu1 %vm13881_vm1, %v13882_v32 }
0x2364   : > { %v8012_v21 = vmul.f32 %v13785_v45, %v13771_v41  ;;  %v7999_v15 = vpop.xlane.xlu0 %7998 }
0x2365   : > { %13790 = vrcp.f32 %v7999_v15 }
0x2366   : > { %12504 = vmatmul.mubr.msk.f32.gmra.mrb[84].mxu1 %vm1545_vm5, %v8012_v21 }
0x2367   : > { %v13787_v17 = vpop.eup %13786  ;;  %12506 = vmatprep.mubr.msk.f32.mxu1 %vm13881_vm1, %v13882_v32 }
0x2368   : > { %v8013_v63 = vmul.f32 %v13787_v17, %v13773_v16  ;;  %v8002_v5 = vpop.xlane.xlu1 %8001 }
0x2369   : > { %13792 = vrcp.f32 %v8002_v5  ;;  %v8404_v5 = vld [vmem:[%s17016_s1 + $0x10] sm:$0xff] }
0x236a   : > { %12507 = vmatmul.mubr.msk.f32.gmra.mrb[86].mxu1 %vm1545_vm5, %v8013_v63  ;;  %v8402_v63 = vld [vmem:[%s17016_s1] sm:$0xff] }
0x236b   : > { %v13789_v58 = vpop.eup %13788  ;;  %12509 = vmatprep.mubr.msk.f32.mxu1 %vm13881_vm1, %v13882_v32 }
0x236c   : > { %v8014_v24 = vmul.f32 %v13789_v58, %v13775_v54  ;;  %v9481_v54 = vld [vmem:[%s17015_s28] ss:$0 sm:$0xff]  ;;  %s16958_s28 = scalar_lea.vmem %s14036_s4, %s13473_s0 }
0x236e   : > { %12510 = vmatmul.mubr.msk.f32.gmra.mrb[88].mxu1 %vm1545_vm5, %v8014_v24  ;;  %v8405_v24 = vld [vmem:[%s17016_s1 + $0x18] sm:$0xff] }
0x236f   : > { %v13791_v1 = vpop.eup %13790  ;;  %12512 = vmatprep.mubr.msk.f32.mxu1 %vm13881_vm1, %v13882_v32 }
0x2370   : > { %v8015_v0 = vmul.f32 %v13791_v1, %v13777_v23  ;;  %v13441_v1 = vpack.c.bf16 %v8405_v24, %v8404_v5  ;;  %v8416_v5 = vld [vmem:[%s17016_s1 + $0x70] sm:$0xff] }
0x2372   : > { %12513 = vmatmul.mubr.msk.f32.gmra.mrb[90].mxu1 %vm1545_vm5, %v8015_v0  ;;  %v8407_v0 = vld [vmem:[%s17016_s1 + $0x28] sm:$0xff] }
0x2373   : > { %v13793_v2 = vpop.eup %13792  ;;  %12515 = vmatprep.mubr.msk.f32.mxu1 %vm13881_vm1, %v13882_v32 }
0x2374   : > { %v8016_v53 = vmul.f32 %v13793_v2, %v13779_v57 }
0x2376   : > { %12516 = vmatmul.mubr.msk.f32.gmra.mrb[92].mxu1 %vm1545_vm5, %v8016_v53 }
0x2377   : > { %12575 = vmatprep.mubr.msk.f32.mxu1 %vm13881_vm1, %v13882_v32 }
0x2431   : > { %v8104_v13 = vpop.f32.mrb[80].mxu1 }
0x2432   : > { %v12499_v40 = vpop.f32.mrb[81].mxu1  ;;  %12523 = vmatmul.mubr.msk.f32.vlgmr.msra.gmra.mrb[80].mxu0 %vm1388_vm2, %v8104_v13 }
0x2433   : > { %12525 = vmatprep.mubr.msk.f32.mxu0 %vm13881_vm1, %v13882_v32 }
0x2435   : > { %v8109_v52 = vpop.f32.mrb[82].mxu1 }
0x2436   : > { %v12502_v9 = vpop.f32.mrb[83].mxu1  ;;  %12526 = vmatmul.mubr.msk.f32.gmra.mrb[82].mxu0 %vm1388_vm2, %v8109_v52 }
0x2437   : > { %12528 = vmatprep.mubr.msk.f32.mxu0 %vm13881_vm1, %v13882_v32 }
0x2439   : > { %v8114_v12 = vpop.f32.mrb[84].mxu1 }
0x243a   : > { %v12505_v51 = vpop.f32.mrb[85].mxu1  ;;  %12529 = vmatmul.mubr.msk.f32.gmra.mrb[84].mxu0 %vm1388_vm2, %v8114_v12 }
0x243b   : > { %12531 = vmatprep.mubr.msk.f32.mxu0 %vm13881_vm1, %v13882_v32 }
0x243d   : > { %v8119_v39 = vpop.f32.mrb[86].mxu1 }
0x243e   : > { %v12508_v49 = vpop.f32.mrb[87].mxu1  ;;  %12532 = vmatmul.mubr.msk.f32.gmra.mrb[86].mxu0 %vm1388_vm2, %v8119_v39 }
0x243f   : > { %12534 = vmatprep.mubr.msk.f32.mxu0 %vm13881_vm1, %v13882_v32 }
0x2441   : > { %v8124_v44 = vpop.f32.mrb[88].mxu1 }
0x2442   : > { %v12511_v41 = vpop.f32.mrb[89].mxu1  ;;  %12535 = vmatmul.mubr.msk.f32.gmra.mrb[88].mxu0 %vm1388_vm2, %v8124_v44 }
0x2443   : > { %12537 = vmatprep.mubr.msk.f32.mxu0 %vm13881_vm1, %v13882_v32 }
0x2445   : > { %v8129_v18 = vpop.f32.mrb[90].mxu1 }
0x2446   : > { %v12514_v8 = vpop.f32.mrb[91].mxu1  ;;  %12538 = vmatmul.mubr.msk.f32.gmra.mrb[90].mxu0 %vm1388_vm2, %v8129_v18 }
0x2447   : > { %12540 = vmatprep.mubr.msk.f32.mxu0 %vm13881_vm1, %v13882_v32 }
0x2449   : > { %v8134_v20 = vpop.f32.mrb[92].mxu1 }
0x244a   : > { %v12517_v47 = vpop.f32.mrb[93].mxu1  ;;  %12541 = vmatmul.mubr.msk.f32.gmra.mrb[92].mxu0 %vm1388_vm2, %v8134_v20 }
0x244b   : > { %12612 = vmatprep.mubr.msk.f32.mxu0 %vm13881_vm1, %v13882_v32 }
0x2505   : > { %v8228_v16 = vpop.f32.mrb[80].mxu0 }
0x2506   : > { %v8262_v46 = vadd.f32 %v8228_v16, %v16619_v28  ;;  %v12524_v4 = vpop.f32.mrb[81].mxu0 }
0x2508   : > { %v8269_v22 = vadd.f32 %v8262_v46, %v15513_v55 }
0x2509   : > { %v8233_v23 = vpop.f32.mrb[82].mxu0 }
0x250a   : > { %v8263_v34 = vadd.f32 %v8233_v23, %v16622_v11  ;;  %v12527_v57 = vpop.f32.mrb[83].mxu0  ;;  %v16759_v56 = vadd.f32 %v9481_v54, %v8269_v22 }
0x250c   : > { %v8270_v14 = vadd.f32 %v8263_v34, %v15517_v37  ;;  %8292 = vadd.xlane.f32.xlu0 %v16759_v56 }
0x250d   : > { %v8238_v31 = vpop.f32.mrb[84].mxu0 }
0x250e   : > { %v8264_v30 = vadd.f32 %v8238_v31, %v16625_v3  ;;  %v12530_v33 = vpop.f32.mrb[85].mxu0  ;;  %v16764_v42 = vadd.f32 %v9481_v54, %v8270_v14 }
0x250f   : > { %v8409_v33 = vld [vmem:[%s17016_s1 + $0x38] sm:$0xff] }
0x2510   : > { %v8271_v28 = vadd.f32 %v8264_v30, %v15521_v6  ;;  %8294 = vadd.xlane.f32.xlu1 %v16764_v42  ;;  %v8408_v30 = vld [vmem:[%s17016_s1 + $0x30] sm:$0xff] }
0x2511   : > { %v8243_v55 = vpop.f32.mrb[86].mxu0 }
0x2512   : > { %v8265_v11 = vadd.f32 %v8243_v55, %v16628_v25  ;;  %v12533_v36 = vpop.f32.mrb[87].mxu0  ;;  %v16769_v43 = vadd.f32 %v9481_v54, %v8271_v28  ;;  %v13447_v55 = vpack.c.bf16 %v8409_v33, %v8408_v30 }
0x2514   : > { %v8272_v37 = vadd.f32 %v8265_v11, %v15525_v26  ;;  %8296 = vadd.xlane.f32.xlu0 %v16769_v43 }
0x2515   : > { %v8248_v50 = vpop.f32.mrb[88].mxu0 }
0x2516   : > { %v8266_v3 = vadd.f32 %v8248_v50, %v16631_v59  ;;  %v12536_v7 = vpop.f32.mrb[89].mxu0  ;;  %v16774_v35 = vadd.f32 %v9481_v54, %v8272_v37 }
0x2517   : > { %v8411_v7 = vld [vmem:[%s17016_s1 + $0x48] sm:$0xff] }
0x2518   : > { %v8273_v6 = vadd.f32 %v8266_v3, %v15529_v19  ;;  %8298 = vadd.xlane.f32.xlu1 %v16774_v35  ;;  %v8410_v3 = vld [vmem:[%s17016_s1 + $0x40] sm:$0xff] }
0x2519   : > { %v8253_v25 = vpop.f32.mrb[90].mxu0 }
0x251a   : > { %v8267_v38 = vadd.f32 %v8253_v25, %v16634_v29  ;;  %v12539_v62 = vpop.f32.mrb[91].mxu0  ;;  %v16779_v26 = vadd.f32 %v9481_v54, %v8273_v6  ;;  %v13450_v25 = vpack.c.bf16 %v8411_v7, %v8410_v3 }
0x251c   : > { %v8274_v45 = vadd.f32 %v8267_v38, %v15533_v48  ;;  %8300 = vadd.xlane.f32.xlu0 %v16779_v26  ;;  %v8403_v48 = vld [vmem:[%s17016_s1 + $0x8] sm:$0xff] }
0x251d   : > { %v8258_v59 = vpop.f32.mrb[92].mxu0  ;;  %v13438_v58 = vpack.c.bf16 %v8403_v48, %v8402_v63  ;;  %v8415_v63 = vld [vmem:[%s17016_s1 + $0x68] sm:$0xff] }
0x251e   : > { %v8268_v19 = vadd.f32 %v8258_v59, %v16637_v60  ;;  %v12542_v21 = vpop.f32.mrb[93].mxu0  ;;  %v16784_v15 = vadd.f32 %v9481_v54, %v8274_v45  ;;  %v8406_v60 = vld [vmem:[%s17016_s1 + $0x20] sm:$0xff]  ;;  %v8412_v45 = vld [vmem:[%s17016_s1 + $0x50] sm:$0xff]  ;;  %v8413_v59 = vld [vmem:[%s17016_s1 + $0x58] sm:$0xff] }
0x251f   : > { %13439 = vmatpush3.bf16.msra.mxu1 %v13438_v58  ;;  %v13444_v2 = vpack.c.bf16 %v8407_v0, %v8406_v60  ;;  %v13453_v21 = vpack.c.bf16 %v8413_v59, %v8412_v45  ;;  %v8417_v58 = vld [vmem:[%s17016_s1 + $0x78] sm:$0xff] }
0x2520   : > { %v8275_v17 = vadd.f32 %v8268_v19, %v15537_v61  ;;  %8302 = vadd.xlane.f32.xlu1 %v16784_v15  ;;  %13440 = vmatprep.subr.bf16.mxu1 %v13880_v10  ;;  %v13459_v24 = vpack.c.bf16 %v8417_v58, %v8416_v5  ;;  %v8588_v58 = vld [vmem:[%s17019_s18] sm:$0xff] }
0x2522   : > { %v16788_v29 = vadd.f32 %v9481_v54, %v8275_v17  ;;  %v8414_v17 = vld [vmem:[%s17016_s1 + $0x60] sm:$0xff] }
0x2523   : > { %13442 = vmatpush3.bf16.msra.mxu1 %v13441_v1  ;;  %v13456_v48 = vpack.c.bf16 %v8415_v63, %v8414_v17 }
0x2524   : > { %8304 = vadd.xlane.f32.xlu0 %v16788_v29  ;;  %13443 = vmatprep.subr.bf16.mxu1 %v13880_v10 }
0x2527   : > { %13445 = vmatpush3.bf16.msra.mxu1 %v13444_v2 }
0x2528   : > { %13446 = vmatprep.subr.bf16.mxu1 %v13880_v10 }
0x252b   : > { %13448 = vmatpush3.bf16.msra.mxu1 %v13447_v55 }
0x252c   : > { %13449 = vmatprep.subr.bf16.mxu1 %v13880_v10 }
0x252f   : > { %13451 = vmatpush3.bf16.msra.mxu1 %v13450_v25 }
0x2530   : > { %13452 = vmatprep.subr.bf16.mxu1 %v13880_v10 }
0x2533   : > { %13454 = vmatpush3.bf16.msra.mxu1 %v13453_v21 }
0x2534   : > { %13455 = vmatprep.subr.bf16.mxu1 %v13880_v10 }
0x2537   : > { %13457 = vmatpush3.bf16.msra.mxu1 %v13456_v48 }
0x2538   : > { %13458 = vmatprep.subr.bf16.mxu1 %v13880_v10 }
0x253b   : > { %13460 = vmatpush3.bf16.msra.mxu1 %v13459_v24  ;;  %v8589_v24 = vld [vmem:[%s17019_s18 + $0x8] sm:$0xff] }
0x2599   : > { %v8293_v61 = vpop.xlane.xlu0 %8292 }
0x259a   : > { %v8306_v53 = vmul.f32 0.029411765, %v8293_v61 }
0x259c   : > { %v8313_v13 = vsub.f32 %v16759_v56, %v8306_v53 }
0x259d   : > { %v8295_v40 = vpop.xlane.xlu1 %8294 }
0x259e   : > { %v16803_v52 = vsel %vm912_vm0, %v8313_v13, 0.0  ;;  %v8307_v9 = vmul.f32 0.029411765, %v8295_v40 }
0x259f   : > { %v8327_v12 = vmul.f32 %v16803_v52, %v16803_v52 }
0x25a0   : > { %v8314_v51 = vsub.f32 %v16764_v42, %v8307_v9 }
0x25a1   : > { %v8297_v39 = vpop.xlane.xlu0 %8296  ;;  %8334 = vadd.xlane.f32.xlu1 %v8327_v12 }
0x25a2   : > { %v16810_v49 = vsel %vm912_vm0, %v8314_v51, 0.0  ;;  %v8308_v44 = vmul.f32 0.029411765, %v8297_v39 }
0x25a3   : > { %v8328_v41 = vmul.f32 %v16810_v49, %v16810_v49 }
0x25a4   : > { %v8315_v18 = vsub.f32 %v16769_v43, %v8308_v44  ;;  %v9482_v44 = vld [vmem:[%s17017_s2] ss:$0 sm:$0xff] }
0x25a5   : > { %v8299_v8 = vpop.xlane.xlu1 %8298  ;;  %8336 = vadd.xlane.f32.xlu0 %v8328_v41 }
0x25a6   : > { %v16817_v20 = vsel %vm912_vm0, %v8315_v18, 0.0  ;;  %v8309_v47 = vmul.f32 0.029411765, %v8299_v8 }
0x25a7   : > { %v8329_v16 = vmul.f32 %v16817_v20, %v16817_v20 }
0x25a8   : > { %v8316_v46 = vsub.f32 %v16774_v35, %v8309_v47  ;;  %v9483_v47 = vld [vmem:[%s17018_s11] ss:$0 sm:$0xff] }
0x25a9   : > { %v8301_v4 = vpop.xlane.xlu0 %8300  ;;  %8338 = vadd.xlane.f32.xlu1 %v8329_v16 }
0x25aa   : > { %v16824_v54 = vsel %vm912_vm0, %v8316_v46, 0.0  ;;  %v8310_v22 = vmul.f32 0.029411765, %v8301_v4 }
0x25ab   : > { %v8330_v23 = vmul.f32 %v16824_v54, %v16824_v54 }
0x25ac   : > { %v8317_v34 = vsub.f32 %v16779_v26, %v8310_v22 }
0x25ad   : > { %v8303_v57 = vpop.xlane.xlu1 %8302  ;;  %8340 = vadd.xlane.f32.xlu0 %v8330_v23 }
0x25ae   : > { %v16831_v14 = vsel %vm912_vm0, %v8317_v34, 0.0  ;;  %v8311_v31 = vmul.f32 0.029411765, %v8303_v57 }
0x25af   : > { %v8331_v28 = vmul.f32 %v16831_v14, %v16831_v14 }
0x25b0   : > { %v8318_v11 = vsub.f32 %v16784_v15, %v8311_v31 }
0x25b1   : > { %8342 = vadd.xlane.f32.xlu1 %v8331_v28  ;;  %v8305_v36 = vpop.xlane.xlu0 %8304 }
0x25b2   : > { %v16840_v37 = vsel %vm912_vm0, %v8318_v11, 0.0  ;;  %v8312_v50 = vmul.f32 0.029411765, %v8305_v36 }
0x25b3   : > { %v8332_v6 = vmul.f32 %v16840_v37, %v16840_v37 }
0x25b4   : > { %v8319_v38 = vsub.f32 %v16788_v29, %v8312_v50 }
0x25b5   : > { %8344 = vadd.xlane.f32.xlu0 %v8332_v6 }
0x25b6   : > { %v16850_v62 = vsel %vm912_vm0, %v8319_v38, 0.0 }
0x25b7   : > { %v8333_v19 = vmul.f32 %v16850_v62, %v16850_v62 }
0x25b9   : > { %8346 = vadd.xlane.f32.xlu1 %v8333_v19 }
0x262e   : > { %v8335_v1 = vpop.xlane.xlu1 %8334 }
0x262f   : > { %v8348_v60 = vmul.f32 0.029411765, %v8335_v1  ;;  %v13462_v1 = vpack.c.bf16 %v8589_v24, %v8588_v58 }
0x2631   : > { %v8355_v0 = vadd.f32 1e-05, %v8348_v60  ;;  %13463 = vmatpush3.bf16.msra.mxu0 %v13462_v1  ;;  %v8591_v60 = vld [vmem:[%s17019_s18 + $0x18] sm:$0xff] }
0x2632   : > { %v8337_v2 = vpop.xlane.xlu0 %8336  ;;  %13464 = vmatprep.subr.bf16.mxu0 %v13880_v10 }
0x2633   : > { %13794 = vrsqrt.f32 %v8355_v0  ;;  %v8349_v61 = vmul.f32 0.029411765, %v8337_v2  ;;  %v8592_v2 = vld [vmem:[%s17019_s18 + $0x20] sm:$0xff] }
0x2635   : > { %v8356_v53 = vadd.f32 1e-05, %v8349_v61  ;;  %v8593_v61 = vld [vmem:[%s17019_s18 + $0x28] sm:$0xff] }
0x2636   : > { %v8339_v13 = vpop.xlane.xlu1 %8338 }
0x2637   : > { %13796 = vrsqrt.f32 %v8356_v53  ;;  %v8350_v40 = vmul.f32 0.029411765, %v8339_v13  ;;  %v13468_v53 = vpack.c.bf16 %v8593_v61, %v8592_v2  ;;  %v8594_v13 = vld [vmem:[%s17019_s18 + $0x30] sm:$0xff] }
0x2639   : > { %v8357_v9 = vadd.f32 1e-05, %v8350_v40  ;;  %v8595_v40 = vld [vmem:[%s17019_s18 + $0x38] sm:$0xff] }
0x263a   : > { %v8341_v12 = vpop.xlane.xlu0 %8340 }
0x263b   : > { %13798 = vrsqrt.f32 %v8357_v9  ;;  %v8351_v51 = vmul.f32 0.029411765, %v8341_v12  ;;  %v13471_v9 = vpack.c.bf16 %v8595_v40, %v8594_v13  ;;  %v9484_v12 = vld [vmem:[%s17020_s23] ss:$0 sm:$0xff] }
0x263d   : > { %v13795_v39 = vpop.eup %13794  ;;  %v8358_v41 = vadd.f32 1e-05, %v8351_v51 }
0x263e   : > { %v8369_v18 = vmul.f32 %v13795_v39, %v16803_v52  ;;  %v8343_v8 = vpop.xlane.xlu1 %8342 }
0x263f   : > { %13800 = vrsqrt.f32 %v8358_v41  ;;  %v8352_v16 = vmul.f32 0.029411765, %v8343_v8 }
0x2640   : > { %v8382_v46 = vmul.f32 %v9482_v44, %v8369_v18 }
0x2641   : > { %v13797_v4 = vpop.eup %13796  ;;  %v8359_v22 = vadd.f32 1e-05, %v8352_v16 }
0x2642   : > { %v8395_v23 = vadd.f32 %v9483_v47, %v8382_v46  ;;  %v8370_v34 = vmul.f32 %v13797_v4, %v16810_v49  ;;  %v8345_v57 = vpop.xlane.xlu0 %8344 }
0x2643   : > { %13802 = vrsqrt.f32 %v8359_v22  ;;  %v8353_v31 = vmul.f32 0.029411765, %v8345_v57 }
0x2644   : > { %12576 = vmatmul.mubr.f32.vlgmr.msra.gmra.mrb[94].mxu1 %v8395_v23  ;;  %v8383_v30 = vmul.f32 %v9482_v44, %v8370_v34 }
0x2645   : > { %v13799_v33 = vpop.eup %13798  ;;  %v8360_v28 = vadd.f32 1e-05, %v8353_v31  ;;  %12578 = vmatprep.mubr.msk.f32.mxu1 %vm13881_vm1, %v13882_v32 }
0x2646   : > { %v8371_v52 = vmul.f32 %v13799_v33, %v16817_v20  ;;  %v8347_v55 = vpop.xlane.xlu1 %8346  ;;  %v8396_v11 = vadd.f32 %v9483_v47, %v8383_v30 }
0x2647   : > { %13804 = vrsqrt.f32 %v8360_v28  ;;  %v8354_v36 = vmul.f32 0.029411765, %v8347_v55 }
0x2648   : > { %12579 = vmatmul.mubr.f32.gmra.mrb[96].mxu1 %v8396_v11  ;;  %v8384_v50 = vmul.f32 %v9482_v44, %v8371_v52 }
0x2649   : > { %v13801_v3 = vpop.eup %13800  ;;  %v8361_v49 = vadd.f32 1e-05, %v8354_v36  ;;  %12581 = vmatprep.mubr.msk.f32.mxu1 %vm13881_vm1, %v13882_v32 }
0x264a   : > { %v8372_v7 = vmul.f32 %v13801_v3, %v16824_v54  ;;  %v8397_v6 = vadd.f32 %v9483_v47, %v8384_v50 }
0x264b   : > { %13806 = vrsqrt.f32 %v8361_v49 }
0x264c   : > { %12582 = vmatmul.mubr.f32.gmra.mrb[98].mxu1 %v8397_v6  ;;  %v8385_v25 = vmul.f32 %v9482_v44, %v8372_v7 }
0x264d   : > { %v13803_v38 = vpop.eup %13802  ;;  %12584 = vmatprep.mubr.msk.f32.mxu1 %vm13881_vm1, %v13882_v32 }
0x264e   : > { %v8373_v20 = vmul.f32 %v13803_v38, %v16831_v14  ;;  %v8398_v45 = vadd.f32 %v9483_v47, %v8385_v25 }
0x2650   : > { %12585 = vmatmul.mubr.f32.gmra.mrb[100].mxu1 %v8398_v45  ;;  %v8386_v59 = vmul.f32 %v9482_v44, %v8373_v20 }
0x2651   : > { %v13805_v19 = vpop.eup %13804  ;;  %12587 = vmatprep.mubr.msk.f32.mxu1 %vm13881_vm1, %v13882_v32 }
0x2652   : > { %v8374_v54 = vmul.f32 %v13805_v19, %v16840_v37  ;;  %v8399_v21 = vadd.f32 %v9483_v47, %v8386_v59 }
0x2654   : > { %12588 = vmatmul.mubr.f32.gmra.mrb[102].mxu1 %v8399_v21  ;;  %v8387_v17 = vmul.f32 %v9482_v44, %v8374_v54 }
0x2655   : > { %v13807_v63 = vpop.eup %13806  ;;  %12590 = vmatprep.mubr.msk.f32.mxu1 %vm13881_vm1, %v13882_v32 }
0x2656   : > { %v8375_v14 = vmul.f32 %v13807_v63, %v16850_v62  ;;  %v8400_v48 = vadd.f32 %v9483_v47, %v8387_v17  ;;  %v8590_v62 = vld [vmem:[%s17019_s18 + $0x10] sm:$0xff] }
0x2657   : > { %v13465_v0 = vpack.c.bf16 %v8591_v60, %v8590_v62 }
0x2658   : > { %12591 = vmatmul.mubr.f32.gmra.mrb[104].mxu1 %v8400_v48  ;;  %v8388_v5 = vmul.f32 %v9482_v44, %v8375_v14 }
0x2659   : > { %12593 = vmatprep.mubr.msk.f32.mxu1 %vm13881_vm1, %v13882_v32  ;;  %13466 = vmatpush3.bf16.msra.mxu0 %v13465_v0 }
0x265a   : > { %v8401_v37 = vadd.f32 %v9483_v47, %v8388_v5  ;;  %13467 = vmatprep.subr.bf16.mxu0 %v13880_v10 }
0x265c   : > { %12594 = vmatmul.mubr.f32.gmra.mrb[106].mxu1 %v8401_v37 }
0x265d   : > { %13469 = vmatpush3.bf16.msra.mxu0 %v13468_v53 }
0x265e   : > { %13470 = vmatprep.subr.bf16.mxu0 %v13880_v10 }
0x2661   : > { %13472 = vmatpush3.bf16.msra.mxu0 %v13471_v9 }
0x2717   : > { %v8491_v51 = vpop.f32.mrb[94].mxu1 }
0x2718   : > { %v8492_v39 = vadd.f32 %v9484_v12, %v8491_v51  ;;  %v12577_v44 = vpop.f32.mrb[95].mxu1 }
0x271a   : > { %v8532_v41 = vmul.f32 0.044715, %v8492_v39  ;;  %v8525_v24 = vmul.f32 0.5, %v8492_v39 }
0x271b   : > { %v8496_v18 = vpop.f32.mrb[96].mxu1 }
0x271c   : > { %v8539_v8 = vmul.f32 %v8532_v41, %v8492_v39  ;;  %v8497_v47 = vadd.f32 %v9484_v12, %v8496_v18  ;;  %v12580_v16 = vpop.f32.mrb[97].mxu1 }
0x271e   : > { %v8546_v46 = vmul.f32 %v8539_v8, %v8492_v39  ;;  %v8533_v4 = vmul.f32 0.044715, %v8497_v47  ;;  %v8526_v44 = vmul.f32 0.5, %v8497_v47 }
0x271f   : > { %v8501_v22 = vpop.f32.mrb[98].mxu1 }
0x2720   : > { %v8553_v23 = vadd.f32 %v8546_v46, %v8492_v39  ;;  %v8540_v34 = vmul.f32 %v8533_v4, %v8497_v47  ;;  %v8502_v57 = vadd.f32 %v9484_v12, %v8501_v22  ;;  %v12583_v10 = vpop.f32.mrb[99].mxu1 }
0x2722   : > { %v8560_v31 = vmul.f32 0.7978846, %v8553_v23  ;;  %v8547_v30 = vmul.f32 %v8540_v34, %v8497_v47  ;;  %v8534_v33 = vmul.f32 0.044715, %v8502_v57  ;;  %v8527_v4 = vmul.f32 0.5, %v8502_v57 }
0x2723   : > { %v8506_v28 = vpop.f32.mrb[100].mxu1 }
0x2724   : > { %13808 = vtanh.f32 %v8560_v31  ;;  %v8554_v52 = vadd.f32 %v8547_v30, %v8497_v47  ;;  %v8541_v55 = vmul.f32 %v8534_v33, %v8502_v57  ;;  %v8507_v11 = vadd.f32 %v9484_v12, %v8506_v28  ;;  %v12586_v36 = vpop.f32.mrb[101].mxu1 }
0x2726   : > { %v8561_v50 = vmul.f32 0.7978846, %v8554_v52  ;;  %v8548_v3 = vmul.f32 %v8541_v55, %v8502_v57  ;;  %v8535_v49 = vmul.f32 0.044715, %v8507_v11  ;;  %v8528_v31 = vmul.f32 0.5, %v8507_v11 }
0x2727   : > { %v8511_v7 = vpop.f32.mrb[102].mxu1 }
0x2728   : > { %13810 = vtanh.f32 %v8561_v50  ;;  %v8555_v6 = vadd.f32 %v8548_v3, %v8502_v57  ;;  %v8542_v25 = vmul.f32 %v8535_v49, %v8507_v11  ;;  %v8512_v38 = vadd.f32 %v9484_v12, %v8511_v7  ;;  %v12589_v20 = vpop.f32.mrb[103].mxu1 }
0x272a   : > { %v8562_v45 = vmul.f32 0.7978846, %v8555_v6  ;;  %v8549_v59 = vmul.f32 %v8542_v25, %v8507_v11  ;;  %v8536_v19 = vmul.f32 0.044715, %v8512_v38  ;;  %v8529_v28 = vmul.f32 0.5, %v8512_v38 }
0x272b   : > { %v8516_v54 = vpop.f32.mrb[104].mxu1 }
0x272c   : > { %13812 = vtanh.f32 %v8562_v45  ;;  %v8556_v21 = vadd.f32 %v8549_v59, %v8507_v11  ;;  %v8543_v17 = vmul.f32 %v8536_v19, %v8512_v38  ;;  %v8517_v63 = vadd.f32 %v9484_v12, %v8516_v54  ;;  %v12592_v14 = vpop.f32.mrb[105].mxu1 }
0x272e   : > { %v13809_v48 = vpop.eup %13808  ;;  %v8563_v5 = vmul.f32 0.7978846, %v8556_v21  ;;  %v8550_v37 = vmul.f32 %v8543_v17, %v8512_v38  ;;  %v8537_v58 = vmul.f32 0.044715, %v8517_v63  ;;  %v8530_v11 = vmul.f32 0.5, %v8517_v63 }
0x272f   : > { %v8574_v1 = vadd.f32 1.0, %v13809_v48  ;;  %v8521_v62 = vpop.f32.mrb[106].mxu1 }
0x2730   : > { %13814 = vtanh.f32 %v8563_v5  ;;  %v8557_v60 = vadd.f32 %v8550_v37, %v8512_v38  ;;  %v8544_v0 = vmul.f32 %v8537_v58, %v8517_v63  ;;  %v8522_v2 = vadd.f32 %v9484_v12, %v8521_v62  ;;  %v12595_v61 = vpop.f32.mrb[107].mxu1  ;;  %v9485_v38 = vld [vmem:[%s14021_s12] ss:$0 sm:$0xff] }
0x2731   : > { %v8581_v53 = vmul.f32 %v8574_v1, %v8525_v24 }
0x2732   : > { %v13811_v13 = vpop.eup %13810  ;;  %v8564_v40 = vmul.f32 0.7978846, %v8557_v60  ;;  %v8551_v9 = vmul.f32 %v8544_v0, %v8517_v63  ;;  %v8538_v51 = vmul.f32 0.044715, %v8522_v2  ;;  %v8531_v7 = vmul.f32 0.5, %v8522_v2 }
0x2733   : > { %v8575_v41 = vadd.f32 1.0, %v13811_v13  ;;  %12613 = vmatmul.mubr.msk.f32.vlgmr.msra.gmra.mrb[94].mxu0 %vm4702_vm12, %v8581_v53 }
0x2734   : > { %13816 = vtanh.f32 %v8564_v40  ;;  %v8558_v18 = vadd.f32 %v8551_v9, %v8517_v63  ;;  %v8545_v8 = vmul.f32 %v8538_v51, %v8522_v2  ;;  %12615 = vmatprep.mubr.msk.f32.mxu0 %vm13881_vm1, %v13882_v32 }
0x2735   : > { %v8582_v39 = vmul.f32 %v8575_v41, %v8526_v44 }
0x2736   : > { %v13813_v16 = vpop.eup %13812  ;;  %v8565_v46 = vmul.f32 0.7978846, %v8558_v18  ;;  %v8552_v12 = vmul.f32 %v8545_v8, %v8522_v2 }
0x2737   : > { %v8576_v22 = vadd.f32 1.0, %v13813_v16  ;;  %12616 = vmatmul.mubr.msk.f32.gmra.mrb[96].mxu0 %vm4702_vm12, %v8582_v39 }
0x2738   : > { %13818 = vtanh.f32 %v8565_v46  ;;  %v8559_v23 = vadd.f32 %v8552_v12, %v8522_v2  ;;  %12618 = vmatprep.mubr.msk.f32.mxu0 %vm13881_vm1, %v13882_v32 }
0x2739   : > { %v8583_v47 = vmul.f32 %v8576_v22, %v8527_v4 }
0x273a   : > { %v13815_v34 = vpop.eup %13814  ;;  %v8566_v10 = vmul.f32 0.7978846, %v8559_v23 }
0x273b   : > { %v8577_v30 = vadd.f32 1.0, %v13815_v34  ;;  %12619 = vmatmul.mubr.msk.f32.gmra.mrb[98].mxu0 %vm4702_vm12, %v8583_v47 }
0x273c   : > { %13820 = vtanh.f32 %v8566_v10  ;;  %12621 = vmatprep.mubr.msk.f32.mxu0 %vm13881_vm1, %v13882_v32 }
0x273d   : > { %v8584_v57 = vmul.f32 %v8577_v30, %v8528_v31 }
0x273e   : > { %v13817_v33 = vpop.eup %13816 }
0x273f   : > { %v8578_v52 = vadd.f32 1.0, %v13817_v33  ;;  %12622 = vmatmul.mubr.msk.f32.gmra.mrb[100].mxu0 %vm4702_vm12, %v8584_v57 }
0x2740   : > { %12624 = vmatprep.mubr.msk.f32.mxu0 %vm13881_vm1, %v13882_v32 }
0x2741   : > { %v8585_v55 = vmul.f32 %v8578_v52, %v8529_v28 }
0x2742   : > { %v13819_v36 = vpop.eup %13818 }
0x2743   : > { %v8579_v50 = vadd.f32 1.0, %v13819_v36  ;;  %12625 = vmatmul.mubr.msk.f32.gmra.mrb[102].mxu0 %vm4702_vm12, %v8585_v55 }
0x2744   : > { %12627 = vmatprep.mubr.msk.f32.mxu0 %vm13881_vm1, %v13882_v32 }
0x2745   : > { %v8586_v3 = vmul.f32 %v8579_v50, %v8530_v11 }
0x2746   : > { %v13821_v49 = vpop.eup %13820 }
0x2747   : > { %v8580_v6 = vadd.f32 1.0, %v13821_v49  ;;  %12628 = vmatmul.mubr.msk.f32.gmra.mrb[104].mxu0 %vm4702_vm12, %v8586_v3 }
0x2748   : > { %12630 = vmatprep.mubr.msk.f32.mxu0 %vm13881_vm1, %v13882_v32 }
0x2749   : > { %v8587_v25 = vmul.f32 %v8580_v6, %v8531_v7 }
0x274b   : > { %12631 = vmatmul.mubr.msk.f32.gmra.mrb[106].mxu0 %vm4702_vm12, %v8587_v25 }
0x2806   : > { %v8690_v20 = vpop.f32.mrb[94].mxu0 }
0x2807   : > { %v8691_v45 = vadd.f32 %v9485_v38, %v8690_v20  ;;  %v12614_v59 = vpop.f32.mrb[95].mxu0 }
0x2809   : > { %v8724_v19 = vadd.f32 %v8691_v45, %v16759_v56 }
0x280a   : > { %v8695_v54 = vpop.f32.mrb[96].mxu0 }
0x280b   : > { %v8696_v21 = vadd.f32 %v9485_v38, %v8695_v54  ;;  %8733 = vadd.xlane.f32.xlu0 %v8724_v19  ;;  %v12617_v17 = vpop.f32.mrb[97].mxu0 }
0x280d   : > { %v8725_v63 = vadd.f32 %v8696_v21, %v16764_v42 }
0x280e   : > { %v8700_v14 = vpop.f32.mrb[98].mxu0 }
0x280f   : > { %v8701_v48 = vadd.f32 %v9485_v38, %v8700_v14  ;;  %8735 = vadd.xlane.f32.xlu1 %v8725_v63  ;;  %v12620_v5 = vpop.f32.mrb[99].mxu0 }
0x2811   : > { %v8726_v32 = vadd.f32 %v8701_v48, %v16769_v43 }
0x2812   : > { %v8705_v37 = vpop.f32.mrb[100].mxu0 }
0x2813   : > { %v8706_v58 = vadd.f32 %v9485_v38, %v8705_v37  ;;  %8737 = vadd.xlane.f32.xlu0 %v8726_v32  ;;  %v12623_v24 = vpop.f32.mrb[101].mxu0 }
0x2815   : > { %v8727_v1 = vadd.f32 %v8706_v58, %v16774_v35 }
0x2816   : > { %v8710_v62 = vpop.f32.mrb[102].mxu0 }
0x2817   : > { %v8711_v56 = vadd.f32 %v9485_v38, %v8710_v62  ;;  %8739 = vadd.xlane.f32.xlu1 %v8727_v1  ;;  %v12626_v60 = vpop.f32.mrb[103].mxu0 }
0x2819   : > { %v8728_v0 = vadd.f32 %v8711_v56, %v16779_v26 }
0x281a   : > { %v8715_v2 = vpop.f32.mrb[104].mxu0 }
0x281b   : > { %v8716_v42 = vadd.f32 %v9485_v38, %v8715_v2  ;;  %8741 = vadd.xlane.f32.xlu0 %v8728_v0  ;;  %v12629_v61 = vpop.f32.mrb[105].mxu0 }
0x281d   : > { %v8729_v53 = vadd.f32 %v8716_v42, %v16784_v15 }
0x281e   : > { %v8720_v13 = vpop.f32.mrb[106].mxu0 }
0x281f   : > { %v8721_v43 = vadd.f32 %v9485_v38, %v8720_v13  ;;  %8743 = vadd.xlane.f32.xlu1 %v8729_v53  ;;  %v12632_v40 = vpop.f32.mrb[107].mxu0 }
0x2821   : > { %v8730_v9 = vadd.f32 %v8721_v43, %v16788_v29 }
0x2823   : > { %8745 = vadd.xlane.f32.xlu0 %v8730_v9 }
0x2898   : > { %v8734_v35 = vpop.xlane.xlu0 %8733 }
0x2899   : > { %v8747_v51 = vmul.f32 0.029411765, %v8734_v35 }
0x289b   : > { %v8754_v44 = vsub.f32 %v8724_v19, %v8747_v51 }
0x289c   : > { %v8736_v41 = vpop.xlane.xlu1 %8735 }
0x289d   : > { %v8761_v26 = vsel %vm912_vm0, %v8754_v44, 0.0  ;;  %v8748_v18 = vmul.f32 0.029411765, %v8736_v41 }
0x289e   : > { %v8768_v8 = vmul.f32 %v8761_v26, %v8761_v26 }
0x289f   : > { %v8755_v39 = vsub.f32 %v8725_v63, %v8748_v18 }
0x28a0   : > { %v8738_v16 = vpop.xlane.xlu0 %8737  ;;  %8775 = vadd.xlane.f32.xlu1 %v8768_v8 }
0x28a1   : > { %v8762_v15 = vsel %vm912_vm0, %v8755_v39, 0.0  ;;  %v8749_v46 = vmul.f32 0.029411765, %v8738_v16 }
0x28a2   : > { %v8769_v12 = vmul.f32 %v8762_v15, %v8762_v15 }
0x28a3   : > { %v8756_v4 = vsub.f32 %v8726_v32, %v8749_v46  ;;  %v9493_v32 = vld [vmem:[%s14026_s20] ss:$0 sm:$0xff] }
0x28a4   : > { %v8740_v29 = vpop.xlane.xlu1 %8739  ;;  %8777 = vadd.xlane.f32.xlu0 %v8769_v12 }
0x28a5   : > { %v8763_v22 = vsel %vm912_vm0, %v8756_v4, 0.0  ;;  %v8750_v23 = vmul.f32 0.029411765, %v8740_v29 }
0x28a6   : > { %v8770_v47 = vmul.f32 %v8763_v22, %v8763_v22 }
0x28a7   : > { %v8757_v34 = vsub.f32 %v8727_v1, %v8750_v23  ;;  %v9494_v1 = vld [vmem:[%s14031_s27] ss:$0 sm:$0xff] }
0x28a8   : > { %v8742_v10 = vpop.xlane.xlu0 %8741  ;;  %8779 = vadd.xlane.f32.xlu1 %v8770_v47 }
0x28a9   : > { %v16931_v31 = vsel %vm912_vm0, %v8757_v34, 0.0  ;;  %v8751_v30 = vmul.f32 0.029411765, %v8742_v10 }
0x28aa   : > { %v8771_v57 = vmul.f32 %v16931_v31, %v16931_v31 }
0x28ab   : > { %v8758_v33 = vsub.f32 %v8728_v0, %v8751_v30 }
0x28ac   : > { %v8744_v28 = vpop.xlane.xlu1 %8743  ;;  %8781 = vadd.xlane.f32.xlu0 %v8771_v57 }
0x28ad   : > { %v16937_v52 = vsel %vm912_vm0, %v8758_v33, 0.0  ;;  %v8752_v55 = vmul.f32 0.029411765, %v8744_v28 }
0x28ae   : > { %v8772_v36 = vmul.f32 %v16937_v52, %v16937_v52 }
0x28af   : > { %v8759_v11 = vsub.f32 %v8729_v53, %v8752_v55 }
0x28b0   : > { %8783 = vadd.xlane.f32.xlu1 %v8772_v36  ;;  %v8746_v50 = vpop.xlane.xlu0 %8745 }
0x28b1   : > { %v16943_v3 = vsel %vm912_vm0, %v8759_v11, 0.0  ;;  %v8753_v49 = vmul.f32 0.029411765, %v8746_v50 }
0x28b2   : > { %v8773_v7 = vmul.f32 %v16943_v3, %v16943_v3 }
0x28b3   : > { %v8760_v6 = vsub.f32 %v8730_v9, %v8753_v49 }
0x28b4   : > { %8785 = vadd.xlane.f32.xlu0 %v8773_v7 }
0x28b5   : > { %v16949_v25 = vsel %vm912_vm0, %v8760_v6, 0.0 }
0x28b6   : > { %v8774_v38 = vmul.f32 %v16949_v25, %v16949_v25 }
0x28b8   : > { %8787 = vadd.xlane.f32.xlu1 %v8774_v38 }
0x292d   : > { %v8776_v20 = vpop.xlane.xlu1 %8775 }
0x292e   : > { %v8789_v45 = vmul.f32 0.029411765, %v8776_v20 }
0x2930   : > { %v8796_v59 = vadd.f32 1e-05, %v8789_v45 }
0x2931   : > { %v8778_v19 = vpop.xlane.xlu0 %8777 }
0x2932   : > { %13822 = vrsqrt.f32 %v8796_v59  ;;  %v8790_v54 = vmul.f32 0.029411765, %v8778_v19 }
0x2934   : > { %v8797_v21 = vadd.f32 1e-05, %v8790_v54 }
0x2935   : > { %v8780_v17 = vpop.xlane.xlu1 %8779 }
0x2936   : > { %13824 = vrsqrt.f32 %v8797_v21  ;;  %v8791_v27 = vmul.f32 0.029411765, %v8780_v17 }
0x2938   : > { %v8798_v63 = vadd.f32 1e-05, %v8791_v27 }
0x2939   : > { %v8782_v14 = vpop.xlane.xlu0 %8781 }
0x293a   : > { %13826 = vrsqrt.f32 %v8798_v63  ;;  %v8792_v48 = vmul.f32 0.029411765, %v8782_v14 }
0x293c   : > { %v13823_v5 = vpop.eup %13822  ;;  %v8799_v37 = vadd.f32 1e-05, %v8792_v48 }
0x293d   : > { %v8810_v58 = vmul.f32 %v13823_v5, %v8761_v26  ;;  %v8784_v24 = vpop.xlane.xlu1 %8783 }
0x293e   : > { %13828 = vrsqrt.f32 %v8799_v37  ;;  %v8793_v62 = vmul.f32 0.029411765, %v8784_v24 }
0x293f   : > { %v8823_v56 = vmul.f32 %v9493_v32, %v8810_v58 }
0x2940   : > { %v13825_v60 = vpop.eup %13824  ;;  %v8800_v0 = vadd.f32 1e-05, %v8793_v62 }
0x2941   : > { %v8836_v2 = vadd.f32 %v9494_v1, %v8823_v56  ;;  %v8811_v42 = vmul.f32 %v13825_v60, %v8762_v15  ;;  %v8786_v61 = vpop.xlane.xlu0 %8785 }
0x2942   : > { %13830 = vrsqrt.f32 %v8800_v0  ;;  %v8794_v53 = vmul.f32 0.029411765, %v8786_v61 }
0x2943   : > { %8843 = vst [vmem:[%s16958_s28] sm:$0xff] %v8836_v2  ;;  %v8824_v13 = vmul.f32 %v9493_v32, %v8811_v42 }
0x2944   : > { %v13827_v43 = vpop.eup %13826  ;;  %v8801_v40 = vadd.f32 1e-05, %v8794_v53 }
0x2945   : > { %v8837_v9 = vadd.f32 %v9494_v1, %v8824_v13  ;;  %v8812_v35 = vmul.f32 %v13827_v43, %v8763_v22  ;;  %v8788_v51 = vpop.xlane.xlu1 %8787 }
0x2946   : > { %13832 = vrsqrt.f32 %v8801_v40  ;;  %v8795_v44 = vmul.f32 0.029411765, %v8788_v51 }
0x2947   : > { %8844 = vst [vmem:[%s16958_s28 + $0x8] sm:$0xff] %v8837_v9  ;;  %v8825_v41 = vmul.f32 %v9493_v32, %v8812_v35 }
0x2948   : > { %v13829_v26 = vpop.eup %13828  ;;  %v8802_v18 = vadd.f32 1e-05, %v8795_v44 }
0x2949   : > { %v8838_v8 = vadd.f32 %v9494_v1, %v8825_v41  ;;  %v8813_v39 = vmul.f32 %v13829_v26, %v16931_v31 }
0x294a   : > { %13834 = vrsqrt.f32 %v8802_v18 }
0x294b   : > { %8845 = vst [vmem:[%s16958_s28 + $0x10] sm:$0xff] %v8838_v8  ;;  %v8826_v16 = vmul.f32 %v9493_v32, %v8813_v39 }
0x294c   : > { %v13831_v15 = vpop.eup %13830 }
0x294d   : > { %v8839_v46 = vadd.f32 %v9494_v1, %v8826_v16  ;;  %v8814_v12 = vmul.f32 %v13831_v15, %v16937_v52 }
0x294f   : > { %8846 = vst [vmem:[%s16958_s28 + $0x18] sm:$0xff] %v8839_v46  ;;  %v8827_v4 = vmul.f32 %v9493_v32, %v8814_v12 }
0x2950   : > { %v13833_v29 = vpop.eup %13832 }
0x2951   : > { %v8840_v22 = vadd.f32 %v9494_v1, %v8827_v4  ;;  %v8815_v23 = vmul.f32 %v13833_v29, %v16943_v3 }
0x2953   : > { %8847 = vst [vmem:[%s16958_s28 + $0x20] sm:$0xff] %v8840_v22  ;;  %v8828_v47 = vmul.f32 %v9493_v32, %v8815_v23 }
0x2954   : > { %v13835_v34 = vpop.eup %13834 }
0x2955   : > { %v8841_v10 = vadd.f32 %v9494_v1, %v8828_v47  ;;  %v8816_v31 = vmul.f32 %v13835_v34, %v16949_v25 }
0x2957   : > { %8848 = vst [vmem:[%s16958_s28 + $0x28] sm:$0xff] %v8841_v10  ;;  %v8829_v30 = vmul.f32 %v9493_v32, %v8816_v31 }
0x2959   : > { %v8842_v57 = vadd.f32 %v9494_v1, %v8829_v30 }
0x295b   : > { %8849 = vst [vmem:[%s16958_s28 + $0x30] sm:$0xff] %v8842_v57 }
0x295c PF: > { %s69_s7 = sadd.s32 1, %s13849_s7  }
0x295d   : > { %p66_p4 = scmp.ge.s32.totalorder %s69_s7, 4  }
0x295f   :  { %68 = sbr.rel (!%p66_p4) target bundleno = 49 (0x31), region = 219 }

</bundles_post_ra>
